<compile_context>
chip_gen: v6e
topology: v6e:2x2x1
jax: 0.10.0
libtpu: 0.0.40
codegen_flags: <defaults>
</compile_context>

<pallas_src>
import functools

import numpy as np

import jax
import jax.numpy as jnp
from jax.experimental import pallas as pl
from jax.experimental.pallas import tpu as pltpu


_ROW0 = 8   # interior row offset inside the halo scratches (sublane-aligned);
            # rows 0.._ROW0-2 are never read, row _ROW0-1 is the top halo.


def _fused_kernel(
    x_ref, oh_ref,
    wb1_ref, bb1_ref, wb2_ref, bb2_ref, wb3_ref, bb3_ref,   # banded conv stack
    w0oh_ref, b0_ref, w0_hbm,                                # first linear (K-split)
    w1_ref, b1_ref, w2_ref, b2_ref, w3_ref, b3_ref, w4_ref, b4_ref,
    o_ref,
    pad1, pad2, pad3, w0_vm, w0_sem,
    *, B, H, W,
):
    H2 = H // 2
    # Kick off the big first-linear weight fetch immediately (2 K-chunks so the
    # head matmul can start on chunk 0 while chunk 1 is still in flight).
    cp0 = pltpu.make_async_copy(w0_hbm.at[0:H2], w0_vm.at[0:H2], w0_sem.at[0])
    cp1 = pltpu.make_async_copy(w0_hbm.at[H2:H], w0_vm.at[H2:H], w0_sem.at[1])
    cp0.start()
    cp1.start()

    def conv_layer(act, pad_ref, wb_ref, bias_ref, lw_in, lw_out):
        """3x3 stride-1 'same' conv in row-banded form.

        act: (B, H, lw_in) f32, lanes = (w, c) folded.  Returns (B, H, lw_out).
        One lane-dense, sublane-aligned interior store; two single-row halo
        zero stores; three row-shifted bf16 MXU matmuls with f32 accumulation.
        """
        pad_ref[:, _ROW0 - 1:_ROW0, :] = jnp.zeros((B, 1, lw_in), jnp.float32)
        pad_ref[:, _ROW0 + H:_ROW0 + H + 1, :] = jnp.zeros((B, 1, lw_in),
                                                           jnp.float32)
        pad_ref[:, _ROW0:_ROW0 + H, :] = act          # lane-dense, aligned
        acc = jnp.zeros((B * H, lw_out), jnp.float32)
        for ky in range(3):                           # banded matmul per ky
            r0 = _ROW0 - 1 + ky
            rows = pad_ref[:, r0:r0 + H, :]
            rows = rows.reshape(B * H, lw_in).astype(jnp.bfloat16)
            acc = acc + jnp.dot(rows, wb_ref[ky],
                                preferred_element_type=jnp.float32)
        acc = acc + bias_ref[...]                     # (1, lw_out) broadcast
        return acc.reshape(B, H, lw_out)

    a = conv_layer(x_ref[...], pad1, wb1_ref, bb1_ref,
                   x_ref.shape[-1], W * 16)
    a = conv_layer(a, pad2, wb2_ref, bb2_ref, W * 16, W * 32)
    a = conv_layer(a, pad3, wb3_ref, bb3_ref, W * 32, W * 64)   # (B, H, W*64)

    # ---- fused linear head ------------------------------------------------
    # First layer: h = feat @ W0 + onehot @ W0oh + b0.  The feat @ W0 matmul
    # is K-split over image rows h, so no sublane->lane flatten is needed and
    # each chunk of W0 is consumed right after its DMA lands.
    h = jnp.dot(oh_ref[...], w0oh_ref[...],
                preferred_element_type=jnp.float32) + b0_ref[...]
    cp0.wait()
    for hi in range(H):
        if hi == H2:
            cp1.wait()
        a_h = a[:, hi, :].astype(jnp.bfloat16)            # (B, W*64)
        h = h + jnp.dot(a_h, w0_vm[hi], preferred_element_type=jnp.float32)

    h = jnp.dot(h.astype(jnp.bfloat16), w1_ref[...],
                preferred_element_type=jnp.float32) + b1_ref[...]
    h = jnp.dot(h.astype(jnp.bfloat16), w2_ref[...],
                preferred_element_type=jnp.float32) + b2_ref[...]
    h = jnp.dot(h.astype(jnp.bfloat16), w3_ref[...],
                preferred_element_type=jnp.float32) + b3_ref[...]
    o_ref[...] = jnp.dot(h.astype(jnp.bfloat16), w4_ref[...],
                         preferred_element_type=jnp.float32) + b4_ref[...]


# ----------------------------------------------------------------------------
# Host-side parameter re-layout (done once).
# ----------------------------------------------------------------------------
def prepare_kernel_params(params, H, W):
    def fused_conv(layer_before, layer_after):
        wb, bb = layer_before
        wa, ba = layer_after
        wb = np.asarray(wb, np.float32)
        wa = np.asarray(wa, np.float32)
        cin, cout = wb.shape[2], wb.shape[3]
        wf = np.zeros((3, 3, 2 * cin, 2 * cout), np.float32)
        wf[:, :, :cin, :cout] = wb          # "before" stack block
        wf[:, :, cin:, cout:] = wa          # "after" stack block
        bf = np.concatenate([np.asarray(bb, np.float32),
                             np.asarray(ba, np.float32)])
        return wf, bf

    def band(wf, bf):
        # Banded-over-W weight (3, W*cin, W*cout): taps that fall outside the
        # image are simply absent (zero), matching Conv2d zero padding.
        cin, cout = wf.shape[2], wf.shape[3]
        wband = np.zeros((3, W * cin, W * cout), np.float32)
        for ky in range(3):
            for w in range(W):
                for kx in range(3):
                    u = w + kx - 1
                    if 0 <= u < W:
                        wband[ky, u * cin:(u + 1) * cin,
                              w * cout:(w + 1) * cout] = wf[ky, kx]
        bias_band = np.tile(bf, W)[None, :]               # (1, W*cout)
        return (jnp.asarray(wband, jnp.bfloat16),
                jnp.asarray(bias_band, jnp.float32))

    conv = [band(*fused_conv(lb, la))
            for lb, la in zip(params["before"], params["after"])]

    # First linear weight: permute rows from the reference (f1|f2, (h,w,c))
    # flatten order to the kernel's (h, w, [c_before|c_after]) order, then
    # split into per-image-row K-chunks of shape (W*64, 512).
    w0oh, w0f, b0 = params["mlp0"]
    S = 32 * H * W
    hw = np.arange(H * W)[:, None]
    cf = np.arange(64)[None, :]
    ridx = np.where(cf < 32, hw * 32 + cf, S + hw * 32 + (cf - 32))
    perm = jnp.asarray(ridx.reshape(-1), jnp.int32)
    w0k = jnp.take(w0f, perm, axis=0).astype(jnp.bfloat16)
    w0k = w0k.reshape(H, W * 64, 512)

    rest = [(w.astype(jnp.bfloat16),
             jnp.reshape(b, (1, -1)).astype(jnp.float32))
            for (w, b) in params["mlp_rest"]]
    return {
        "conv": conv,
        "w0oh": jnp.asarray(w0oh, jnp.float32),
        "w0k": w0k,
        "b0": jnp.reshape(b0, (1, -1)).astype(jnp.float32),
        "rest": rest,
    }


def magneto_optical_cnn_forward(kparams, img_1, img_2, conditions):
    """img_1/img_2: (B, C, H, W) NCHW float32; conditions: (B,) int in {0,1,2}."""
    x1 = jnp.transpose(img_1, (0, 2, 3, 1)).astype(jnp.float32)   # NCHW -> NHWC
    x2 = jnp.transpose(img_2, (0, 2, 3, 1)).astype(jnp.float32)
    x = jnp.concatenate([x1, x2], axis=-1)          # fused stacks: (B,H,W,2C)
    B, H, W, C2 = x.shape
    assert H % 8 == 0, "row-folded conv layout assumes H % 8 == 0"
    x_rows = x.reshape(B, H, W * C2)                # lanes = (w, c) folded
    oh = jax.nn.one_hot(conditions, 3, dtype=jnp.float32)

    vmem = pl.BlockSpec(memory_space=pltpu.MemorySpace.VMEM)
    hbm = pl.BlockSpec(memory_space=pl.ANY)         # manual DMA inside kernel
    args, in_specs = [], []

    def add(a, spec=vmem):
        args.append(a)
        in_specs.append(spec)

    add(x_rows)
    add(oh)
    for wband, bband in kparams["conv"]:
        add(wband)
        add(bband)
    add(kparams["w0oh"])
    add(kparams["b0"])
    add(kparams["w0k"], hbm)
    for w, b in kparams["rest"]:
        add(w)
        add(b)

    kern = functools.partial(_fused_kernel, B=B, H=H, W=W)
    return pl.pallas_call(
        kern,
        out_shape=jax.ShapeDtypeStruct((B, 4), jnp.float32),
        in_specs=in_specs,
        out_specs=pl.BlockSpec(memory_space=pltpu.MemorySpace.VMEM),
        scratch_shapes=[
            pltpu.VMEM((B, _ROW0 + H + 1, W * C2), jnp.float32),   # halo L1
            pltpu.VMEM((B, _ROW0 + H + 1, W * 16), jnp.float32),   # halo L2
            pltpu.VMEM((B, _ROW0 + H + 1, W * 32), jnp.float32),   # halo L3
            pltpu.VMEM((H, W * 64, 512), jnp.bfloat16),            # w0 stage
            pltpu.SemaphoreType.DMA((2,)),                         # 2 chunks
        ],
        compiler_params=pltpu.CompilerParams(
            vmem_limit_bytes=32 * 1024 * 1024),
    )(*args)


# ----------------------------------------------------------------------------
# Deterministic synthetic parameters + pure-JAX reference.
# ----------------------------------------------------------------------------
def init_params(key, channels, H, W):
    keys = iter(jax.random.split(key, 32))

    def conv_p(cin, cout):
        scale = (9.0 * cin) ** -0.5
        w = scale * jax.random.normal(next(keys), (3, 3, cin, cout), jnp.float32)
        b = 0.1 * scale * jax.random.normal(next(keys), (cout,), jnp.float32)
        return (w, b)

    before = [conv_p(channels, 8), conv_p(8, 16), conv_p(16, 32)]
    after = [conv_p(channels, 8), conv_p(8, 16), conv_p(16, 32)]

    S = 32 * H * W
    s0 = (2.0 * S + 3.0) ** -0.5
    w0oh = s0 * jax.random.normal(next(keys), (3, 512), jnp.float32)
    w0f = (s0 * jax.random.normal(next(keys), (2 * S, 512), jnp.float32)
           ).astype(jnp.bfloat16)
    b0 = 0.01 * jax.random.normal(next(keys), (512,), jnp.float32)

    dims = [512, 256, 128, 64, 4]
    rest = []
    for din, dout in zip(dims[:-1], dims[1:]):
        w = (din ** -0.5 * jax.random.normal(next(keys), (din, dout),
                                             jnp.float32)).astype(jnp.bfloat16)
        b = 0.01 * jax.random.normal(next(keys), (dout,), jnp.float32)
        rest.append((w, b))
    return {"before": before, "after": after, "mlp0": (w0oh, w0f, b0),
            "mlp_rest": rest}


def reference_forward(params, img_1, img_2, conditions):
    """Pure-JAX/XLA reference with identical parameters and math."""
    def conv_stack(x, layers):
        for w, b in layers:
            x = jax.lax.conv_general_dilated(
                x, w, window_strides=(1, 1), padding="SAME",
                dimension_numbers=("NHWC", "HWIO", "NHWC")) + b
        return x.reshape(x.shape[0], -1)      # (B, 32*H*W), (h, w, c) order

    x1 = jnp.transpose(img_1, (0, 2, 3, 1))
    x2 = jnp.transpose(img_2, (0, 2, 3, 1))
    f1 = conv_stack(x1, params["before"])
    f2 = conv_stack(x2, params["after"])
    oh = jax.nn.one_hot(conditions, 3, dtype=jnp.float32)
    w0oh, w0f, b0 = params["mlp0"]
    h = (jnp.concatenate([f1, f2], axis=-1) @ w0f.astype(jnp.float32)
         + oh @ w0oh + b0)
    for w, b in params["mlp_rest"]:
        h = h @ w.astype(jnp.float32) + b
    return h


if __name__ == "__main__":
    B, C, H, W = 2, 2, 8, 8
    root = jax.random.PRNGKey(0)
    k_params, k_img1, k_img2 = jax.random.split(root, 3)

    params = init_params(k_params, C, H, W)
    img_1 = jax.random.normal(k_img1, (B, C, H, W), jnp.float32)
    img_2 = jax.random.normal(k_img2, (B, C, H, W), jnp.float32)
    conditions = jnp.array([0, 2], dtype=jnp.int32)

    kparams = prepare_kernel_params(params, H, W)
    out = jax.block_until_ready(
        magneto_optical_cnn_forward(kparams, img_1, img_2, conditions))
    assert out.shape == (B, 4) and out.dtype == jnp.float32

    ref = jax.block_until_ready(
        reference_forward(params, img_1, img_2, conditions))
    assert jnp.allclose(out, ref, rtol=5e-2, atol=5e-2), (out, ref)
    print("KERNEL_OK")
</pallas_src>

<mosaic_0001>
module attributes {stable_mosaic.version = 11 : i64} {
  func.func @_fused_kernel(%arg0: memref<2x8x32xf32, #tpu.memory_space<vmem>>, %arg1: memref<2x3xf32, #tpu.memory_space<vmem>>, %arg2: memref<3x32x128xbf16, #tpu.memory_space<vmem>>, %arg3: memref<1x128xf32, #tpu.memory_space<vmem>>, %arg4: memref<3x128x256xbf16, #tpu.memory_space<vmem>>, %arg5: memref<1x256xf32, #tpu.memory_space<vmem>>, %arg6: memref<3x256x512xbf16, #tpu.memory_space<vmem>>, %arg7: memref<1x512xf32, #tpu.memory_space<vmem>>, %arg8: memref<3x512xf32, #tpu.memory_space<vmem>>, %arg9: memref<1x512xf32, #tpu.memory_space<vmem>>, %arg10: memref<8x512x512xbf16, #tpu.memory_space<any>>, %arg11: memref<512x256xbf16, #tpu.memory_space<vmem>>, %arg12: memref<1x256xf32, #tpu.memory_space<vmem>>, %arg13: memref<256x128xbf16, #tpu.memory_space<vmem>>, %arg14: memref<1x128xf32, #tpu.memory_space<vmem>>, %arg15: memref<128x64xbf16, #tpu.memory_space<vmem>>, %arg16: memref<1x64xf32, #tpu.memory_space<vmem>>, %arg17: memref<64x4xbf16, #tpu.memory_space<vmem>>, %arg18: memref<1x4xf32, #tpu.memory_space<vmem>>, %arg19: memref<2x4xf32, #tpu.memory_space<vmem>>, %arg20: memref<2x17x32xf32, #tpu.memory_space<vmem>>, %arg21: memref<2x17x128xf32, #tpu.memory_space<vmem>>, %arg22: memref<2x17x256xf32, #tpu.memory_space<vmem>>, %arg23: memref<8x512x512xbf16, #tpu.memory_space<vmem>>, %arg24: memref<2x!tpu.dma_semaphore, #tpu.memory_space<semaphore_mem>>) attributes {dimension_semantics = [], scalar_prefetch = 0 : i64, scratch_operands = 5 : i64, tpu.core_type = #tpu.core_type<tc>} {
    %c0_i32 = arith.constant 0 : i32
    %c0_i32_0 = arith.constant 0 : i32
    %c0_i32_1 = arith.constant 0 : i32
    %c0_i32_2 = arith.constant 0 : i32
    %0 = tpu.memref_slice %arg10[%c0_i32_0, %c0_i32_1, %c0_i32_2] : memref<8x512x512xbf16, #tpu.memory_space<any>> -> memref<4x512x512xbf16, #tpu.memory_space<any>>
    %c0_i32_3 = arith.constant 0 : i32
    %c0_i32_4 = arith.constant 0 : i32
    %c0_i32_5 = arith.constant 0 : i32
    %1 = tpu.memref_slice %arg23[%c0_i32_3, %c0_i32_4, %c0_i32_5] : memref<8x512x512xbf16, #tpu.memory_space<vmem>> -> memref<4x512x512xbf16, #tpu.memory_space<vmem>>
    %2 = tpu.memref_slice %arg24[%c0_i32] : memref<2x!tpu.dma_semaphore, #tpu.memory_space<semaphore_mem>> -> memref<1x!tpu.dma_semaphore, #tpu.memory_space<semaphore_mem>>
    %3 = tpu.memref_squeeze %2 : memref<1x!tpu.dma_semaphore, #tpu.memory_space<semaphore_mem>> -> memref<!tpu.dma_semaphore, #tpu.memory_space<semaphore_mem>>
    tpu.enqueue_dma source(%0 : memref<4x512x512xbf16, #tpu.memory_space<any>>) target(%1 : memref<4x512x512xbf16, #tpu.memory_space<vmem>>) target_semaphore(%3 : memref<!tpu.dma_semaphore, #tpu.memory_space<semaphore_mem>>)
    %c1_i32 = arith.constant 1 : i32
    %c4_i32 = arith.constant 4 : i32
    %c0_i32_6 = arith.constant 0 : i32
    %c0_i32_7 = arith.constant 0 : i32
    %4 = tpu.memref_slice %arg10[%c4_i32, %c0_i32_6, %c0_i32_7] : memref<8x512x512xbf16, #tpu.memory_space<any>> -> memref<4x512x512xbf16, #tpu.memory_space<any>>
    %c4_i32_8 = arith.constant 4 : i32
    %c0_i32_9 = arith.constant 0 : i32
    %c0_i32_10 = arith.constant 0 : i32
    %5 = tpu.memref_slice %arg23[%c4_i32_8, %c0_i32_9, %c0_i32_10] : memref<8x512x512xbf16, #tpu.memory_space<vmem>> -> memref<4x512x512xbf16, #tpu.memory_space<vmem>>
    %6 = tpu.memref_slice %arg24[%c1_i32] : memref<2x!tpu.dma_semaphore, #tpu.memory_space<semaphore_mem>> -> memref<1x!tpu.dma_semaphore, #tpu.memory_space<semaphore_mem>>
    %7 = tpu.memref_squeeze %6 : memref<1x!tpu.dma_semaphore, #tpu.memory_space<semaphore_mem>> -> memref<!tpu.dma_semaphore, #tpu.memory_space<semaphore_mem>>
    tpu.enqueue_dma source(%4 : memref<4x512x512xbf16, #tpu.memory_space<any>>) target(%5 : memref<4x512x512xbf16, #tpu.memory_space<vmem>>) target_semaphore(%7 : memref<!tpu.dma_semaphore, #tpu.memory_space<semaphore_mem>>)
    %c0 = arith.constant 0 : index
    %c0_11 = arith.constant 0 : index
    %c0_12 = arith.constant 0 : index
    %8 = vector.load %arg0[%c0, %c0_11, %c0_12] : memref<2x8x32xf32, #tpu.memory_space<vmem>>, vector<2x8x32xf32>
    %cst = arith.constant 0.000000e+00 : f32
    %9 = vector.broadcast %cst : f32 to vector<2x1x32xf32>
    %c0_13 = arith.constant 0 : index
    %c7 = arith.constant 7 : index
    %c0_14 = arith.constant 0 : index
    %10 = vector.load %arg20[%c0_13, %c7, %c0_14] : memref<2x17x32xf32, #tpu.memory_space<vmem>>, vector<2x1x32xf32>
    tpu.vector_store %arg20[%c0_13, %c7, %c0_14], %9 {strides = array<i32>} : memref<2x17x32xf32, #tpu.memory_space<vmem>>, vector<2x1x32xf32>,
    %cst_15 = arith.constant 0.000000e+00 : f32
    %11 = vector.broadcast %cst_15 : f32 to vector<2x1x32xf32>
    %c0_16 = arith.constant 0 : index
    %c16 = arith.constant 16 : index
    %c0_17 = arith.constant 0 : index
    %12 = vector.load %arg20[%c0_16, %c16, %c0_17] : memref<2x17x32xf32, #tpu.memory_space<vmem>>, vector<2x1x32xf32>
    tpu.vector_store %arg20[%c0_16, %c16, %c0_17], %11 {strides = array<i32>} : memref<2x17x32xf32, #tpu.memory_space<vmem>>, vector<2x1x32xf32>,
    %c0_18 = arith.constant 0 : index
    %c8 = arith.constant 8 : index
    %c0_19 = arith.constant 0 : index
    %13 = vector.load %arg20[%c0_18, %c8, %c0_19] : memref<2x17x32xf32, #tpu.memory_space<vmem>>, vector<2x8x32xf32>
    tpu.vector_store %arg20[%c0_18, %c8, %c0_19], %8 {strides = array<i32>} : memref<2x17x32xf32, #tpu.memory_space<vmem>>, vector<2x8x32xf32>,
    %cst_20 = arith.constant 0.000000e+00 : f32
    %14 = vector.broadcast %cst_20 : f32 to vector<16x128xf32>
    %c0_21 = arith.constant 0 : index
    %c7_22 = arith.constant 7 : index
    %c0_23 = arith.constant 0 : index
    %15 = vector.load %arg20[%c0_21, %c7_22, %c0_23] : memref<2x17x32xf32, #tpu.memory_space<vmem>>, vector<2x8x32xf32>
    %16 = vector.shape_cast %15 : vector<2x8x32xf32> to vector<16x32xf32>
    %17 = arith.truncf %16 : vector<16x32xf32> to vector<16x32xbf16>
    %c0_24 = arith.constant 0 : index
    %c0_25 = arith.constant 0 : index
    %c0_26 = arith.constant 0 : index
    %18 = vector.load %arg2[%c0_24, %c0_25, %c0_26] : memref<3x32x128xbf16, #tpu.memory_space<vmem>>, vector<1x32x128xbf16>
    %19 = vector.shape_cast %18 : vector<1x32x128xbf16> to vector<32x128xbf16>
    %cst_27 = arith.constant dense<0.000000e+00> : vector<16x128xf32>
    %20 = tpu.matmul %17, %19, %cst_27 {dimension_numbers = #tpu.dot_dimension_numbers<[1], [0], [0], [1], [0, 0, 1, 1], [], []>} : vector<16x32xbf16>, vector<32x128xbf16>, vector<16x128xf32> -> vector<16x128xf32>
    %21 = arith.addf %14, %20 : vector<16x128xf32>
    %c0_28 = arith.constant 0 : index
    %c8_29 = arith.constant 8 : index
    %c0_30 = arith.constant 0 : index
    %22 = vector.load %arg20[%c0_28, %c8_29, %c0_30] : memref<2x17x32xf32, #tpu.memory_space<vmem>>, vector<2x8x32xf32>
    %23 = vector.shape_cast %22 : vector<2x8x32xf32> to vector<16x32xf32>
    %24 = arith.truncf %23 : vector<16x32xf32> to vector<16x32xbf16>
    %c1 = arith.constant 1 : index
    %c0_31 = arith.constant 0 : index
    %c0_32 = arith.constant 0 : index
    %25 = vector.load %arg2[%c1, %c0_31, %c0_32] : memref<3x32x128xbf16, #tpu.memory_space<vmem>>, vector<1x32x128xbf16>
    %26 = vector.shape_cast %25 : vector<1x32x128xbf16> to vector<32x128xbf16>
    %cst_33 = arith.constant dense<0.000000e+00> : vector<16x128xf32>
    %27 = tpu.matmul %24, %26, %cst_33 {dimension_numbers = #tpu.dot_dimension_numbers<[1], [0], [0], [1], [0, 0, 1, 1], [], []>} : vector<16x32xbf16>, vector<32x128xbf16>, vector<16x128xf32> -> vector<16x128xf32>
    %28 = arith.addf %21, %27 : vector<16x128xf32>
    %c0_34 = arith.constant 0 : index
    %c9 = arith.constant 9 : index
    %c0_35 = arith.constant 0 : index
    %29 = vector.load %arg20[%c0_34, %c9, %c0_35] : memref<2x17x32xf32, #tpu.memory_space<vmem>>, vector<2x8x32xf32>
    %30 = vector.shape_cast %29 : vector<2x8x32xf32> to vector<16x32xf32>
    %31 = arith.truncf %30 : vector<16x32xf32> to vector<16x32xbf16>
    %c2 = arith.constant 2 : index
    %c0_36 = arith.constant 0 : index
    %c0_37 = arith.constant 0 : index
    %32 = vector.load %arg2[%c2, %c0_36, %c0_37] : memref<3x32x128xbf16, #tpu.memory_space<vmem>>, vector<1x32x128xbf16>
    %33 = vector.shape_cast %32 : vector<1x32x128xbf16> to vector<32x128xbf16>
    %cst_38 = arith.constant dense<0.000000e+00> : vector<16x128xf32>
    %34 = tpu.matmul %31, %33, %cst_38 {dimension_numbers = #tpu.dot_dimension_numbers<[1], [0], [0], [1], [0, 0, 1, 1], [], []>} : vector<16x32xbf16>, vector<32x128xbf16>, vector<16x128xf32> -> vector<16x128xf32>
    %35 = arith.addf %28, %34 : vector<16x128xf32>
    %c0_39 = arith.constant 0 : index
    %c0_40 = arith.constant 0 : index
    %36 = vector.load %arg3[%c0_39, %c0_40] : memref<1x128xf32, #tpu.memory_space<vmem>>, vector<1x128xf32>
    %37 = vector.broadcast %36 : vector<1x128xf32> to vector<16x128xf32>
    %38 = arith.addf %35, %37 : vector<16x128xf32>
    %39 = vector.shape_cast %38 : vector<16x128xf32> to vector<2x8x128xf32>
    %cst_41 = arith.constant 0.000000e+00 : f32
    %40 = vector.broadcast %cst_41 : f32 to vector<2x1x128xf32>
    %c0_42 = arith.constant 0 : index
    %c7_43 = arith.constant 7 : index
    %c0_44 = arith.constant 0 : index
    %41 = vector.load %arg21[%c0_42, %c7_43, %c0_44] : memref<2x17x128xf32, #tpu.memory_space<vmem>>, vector<2x1x128xf32>
    tpu.vector_store %arg21[%c0_42, %c7_43, %c0_44], %40 {strides = array<i32>} : memref<2x17x128xf32, #tpu.memory_space<vmem>>, vector<2x1x128xf32>,
    %cst_45 = arith.constant 0.000000e+00 : f32
    %42 = vector.broadcast %cst_45 : f32 to vector<2x1x128xf32>
    %c0_46 = arith.constant 0 : index
    %c16_47 = arith.constant 16 : index
    %c0_48 = arith.constant 0 : index
    %43 = vector.load %arg21[%c0_46, %c16_47, %c0_48] : memref<2x17x128xf32, #tpu.memory_space<vmem>>, vector<2x1x128xf32>
    tpu.vector_store %arg21[%c0_46, %c16_47, %c0_48], %42 {strides = array<i32>} : memref<2x17x128xf32, #tpu.memory_space<vmem>>, vector<2x1x128xf32>,
    %c0_49 = arith.constant 0 : index
    %c8_50 = arith.constant 8 : index
    %c0_51 = arith.constant 0 : index
    %44 = vector.load %arg21[%c0_49, %c8_50, %c0_51] : memref<2x17x128xf32, #tpu.memory_space<vmem>>, vector<2x8x128xf32>
    tpu.vector_store %arg21[%c0_49, %c8_50, %c0_51], %39 {strides = array<i32>} : memref<2x17x128xf32, #tpu.memory_space<vmem>>, vector<2x8x128xf32>,
    %cst_52 = arith.constant 0.000000e+00 : f32
    %45 = vector.broadcast %cst_52 : f32 to vector<16x256xf32>
    %c0_53 = arith.constant 0 : index
    %c7_54 = arith.constant 7 : index
    %c0_55 = arith.constant 0 : index
    %46 = vector.load %arg21[%c0_53, %c7_54, %c0_55] : memref<2x17x128xf32, #tpu.memory_space<vmem>>, vector<2x8x128xf32>
    %47 = vector.shape_cast %46 : vector<2x8x128xf32> to vector<16x128xf32>
    %48 = arith.truncf %47 : vector<16x128xf32> to vector<16x128xbf16>
    %c0_56 = arith.constant 0 : index
    %c0_57 = arith.constant 0 : index
    %c0_58 = arith.constant 0 : index
    %49 = vector.load %arg4[%c0_56, %c0_57, %c0_58] : memref<3x128x256xbf16, #tpu.memory_space<vmem>>, vector<1x128x256xbf16>
    %50 = vector.shape_cast %49 : vector<1x128x256xbf16> to vector<128x256xbf16>
    %cst_59 = arith.constant dense<0.000000e+00> : vector<16x256xf32>
    %51 = tpu.matmul %48, %50, %cst_59 {dimension_numbers = #tpu.dot_dimension_numbers<[1], [0], [0], [1], [0, 0, 1, 1], [], []>} : vector<16x128xbf16>, vector<128x256xbf16>, vector<16x256xf32> -> vector<16x256xf32>
    %52 = arith.addf %45, %51 : vector<16x256xf32>
    %c0_60 = arith.constant 0 : index
    %c8_61 = arith.constant 8 : index
    %c0_62 = arith.constant 0 : index
    %53 = vector.load %arg21[%c0_60, %c8_61, %c0_62] : memref<2x17x128xf32, #tpu.memory_space<vmem>>, vector<2x8x128xf32>
    %54 = vector.shape_cast %53 : vector<2x8x128xf32> to vector<16x128xf32>
    %55 = arith.truncf %54 : vector<16x128xf32> to vector<16x128xbf16>
    %c1_63 = arith.constant 1 : index
    %c0_64 = arith.constant 0 : index
    %c0_65 = arith.constant 0 : index
    %56 = vector.load %arg4[%c1_63, %c0_64, %c0_65] : memref<3x128x256xbf16, #tpu.memory_space<vmem>>, vector<1x128x256xbf16>
    %57 = vector.shape_cast %56 : vector<1x128x256xbf16> to vector<128x256xbf16>
    %cst_66 = arith.constant dense<0.000000e+00> : vector<16x256xf32>
    %58 = tpu.matmul %55, %57, %cst_66 {dimension_numbers = #tpu.dot_dimension_numbers<[1], [0], [0], [1], [0, 0, 1, 1], [], []>} : vector<16x128xbf16>, vector<128x256xbf16>, vector<16x256xf32> -> vector<16x256xf32>
    %59 = arith.addf %52, %58 : vector<16x256xf32>
    %c0_67 = arith.constant 0 : index
    %c9_68 = arith.constant 9 : index
    %c0_69 = arith.constant 0 : index
    %60 = vector.load %arg21[%c0_67, %c9_68, %c0_69] : memref<2x17x128xf32, #tpu.memory_space<vmem>>, vector<2x8x128xf32>
    %61 = vector.shape_cast %60 : vector<2x8x128xf32> to vector<16x128xf32>
    %62 = arith.truncf %61 : vector<16x128xf32> to vector<16x128xbf16>
    %c2_70 = arith.constant 2 : index
    %c0_71 = arith.constant 0 : index
    %c0_72 = arith.constant 0 : index
    %63 = vector.load %arg4[%c2_70, %c0_71, %c0_72] : memref<3x128x256xbf16, #tpu.memory_space<vmem>>, vector<1x128x256xbf16>
    %64 = vector.shape_cast %63 : vector<1x128x256xbf16> to vector<128x256xbf16>
    %cst_73 = arith.constant dense<0.000000e+00> : vector<16x256xf32>
    %65 = tpu.matmul %62, %64, %cst_73 {dimension_numbers = #tpu.dot_dimension_numbers<[1], [0], [0], [1], [0, 0, 1, 1], [], []>} : vector<16x128xbf16>, vector<128x256xbf16>, vector<16x256xf32> -> vector<16x256xf32>
    %66 = arith.addf %59, %65 : vector<16x256xf32>
    %c0_74 = arith.constant 0 : index
    %c0_75 = arith.constant 0 : index
    %67 = vector.load %arg5[%c0_74, %c0_75] : memref<1x256xf32, #tpu.memory_space<vmem>>, vector<1x256xf32>
    %68 = vector.broadcast %67 : vector<1x256xf32> to vector<16x256xf32>
    %69 = arith.addf %66, %68 : vector<16x256xf32>
    %70 = vector.shape_cast %69 : vector<16x256xf32> to vector<2x8x256xf32>
    %cst_76 = arith.constant 0.000000e+00 : f32
    %71 = vector.broadcast %cst_76 : f32 to vector<2x1x256xf32>
    %c0_77 = arith.constant 0 : index
    %c7_78 = arith.constant 7 : index
    %c0_79 = arith.constant 0 : index
    %72 = vector.load %arg22[%c0_77, %c7_78, %c0_79] : memref<2x17x256xf32, #tpu.memory_space<vmem>>, vector<2x1x256xf32>
    tpu.vector_store %arg22[%c0_77, %c7_78, %c0_79], %71 {strides = array<i32>} : memref<2x17x256xf32, #tpu.memory_space<vmem>>, vector<2x1x256xf32>,
    %cst_80 = arith.constant 0.000000e+00 : f32
    %73 = vector.broadcast %cst_80 : f32 to vector<2x1x256xf32>
    %c0_81 = arith.constant 0 : index
    %c16_82 = arith.constant 16 : index
    %c0_83 = arith.constant 0 : index
    %74 = vector.load %arg22[%c0_81, %c16_82, %c0_83] : memref<2x17x256xf32, #tpu.memory_space<vmem>>, vector<2x1x256xf32>
    tpu.vector_store %arg22[%c0_81, %c16_82, %c0_83], %73 {strides = array<i32>} : memref<2x17x256xf32, #tpu.memory_space<vmem>>, vector<2x1x256xf32>,
    %c0_84 = arith.constant 0 : index
    %c8_85 = arith.constant 8 : index
    %c0_86 = arith.constant 0 : index
    %75 = vector.load %arg22[%c0_84, %c8_85, %c0_86] : memref<2x17x256xf32, #tpu.memory_space<vmem>>, vector<2x8x256xf32>
    tpu.vector_store %arg22[%c0_84, %c8_85, %c0_86], %70 {strides = array<i32>} : memref<2x17x256xf32, #tpu.memory_space<vmem>>, vector<2x8x256xf32>,
    %cst_87 = arith.constant 0.000000e+00 : f32
    %76 = vector.broadcast %cst_87 : f32 to vector<16x512xf32>
    %c0_88 = arith.constant 0 : index
    %c7_89 = arith.constant 7 : index
    %c0_90 = arith.constant 0 : index
    %77 = vector.load %arg22[%c0_88, %c7_89, %c0_90] : memref<2x17x256xf32, #tpu.memory_space<vmem>>, vector<2x8x256xf32>
    %78 = vector.shape_cast %77 : vector<2x8x256xf32> to vector<16x256xf32>
    %79 = arith.truncf %78 : vector<16x256xf32> to vector<16x256xbf16>
    %c0_91 = arith.constant 0 : index
    %c0_92 = arith.constant 0 : index
    %c0_93 = arith.constant 0 : index
    %80 = vector.load %arg6[%c0_91, %c0_92, %c0_93] : memref<3x256x512xbf16, #tpu.memory_space<vmem>>, vector<1x256x512xbf16>
    %81 = vector.shape_cast %80 : vector<1x256x512xbf16> to vector<256x512xbf16>
    %cst_94 = arith.constant dense<0.000000e+00> : vector<16x512xf32>
    %82 = tpu.matmul %79, %81, %cst_94 {dimension_numbers = #tpu.dot_dimension_numbers<[1], [0], [0], [1], [0, 0, 1, 1], [], []>} : vector<16x256xbf16>, vector<256x512xbf16>, vector<16x512xf32> -> vector<16x512xf32>
    %83 = arith.addf %76, %82 : vector<16x512xf32>
    %c0_95 = arith.constant 0 : index
    %c8_96 = arith.constant 8 : index
    %c0_97 = arith.constant 0 : index
    %84 = vector.load %arg22[%c0_95, %c8_96, %c0_97] : memref<2x17x256xf32, #tpu.memory_space<vmem>>, vector<2x8x256xf32>
    %85 = vector.shape_cast %84 : vector<2x8x256xf32> to vector<16x256xf32>
    %86 = arith.truncf %85 : vector<16x256xf32> to vector<16x256xbf16>
    %c1_98 = arith.constant 1 : index
    %c0_99 = arith.constant 0 : index
    %c0_100 = arith.constant 0 : index
    %87 = vector.load %arg6[%c1_98, %c0_99, %c0_100] : memref<3x256x512xbf16, #tpu.memory_space<vmem>>, vector<1x256x512xbf16>
    %88 = vector.shape_cast %87 : vector<1x256x512xbf16> to vector<256x512xbf16>
    %cst_101 = arith.constant dense<0.000000e+00> : vector<16x512xf32>
    %89 = tpu.matmul %86, %88, %cst_101 {dimension_numbers = #tpu.dot_dimension_numbers<[1], [0], [0], [1], [0, 0, 1, 1], [], []>} : vector<16x256xbf16>, vector<256x512xbf16>, vector<16x512xf32> -> vector<16x512xf32>
    %90 = arith.addf %83, %89 : vector<16x512xf32>
    %c0_102 = arith.constant 0 : index
    %c9_103 = arith.constant 9 : index
    %c0_104 = arith.constant 0 : index
    %91 = vector.load %arg22[%c0_102, %c9_103, %c0_104] : memref<2x17x256xf32, #tpu.memory_space<vmem>>, vector<2x8x256xf32>
    %92 = vector.shape_cast %91 : vector<2x8x256xf32> to vector<16x256xf32>
    %93 = arith.truncf %92 : vector<16x256xf32> to vector<16x256xbf16>
    %c2_105 = arith.constant 2 : index
    %c0_106 = arith.constant 0 : index
    %c0_107 = arith.constant 0 : index
    %94 = vector.load %arg6[%c2_105, %c0_106, %c0_107] : memref<3x256x512xbf16, #tpu.memory_space<vmem>>, vector<1x256x512xbf16>
    %95 = vector.shape_cast %94 : vector<1x256x512xbf16> to vector<256x512xbf16>
    %cst_108 = arith.constant dense<0.000000e+00> : vector<16x512xf32>
    %96 = tpu.matmul %93, %95, %cst_108 {dimension_numbers = #tpu.dot_dimension_numbers<[1], [0], [0], [1], [0, 0, 1, 1], [], []>} : vector<16x256xbf16>, vector<256x512xbf16>, vector<16x512xf32> -> vector<16x512xf32>
    %97 = arith.addf %90, %96 : vector<16x512xf32>
    %c0_109 = arith.constant 0 : index
    %c0_110 = arith.constant 0 : index
    %98 = vector.load %arg7[%c0_109, %c0_110] : memref<1x512xf32, #tpu.memory_space<vmem>>, vector<1x512xf32>
    %99 = vector.broadcast %98 : vector<1x512xf32> to vector<16x512xf32>
    %100 = arith.addf %97, %99 : vector<16x512xf32>
    %101 = vector.shape_cast %100 : vector<16x512xf32> to vector<2x8x512xf32>
    %c0_111 = arith.constant 0 : index
    %c0_112 = arith.constant 0 : index
    %102 = vector.load %arg1[%c0_111, %c0_112] : memref<2x3xf32, #tpu.memory_space<vmem>>, vector<2x3xf32>
    %c0_113 = arith.constant 0 : index
    %c0_114 = arith.constant 0 : index
    %103 = vector.load %arg8[%c0_113, %c0_114] : memref<3x512xf32, #tpu.memory_space<vmem>>, vector<3x512xf32>
    %cst_115 = arith.constant dense<0.000000e+00> : vector<2x512xf32>
    %104 = tpu.matmul %102, %103, %cst_115 {dimension_numbers = #tpu.dot_dimension_numbers<[1], [0], [0], [1], [0, 0, 1, 1], [], []>} : vector<2x3xf32>, vector<3x512xf32>, vector<2x512xf32> -> vector<2x512xf32>
    %c0_116 = arith.constant 0 : index
    %c0_117 = arith.constant 0 : index
    %105 = vector.load %arg9[%c0_116, %c0_117] : memref<1x512xf32, #tpu.memory_space<vmem>>, vector<1x512xf32>
    %106 = vector.broadcast %105 : vector<1x512xf32> to vector<2x512xf32>
    %107 = arith.addf %104, %106 : vector<2x512xf32>
    %c0_i32_118 = arith.constant 0 : i32
    %c0_i32_119 = arith.constant 0 : i32
    %c0_i32_120 = arith.constant 0 : i32
    %c0_i32_121 = arith.constant 0 : i32
    %108 = tpu.memref_slice %arg10[%c0_i32_119, %c0_i32_120, %c0_i32_121] : memref<8x512x512xbf16, #tpu.memory_space<any>> -> memref<4x512x512xbf16, #tpu.memory_space<any>>
    %c0_i32_122 = arith.constant 0 : i32
    %c0_i32_123 = arith.constant 0 : i32
    %c0_i32_124 = arith.constant 0 : i32
    %109 = tpu.memref_slice %arg23[%c0_i32_122, %c0_i32_123, %c0_i32_124] : memref<8x512x512xbf16, #tpu.memory_space<vmem>> -> memref<4x512x512xbf16, #tpu.memory_space<vmem>>
    %110 = tpu.memref_slice %arg24[%c0_i32_118] : memref<2x!tpu.dma_semaphore, #tpu.memory_space<semaphore_mem>> -> memref<1x!tpu.dma_semaphore, #tpu.memory_space<semaphore_mem>>
    %111 = tpu.memref_squeeze %110 : memref<1x!tpu.dma_semaphore, #tpu.memory_space<semaphore_mem>> -> memref<!tpu.dma_semaphore, #tpu.memory_space<semaphore_mem>>
    tpu.wait_dma2 semaphore(%111 : memref<!tpu.dma_semaphore, #tpu.memory_space<semaphore_mem>>) src(%108 : memref<4x512x512xbf16, #tpu.memory_space<any>>) dst(%109 : memref<4x512x512xbf16, #tpu.memory_space<vmem>>)
    %112 = vector.extract_strided_slice %101 {offsets = [0, 0, 0], sizes = [2, 1, 512], strides = [1, 1, 1]} : vector<2x8x512xf32> to vector<2x1x512xf32>
    %113 = vector.shape_cast %112 : vector<2x1x512xf32> to vector<2x512xf32>
    %114 = arith.truncf %113 : vector<2x512xf32> to vector<2x512xbf16>
    %c0_125 = arith.constant 0 : index
    %c0_126 = arith.constant 0 : index
    %c0_127 = arith.constant 0 : index
    %115 = vector.load %arg23[%c0_125, %c0_126, %c0_127] : memref<8x512x512xbf16, #tpu.memory_space<vmem>>, vector<1x512x512xbf16>
    %116 = vector.shape_cast %115 : vector<1x512x512xbf16> to vector<512x512xbf16>
    %cst_128 = arith.constant dense<0.000000e+00> : vector<2x512xf32>
    %117 = tpu.matmul %114, %116, %cst_128 {dimension_numbers = #tpu.dot_dimension_numbers<[1], [0], [0], [1], [0, 0, 1, 1], [], []>} : vector<2x512xbf16>, vector<512x512xbf16>, vector<2x512xf32> -> vector<2x512xf32>
    %118 = arith.addf %107, %117 : vector<2x512xf32>
    %119 = vector.extract_strided_slice %101 {offsets = [0, 1, 0], sizes = [2, 1, 512], strides = [1, 1, 1]} : vector<2x8x512xf32> to vector<2x1x512xf32>
    %120 = vector.shape_cast %119 : vector<2x1x512xf32> to vector<2x512xf32>
    %121 = arith.truncf %120 : vector<2x512xf32> to vector<2x512xbf16>
    %c1_129 = arith.constant 1 : index
    %c0_130 = arith.constant 0 : index
    %c0_131 = arith.constant 0 : index
    %122 = vector.load %arg23[%c1_129, %c0_130, %c0_131] : memref<8x512x512xbf16, #tpu.memory_space<vmem>>, vector<1x512x512xbf16>
    %123 = vector.shape_cast %122 : vector<1x512x512xbf16> to vector<512x512xbf16>
    %cst_132 = arith.constant dense<0.000000e+00> : vector<2x512xf32>
    %124 = tpu.matmul %121, %123, %cst_132 {dimension_numbers = #tpu.dot_dimension_numbers<[1], [0], [0], [1], [0, 0, 1, 1], [], []>} : vector<2x512xbf16>, vector<512x512xbf16>, vector<2x512xf32> -> vector<2x512xf32>
    %125 = arith.addf %118, %124 : vector<2x512xf32>
    %126 = vector.extract_strided_slice %101 {offsets = [0, 2, 0], sizes = [2, 1, 512], strides = [1, 1, 1]} : vector<2x8x512xf32> to vector<2x1x512xf32>
    %127 = vector.shape_cast %126 : vector<2x1x512xf32> to vector<2x512xf32>
    %128 = arith.truncf %127 : vector<2x512xf32> to vector<2x512xbf16>
    %c2_133 = arith.constant 2 : index
    %c0_134 = arith.constant 0 : index
    %c0_135 = arith.constant 0 : index
    %129 = vector.load %arg23[%c2_133, %c0_134, %c0_135] : memref<8x512x512xbf16, #tpu.memory_space<vmem>>, vector<1x512x512xbf16>
    %130 = vector.shape_cast %129 : vector<1x512x512xbf16> to vector<512x512xbf16>
    %cst_136 = arith.constant dense<0.000000e+00> : vector<2x512xf32>
    %131 = tpu.matmul %128, %130, %cst_136 {dimension_numbers = #tpu.dot_dimension_numbers<[1], [0], [0], [1], [0, 0, 1, 1], [], []>} : vector<2x512xbf16>, vector<512x512xbf16>, vector<2x512xf32> -> vector<2x512xf32>
    %132 = arith.addf %125, %131 : vector<2x512xf32>
    %133 = vector.extract_strided_slice %101 {offsets = [0, 3, 0], sizes = [2, 1, 512], strides = [1, 1, 1]} : vector<2x8x512xf32> to vector<2x1x512xf32>
    %134 = vector.shape_cast %133 : vector<2x1x512xf32> to vector<2x512xf32>
    %135 = arith.truncf %134 : vector<2x512xf32> to vector<2x512xbf16>
    %c3 = arith.constant 3 : index
    %c0_137 = arith.constant 0 : index
    %c0_138 = arith.constant 0 : index
    %136 = vector.load %arg23[%c3, %c0_137, %c0_138] : memref<8x512x512xbf16, #tpu.memory_space<vmem>>, vector<1x512x512xbf16>
    %137 = vector.shape_cast %136 : vector<1x512x512xbf16> to vector<512x512xbf16>
    %cst_139 = arith.constant dense<0.000000e+00> : vector<2x512xf32>
    %138 = tpu.matmul %135, %137, %cst_139 {dimension_numbers = #tpu.dot_dimension_numbers<[1], [0], [0], [1], [0, 0, 1, 1], [], []>} : vector<2x512xbf16>, vector<512x512xbf16>, vector<2x512xf32> -> vector<2x512xf32>
    %139 = arith.addf %132, %138 : vector<2x512xf32>
    %c1_i32_140 = arith.constant 1 : i32
    %c4_i32_141 = arith.constant 4 : i32
    %c0_i32_142 = arith.constant 0 : i32
    %c0_i32_143 = arith.constant 0 : i32
    %140 = tpu.memref_slice %arg10[%c4_i32_141, %c0_i32_142, %c0_i32_143] : memref<8x512x512xbf16, #tpu.memory_space<any>> -> memref<4x512x512xbf16, #tpu.memory_space<any>>
    %c4_i32_144 = arith.constant 4 : i32
    %c0_i32_145 = arith.constant 0 : i32
    %c0_i32_146 = arith.constant 0 : i32
    %141 = tpu.memref_slice %arg23[%c4_i32_144, %c0_i32_145, %c0_i32_146] : memref<8x512x512xbf16, #tpu.memory_space<vmem>> -> memref<4x512x512xbf16, #tpu.memory_space<vmem>>
    %142 = tpu.memref_slice %arg24[%c1_i32_140] : memref<2x!tpu.dma_semaphore, #tpu.memory_space<semaphore_mem>> -> memref<1x!tpu.dma_semaphore, #tpu.memory_space<semaphore_mem>>
    %143 = tpu.memref_squeeze %142 : memref<1x!tpu.dma_semaphore, #tpu.memory_space<semaphore_mem>> -> memref<!tpu.dma_semaphore, #tpu.memory_space<semaphore_mem>>
    tpu.wait_dma2 semaphore(%143 : memref<!tpu.dma_semaphore, #tpu.memory_space<semaphore_mem>>) src(%140 : memref<4x512x512xbf16, #tpu.memory_space<any>>) dst(%141 : memref<4x512x512xbf16, #tpu.memory_space<vmem>>)
    %144 = vector.extract_strided_slice %101 {offsets = [0, 4, 0], sizes = [2, 1, 512], strides = [1, 1, 1]} : vector<2x8x512xf32> to vector<2x1x512xf32>
    %145 = vector.shape_cast %144 : vector<2x1x512xf32> to vector<2x512xf32>
    %146 = arith.truncf %145 : vector<2x512xf32> to vector<2x512xbf16>
    %c4 = arith.constant 4 : index
    %c0_147 = arith.constant 0 : index
    %c0_148 = arith.constant 0 : index
    %147 = vector.load %arg23[%c4, %c0_147, %c0_148] : memref<8x512x512xbf16, #tpu.memory_space<vmem>>, vector<1x512x512xbf16>
    %148 = vector.shape_cast %147 : vector<1x512x512xbf16> to vector<512x512xbf16>
    %cst_149 = arith.constant dense<0.000000e+00> : vector<2x512xf32>
    %149 = tpu.matmul %146, %148, %cst_149 {dimension_numbers = #tpu.dot_dimension_numbers<[1], [0], [0], [1], [0, 0, 1, 1], [], []>} : vector<2x512xbf16>, vector<512x512xbf16>, vector<2x512xf32> -> vector<2x512xf32>
    %150 = arith.addf %139, %149 : vector<2x512xf32>
    %151 = vector.extract_strided_slice %101 {offsets = [0, 5, 0], sizes = [2, 1, 512], strides = [1, 1, 1]} : vector<2x8x512xf32> to vector<2x1x512xf32>
    %152 = vector.shape_cast %151 : vector<2x1x512xf32> to vector<2x512xf32>
    %153 = arith.truncf %152 : vector<2x512xf32> to vector<2x512xbf16>
    %c5 = arith.constant 5 : index
    %c0_150 = arith.constant 0 : index
    %c0_151 = arith.constant 0 : index
    %154 = vector.load %arg23[%c5, %c0_150, %c0_151] : memref<8x512x512xbf16, #tpu.memory_space<vmem>>, vector<1x512x512xbf16>
    %155 = vector.shape_cast %154 : vector<1x512x512xbf16> to vector<512x512xbf16>
    %cst_152 = arith.constant dense<0.000000e+00> : vector<2x512xf32>
    %156 = tpu.matmul %153, %155, %cst_152 {dimension_numbers = #tpu.dot_dimension_numbers<[1], [0], [0], [1], [0, 0, 1, 1], [], []>} : vector<2x512xbf16>, vector<512x512xbf16>, vector<2x512xf32> -> vector<2x512xf32>
    %157 = arith.addf %150, %156 : vector<2x512xf32>
    %158 = vector.extract_strided_slice %101 {offsets = [0, 6, 0], sizes = [2, 1, 512], strides = [1, 1, 1]} : vector<2x8x512xf32> to vector<2x1x512xf32>
    %159 = vector.shape_cast %158 : vector<2x1x512xf32> to vector<2x512xf32>
    %160 = arith.truncf %159 : vector<2x512xf32> to vector<2x512xbf16>
    %c6 = arith.constant 6 : index
    %c0_153 = arith.constant 0 : index
    %c0_154 = arith.constant 0 : index
    %161 = vector.load %arg23[%c6, %c0_153, %c0_154] : memref<8x512x512xbf16, #tpu.memory_space<vmem>>, vector<1x512x512xbf16>
    %162 = vector.shape_cast %161 : vector<1x512x512xbf16> to vector<512x512xbf16>
    %cst_155 = arith.constant dense<0.000000e+00> : vector<2x512xf32>
    %163 = tpu.matmul %160, %162, %cst_155 {dimension_numbers = #tpu.dot_dimension_numbers<[1], [0], [0], [1], [0, 0, 1, 1], [], []>} : vector<2x512xbf16>, vector<512x512xbf16>, vector<2x512xf32> -> vector<2x512xf32>
    %164 = arith.addf %157, %163 : vector<2x512xf32>
    %165 = vector.extract_strided_slice %101 {offsets = [0, 7, 0], sizes = [2, 1, 512], strides = [1, 1, 1]} : vector<2x8x512xf32> to vector<2x1x512xf32>
    %166 = vector.shape_cast %165 : vector<2x1x512xf32> to vector<2x512xf32>
    %167 = arith.truncf %166 : vector<2x512xf32> to vector<2x512xbf16>
    %c7_156 = arith.constant 7 : index
    %c0_157 = arith.constant 0 : index
    %c0_158 = arith.constant 0 : index
    %168 = vector.load %arg23[%c7_156, %c0_157, %c0_158] : memref<8x512x512xbf16, #tpu.memory_space<vmem>>, vector<1x512x512xbf16>
    %169 = vector.shape_cast %168 : vector<1x512x512xbf16> to vector<512x512xbf16>
    %cst_159 = arith.constant dense<0.000000e+00> : vector<2x512xf32>
    %170 = tpu.matmul %167, %169, %cst_159 {dimension_numbers = #tpu.dot_dimension_numbers<[1], [0], [0], [1], [0, 0, 1, 1], [], []>} : vector<2x512xbf16>, vector<512x512xbf16>, vector<2x512xf32> -> vector<2x512xf32>
    %171 = arith.addf %164, %170 : vector<2x512xf32>
    %172 = arith.truncf %171 : vector<2x512xf32> to vector<2x512xbf16>
    %c0_160 = arith.constant 0 : index
    %c0_161 = arith.constant 0 : index
    %173 = vector.load %arg11[%c0_160, %c0_161] : memref<512x256xbf16, #tpu.memory_space<vmem>>, vector<512x256xbf16>
    %cst_162 = arith.constant dense<0.000000e+00> : vector<2x256xf32>
    %174 = tpu.matmul %172, %173, %cst_162 {dimension_numbers = #tpu.dot_dimension_numbers<[1], [0], [0], [1], [0, 0, 1, 1], [], []>} : vector<2x512xbf16>, vector<512x256xbf16>, vector<2x256xf32> -> vector<2x256xf32>
    %c0_163 = arith.constant 0 : index
    %c0_164 = arith.constant 0 : index
    %175 = vector.load %arg12[%c0_163, %c0_164] : memref<1x256xf32, #tpu.memory_space<vmem>>, vector<1x256xf32>
    %176 = vector.broadcast %175 : vector<1x256xf32> to vector<2x256xf32>
    %177 = arith.addf %174, %176 : vector<2x256xf32>
    %178 = arith.truncf %177 : vector<2x256xf32> to vector<2x256xbf16>
    %c0_165 = arith.constant 0 : index
    %c0_166 = arith.constant 0 : index
    %179 = vector.load %arg13[%c0_165, %c0_166] : memref<256x128xbf16, #tpu.memory_space<vmem>>, vector<256x128xbf16>
    %cst_167 = arith.constant dense<0.000000e+00> : vector<2x128xf32>
    %180 = tpu.matmul %178, %179, %cst_167 {dimension_numbers = #tpu.dot_dimension_numbers<[1], [0], [0], [1], [0, 0, 1, 1], [], []>} : vector<2x256xbf16>, vector<256x128xbf16>, vector<2x128xf32> -> vector<2x128xf32>
    %c0_168 = arith.constant 0 : index
    %c0_169 = arith.constant 0 : index
    %181 = vector.load %arg14[%c0_168, %c0_169] : memref<1x128xf32, #tpu.memory_space<vmem>>, vector<1x128xf32>
    %182 = vector.broadcast %181 : vector<1x128xf32> to vector<2x128xf32>
    %183 = arith.addf %180, %182 : vector<2x128xf32>
    %184 = arith.truncf %183 : vector<2x128xf32> to vector<2x128xbf16>
    %c0_170 = arith.constant 0 : index
    %c0_171 = arith.constant 0 : index
    %185 = vector.load %arg15[%c0_170, %c0_171] : memref<128x64xbf16, #tpu.memory_space<vmem>>, vector<128x64xbf16>
    %cst_172 = arith.constant dense<0.000000e+00> : vector<2x64xf32>
    %186 = tpu.matmul %184, %185, %cst_172 {dimension_numbers = #tpu.dot_dimension_numbers<[1], [0], [0], [1], [0, 0, 1, 1], [], []>} : vector<2x128xbf16>, vector<128x64xbf16>, vector<2x64xf32> -> vector<2x64xf32>
    %c0_173 = arith.constant 0 : index
    %c0_174 = arith.constant 0 : index
    %187 = vector.load %arg16[%c0_173, %c0_174] : memref<1x64xf32, #tpu.memory_space<vmem>>, vector<1x64xf32>
    %188 = vector.broadcast %187 : vector<1x64xf32> to vector<2x64xf32>
    %189 = arith.addf %186, %188 : vector<2x64xf32>
    %190 = arith.truncf %189 : vector<2x64xf32> to vector<2x64xbf16>
    %c0_175 = arith.constant 0 : index
    %c0_176 = arith.constant 0 : index
    %191 = vector.load %arg17[%c0_175, %c0_176] : memref<64x4xbf16, #tpu.memory_space<vmem>>, vector<64x4xbf16>
    %cst_177 = arith.constant dense<0.000000e+00> : vector<2x4xf32>
    %192 = tpu.matmul %190, %191, %cst_177 {dimension_numbers = #tpu.dot_dimension_numbers<[1], [0], [0], [1], [0, 0, 1, 1], [], []>} : vector<2x64xbf16>, vector<64x4xbf16>, vector<2x4xf32> -> vector<2x4xf32>
    %c0_178 = arith.constant 0 : index
    %c0_179 = arith.constant 0 : index
    %193 = vector.load %arg18[%c0_178, %c0_179] : memref<1x4xf32, #tpu.memory_space<vmem>>, vector<1x4xf32>
    %194 = vector.broadcast %193 : vector<1x4xf32> to vector<2x4xf32>
    %195 = arith.addf %192, %194 : vector<2x4xf32>
    %c0_180 = arith.constant 0 : index
    %c0_181 = arith.constant 0 : index
    %196 = vector.load %arg19[%c0_180, %c0_181] : memref<2x4xf32, #tpu.memory_space<vmem>>, vector<2x4xf32>
    tpu.vector_store %arg19[%c0_180, %c0_181], %195 {strides = array<i32>} : memref<2x4xf32, #tpu.memory_space<vmem>>, vector<2x4xf32>,
    return
  }
}

</mosaic_0001>

<bundles_post_ra>
// kernel: tpu_custom_call.1
= control target key start
LH: loop header
LB: loop body
LE: loop exit
PB: predicated region body
PF: predicated region fallthrough
CT: control target
= control target key end

     0   :  { %s15840_s0 = inlined_call_operand.hbm [shape: f32[2,8,32], index: 0, kind: input, shape index: {}]   ;;  %s15841_s1 = inlined_call_operand.hbm [shape: f32[2,3], index: 1, kind: input, shape index: {}]   ;;  %s15842_s2 = inlined_call_operand.hbm [shape: bf16[3,32,128], index: 2, kind: input, shape index: {}]   ;;  %s15843_s3 = inlined_call_operand.hbm [shape: f32[1,128], index: 3, kind: input, shape index: {}]   ;;  %s15844_s4 = inlined_call_operand.hbm [shape: bf16[3,128,256], index: 4, kind: input, shape index: {}]   ;;  %s15845_s5 = inlined_call_operand.hbm [shape: f32[1,256], index: 5, kind: input, shape index: {}]   ;;  %s15846_s6 = inlined_call_operand.hbm [shape: bf16[3,256,512], index: 6, kind: input, shape index: {}]   ;;  %s15847_s7 = inlined_call_operand.hbm [shape: f32[1,512], index: 7, kind: input, shape index: {}]   ;;  %s15848_s8 = inlined_call_operand.hbm [shape: f32[3,512], index: 8, kind: input, shape index: {}]   ;;  %s15849_s9 = inlined_call_operand.hbm [shape: f32[1,512], index: 9, kind: input, shape index: {}]   ;;  %s15850_s10 = inlined_call_operand.hbm [shape: bf16[8,512,512], index: 10, kind: input, shape index: {}]   ;;  %s15851_s11 = inlined_call_operand.hbm [shape: bf16[512,256], index: 11, kind: input, shape index: {}]   ;;  %s15852_s12 = inlined_call_operand.hbm [shape: f32[1,256], index: 12, kind: input, shape index: {}]   ;;  %s15853_s13 = inlined_call_operand.hbm [shape: bf16[256,128], index: 13, kind: input, shape index: {}]   ;;  %s15854_s14 = inlined_call_operand.hbm [shape: f32[1,128], index: 14, kind: input, shape index: {}]   ;;  %s15855_s15 = inlined_call_operand.vmem [shape: bf16[128,64], index: 15, kind: input, shape index: {}]   ;;  %s15856_s16 = inlined_call_operand.hbm [shape: f32[1,64], index: 16, kind: input, shape index: {}]   ;;  %s15857_s17 = inlined_call_operand.vmem [shape: bf16[64,4], index: 17, kind: input, shape index: {}]   ;;  %s15858_s18 = inlined_call_operand.hbm [shape: f32[1,4], index: 18, kind: input, shape index: {}]   ;;  %s15859_s19 = inlined_call_operand.hbm [shape: f32[2,4], index: 19, kind: output, shape index: {}]  }
   0x1   :  { %15860 = sst [smem:[#allocation52_spill]] %s15840_s0 }
   0x2   :  { %15861 = sst [smem:[#allocation53_spill]] %s15841_s1 }
   0x3   :  { %15862 = sst [smem:[#allocation54_spill]] %s15842_s2 }
   0x4   :  { %15863 = sst [smem:[#allocation55_spill]] %s15843_s3 }
   0x5   :  { %24 = vsyncpa [#allocation8], 0 }
   0x6   :  { %25 = vsyncpa [#allocation11], 0 }
   0x7   :  { %26 = vsyncpa [#allocation14], 0 }
   0x8   :  { %27 = vsyncpa [#allocation17], 0 }
   0x9   :  { %28 = vsyncpa [#allocation20], 0 }
   0xa   :  { %29 = vsyncpa [#allocation23], 0 }
   0xb   :  { %30 = vsyncpa [#allocation26], 0 }
   0xc   :  { %31 = vsyncpa [#allocation29], 0 }
   0xd   :  { %32 = vsyncpa [#allocation32], 0 }
   0xe   :  { %33 = vsyncpa [#allocation9], 0  ;;  %s15193_s0 = smov [#allocation10]   ;;  %s15194_s20 = smov [#allocation13]  }
   0xf   :  { %s52_s30 = sshll.u32 %s15193_s0, 4  ;;  %s74_s21 = sshll.u32 %s15194_s20, 4  ;;  %s53_s30 = int_to_ptr.vmem [resolvable:$true] %s52_s30  ;;  %s75_s21 = int_to_ptr.vmem [resolvable:$true] %s74_s21 }
  0x10   :  { %s14794_s1 = scalar_lea.vmem %s53_s30, 32  ;;  %p14799_p1 = scmp.lt.s32.totalorder %s53_s30, %s53_s30 }
  0x11   :  { %p14795_p0 = scmp.ne.s32.totalorder %s53_s30, %s14794_s1  ;;  %p14800_p2 = scmp.lt.s32.totalorder %s14794_s1, %s14794_s1 }
  0x13   :  { %p14801_p3 = por %p14800_p2, %p14799_p1 }
  0x15   :  { %p14802_p4 = pnand %p14801_p3, %p14795_p0 }
  0x17   :  { %14805 = shalt.err (!%p14802_p4)
}
  0x18   :  { %s15864_s23 = sld [smem:[#allocation53_spill]]  ;;  %s14814_s24 = scalar_lea.vmem %s75_s21, 16 }
  0x19   :  { %p14815_p5 = scmp.ne.s32.totalorder %s75_s21, %s14814_s24  ;;  %s14818_s25 = scalar_lea.vmem %s75_s21, 32 }
  0x1a   :  { %p14819_p6 = scmp.lt.s32.totalorder %s75_s21, %s75_s21  ;;  %p14820_p7 = scmp.lt.s32.totalorder %s14818_s25, %s14814_s24 }
  0x1c   :  { %p14821_p8 = por %p14820_p7, %p14819_p6 }
  0x1e   :  { %55 = dma.hbm_to_vmem [thread:$0]  %s15864_s23, 32, %s53_s30, [#allocation11]  }
  0x1f   :  { %p14822_p9 = pnand %p14821_p8, %p14815_p5 }
  0x21   :  { %14825 = shalt.err (!%p14822_p9)
}
  0x22   :  { %s15865_s27 = sld [smem:[#allocation55_spill]]  ;;  %s15195_s28 = smov [#allocation16]  }
  0x23   :  { %s96_s29 = sshll.u32 %s15195_s28, 4  ;;  %s15196_s0 = smov [#allocation19]   ;;  %s97_s29 = int_to_ptr.vmem [resolvable:$true] %s96_s29 }
  0x24   :  { %s118_s20 = sshll.u32 %s15196_s0, 4  ;;  %s14834_s1 = scalar_lea.vmem %s97_s29, 32  ;;  %s119_s20 = int_to_ptr.vmem [resolvable:$true] %s118_s20 }
  0x25   :  { %p14835_p10 = scmp.ne.s32.totalorder %s97_s29, %s14834_s1  ;;  %p14839_p11 = scmp.lt.s32.totalorder %s97_s29, %s97_s29 }
  0x26   :  { %p14840_p12 = scmp.lt.s32.totalorder %s14834_s1, %s14834_s1 }
  0x28   :  { %77 = dma.hbm_to_vmem [thread:$0]  %s15865_s27, 16, %s75_s21, [#allocation14]  }
  0x29   :  { %p14841_p13 = por %p14840_p12, %p14839_p11 }
  0x2b   :  { %p14842_p0 = pnand %p14841_p13, %p14835_p10 }
  0x2d   :  { %14845 = shalt.err (!%p14842_p0)
}
  0x2e   :  { %99 = dma.hbm_to_vmem [thread:$0]  %s15845_s5, 32, %s97_s29, [#allocation17]  }
  0x2f   :  { %s14854_s2 = scalar_lea.vmem %s119_s20, 64  ;;  %p14859_p2 = scmp.lt.s32.totalorder %s119_s20, %s119_s20 }
  0x30   :  { %p14855_p1 = scmp.ne.s32.totalorder %s119_s20, %s14854_s2  ;;  %p14860_p3 = scmp.lt.s32.totalorder %s14854_s2, %s14854_s2 }
  0x32   :  { %p14861_p4 = por %p14860_p3, %p14859_p2 }
  0x34   :  { %p14862_p5 = pnand %p14861_p4, %p14855_p1 }
  0x36   :  { %14865 = shalt.err (!%p14862_p5)
}
  0x37   :  { %121 = dma.hbm_to_vmem [thread:$0]  %s15847_s7, 64, %s119_s20, [#allocation20]  }
  0x38   :  { %s15197_s24 = smov [#allocation22]   ;;  %s15198_s3 = smov [#allocation25]  }
  0x39   :  { %s138_s25 = sshll.u32 %s15197_s24, 4  ;;  %s160_s26 = sshll.u32 %s15198_s3, 4  ;;  %s139_s25 = int_to_ptr.vmem [resolvable:$true] %s138_s25  ;;  %s161_s26 = int_to_ptr.vmem [resolvable:$true] %s160_s26 }
  0x3a   :  { %s14874_s27 = scalar_lea.vmem %s139_s25, 64  ;;  %p14879_p7 = scmp.lt.s32.totalorder %s139_s25, %s139_s25 }
  0x3b   :  { %p14875_p6 = scmp.ne.s32.totalorder %s139_s25, %s14874_s27  ;;  %p14880_p8 = scmp.lt.s32.totalorder %s14874_s27, %s14874_s27 }
  0x3d   :  { %p14881_p9 = por %p14880_p8, %p14879_p7 }
  0x3f   :  { %p14882_p10 = pnand %p14881_p9, %p14875_p6 }
  0x41   :  { %14885 = shalt.err (!%p14882_p10)
}
  0x42   :  { %141 = dma.hbm_to_vmem [thread:$0]  %s15849_s9, 64, %s139_s25, [#allocation23]  }
  0x43   :  { %s14894_s29 = scalar_lea.vmem %s161_s26, 32  ;;  %p14899_p12 = scmp.lt.s32.totalorder %s161_s26, %s161_s26 }
  0x44   :  { %p14895_p11 = scmp.ne.s32.totalorder %s161_s26, %s14894_s29  ;;  %p14900_p13 = scmp.lt.s32.totalorder %s14894_s29, %s14894_s29 }
  0x46   :  { %p14901_p0 = por %p14900_p13, %p14899_p12 }
  0x48   :  { %p14902_p1 = pnand %p14901_p0, %p14895_p11 }
  0x4a   :  { %14905 = shalt.err (!%p14902_p1)
}
  0x4b   :  { %163 = dma.hbm_to_vmem [thread:$0]  %s15852_s12, 32, %s161_s26, [#allocation26]  }
  0x4c   :  { %s15199_s20 = smov [#allocation28]   ;;  %s15200_s30 = smov [#allocation7]  }
  0x4d   :  { %s182_s1 = sshll.u32 %s15199_s20, 4  ;;  %s39_s22 = sshll.u32 %s15200_s30, 4  ;;  %s183_s1 = int_to_ptr.vmem [resolvable:$true] %s182_s1  ;;  %s40_s22 = int_to_ptr.vmem [resolvable:$true] %s39_s22 }
  0x4e   :  { %s14914_s2 = scalar_lea.vmem %s183_s1, 16  ;;  %s14918_s9 = scalar_lea.vmem %s183_s1, 32 }
  0x4f   :  { %p14915_p2 = scmp.ne.s32.totalorder %s183_s1, %s14914_s2  ;;  %p14919_p3 = scmp.lt.s32.totalorder %s183_s1, %s183_s1 }
  0x50   :  { %p14920_p4 = scmp.lt.s32.totalorder %s14918_s9, %s14914_s2 }
  0x52   :  { %p14921_p5 = por %p14920_p4, %p14919_p3 }
  0x54   :  { %p14922_p6 = pnand %p14921_p5, %p14915_p2 }
  0x56   :  { %14925 = shalt.err (!%p14922_p6)
}
  0x57   :  { %185 = dma.hbm_to_vmem [thread:$0]  %s15854_s14, 16, %s183_s1, [#allocation29]  }
  0x58   :  { %s14934_s24 = scalar_lea.vmem %s40_s22, 256  ;;  %p14939_p8 = scmp.lt.s32.totalorder %s40_s22, %s40_s22 }
  0x59   :  { %p14935_p7 = scmp.ne.s32.totalorder %s40_s22, %s14934_s24  ;;  %p14940_p9 = scmp.lt.s32.totalorder %s14934_s24, %s14934_s24 }
  0x5b   :  { %p14941_p10 = por %p14940_p9, %p14939_p8 }
  0x5d   :  { %p14942_p11 = pnand %p14941_p10, %p14935_p7 }
  0x5f   :  { %14945 = shalt.err (!%p14942_p11)
}
  0x60   :  { %s15201_s12 = smov 128   ;;  %s15202_s25 = smov 8  }
  0x61   :  { %s15866_s27 = sld [smem:[#allocation52_spill]]  ;;  %s15203_s5 = smov [#allocation12]  }
  0x62   :  { %s61_s28 = sshll.u32 %s15203_s5, 4  ;;  %s62_s28 = int_to_ptr.vmem [resolvable:$true] %s61_s28 }
  0x63   :  { %s14954_s14 = scalar_lea.vmem %s62_s28, 768  ;;  %p14959_p13 = scmp.lt.s32.totalorder %s62_s28, %s62_s28 }
  0x64   :  { %p14955_p12 = scmp.ne.s32.totalorder %s62_s28, %s14954_s14  ;;  %p14960_p0 = scmp.lt.s32.totalorder %s14954_s14, %s14954_s14 }
  0x66   :  { %p14961_p1 = por %p14960_p0, %p14959_p13 }
  0x67   :  { %45 = dma.hbm_to_vmem [thread:$0]  %s15866_s27, 256, %s40_s22, [#allocation8], %s15201_s12, %s15201_s12, %s15202_s25  }
  0x68   :  { %p14962_p2 = pnand %p14961_p1, %p14955_p12 }
  0x6a   :  { %14965 = shalt.err (!%p14962_p2)
}
  0x6b   :  { %s15204_s29 = smov 64   ;;  %s15205_s7 = smov 4  }
  0x6c   :  { %s15867_s1 = sld [smem:[#allocation54_spill]]  ;;  %s15206_s30 = smov [#allocation15]  }
  0x6d   :  { %s83_s22 = sshll.u32 %s15206_s30, 4  ;;  %s15207_s2 = smov [#allocation18]   ;;  %s84_s22 = int_to_ptr.vmem [resolvable:$true] %s83_s22 }
  0x6e   :  { %s105_s9 = sshll.u32 %s15207_s2, 4  ;;  %s14974_s21 = scalar_lea.vmem %s84_s22, 6144  ;;  %s106_s9 = int_to_ptr.vmem [resolvable:$true] %s105_s9 }
  0x6f   :  { %p14975_p3 = scmp.ne.s32.totalorder %s84_s22, %s14974_s21  ;;  %p14979_p4 = scmp.lt.s32.totalorder %s84_s22, %s84_s22 }
  0x70   :  { %p14980_p5 = scmp.lt.s32.totalorder %s14974_s21, %s14974_s21 }
  0x72   :  { %67 = dma.hbm_to_vmem [thread:$0]  %s15867_s1, 768, %s62_s28, [#allocation11], %s15204_s29, %s15204_s29, %s15205_s7  }
  0x73   :  { %p14981_p6 = por %p14980_p5, %p14979_p4 }
  0x75   :  { %p14982_p7 = pnand %p14981_p6, %p14975_p3 }
  0x77   :  { %14985 = shalt.err (!%p14982_p7)
}
  0x78   :  { %89 = dma.hbm_to_vmem [thread:$0]  %s15844_s4, 6144, %s84_s22, [#allocation14], %s15201_s12, %s15201_s12, %s15202_s25  }
  0x79   :  { %s14994_s3 = scalar_lea.vmem %s106_s9, 24576  ;;  %p14999_p9 = scmp.lt.s32.totalorder %s106_s9, %s106_s9 }
  0x7a   :  { %p14995_p8 = scmp.ne.s32.totalorder %s106_s9, %s14994_s3  ;;  %p15000_p10 = scmp.lt.s32.totalorder %s14994_s3, %s14994_s3 }
  0x7c   :  { %p15001_p11 = por %p15000_p10, %p14999_p9 }
  0x7e   :  { %p15002_p12 = pnand %p15001_p11, %p14995_p8 }
  0x80   :  { %15005 = shalt.err (!%p15002_p12)
}
  0x81   :  { %s15208_s26 = smov 256   ;;  %s15209_s27 = smov 16  }
  0x82   :  { %111 = dma.hbm_to_vmem [thread:$0]  %s15846_s6, 24576, %s106_s9, [#allocation17], %s15208_s26, %s15208_s26, %s15209_s27  }
  0x83   :  { %s15210_s14 = smov [#allocation21]   ;;  %s15211_s20 = smov [#allocation24]  }
  0x84   :  { %s128_s0 = sshll.u32 %s15210_s14, 4  ;;  %s147_s1 = sshll.u32 %s15211_s20, 4  ;;  %s129_s0 = int_to_ptr.vmem [resolvable:$true] %s128_s0  ;;  %s148_s1 = int_to_ptr.vmem [resolvable:$true] %s147_s1 }
  0x85   :  { %s15014_s4 = scalar_lea.vmem %s129_s0, 256  ;;  %p15019_p0 = scmp.lt.s32.totalorder %s129_s0, %s129_s0 }
  0x86   :  { %p15015_p13 = scmp.ne.s32.totalorder %s129_s0, %s15014_s4  ;;  %p15020_p1 = scmp.lt.s32.totalorder %s15014_s4, %s15014_s4 }
  0x88   :  { %p15021_p2 = por %p15020_p1, %p15019_p0 }
  0x8a   :  { %p15022_p3 = pnand %p15021_p2, %p15015_p13 }
  0x8c   :  { %15025 = shalt.err (!%p15022_p3)
}
  0x8d   :  { %131 = dma.hbm_to_vmem [thread:$0]  %s15848_s8, 256, %s129_s0, [#allocation20]  }
  0x8e   :  { %s15034_s2 = scalar_lea.vmem %s148_s1, 8192  ;;  %p15039_p5 = scmp.lt.s32.totalorder %s148_s1, %s148_s1 }
  0x8f   :  { %p15035_p4 = scmp.ne.s32.totalorder %s148_s1, %s15034_s2  ;;  %p15040_p6 = scmp.lt.s32.totalorder %s15034_s2, %s15034_s2 }
  0x91   :  { %p15041_p7 = por %p15040_p6, %p15039_p5 }
  0x93   :  { %p15042_p8 = pnand %p15041_p7, %p15035_p4 }
  0x95   :  { %15045 = shalt.err (!%p15042_p8)
}
  0x96   :  { %153 = dma.hbm_to_vmem [thread:$0]  %s15851_s11, 8192, %s148_s1, [#allocation23], %s15201_s12, %s15201_s12, %s15202_s25  }
  0x97   :  { %s15212_s21 = smov [#allocation27]   ;;  %s15213_s24 = smov [#allocation30]  }
  0x98   :  { %s169_s23 = sshll.u32 %s15212_s21, 4  ;;  %s194_s8 = sshll.u32 %s15213_s24, 4  ;;  %s170_s23 = int_to_ptr.vmem [resolvable:$true] %s169_s23  ;;  %s195_s8 = int_to_ptr.vmem [resolvable:$true] %s194_s8 }
  0x99   :  { %s15054_s3 = scalar_lea.vmem %s170_s23, 2048  ;;  %p15059_p10 = scmp.lt.s32.totalorder %s170_s23, %s170_s23 }
  0x9a   :  { %p15055_p9 = scmp.ne.s32.totalorder %s170_s23, %s15054_s3  ;;  %p15060_p11 = scmp.lt.s32.totalorder %s15054_s3, %s15054_s3 }
  0x9c   :  { %p15061_p12 = por %p15060_p11, %p15059_p10 }
  0x9e   :  { %p15062_p13 = pnand %p15061_p12, %p15055_p9 }
  0xa0   :  { %15065 = shalt.err (!%p15062_p13)
}
  0xa1   :  { %175 = dma.hbm_to_vmem [thread:$0]  %s15853_s13, 2048, %s170_s23, [#allocation26], %s15204_s29, %s15204_s29, %s15205_s7  }
  0xa2   :  { %s15074_s11 = scalar_lea.vmem %s195_s8, 16  ;;  %s15078_s12 = scalar_lea.vmem %s195_s8, 32 }
  0xa3   :  { %p15075_p0 = scmp.ne.s32.totalorder %s195_s8, %s15074_s11  ;;  %p15079_p1 = scmp.lt.s32.totalorder %s195_s8, %s195_s8 }
  0xa4   :  { %p15080_p2 = scmp.lt.s32.totalorder %s15078_s12, %s15074_s11 }
  0xa6   :  { %p15081_p3 = por %p15080_p2, %p15079_p1 }
  0xa8   :  { %p15082_p4 = pnand %p15081_p3, %p15075_p0 }
  0xaa   :  { %15085 = shalt.err (!%p15082_p4)
}
  0xab   :  { %197 = dma.hbm_to_vmem [thread:$0]  %s15856_s16, 16, %s195_s8, [#allocation29]  }
  0xac   :  { %s15214_s28 = smov [#allocation31]  }
  0xad   :  { %s206_s14 = sshll.u32 %s15214_s28, 4  ;;  %s207_s14 = int_to_ptr.vmem [resolvable:$true] %s206_s14 }
  0xae   :  { %s15094_s0 = scalar_lea.vmem %s207_s14, 16  ;;  %s15098_s20 = scalar_lea.vmem %s207_s14, 32 }
  0xaf   :  { %p15095_p5 = scmp.ne.s32.totalorder %s207_s14, %s15094_s0  ;;  %p15099_p6 = scmp.lt.s32.totalorder %s207_s14, %s207_s14 }
  0xb0   :  { %p15100_p7 = scmp.lt.s32.totalorder %s15098_s20, %s15094_s0 }
  0xb2   :  { %p15101_p8 = por %p15100_p7, %p15099_p6 }
  0xb4   :  { %p15102_p9 = pnand %p15101_p8, %p15095_p5 }
  0xb6   :  { %15105 = shalt.err (!%p15102_p9)
}
  0xb7   :  { %209 = dma.hbm_to_vmem [thread:$0]  %s15858_s18, 16, %s207_s14, [#allocation32]  }
  0xb8   :  { %15169 = dma.done.wait [#allocation8], 256  }
  0xb9   :  { %15170 = vsyncadd [#allocation8], 4294967040 }
  0xba   :  { %15171 = dma.done.wait [#allocation11], 800  }
  0xbb   :  { %15172 = vsyncadd [#allocation11], 4294966496 }
  0xbc   :  { %15173 = dma.done.wait [#allocation14], 6160  }
  0xbd   :  { %15174 = vsyncadd [#allocation14], 4294961136 }
  0xbe   :  { %15175 = dma.done.wait [#allocation17], 24608  }
  0xbf   :  { %15176 = vsyncadd [#allocation17], 4294942688 }
  0xc0   :  { %15177 = dma.done.wait [#allocation20], 320  }
  0xc1   :  { %15178 = vsyncadd [#allocation20], 4294966976 }
  0xc2   :  { %15179 = dma.done.wait [#allocation23], 8256  }
  0xc3   :  { %15180 = vsyncadd [#allocation23], 4294959040 }
  0xc4   :  { %15181 = dma.done.wait [#allocation26], 2080  }
  0xc5   :  { %15182 = vsyncadd [#allocation26], 4294965216 }
  0xc6   :  { %15183 = dma.done.wait [#allocation29], 32  }
  0xc7   :  { %15184 = vsyncadd [#allocation29], 4294967264 }
  0xc8   :  { %15185 = dma.done.wait [#allocation32], 16  }
  0xc9   :  { %15186 = vsyncadd [#allocation32], 4294967280  ;;  %vm286_vm0 = vcmask 253952   ;;  %v15215_v0 = vmov 0.0   ;;  %vm15216_vm1 = vmmov 0   ;;  %v12758_v1 = vld [vmem:[#allocation12 + $0x18] sm:$0xff]  }
  0xca   :  { %12674 = vmatprep.subr.bf16.mxu0 %v15215_v0  ;;  %496 = vst [vmem:[#allocation3 + $0x7] sm:$0x1] %v15215_v0  ;;  %497 = vst [vmem:[#allocation3 + $0x1f] sm:$0x1] %v15215_v0  ;;  %12682 = vmatprep.subr.bf16.mxu1 %v15215_v0  ;;  %v12759_v2 = vld [vmem:[#allocation12 + $0x8] sm:$0xff]   ;;  %v12760_v3 = vld [vmem:[#allocation12 + $0x10] sm:$0xff]  }
  0xcb   :  { %498 = vst [vmem:[#allocation3 + $0x10] sm:$0x1] %v15215_v0  ;;  %499 = vst [vmem:[#allocation3 + $0x28] sm:$0x1] %v15215_v0  ;;  %12678 = vmatprep.mubr.msk.bf16.mxu0 %vm15216_vm1, %v15215_v0  ;;  %12686 = vmatprep.mubr.msk.bf16.mxu1 %vm15216_vm1, %v15215_v0  ;;  %vm291_vm2 = vcmask 261120   ;;  %v12761_v4 = vld [vmem:[#allocation12] sm:$0xff]  }
  0xcc   :  { %287 = vst.msk [vmem:[#allocation2 + $0x7] sm:$0x1] %vm286_vm0, %v15215_v0  ;;  %288 = vst.msk [vmem:[#allocation2 + $0x1f] sm:$0x1] %vm286_vm0, %v15215_v0  ;;  %12675 = vmatpush3.bf16.msra.mxu0 %v12758_v1  ;;  %12683 = vmatpush3.bf16.msra.mxu1 %v12759_v2  ;;  %v284_v5 = vld [vmem:[#allocation7] sm:$0xff]  ;;  %v285_v6 = vld [vmem:[#allocation7 + $0x8] sm:$0xff] }
  0xcd   :  { %289 = vst.msk [vmem:[#allocation2 + $0x10] sm:$0x1] %vm286_vm0, %v15215_v0  ;;  %290 = vst.msk [vmem:[#allocation2 + $0x28] sm:$0x1] %vm286_vm0, %v15215_v0  ;;  %12676 = vmatprep.subr.bf16.mxu0 %v15215_v0  ;;  %12684 = vmatprep.subr.bf16.mxu1 %v15215_v0  ;;  %v12766_v7 = vld [vmem:[#allocation15 + $0xf4] ss:$8 sps:$4 sm:$0xff]  }
  0xce   :  { %292 = vst.msk [vmem:[#allocation2 + $0x8] sm:$0xff] %vm291_vm2, %v284_v5  ;;  %293 = vst.msk [vmem:[#allocation2 + $0x20] sm:$0xff] %vm291_vm2, %v285_v6  ;;  %v12762_v8 = vld [vmem:[#allocation12 + $0x28] sm:$0xff]   ;;  %v12772_v15 = vld [vmem:[#allocation15 + $0xe4] ss:$8 sps:$4 sm:$0xff]   ;;  %v15217_v49 = vmov 0  }
  0xcf   :  { %v12764_v14 = vld [vmem:[#allocation15 + $0xf0] ss:$8 sps:$4 sm:$0xff]   ;;  %v12769_v20 = vld [vmem:[#allocation15 + $0x74] ss:$8 sps:$4 sm:$0xff]   ;;  %v12770_v21 = vld [vmem:[#allocation15 + $0xe0] ss:$8 sps:$4 sm:$0xff]  }
  0xd0   :  { %12677 = vmatpush3.bf16.msra.mxu0 %v12760_v3  ;;  %12685 = vmatpush3.bf16.msra.mxu1 %v12761_v4  ;;  %v12763_v17 = vld [vmem:[#allocation12 + $0x20] sm:$0xff]   ;;  %v12773_v25 = vld [vmem:[#allocation15 + $0x60] ss:$8 sps:$4 sm:$0xff]   ;;  %v11260_v63 = vld [vmem:[#allocation13] ss:$0 sm:$0xff]  ;;  %vm986_vm4 = vcmask 1040384  }
  0xd1   :  { %12690 = vmatprep.subr.bf16.mxu0 %v15215_v0  ;;  %621 = vmatprep.subr.bf16.mxu1 %v12766_v7  ;;  %v12767_v22 = vld [vmem:[#allocation15 + $0x70] ss:$8 sps:$4 sm:$0xff]   ;;  %v12775_v24 = vld [vmem:[#allocation15 + $0x64] ss:$8 sps:$4 sm:$0xff]   ;;  %v12778_v26 = vld [vmem:[#allocation15 + $0xd4] ss:$8 sps:$4 sm:$0xff]  }
  0xd2   :  { %v12776_v27 = vld [vmem:[#allocation15 + $0xd0] ss:$8 sps:$4 sm:$0xff]   ;;  %v12784_v28 = vld [vmem:[#allocation15 + $0xc4] ss:$8 sps:$4 sm:$0xff]   ;;  %v12782_v29 = vld [vmem:[#allocation15 + $0xc0] ss:$8 sps:$4 sm:$0xff]  }
  0xd3   :  { %v12790_v30 = vld [vmem:[#allocation15 + $0xb4] ss:$8 sps:$4 sm:$0xff]   ;;  %v12788_v32 = vld [vmem:[#allocation15 + $0xb0] ss:$8 sps:$4 sm:$0xff]   ;;  %v12796_v34 = vld [vmem:[#allocation15 + $0xa4] ss:$8 sps:$4 sm:$0xff]  }
  0xd4   :  { %v12781_v31 = vld [vmem:[#allocation15 + $0x54] ss:$8 sps:$4 sm:$0xff]   ;;  %v12779_v33 = vld [vmem:[#allocation15 + $0x50] ss:$8 sps:$4 sm:$0xff]   ;;  %v12787_v35 = vld [vmem:[#allocation15 + $0x44] ss:$8 sps:$4 sm:$0xff]  }
  0xd5   :  { %v301_v9 = vld [vmem:[#allocation2 + $0x8] sm:$0xff]  ;;  %v302_v10 = vld [vmem:[#allocation2 + $0x20] sm:$0xff]  ;;  %v12800_v40 = vld [vmem:[#allocation15 + $0x90] ss:$8 sps:$4 sm:$0xff]   ;;  %vm1968_vm5 = vcmask 1046528   ;;  %vm2529_vm6 = vcmask 1042432  }
  0xd6   :  { %v294_v11 = vld [vmem:[#allocation2 + $0x7] sm:$0xff]  ;;  %v303_v12 = vpack.c.bf16 %v302_v10, %v301_v9  ;;  %v295_v13 = vld [vmem:[#allocation2 + $0x1f] sm:$0xff]  ;;  %vm2525_vm7 = vcmask 23552   ;;  %s15218_s16 = smov [#allocation5]   ;;  %s15219_s7 = smov [#allocation5 + $0x1000]  }
  0xd7   :  { %v296_v16 = vpack.c.bf16 %v295_v13, %v294_v11  ;;  %v421_v18 = vld [vmem:[#allocation2 + $0x9] sm:$0xff]  ;;  %v422_v19 = vld [vmem:[#allocation2 + $0x21] sm:$0xff]  ;;  %v12791_v41 = vld [vmem:[#allocation15 + $0x30] ss:$8 sps:$4 sm:$0xff]   ;;  %s266_s18 = sshll.u32 %s15218_s16, 4  ;;  %s280_s1 = sshll.u32 %s15219_s7, 4  ;;  %s267_s18 = int_to_ptr.vmem [resolvable:$true] %s266_s18  ;;  %s281_s1 = int_to_ptr.vmem [resolvable:$true] %s280_s1 }
  0xd8   :  { %12679 = vmatmul.mubr.msk.bf16.vlgmr.msra.gmra.mxu0 %vm291_vm2, %v303_v12  ;;  %v423_v23 = vpack.c.bf16 %v422_v19, %v421_v18  ;;  %v12794_v36 = vld [vmem:[#allocation15 + $0xa0] ss:$8 sps:$4 sm:$0xff]   ;;  %v12802_v38 = vld [vmem:[#allocation15 + $0x94] ss:$8 sps:$4 sm:$0xff]   ;;  %v12808_v42 = vld [vmem:[#allocation15 + $0x84] ss:$8 sps:$4 sm:$0xff]   ;;  %p15119_p11 = scmp.lt.s32.totalorder %s267_s18, %s267_s18 }
  0xd9   :  { %12687 = vmatmul.mubr.msk.bf16.vlgmr.msra.gmra.mxu1 %vm291_vm2, %v296_v16  ;;  %12691 = vmatpush3.bf16.msra.mxu0 %v12762_v8  ;;  %v12785_v37 = vld [vmem:[#allocation15 + $0x40] ss:$8 sps:$4 sm:$0xff]   ;;  %v12793_v39 = vld [vmem:[#allocation15 + $0x34] ss:$8 sps:$4 sm:$0xff]   ;;  %v12799_v43 = vld [vmem:[#allocation15 + $0x24] ss:$8 sps:$4 sm:$0xff]  }
  0xda   :  { %12692 = vmatprep.subr.bf16.mxu0 %v15215_v0  ;;  %12694 = vmatprep.mubr.msk.bf16.mxu0 %vm15216_vm1, %v15215_v0  ;;  %v12806_v44 = vld [vmem:[#allocation15 + $0x80] ss:$8 sps:$4 sm:$0xff]   ;;  %v12803_v46 = vld [vmem:[#allocation15 + $0x10] ss:$8 sps:$4 sm:$0xff]   ;;  %v12805_v47 = vld [vmem:[#allocation15 + $0x14] ss:$8 sps:$4 sm:$0xff]  }
  0xdb   :  { %622 = vmatpush1.bf16.msra.mxu1 %v12764_v14  ;;  %v12797_v45 = vld [vmem:[#allocation15 + $0x20] ss:$8 sps:$4 sm:$0xff]   ;;  %v12811_v48 = vld [vmem:[#allocation15 + $0x4] ss:$8 sps:$4 sm:$0xff]   ;;  %653 = vmatprep.mubr.bf16.mxu1 %v15217_v49  ;;  %v12814_v50 = vld [vmem:[#allocation15 + $0x174] ss:$8 sps:$4 sm:$0xff]  }
  0xdc   :  { %623 = vmatprep.subr.bf16.mxu1 %v12772_v15  ;;  %v12809_v51 = vld [vmem:[#allocation15] ss:$8 sps:$4 sm:$0xff]   ;;  %v12812_v9 = vld [vmem:[#allocation15 + $0x170] ss:$8 sps:$4 sm:$0xff]   ;;  %v12817_v11 = vld [vmem:[#allocation15 + $0x164] ss:$8 sps:$4 sm:$0xff]  }
  0xdd   :  { %12693 = vmatpush3.bf16.msra.mxu0 %v12763_v17  ;;  %v12838_v52 = vld [vmem:[#allocation18 + $0x2e4] ss:$16 sps:$4 sm:$0xff]   ;;  %v12836_v17 = vld [vmem:[#allocation18 + $0x2e0] ss:$16 sps:$4 sm:$0xff]   ;;  %s15114_s4 = scalar_lea.vmem %s267_s18, 65536  ;;  %s15118_s30 = scalar_lea.vmem %s267_s18, 131072 }
  0xde   :  { %744 = vmatprep.subr.bf16.mxu0 %v12769_v20  ;;  %v12815_v12 = vld [vmem:[#allocation15 + $0x160] ss:$8 sps:$4 sm:$0xff]   ;;  %v12820_v13 = vld [vmem:[#allocation15 + $0x154] ss:$8 sps:$4 sm:$0xff]   ;;  %v12818_v14 = vld [vmem:[#allocation15 + $0x150] ss:$8 sps:$4 sm:$0xff]   ;;  %p15115_p10 = scmp.ne.s32.totalorder %s267_s18, %s15114_s4  ;;  %p15120_p12 = scmp.lt.s32.totalorder %s15118_s30, %s15114_s4 }
  0xdf   :  { %624 = vmatpush1.bf16.msra.mxu1 %v12770_v21  ;;  %v12823_v19 = vld [vmem:[#allocation15 + $0x144] ss:$8 sps:$4 sm:$0xff]   ;;  %v12821_v21 = vld [vmem:[#allocation15 + $0x140] ss:$8 sps:$4 sm:$0xff]  }
  0xe0   :  { %12695 = vmatmul.mubr.msk.bf16.vlgmr.msra.gmra.mxu0 %vm291_vm2, %v423_v23  ;;  %625 = vmatprep.subr.bf16.mxu1 %v12778_v26  ;;  %v12844_v20 = vld [vmem:[#allocation18 + $0x2c4] ss:$16 sps:$4 sm:$0xff]   ;;  %v12848_v26 = vld [vmem:[#allocation18 + $0x2a0] ss:$16 sps:$4 sm:$0xff]   ;;  %p15121_p13 = por %p15120_p12, %p15119_p11 }
  0xe1   :  { %745 = vmatpush1.bf16.msra.mxu0 %v12767_v22  ;;  %776 = vmatprep.mubr.bf16.mxu0 %v15217_v49  ;;  %v12842_v22 = vld [vmem:[#allocation18 + $0x2c0] ss:$16 sps:$4 sm:$0xff]  }
  0xe2   :  { %746 = vmatprep.subr.bf16.mxu0 %v12775_v24  ;;  %v12826_v23 = vld [vmem:[#allocation15 + $0x134] ss:$8 sps:$4 sm:$0xff]   ;;  %p15122_p0 = pnand %p15121_p13, %p15115_p10 }
  0xe3   :  { %626 = vmatpush1.bf16.msra.mxu1 %v12776_v27  ;;  %v12850_v24 = vld [vmem:[#allocation18 + $0x2a4] ss:$16 sps:$4 sm:$0xff]  }
  0xe4   :  { %627 = vmatprep.subr.bf16.mxu1 %v12784_v28  ;;  %v12829_v27 = vld [vmem:[#allocation15 + $0x124] ss:$8 sps:$4 sm:$0xff]   ;;  %v12827_v28 = vld [vmem:[#allocation15 + $0x120] ss:$8 sps:$4 sm:$0xff]  }
  0xe5   :  { %747 = vmatpush1.bf16.msra.mxu0 %v12773_v25  ;;  %v12824_v25 = vld [vmem:[#allocation15 + $0x130] ss:$8 sps:$4 sm:$0xff]  }
  0xe6   :  { %748 = vmatprep.subr.bf16.mxu0 %v12781_v31  ;;  %v12835_v31 = vld [vmem:[#allocation15 + $0x104] ss:$8 sps:$4 sm:$0xff]  }
  0xe7   :  { %628 = vmatpush1.bf16.msra.mxu1 %v12782_v29  ;;  %v12832_v29 = vld [vmem:[#allocation15 + $0x114] ss:$8 sps:$4 sm:$0xff]  }
  0xe8   :  { %629 = vmatprep.subr.bf16.mxu1 %v12790_v30  ;;  %v12830_v30 = vld [vmem:[#allocation15 + $0x110] ss:$8 sps:$4 sm:$0xff]  }
  0xe9   :  { %749 = vmatpush1.bf16.msra.mxu0 %v12779_v33  ;;  %v12841_v33 = vld [vmem:[#allocation18 + $0x2ec] ss:$16 sps:$4 sm:$0xff]  }
  0xea   :  { %750 = vmatprep.subr.bf16.mxu0 %v12787_v35 }
  0xeb   :  { %630 = vmatpush1.bf16.msra.mxu1 %v12788_v32  ;;  %v12833_v32 = vld [vmem:[#allocation15 + $0x100] ss:$8 sps:$4 sm:$0xff]  }
  0xec   :  { %631 = vmatprep.subr.bf16.mxu1 %v12796_v34 }
  0xed   :  { %751 = vmatpush1.bf16.msra.mxu0 %v12785_v37 }
  0xee   :  { %752 = vmatprep.subr.bf16.mxu0 %v12793_v39  ;;  %v12845_v39 = vld [vmem:[#allocation18 + $0x2c8] ss:$16 sps:$4 sm:$0xff]  }
  0xef   :  { %632 = vmatpush1.bf16.msra.mxu1 %v12794_v36  ;;  %v12839_v36 = vld [vmem:[#allocation18 + $0x2e8] ss:$16 sps:$4 sm:$0xff]  }
  0xf0   :  { %633 = vmatprep.subr.bf16.mxu1 %v12802_v38  ;;  %v12847_v38 = vld [vmem:[#allocation18 + $0x2cc] ss:$16 sps:$4 sm:$0xff]  }
  0xf1   :  { %753 = vmatpush1.bf16.msra.mxu0 %v12791_v41  ;;  %v12851_v41 = vld [vmem:[#allocation18 + $0x2a8] ss:$16 sps:$4 sm:$0xff]  }
  0xf2   :  { %754 = vmatprep.subr.bf16.mxu0 %v12799_v43  ;;  %v12859_v43 = vld [vmem:[#allocation18 + $0x28c] ss:$16 sps:$4 sm:$0xff]  }
  0xf3   :  { %634 = vmatpush1.bf16.msra.mxu1 %v12800_v40  ;;  %v12853_v40 = vld [vmem:[#allocation18 + $0x2ac] ss:$16 sps:$4 sm:$0xff]  }
  0xf4   :  { %635 = vmatprep.subr.bf16.mxu1 %v12808_v42  ;;  %v12856_v42 = vld [vmem:[#allocation18 + $0x284] ss:$16 sps:$4 sm:$0xff]  }
  0xf5   :  { %755 = vmatpush1.bf16.msra.mxu0 %v12797_v45  ;;  %v12857_v45 = vld [vmem:[#allocation18 + $0x288] ss:$16 sps:$4 sm:$0xff]  }
  0xf6   :  { %756 = vmatprep.subr.bf16.mxu0 %v12805_v47  ;;  %v12865_v47 = vld [vmem:[#allocation18 + $0x26c] ss:$16 sps:$4 sm:$0xff]  }
  0xf7   :  { %636 = vmatpush1.bf16.msra.mxu1 %v12806_v44  ;;  %v12854_v44 = vld [vmem:[#allocation18 + $0x280] ss:$16 sps:$4 sm:$0xff]  }
  0xf8   :  { %887 = vmatprep.subr.bf16.mxu1 %v12814_v50  ;;  %v12868_v50 = vld [vmem:[#allocation18 + $0x244] ss:$16 sps:$4 sm:$0xff]  }
  0xf9   :  { %757 = vmatpush1.bf16.msra.mxu0 %v12803_v46  ;;  %v12862_v46 = vld [vmem:[#allocation18 + $0x264] ss:$16 sps:$4 sm:$0xff]  }
  0xfa   :  { %758 = vmatprep.subr.bf16.mxu0 %v12811_v48  ;;  %v12860_v48 = vld [vmem:[#allocation18 + $0x260] ss:$16 sps:$4 sm:$0xff]  }
  0xfd   :  { %759 = vmatpush1.bf16.msra.mxu0 %v12809_v51  ;;  %v12871_v51 = vld [vmem:[#allocation18 + $0x24c] ss:$16 sps:$4 sm:$0xff]  }
  0xfe   :  { %1460 = vmatprep.subr.bf16.mxu0 %v12838_v52  ;;  %v12866_v52 = vld [vmem:[#allocation18 + $0x240] ss:$16 sps:$4 sm:$0xff]  }
 0x198   :  { %v358_v53 = vpop.f32.mrf.mxu0 }
 0x199   :  { %v414_v54 = vpop.f32.mrf.mxu1 }
 0x19a   :  { %v12680_v55 = vpop.f32.mrf.mxu0  ;;  %v415_v60 = vadd.f32 %v414_v54, %v358_v53  ;;  %v12869_v53 = vld [vmem:[#allocation18 + $0x248] ss:$16 sps:$4 sm:$0xff]   ;;  %v12874_v54 = vld [vmem:[#allocation18 + $0x224] ss:$16 sps:$4 sm:$0xff]  }
 0x19b   :  { %v12688_v56 = vpop.f32.mrf.mxu1  ;;  %v12877_v55 = vld [vmem:[#allocation18 + $0x22c] ss:$16 sps:$4 sm:$0xff]  }
 0x19c   :  { %v361_v57 = vpop.f32.mrf.mxu0  ;;  %v12872_v56 = vld [vmem:[#allocation18 + $0x220] ss:$16 sps:$4 sm:$0xff]  }
 0x19d   :  { %v417_v58 = vpop.f32.mrf.mxu1 }
 0x19e   :  { %v12681_v59 = vpop.f32.mrf.mxu0  ;;  %v418_v3 = vadd.f32 %v417_v58, %v361_v57  ;;  %v12875_v57 = vld [vmem:[#allocation18 + $0x228] ss:$16 sps:$4 sm:$0xff]   ;;  %v12880_v58 = vld [vmem:[#allocation18 + $0x204] ss:$16 sps:$4 sm:$0xff]  }
 0x19f   :  { %v12689_v61 = vpop.f32.mrf.mxu1  ;;  %v12883_v59 = vld [vmem:[#allocation18 + $0x20c] ss:$16 sps:$4 sm:$0xff]  }
 0x1a0   :  { %v478_v62 = vpop.f32.mrf.mxu0  ;;  %v12881_v61 = vld [vmem:[#allocation18 + $0x208] ss:$16 sps:$4 sm:$0xff]  }
 0x1a1   :  { %v485_v1 = vadd.f32 %v478_v62, %v415_v60  ;;  %v12878_v60 = vld [vmem:[#allocation18 + $0x200] ss:$16 sps:$4 sm:$0xff]   ;;  %v12886_v62 = vld [vmem:[#allocation18 + $0x3e4] ss:$16 sps:$4 sm:$0xff]  }
 0x1a2   :  { %v12696_v2 = vpop.f32.mrf.mxu0 }
 0x1a3   :  { %v494_v4 = vadd.f32 %v11260_v63, %v485_v1  ;;  %v12884_v1 = vld [vmem:[#allocation18 + $0x3e0] ss:$16 sps:$4 sm:$0xff]   ;;  %v12887_v2 = vld [vmem:[#allocation18 + $0x3e8] ss:$16 sps:$4 sm:$0xff]  }
 0x1a4   :  { %v481_v5 = vpop.f32.mrf.mxu0 }
 0x1a5   :  { %500 = vst [vmem:[#allocation3 + $0x8] sm:$0xff] %v494_v4  ;;  %v486_v6 = vadd.f32 %v481_v5, %v418_v3  ;;  %v12890_v3 = vld [vmem:[#allocation18 + $0x3c0] ss:$16 sps:$4 sm:$0xff]   ;;  %v12893_v5 = vld [vmem:[#allocation18 + $0x3c8] ss:$16 sps:$4 sm:$0xff]  }
 0x1a6   :  { %v12697_v7 = vpop.f32.mrf.mxu0 }
 0x1a7   :  { %v495_v8 = vadd.f32 %v11260_v63, %v486_v6  ;;  %v12889_v63 = vld [vmem:[#allocation18 + $0x3ec] ss:$16 sps:$4 sm:$0xff]   ;;  %v12898_v7 = vld [vmem:[#allocation18 + $0x3a4] ss:$16 sps:$4 sm:$0xff]  }
 0x1a8   :  { %v12895_v6 = vld [vmem:[#allocation18 + $0x3cc] ss:$16 sps:$4 sm:$0xff]  }
 0x1a9   :  { %501 = vst [vmem:[#allocation3 + $0x20] sm:$0xff] %v495_v8  ;;  %v523_v10 = vpack.c.bf16 %v495_v8, %v494_v4  ;;  %v12892_v4 = vld [vmem:[#allocation18 + $0x3c4] ss:$16 sps:$4 sm:$0xff]   ;;  %v12901_v8 = vld [vmem:[#allocation18 + $0x3ac] ss:$16 sps:$4 sm:$0xff]  }
 0x1ab   :  { %654 = vmatmul.mubr.bf16.vlgmr.msra.gmra.mxu1 %v523_v10  ;;  %v12899_v10 = vld [vmem:[#allocation18 + $0x3a8] ss:$16 sps:$4 sm:$0xff]  }
 0x1ac   :  { %888 = vmatpush1.bf16.msra.mxu1 %v12812_v9  ;;  %919 = vmatprep.mubr.bf16.mxu1 %v15217_v49  ;;  %v502_v15 = vld [vmem:[#allocation3 + $0x7] sm:$0xff] }
 0x1ad   :  { %889 = vmatprep.subr.bf16.mxu1 %v12817_v11  ;;  %v787_v35 = vld [vmem:[#allocation3 + $0x9] sm:$0xff] }
 0x1ae   :  { %v12863_v49 = vld [vmem:[#allocation18 + $0x268] ss:$16 sps:$4 sm:$0xff]   ;;  %v12896_v9 = vld [vmem:[#allocation18 + $0x3a0] ss:$16 sps:$4 sm:$0xff]   ;;  %v12904_v11 = vld [vmem:[#allocation18 + $0x384] ss:$16 sps:$4 sm:$0xff]  }
 0x1b0   :  { %v503_v16 = vld [vmem:[#allocation3 + $0x1f] sm:$0xff]  ;;  %890 = vmatpush1.bf16.msra.mxu1 %v12815_v12 }
 0x1b1   :  { %v504_v18 = vpack.c.bf16 %v503_v16, %v502_v15  ;;  %891 = vmatprep.subr.bf16.mxu1 %v12820_v13  ;;  %v788_v34 = vld [vmem:[#allocation3 + $0x21] sm:$0xff]  ;;  %v12910_v15 = vld [vmem:[#allocation18 + $0x364] ss:$16 sps:$4 sm:$0xff]  }
 0x1b2   :  { %v789_v37 = vpack.c.bf16 %v788_v34, %v787_v35  ;;  %v12907_v12 = vld [vmem:[#allocation18 + $0x38c] ss:$16 sps:$4 sm:$0xff]   ;;  %v12902_v13 = vld [vmem:[#allocation18 + $0x380] ss:$16 sps:$4 sm:$0xff]  }
 0x1b3   :  { %777 = vmatmul.mubr.bf16.vlgmr.msra.gmra.mxu0 %v504_v18  ;;  %v12913_v16 = vld [vmem:[#allocation18 + $0x36c] ss:$16 sps:$4 sm:$0xff]   ;;  %v12911_v18 = vld [vmem:[#allocation18 + $0x368] ss:$16 sps:$4 sm:$0xff]  }
 0x1b4   :  { %892 = vmatpush1.bf16.msra.mxu1 %v12818_v14  ;;  %1461 = vmatpush1.bf16.msra.mxu0 %v12836_v17  ;;  %v12905_v14 = vld [vmem:[#allocation18 + $0x388] ss:$16 sps:$4 sm:$0xff]   ;;  %v12908_v17 = vld [vmem:[#allocation18 + $0x360] ss:$16 sps:$4 sm:$0xff]  }
 0x1b5   :  { %893 = vmatprep.subr.bf16.mxu1 %v12823_v19  ;;  %1462 = vmatprep.subr.bf16.mxu0 %v12844_v20  ;;  %v12916_v19 = vld [vmem:[#allocation18 + $0x344] ss:$16 sps:$4 sm:$0xff]   ;;  %v12919_v20 = vld [vmem:[#allocation18 + $0x34c] ss:$16 sps:$4 sm:$0xff]  }
 0x1b8   :  { %894 = vmatpush1.bf16.msra.mxu1 %v12821_v21  ;;  %1463 = vmatpush1.bf16.msra.mxu0 %v12842_v22  ;;  %v12914_v21 = vld [vmem:[#allocation18 + $0x340] ss:$16 sps:$4 sm:$0xff]   ;;  %v12917_v22 = vld [vmem:[#allocation18 + $0x348] ss:$16 sps:$4 sm:$0xff]  }
 0x1b9   :  { %895 = vmatprep.subr.bf16.mxu1 %v12826_v23  ;;  %1464 = vmatprep.subr.bf16.mxu0 %v12850_v24  ;;  %v936_v23 = vlaneseq  ;;  %v12922_v24 = vld [vmem:[#allocation18 + $0x324] ss:$16 sps:$4 sm:$0xff]  }
 0x1bb   :  { %vm952_vm3 = vcmp.lt.s32.totalorder %v936_v23, 256 }
 0x1bc   :  { %896 = vmatpush1.bf16.msra.mxu1 %v12824_v25  ;;  %1465 = vmatpush1.bf16.msra.mxu0 %v12848_v26  ;;  %v12925_v25 = vld [vmem:[#allocation18 + $0x32c] ss:$16 sps:$4 sm:$0xff]   ;;  %955 = vst.msk [vmem:[#allocation4 + $0x7] ss:$8 sm:$0x3] %vm952_vm3, %v15215_v0 }
 0x1bd   :  { %897 = vmatprep.subr.bf16.mxu1 %v12829_v27  ;;  %1466 = vmatprep.subr.bf16.mxu0 %v12856_v42  ;;  %958 = vst.msk [vmem:[#allocation4 + $0x37] ss:$8 sm:$0x3] %vm952_vm3, %v15215_v0  ;;  %961 = vst.msk [vmem:[#allocation4 + $0x20] ss:$8 sm:$0x3] %vm952_vm3, %v15215_v0 }
 0x1be   :  { %964 = vst.msk [vmem:[#allocation4 + $0x50] ss:$8 sm:$0x3] %vm952_vm3, %v15215_v0  ;;  %v12920_v26 = vld [vmem:[#allocation18 + $0x320] ss:$16 sps:$4 sm:$0xff]  }
 0x1bf   :  { %v12923_v27 = vld [vmem:[#allocation18 + $0x328] ss:$16 sps:$4 sm:$0xff]  }
 0x1c0   :  { %898 = vmatpush1.bf16.msra.mxu1 %v12827_v28  ;;  %1467 = vmatpush1.bf16.msra.mxu0 %v12854_v44  ;;  %v12928_v28 = vld [vmem:[#allocation18 + $0x304] ss:$16 sps:$4 sm:$0xff]  }
 0x1c1   :  { %899 = vmatprep.subr.bf16.mxu1 %v12832_v29  ;;  %1468 = vmatprep.subr.bf16.mxu0 %v12862_v46  ;;  %v12931_v29 = vld [vmem:[#allocation18 + $0x30c] ss:$16 sps:$4 sm:$0xff]  }
 0x1c4   :  { %900 = vmatpush1.bf16.msra.mxu1 %v12830_v30  ;;  %1469 = vmatpush1.bf16.msra.mxu0 %v12860_v48  ;;  %v12926_v30 = vld [vmem:[#allocation18 + $0x300] ss:$16 sps:$4 sm:$0xff]  }
 0x1c5   :  { %901 = vmatprep.subr.bf16.mxu1 %v12835_v31  ;;  %1470 = vmatprep.subr.bf16.mxu0 %v12868_v50  ;;  %v12929_v31 = vld [vmem:[#allocation18 + $0x308] ss:$16 sps:$4 sm:$0xff]  }
 0x1c8   :  { %902 = vmatpush1.bf16.msra.mxu1 %v12833_v32  ;;  %1471 = vmatpush1.bf16.msra.mxu0 %v12866_v52  ;;  %v12934_v32 = vld [vmem:[#allocation18 + $0xe4] ss:$16 sps:$4 sm:$0xff]  }
 0x1c9   :  { %1503 = vmatprep.subr.bf16.mxu1 %v12841_v33  ;;  %1472 = vmatprep.subr.bf16.mxu0 %v12874_v54  ;;  %v12937_v33 = vld [vmem:[#allocation18 + $0xec] ss:$16 sps:$4 sm:$0xff]  }
 0x1cb   :  { %920 = vmatmul.mubr.bf16.vlgmr.msra.gmra.mxu1 %v789_v37  ;;  %v15413_v37 = vshrl.u32 %v936_v23, 7  ;;  %v12952_v23 = vld [vmem:[#allocation18 + $0x84] ss:$16 sps:$4 sm:$0xff]  }
 0x1cc   :  { %1504 = vmatpush1.bf16.msra.mxu1 %v12839_v36  ;;  %1473 = vmatpush1.bf16.msra.mxu0 %v12872_v56 }
 0x1cd   :  { %1505 = vmatprep.subr.bf16.mxu1 %v12847_v38  ;;  %1474 = vmatprep.subr.bf16.mxu0 %v12880_v58  ;;  %v15419_v42 = vsub.s32 1, %v15413_v37 }
 0x1d0   :  { %1506 = vmatpush1.bf16.msra.mxu1 %v12845_v39  ;;  %1475 = vmatpush1.bf16.msra.mxu0 %v12878_v60 }
 0x1d1   :  { %1507 = vmatprep.subr.bf16.mxu1 %v12853_v40  ;;  %1476 = vmatprep.subr.bf16.mxu0 %v12886_v62  ;;  %v15416_v40 = vsub.s32 0, %v15413_v37 }
 0x1d4   :  { %1508 = vmatpush1.bf16.msra.mxu1 %v12851_v41  ;;  %1477 = vmatpush2.bf16.msra.mxu0 %v12884_v1  ;;  %v934_v41 = vld [vmem:[#allocation16] sm:$0x3] }
 0x1d5   :  { %1509 = vmatprep.subr.bf16.mxu1 %v12859_v43  ;;  %1478 = vmatprep.subr.bf16.mxu0 %v12892_v4  ;;  %v939_v46 = vrot.slane %v934_v41, %v15416_v40  ;;  %v943_v50 = vrot.slane %v934_v41, %v15419_v42  ;;  %v12971_v41 = vld [vmem:[#allocation18 + $0x28] ss:$16 sps:$4 sm:$0xff]  }
 0x1d8   :  { %1510 = vmatpush1.bf16.msra.mxu1 %v12857_v45  ;;  %1479 = vmatpush2.bf16.msra.mxu0 %v12890_v3  ;;  %v12935_v3 = vld [vmem:[#allocation18 + $0xe8] ss:$16 sps:$4 sm:$0xff]  }
 0x1d9   :  { %1511 = vmatprep.subr.bf16.mxu1 %v12865_v47  ;;  %1480 = vmatprep.subr.bf16.mxu0 %v12898_v7  ;;  %v971_v7 = vld [vmem:[#allocation4 + $0x8] sm:$0x80] }
 0x1dc   :  { %1512 = vmatpush1.bf16.msra.mxu1 %v12863_v49  ;;  %1481 = vmatpush2.bf16.msra.mxu0 %v12896_v9  ;;  %v975_v9 = vld [vmem:[#allocation4 + $0x38] sm:$0x80] }
 0x1dd   :  { %1513 = vmatprep.subr.bf16.mxu1 %v12871_v51  ;;  %1482 = vmatprep.subr.bf16.mxu0 %v12904_v11  ;;  %v12941_v11 = vld [vmem:[#allocation18 + $0xc8] ss:$16 sps:$4 sm:$0xff]  }
 0x1e0   :  { %1514 = vmatpush1.bf16.msra.mxu1 %v12869_v53  ;;  %1483 = vmatpush2.bf16.msra.mxu0 %v12902_v13  ;;  %v12949_v13 = vld [vmem:[#allocation18 + $0xac] ss:$16 sps:$4 sm:$0xff]  }
 0x1e1   :  { %1515 = vmatprep.subr.bf16.mxu1 %v12877_v55  ;;  %1484 = vmatprep.subr.bf16.mxu0 %v12910_v15 }
 0x1e4   :  { %1516 = vmatpush1.bf16.msra.mxu1 %v12875_v57  ;;  %1485 = vmatpush2.bf16.msra.mxu0 %v12908_v17 }
 0x1e5   :  { %1517 = vmatprep.subr.bf16.mxu1 %v12883_v59  ;;  %1486 = vmatprep.subr.bf16.mxu0 %v12916_v19  ;;  %v12944_v19 = vld [vmem:[#allocation18 + $0xa0] ss:$16 sps:$4 sm:$0xff]  }
 0x1e8   :  { %1518 = vmatpush1.bf16.msra.mxu1 %v12881_v61  ;;  %1487 = vmatpush2.bf16.msra.mxu0 %v12914_v21 }
 0x1e9   :  { %1519 = vmatprep.subr.bf16.mxu1 %v12889_v63  ;;  %1488 = vmatprep.subr.bf16.mxu0 %v12922_v24  ;;  %v12955_v24 = vld [vmem:[#allocation18 + $0x8c] ss:$16 sps:$4 sm:$0xff]  }
 0x1ec   :  { %1520 = vmatpush2.bf16.msra.mxu1 %v12887_v2  ;;  %1489 = vmatpush2.bf16.msra.mxu0 %v12920_v26  ;;  %v12932_v2 = vld [vmem:[#allocation18 + $0xe0] ss:$16 sps:$4 sm:$0xff]  }
 0x1ed   :  { %1521 = vmatprep.subr.bf16.mxu1 %v12895_v6  ;;  %1490 = vmatprep.subr.bf16.mxu0 %v12928_v28  ;;  %v12943_v6 = vld [vmem:[#allocation18 + $0xcc] ss:$16 sps:$4 sm:$0xff]   ;;  %v12950_v26 = vld [vmem:[#allocation18 + $0x80] ss:$16 sps:$4 sm:$0xff]   ;;  %v12958_v28 = vld [vmem:[#allocation18 + $0x64] ss:$16 sps:$4 sm:$0xff]  }
 0x1f0   :  { %1522 = vmatpush2.bf16.msra.mxu1 %v12893_v5  ;;  %1491 = vmatpush2.bf16.msra.mxu0 %v12926_v30  ;;  %v12940_v5 = vld [vmem:[#allocation18 + $0xc4] ss:$16 sps:$4 sm:$0xff]   ;;  %v12956_v30 = vld [vmem:[#allocation18 + $0x60] ss:$16 sps:$4 sm:$0xff]  }
 0x1f1   :  { %1523 = vmatprep.subr.bf16.mxu1 %v12901_v8  ;;  %1866 = vmatprep.subr.bf16.mxu0 %v12934_v32  ;;  %v12964_v32 = vld [vmem:[#allocation18 + $0x44] ss:$16 sps:$4 sm:$0xff]  }
 0x1f4   :  { %1524 = vmatpush2.bf16.msra.mxu1 %v12899_v10  ;;  %v12938_v10 = vld [vmem:[#allocation18 + $0xc0] ss:$16 sps:$4 sm:$0xff]  }
 0x1f5   :  { %1525 = vmatprep.subr.bf16.mxu1 %v12907_v12  ;;  %v12946_v12 = vld [vmem:[#allocation18 + $0xa4] ss:$16 sps:$4 sm:$0xff]  }
 0x1f8   :  { %1526 = vmatpush2.bf16.msra.mxu1 %v12905_v14  ;;  %v990_v14 = vrot.slane %v971_v7, 7  ;;  %v13013_v7 = vld [vmem:[#allocation18 + $0x148] ss:$16 sps:$4 sm:$0xff]  }
 0x1f9   :  { %1527 = vmatprep.subr.bf16.mxu1 %v12913_v16  ;;  %v996_v16 = vrot.slane %v975_v9, 7  ;;  %v13021_v9 = vld [vmem:[#allocation18 + $0x12c] ss:$16 sps:$4 sm:$0xff]  }
 0x1fc   :  { %1528 = vmatpush2.bf16.msra.mxu1 %v12911_v18 }
 0x1fd   :  { %1529 = vmatprep.subr.bf16.mxu1 %v12919_v20  ;;  %v12947_v20 = vld [vmem:[#allocation18 + $0xa8] ss:$16 sps:$4 sm:$0xff]  }
 0x200   :  { %1530 = vmatpush2.bf16.msra.mxu1 %v12917_v22 }
 0x201   :  { %1531 = vmatprep.subr.bf16.mxu1 %v12925_v25 }
 0x204   :  { %1532 = vmatpush2.bf16.msra.mxu1 %v12923_v27  ;;  %v12953_v27 = vld [vmem:[#allocation18 + $0x88] ss:$16 sps:$4 sm:$0xff]  }
 0x205   :  { %1533 = vmatprep.subr.bf16.mxu1 %v12931_v29  ;;  %v12961_v29 = vld [vmem:[#allocation18 + $0x6c] ss:$16 sps:$4 sm:$0xff]  }
 0x208   :  { %1534 = vmatpush2.bf16.msra.mxu1 %v12929_v31  ;;  %v12959_v31 = vld [vmem:[#allocation18 + $0x68] ss:$16 sps:$4 sm:$0xff]  }
 0x209   :  { %1909 = vmatprep.subr.bf16.mxu1 %v12937_v33  ;;  %v12967_v33 = vld [vmem:[#allocation18 + $0x4c] ss:$16 sps:$4 sm:$0xff]  }
 0x26b   :  { %v655_v34 = vpop.f32.mrf.mxu1 }
 0x26d   :  { %v657_v36 = vpop.f32.mrf.mxu1 }
 0x26f   :  { %v659_v39 = vpop.f32.mrf.mxu1 }
 0x271   :  { %v661_v44 = vpop.f32.mrf.mxu1 }
 0x273   :  { %v778_v35 = vpop.f32.mrf.mxu0 }
 0x274   :  { %v779_v45 = vadd.f32 %v778_v35, %v655_v34  ;;  %v12962_v34 = vld [vmem:[#allocation18 + $0x40] ss:$16 sps:$4 sm:$0xff]   ;;  %v12965_v35 = vld [vmem:[#allocation18 + $0x48] ss:$16 sps:$4 sm:$0xff]  }
 0x275   :  { %v780_v38 = vpop.f32.mrf.mxu0 }
 0x276   :  { %v781_v48 = vadd.f32 %v780_v38, %v657_v36  ;;  %v12970_v36 = vld [vmem:[#allocation18 + $0x24] ss:$16 sps:$4 sm:$0xff]   ;;  %v12973_v38 = vld [vmem:[#allocation18 + $0x2c] ss:$16 sps:$4 sm:$0xff]  }
 0x277   :  { %v782_v43 = vpop.f32.mrf.mxu0 }
 0x278   :  { %v783_v53 = vadd.f32 %v782_v43, %v659_v39  ;;  %v12968_v39 = vld [vmem:[#allocation18 + $0x20] ss:$16 sps:$4 sm:$0xff]   ;;  %v12976_v43 = vld [vmem:[#allocation18 + $0x4] ss:$16 sps:$4 sm:$0xff]  }
 0x279   :  { %v784_v51 = vpop.f32.mrf.mxu0 }
 0x27a   :  { %v785_v57 = vadd.f32 %v784_v51, %v661_v44  ;;  %v12979_v44 = vld [vmem:[#allocation18 + $0xc] ss:$16 sps:$4 sm:$0xff]   ;;  %v12988_v51 = vld [vmem:[#allocation18 + $0x1c4] ss:$16 sps:$4 sm:$0xff]  }
 0x28b   :  { %v921_v47 = vpop.f32.mrf.mxu1 }
 0x28c   :  { %v930_v49 = vadd.f32 %v921_v47, %v779_v45  ;;  %v12974_v45 = vld [vmem:[#allocation18] ss:$16 sps:$4 sm:$0xff]   ;;  %v12982_v47 = vld [vmem:[#allocation18 + $0x1e4] ss:$16 sps:$4 sm:$0xff]  }
 0x28d   :  { %v923_v52 = vpop.f32.mrf.mxu1 }
 0x28e   :  { %v946_v54 = vadd.f32 %v939_v46, %v930_v49  ;;  %v931_v55 = vadd.f32 %v923_v52, %v781_v48  ;;  %v12985_v48 = vld [vmem:[#allocation18 + $0x1ec] ss:$16 sps:$4 sm:$0xff]   ;;  %v12980_v49 = vld [vmem:[#allocation18 + $0x1e0] ss:$16 sps:$4 sm:$0xff]  }
 0x28f   :  { %v925_v56 = vpop.f32.mrf.mxu1  ;;  %v12991_v52 = vld [vmem:[#allocation18 + $0x1cc] ss:$16 sps:$4 sm:$0xff]  }
 0x290   :  { %966 = vst [vmem:[#allocation4 + $0x10] sm:$0xff] %v946_v54  ;;  %v947_v58 = vadd.f32 %v943_v50, %v931_v55  ;;  %v932_v59 = vadd.f32 %v925_v56, %v783_v53  ;;  %v12986_v53 = vld [vmem:[#allocation18 + $0x1c0] ss:$16 sps:$4 sm:$0xff]   ;;  %v12994_v55 = vld [vmem:[#allocation18 + $0x1a4] ss:$16 sps:$4 sm:$0xff]  }
 0x291   :  { %v927_v60 = vpop.f32.mrf.mxu1  ;;  %v12997_v56 = vld [vmem:[#allocation18 + $0x1ac] ss:$16 sps:$4 sm:$0xff]  }
 0x292   :  { %967 = vst [vmem:[#allocation4 + $0x18] sm:$0xff] %v947_v58  ;;  %v948_v61 = vadd.f32 %v939_v46, %v932_v59  ;;  %v933_v62 = vadd.f32 %v927_v60, %v785_v57  ;;  %v12977_v46 = vld [vmem:[#allocation18 + $0x8] ss:$16 sps:$4 sm:$0xff]   ;;  %v12992_v57 = vld [vmem:[#allocation18 + $0x1a0] ss:$16 sps:$4 sm:$0xff]  }
 0x293   :  { %v13000_v59 = vld [vmem:[#allocation18 + $0x184] ss:$16 sps:$4 sm:$0xff]   ;;  %v13003_v60 = vld [vmem:[#allocation18 + $0x18c] ss:$16 sps:$4 sm:$0xff]  }
 0x294   :  { %968 = vst [vmem:[#allocation4 + $0x40] sm:$0xff] %v948_v61  ;;  %v949_v63 = vadd.f32 %v943_v50, %v933_v62  ;;  %v1073_v4 = vpack.c.bf16 %v948_v61, %v946_v54  ;;  %v12983_v50 = vld [vmem:[#allocation18 + $0x1e8] ss:$16 sps:$4 sm:$0xff]   ;;  %v12998_v61 = vld [vmem:[#allocation18 + $0x180] ss:$16 sps:$4 sm:$0xff]  }
 0x295   :  { %v12989_v54 = vld [vmem:[#allocation18 + $0x1c8] ss:$16 sps:$4 sm:$0xff]  }
 0x296   :  { %969 = vst [vmem:[#allocation4 + $0x48] sm:$0xff] %v949_v63  ;;  %v1074_v1 = vpack.c.bf16 %v949_v63, %v947_v58  ;;  %v12995_v58 = vld [vmem:[#allocation18 + $0x1a8] ss:$16 sps:$4 sm:$0xff]   ;;  %v13006_v63 = vld [vmem:[#allocation18 + $0x164] ss:$16 sps:$4 sm:$0xff]  }
 0x297   :  { %v13001_v62 = vld [vmem:[#allocation18 + $0x188] ss:$16 sps:$4 sm:$0xff]  }
 0x298   :  { %1492 = vmatprep.mubr.bf16.mxu0 %v1074_v1  ;;  %1535 = vmatprep.mubr.bf16.mxu1 %v1074_v1  ;;  %v13009_v1 = vld [vmem:[#allocation18 + $0x16c] ss:$16 sps:$4 sm:$0xff]  }
 0x299   :  { %1493 = vmatmul.mubr.bf16.vlgmr.msra.gmra.mxu0 %v1073_v4  ;;  %1536 = vmatmul.mubr.bf16.vlgmr.msra.gmra.mxu1 %v1073_v4  ;;  %v973_v8 = vld [vmem:[#allocation4 + $0x18] sm:$0x7f] }
 0x29a   :  { %1867 = vmatpush1.bf16.msra.mxu0 %v12932_v2  ;;  %1910 = vmatpush1.bf16.msra.mxu1 %v12935_v3  ;;  %v991_v15 = vrot.slane %v973_v8, 7  ;;  %v13004_v2 = vld [vmem:[#allocation18 + $0x160] ss:$16 sps:$4 sm:$0xff]   ;;  %v13007_v3 = vld [vmem:[#allocation18 + $0x168] ss:$16 sps:$4 sm:$0xff]  }
 0x29b   :  { %1868 = vmatprep.subr.bf16.mxu0 %v12940_v5  ;;  %1911 = vmatprep.subr.bf16.mxu1 %v12943_v6  ;;  %v13012_v4 = vld [vmem:[#allocation18 + $0x144] ss:$16 sps:$4 sm:$0xff]   ;;  %v13015_v5 = vld [vmem:[#allocation18 + $0x14c] ss:$16 sps:$4 sm:$0xff]   ;;  %v13010_v6 = vld [vmem:[#allocation18 + $0x140] ss:$16 sps:$4 sm:$0xff]  }
 0x29c   :  { %v992_v21 = vsel %vm986_vm4, %v990_v14, %v991_v15  ;;  %v13018_v8 = vld [vmem:[#allocation18 + $0x124] ss:$16 sps:$4 sm:$0xff]   ;;  %v13016_v14 = vld [vmem:[#allocation18 + $0x120] ss:$16 sps:$4 sm:$0xff]   ;;  %v13019_v15 = vld [vmem:[#allocation18 + $0x128] ss:$16 sps:$4 sm:$0xff]  }
 0x29d   :  { %v977_v17 = vld [vmem:[#allocation4 + $0x48] sm:$0x7f] }
 0x29e   :  { %v997_v18 = vrot.slane %v977_v17, 7  ;;  %1869 = vmatpush1.bf16.msra.mxu0 %v12938_v10  ;;  %1912 = vmatpush1.bf16.msra.mxu1 %v12941_v11  ;;  %v970_v10 = vld [vmem:[#allocation4] sm:$0x80]  ;;  %v974_v11 = vld [vmem:[#allocation4 + $0x30] sm:$0x80] }
 0x29f   :  { %1870 = vmatprep.subr.bf16.mxu0 %v12946_v12  ;;  %1913 = vmatprep.subr.bf16.mxu1 %v12949_v13  ;;  %v976_v12 = vld [vmem:[#allocation4 + $0x40] sm:$0x7f]  ;;  %v1959_v13 = vld [vmem:[#allocation4 + $0x58] sm:$0x1]  ;;  %v13024_v17 = vld [vmem:[#allocation18 + $0x104] ss:$16 sps:$4 sm:$0xff]  }
 0x2a0   :  { %v998_v22 = vsel %vm986_vm4, %v996_v16, %v997_v18  ;;  %v1957_v16 = vld [vmem:[#allocation4 + $0x48] sm:$0xfe]  ;;  %v13027_v18 = vld [vmem:[#allocation18 + $0x10c] ss:$16 sps:$4 sm:$0xff]  }
 0x2a1   :  { %v1004_v25 = vpack.c.bf16 %v998_v22, %v992_v21  ;;  %v994_v21 = vrot.slane %v976_v12, 7  ;;  %v1953_v22 = vld [vmem:[#allocation4 + $0x18] sm:$0xfe] }
 0x2a2   :  { %1871 = vmatpush1.bf16.msra.mxu0 %v12944_v19  ;;  %1914 = vmatpush1.bf16.msra.mxu1 %v12947_v20  ;;  %v972_v19 = vld [vmem:[#allocation4 + $0x10] sm:$0x7f]  ;;  %v993_v20 = vrot.slane %v974_v11, 7 }
 0x2a3   :  { %1898 = vmatprep.mubr.bf16.mxu0 %v1004_v25  ;;  %1941 = vmatprep.mubr.bf16.mxu1 %v1004_v25  ;;  %v1979_v25 = vrot.slane %v1959_v13, 1  ;;  %v13081_v11 = vld [vmem:[#allocation18 + $0x5ec] ss:$16 sps:$4 sm:$0xff]   ;;  %v13076_v12 = vld [vmem:[#allocation18 + $0x5e0] ss:$16 sps:$4 sm:$0xff]  }
 0x2a4   :  { %1872 = vmatprep.subr.bf16.mxu0 %v12952_v23  ;;  %1915 = vmatprep.subr.bf16.mxu1 %v12955_v24  ;;  %v1955_v23 = vld [vmem:[#allocation4 + $0x28] sm:$0x1]  ;;  %v1978_v24 = vrot.slane %v1957_v16, 1  ;;  %v13079_v13 = vld [vmem:[#allocation18 + $0x5e8] ss:$16 sps:$4 sm:$0xff]  }
 0x2a5   :  { %v13082_v16 = vld [vmem:[#allocation18 + $0x5c0] ss:$16 sps:$4 sm:$0xff]  }
 0x2a6   :  { %1873 = vmatpush1.bf16.msra.mxu0 %v12950_v26  ;;  %1916 = vmatpush1.bf16.msra.mxu1 %v12953_v27  ;;  %v13022_v26 = vld [vmem:[#allocation18 + $0x100] ss:$16 sps:$4 sm:$0xff]   ;;  %v13025_v27 = vld [vmem:[#allocation18 + $0x108] ss:$16 sps:$4 sm:$0xff]  }
 0x2a7   :  { %1874 = vmatprep.subr.bf16.mxu0 %v12958_v28  ;;  %1917 = vmatprep.subr.bf16.mxu1 %v12961_v29  ;;  %v987_v28 = vrot.slane %v970_v10, 7  ;;  %v988_v29 = vrot.slane %v972_v19, 7  ;;  %v13078_v10 = vld [vmem:[#allocation18 + $0x5e4] ss:$16 sps:$4 sm:$0xff]   ;;  %v13093_v19 = vld [vmem:[#allocation18 + $0x5ac] ss:$16 sps:$4 sm:$0xff]  }
 0x2aa   :  { %1875 = vmatpush1.bf16.msra.mxu0 %v12956_v30  ;;  %1918 = vmatpush1.bf16.msra.mxu1 %v12959_v31  ;;  %v13030_v30 = vld [vmem:[#allocation18 + $0x4e4] ss:$16 sps:$4 sm:$0xff]   ;;  %v13033_v31 = vld [vmem:[#allocation18 + $0x4ec] ss:$16 sps:$4 sm:$0xff]  }
 0x2ab   :  { %1876 = vmatprep.subr.bf16.mxu0 %v12964_v32  ;;  %1919 = vmatprep.subr.bf16.mxu1 %v12967_v33  ;;  %v1972_v32 = vrot.slane %v1953_v22, 1  ;;  %v1973_v33 = vrot.slane %v1955_v23, 1  ;;  %v13096_v22 = vld [vmem:[#allocation18 + $0x584] ss:$16 sps:$4 sm:$0xff]   ;;  %v13099_v23 = vld [vmem:[#allocation18 + $0x58c] ss:$16 sps:$4 sm:$0xff]  }
 0x2ae   :  { %1877 = vmatpush1.bf16.msra.mxu0 %v12962_v34  ;;  %1920 = vmatpush1.bf16.msra.mxu1 %v12965_v35  ;;  %v995_v34 = vsel %vm986_vm4, %v993_v20, %v994_v21  ;;  %v1980_v35 = vsel %vm1968_vm5, %v1978_v24, %v1979_v25  ;;  %v13088_v20 = vld [vmem:[#allocation18 + $0x5a0] ss:$16 sps:$4 sm:$0xff]   ;;  %v13091_v21 = vld [vmem:[#allocation18 + $0x5a8] ss:$16 sps:$4 sm:$0xff]  }
 0x2af   :  { %1878 = vmatprep.subr.bf16.mxu0 %v12970_v36  ;;  %1921 = vmatprep.subr.bf16.mxu1 %v12973_v38  ;;  %v989_v36 = vsel %vm986_vm4, %v987_v28, %v988_v29  ;;  %v13028_v38 = vld [vmem:[#allocation18 + $0x4e0] ss:$16 sps:$4 sm:$0xff]   ;;  %v13097_v25 = vld [vmem:[#allocation18 + $0x588] ss:$16 sps:$4 sm:$0xff]  }
 0x2b0   :  { %v13094_v24 = vld [vmem:[#allocation18 + $0x580] ss:$16 sps:$4 sm:$0xff]   ;;  %v13103_v29 = vld [vmem:[#allocation18 + $0x568] ss:$16 sps:$4 sm:$0xff]  }
 0x2b1   :  { %v13100_v28 = vld [vmem:[#allocation18 + $0x560] ss:$16 sps:$4 sm:$0xff]  }
 0x2b2   :  { %1879 = vmatpush1.bf16.msra.mxu0 %v12968_v39  ;;  %1922 = vmatpush1.bf16.msra.mxu1 %v12971_v41  ;;  %v1003_v39 = vpack.c.bf16 %v995_v34, %v989_v36  ;;  %v13031_v41 = vld [vmem:[#allocation18 + $0x4e8] ss:$16 sps:$4 sm:$0xff]   ;;  %v13114_v34 = vld [vmem:[#allocation18 + $0x524] ss:$16 sps:$4 sm:$0xff]  }
 0x2b3   :  { %1880 = vmatprep.subr.bf16.mxu0 %v12976_v43  ;;  %1923 = vmatprep.subr.bf16.mxu1 %v12979_v44  ;;  %v1974_v43 = vsel %vm1968_vm5, %v1972_v32, %v1973_v33  ;;  %v13106_v32 = vld [vmem:[#allocation18 + $0x540] ss:$16 sps:$4 sm:$0xff]   ;;  %v13109_v33 = vld [vmem:[#allocation18 + $0x548] ss:$16 sps:$4 sm:$0xff]  }
 0x2b4   :  { %v1986_v44 = vpack.c.bf16 %v1980_v35, %v1974_v43  ;;  %v13117_v35 = vld [vmem:[#allocation18 + $0x52c] ss:$16 sps:$4 sm:$0xff]   ;;  %v13115_v43 = vld [vmem:[#allocation18 + $0x528] ss:$16 sps:$4 sm:$0xff]  }
 0x2b5   :  { %v1956_v36 = vld [vmem:[#allocation4 + $0x40] sm:$0xfe] }
 0x2b6   :  { %1881 = vmatpush1.bf16.msra.mxu0 %v12974_v45  ;;  %1924 = vmatpush1.bf16.msra.mxu1 %v12977_v46  ;;  %v13036_v45 = vld [vmem:[#allocation18 + $0x4c4] ss:$16 sps:$4 sm:$0xff]   ;;  %v13039_v46 = vld [vmem:[#allocation18 + $0x4cc] ss:$16 sps:$4 sm:$0xff]  }
 0x2b7   :  { %1882 = vmatprep.subr.bf16.mxu0 %v12982_v47  ;;  %1925 = vmatprep.subr.bf16.mxu1 %v12985_v48  ;;  %v13034_v47 = vld [vmem:[#allocation18 + $0x4c0] ss:$16 sps:$4 sm:$0xff]   ;;  %v13037_v48 = vld [vmem:[#allocation18 + $0x4c8] ss:$16 sps:$4 sm:$0xff]  }
 0x2ba   :  { %1883 = vmatpush2.bf16.msra.mxu0 %v12980_v49  ;;  %1926 = vmatpush2.bf16.msra.mxu1 %v12983_v50  ;;  %v13042_v49 = vld [vmem:[#allocation18 + $0x4a4] ss:$16 sps:$4 sm:$0xff]   ;;  %v13045_v50 = vld [vmem:[#allocation18 + $0x4ac] ss:$16 sps:$4 sm:$0xff]  }
 0x2bb   :  { %1884 = vmatprep.subr.bf16.mxu0 %v12988_v51  ;;  %1927 = vmatprep.subr.bf16.mxu1 %v12991_v52  ;;  %v13040_v51 = vld [vmem:[#allocation18 + $0x4a0] ss:$16 sps:$4 sm:$0xff]   ;;  %v13043_v52 = vld [vmem:[#allocation18 + $0x4a8] ss:$16 sps:$4 sm:$0xff]  }
 0x2be   :  { %1885 = vmatpush2.bf16.msra.mxu0 %v12986_v53  ;;  %1928 = vmatpush2.bf16.msra.mxu1 %v12989_v54  ;;  %v13048_v53 = vld [vmem:[#allocation18 + $0x484] ss:$16 sps:$4 sm:$0xff]   ;;  %v13051_v54 = vld [vmem:[#allocation18 + $0x48c] ss:$16 sps:$4 sm:$0xff]  }
 0x2bf   :  { %1886 = vmatprep.subr.bf16.mxu0 %v12994_v55  ;;  %1929 = vmatprep.subr.bf16.mxu1 %v12997_v56  ;;  %v13046_v55 = vld [vmem:[#allocation18 + $0x480] ss:$16 sps:$4 sm:$0xff]   ;;  %v13049_v56 = vld [vmem:[#allocation18 + $0x488] ss:$16 sps:$4 sm:$0xff]  }
 0x2c2   :  { %1887 = vmatpush2.bf16.msra.mxu0 %v12992_v57  ;;  %1930 = vmatpush2.bf16.msra.mxu1 %v12995_v58  ;;  %v13054_v57 = vld [vmem:[#allocation18 + $0x464] ss:$16 sps:$4 sm:$0xff]   ;;  %v13057_v58 = vld [vmem:[#allocation18 + $0x46c] ss:$16 sps:$4 sm:$0xff]  }
 0x2c3   :  { %1888 = vmatprep.subr.bf16.mxu0 %v13000_v59  ;;  %1931 = vmatprep.subr.bf16.mxu1 %v13003_v60  ;;  %v13052_v59 = vld [vmem:[#allocation18 + $0x460] ss:$16 sps:$4 sm:$0xff]   ;;  %v13055_v60 = vld [vmem:[#allocation18 + $0x468] ss:$16 sps:$4 sm:$0xff]  }
 0x2c6   :  { %1889 = vmatpush2.bf16.msra.mxu0 %v12998_v61  ;;  %1932 = vmatpush2.bf16.msra.mxu1 %v13001_v62  ;;  %v13060_v61 = vld [vmem:[#allocation18 + $0x444] ss:$16 sps:$4 sm:$0xff]   ;;  %v13063_v62 = vld [vmem:[#allocation18 + $0x44c] ss:$16 sps:$4 sm:$0xff]  }
 0x2c7   :  { %1890 = vmatprep.subr.bf16.mxu0 %v13006_v63  ;;  %1933 = vmatprep.subr.bf16.mxu1 %v13009_v1  ;;  %v13058_v63 = vld [vmem:[#allocation18 + $0x440] ss:$16 sps:$4 sm:$0xff]   ;;  %v13061_v1 = vld [vmem:[#allocation18 + $0x448] ss:$16 sps:$4 sm:$0xff]  }
 0x2ca   :  { %1891 = vmatpush2.bf16.msra.mxu0 %v13004_v2  ;;  %1934 = vmatpush2.bf16.msra.mxu1 %v13007_v3  ;;  %v13066_v2 = vld [vmem:[#allocation18 + $0x424] ss:$16 sps:$4 sm:$0xff]   ;;  %v13069_v3 = vld [vmem:[#allocation18 + $0x42c] ss:$16 sps:$4 sm:$0xff]  }
 0x2cb   :  { %1892 = vmatprep.subr.bf16.mxu0 %v13012_v4  ;;  %1935 = vmatprep.subr.bf16.mxu1 %v13015_v5  ;;  %v13064_v4 = vld [vmem:[#allocation18 + $0x420] ss:$16 sps:$4 sm:$0xff]   ;;  %v13067_v5 = vld [vmem:[#allocation18 + $0x428] ss:$16 sps:$4 sm:$0xff]  }
 0x2ce   :  { %1893 = vmatpush2.bf16.msra.mxu0 %v13010_v6  ;;  %1936 = vmatpush2.bf16.msra.mxu1 %v13013_v7  ;;  %v13072_v6 = vld [vmem:[#allocation18 + $0x404] ss:$16 sps:$4 sm:$0xff]   ;;  %v13075_v7 = vld [vmem:[#allocation18 + $0x40c] ss:$16 sps:$4 sm:$0xff]  }
 0x2cf   :  { %1894 = vmatprep.subr.bf16.mxu0 %v13018_v8  ;;  %1937 = vmatprep.subr.bf16.mxu1 %v13021_v9  ;;  %v13070_v8 = vld [vmem:[#allocation18 + $0x400] ss:$16 sps:$4 sm:$0xff]   ;;  %v13073_v9 = vld [vmem:[#allocation18 + $0x408] ss:$16 sps:$4 sm:$0xff]  }
 0x2d2   :  { %1895 = vmatpush2.bf16.msra.mxu0 %v13016_v14  ;;  %1938 = vmatpush2.bf16.msra.mxu1 %v13019_v15  ;;  %v13084_v14 = vld [vmem:[#allocation18 + $0x5c4] ss:$16 sps:$4 sm:$0xff]   ;;  %v13087_v15 = vld [vmem:[#allocation18 + $0x5cc] ss:$16 sps:$4 sm:$0xff]  }
 0x2d3   :  { %1896 = vmatprep.subr.bf16.mxu0 %v13024_v17  ;;  %1939 = vmatprep.subr.bf16.mxu1 %v13027_v18  ;;  %v13085_v17 = vld [vmem:[#allocation18 + $0x5c8] ss:$16 sps:$4 sm:$0xff]   ;;  %v13090_v18 = vld [vmem:[#allocation18 + $0x5a4] ss:$16 sps:$4 sm:$0xff]  }
 0x2d6   :  { %1897 = vmatpush2.bf16.msra.mxu0 %v13022_v26  ;;  %1940 = vmatpush2.bf16.msra.mxu1 %v13025_v27  ;;  %v13102_v26 = vld [vmem:[#allocation18 + $0x564] ss:$16 sps:$4 sm:$0xff]   ;;  %v13105_v27 = vld [vmem:[#allocation18 + $0x56c] ss:$16 sps:$4 sm:$0xff]  }
 0x2d7   :  { %2372 = vmatprep.subr.bf16.mxu0 %v13030_v30  ;;  %2415 = vmatprep.subr.bf16.mxu1 %v13033_v31  ;;  %v13108_v30 = vld [vmem:[#allocation18 + $0x544] ss:$16 sps:$4 sm:$0xff]   ;;  %v13111_v31 = vld [vmem:[#allocation18 + $0x54c] ss:$16 sps:$4 sm:$0xff]  }
 0x2d9   :  { %1899 = vmatmul.mubr.bf16.vlgmr.msra.gmra.mxu0 %v1003_v39  ;;  %1942 = vmatmul.mubr.bf16.vlgmr.msra.gmra.mxu1 %v1003_v39  ;;  %v13112_v39 = vld [vmem:[#allocation18 + $0x520] ss:$16 sps:$4 sm:$0xff]  }
 0x2da   :  { %2373 = vmatpush1.bf16.msra.mxu0 %v13028_v38  ;;  %2404 = vmatprep.mubr.bf16.mxu0 %v1986_v44  ;;  %v1958_v38 = vld [vmem:[#allocation4 + $0x50] sm:$0x1] }
 0x2db   :  { %2416 = vmatpush1.bf16.msra.mxu1 %v13031_v41  ;;  %2447 = vmatprep.mubr.bf16.mxu1 %v1986_v44  ;;  %v1954_v41 = vld [vmem:[#allocation4 + $0x20] sm:$0x1]  ;;  %v13120_v44 = vld [vmem:[#allocation18 + $0x504] ss:$16 sps:$4 sm:$0xff]  }
 0x2dc   :  { %2374 = vmatprep.subr.bf16.mxu0 %v13036_v45  ;;  %2417 = vmatprep.subr.bf16.mxu1 %v13039_v46  ;;  %v1952_v45 = vld [vmem:[#allocation4 + $0x10] sm:$0xfe] }
 0x2dd   :  { %v13123_v46 = vld [vmem:[#allocation18 + $0x50c] ss:$16 sps:$4 sm:$0xff]  }
 0x2de   :  { %2375 = vmatpush1.bf16.msra.mxu0 %v13034_v47  ;;  %v1975_v47 = vrot.slane %v1956_v36, 1 }
 0x2df   :  { %2418 = vmatpush1.bf16.msra.mxu1 %v13037_v48  ;;  %2376 = vmatprep.subr.bf16.mxu0 %v13042_v49  ;;  %v1976_v48 = vrot.slane %v1958_v38, 1  ;;  %v2497_v49 = vld [vmem:[#allocation21] sm:$0x77] }
 0x2e0   :  { %2419 = vmatprep.subr.bf16.mxu1 %v13045_v50  ;;  %v13118_v50 = vld [vmem:[#allocation18 + $0x500] ss:$16 sps:$4 sm:$0xff]  }
 0x2e2   :  { %2377 = vmatpush1.bf16.msra.mxu0 %v13040_v51  ;;  %v1969_v51 = vrot.slane %v1952_v45, 1 }
 0x2e3   :  { %2420 = vmatpush1.bf16.msra.mxu1 %v13043_v52  ;;  %2378 = vmatprep.subr.bf16.mxu0 %v13048_v53  ;;  %v1970_v52 = vrot.slane %v1954_v41, 1  ;;  %v13121_v53 = vld [vmem:[#allocation18 + $0x508] ss:$16 sps:$4 sm:$0xff]  }
 0x2e4   :  { %2421 = vmatprep.subr.bf16.mxu1 %v13051_v54  ;;  %v2523_v54 = vcombine.high %v2497_v49, %v2497_v49 }
 0x2e6   :  { %2379 = vmatpush1.bf16.msra.mxu0 %v13046_v55  ;;  %v1977_v55 = vsel %vm1968_vm5, %v1975_v47, %v1976_v48 }
 0x2e7   :  { %2422 = vmatpush1.bf16.msra.mxu1 %v13049_v56  ;;  %2380 = vmatprep.subr.bf16.mxu0 %v13054_v57  ;;  %v2498_v56 = vld [vmem:[#allocation21 + $0x8] sm:$0x77]  ;;  %v1971_v57 = vsel %vm1968_vm5, %v1969_v51, %v1970_v52 }
 0x2e8   :  { %2423 = vmatprep.subr.bf16.mxu1 %v13057_v58  ;;  %v1985_v58 = vpack.c.bf16 %v1977_v55, %v1971_v57 }
 0x2ea   :  { %2381 = vmatpush1.bf16.msra.mxu0 %v13052_v59  ;;  %v2524_v59 = vcombine.high %v2498_v56, %v2498_v56 }
 0x2eb   :  { %2424 = vmatpush1.bf16.msra.mxu1 %v13055_v60  ;;  %2382 = vmatprep.subr.bf16.mxu0 %v13060_v61  ;;  %v2496_v60 = vld [vmem:[#allocation10] sm:$0x3] }
 0x2ec   :  { %2425 = vmatprep.subr.bf16.mxu1 %v13063_v62 }
 0x2ee   :  { %2383 = vmatpush1.bf16.msra.mxu0 %v13058_v63 }
 0x2ef   :  { %2426 = vmatpush1.bf16.msra.mxu1 %v13061_v1  ;;  %2384 = vmatprep.subr.bf16.mxu0 %v13066_v2 }
 0x2f0   :  { %2427 = vmatprep.subr.bf16.mxu1 %v13069_v3 }
 0x2f2   :  { %2385 = vmatpush1.bf16.msra.mxu0 %v13064_v4 }
 0x2f3   :  { %2428 = vmatpush1.bf16.msra.mxu1 %v13067_v5  ;;  %2386 = vmatprep.subr.bf16.mxu0 %v13072_v6 }
 0x2f4   :  { %2429 = vmatprep.subr.bf16.mxu1 %v13075_v7 }
 0x2f6   :  { %2387 = vmatpush1.bf16.msra.mxu0 %v13070_v8 }
 0x2f7   :  { %2430 = vmatpush1.bf16.msra.mxu1 %v13073_v9  ;;  %2388 = vmatprep.subr.bf16.mxu0 %v13078_v10 }
 0x2f8   :  { %2431 = vmatprep.subr.bf16.mxu1 %v13081_v11 }
 0x2fa   :  { %2389 = vmatpush2.bf16.msra.mxu0 %v13076_v12 }
 0x2fb   :  { %2432 = vmatpush2.bf16.msra.mxu1 %v13079_v13  ;;  %2390 = vmatprep.subr.bf16.mxu0 %v13084_v14 }
 0x2fc   :  { %2433 = vmatprep.subr.bf16.mxu1 %v13087_v15 }
 0x2fe   :  { %2391 = vmatpush2.bf16.msra.mxu0 %v13082_v16 }
 0x2ff   :  { %2434 = vmatpush2.bf16.msra.mxu1 %v13085_v17  ;;  %2392 = vmatprep.subr.bf16.mxu0 %v13090_v18 }
 0x300   :  { %2435 = vmatprep.subr.bf16.mxu1 %v13093_v19 }
 0x302   :  { %2393 = vmatpush2.bf16.msra.mxu0 %v13088_v20 }
 0x303   :  { %2436 = vmatpush2.bf16.msra.mxu1 %v13091_v21  ;;  %2394 = vmatprep.subr.bf16.mxu0 %v13096_v22 }
 0x304   :  { %2437 = vmatprep.subr.bf16.mxu1 %v13099_v23 }
 0x306   :  { %2395 = vmatpush2.bf16.msra.mxu0 %v13094_v24 }
 0x307   :  { %2438 = vmatpush2.bf16.msra.mxu1 %v13097_v25  ;;  %2396 = vmatprep.subr.bf16.mxu0 %v13102_v26 }
 0x308   :  { %2439 = vmatprep.subr.bf16.mxu1 %v13105_v27 }
 0x30a   :  { %2397 = vmatpush2.bf16.msra.mxu0 %v13100_v28 }
 0x30b   :  { %2440 = vmatpush2.bf16.msra.mxu1 %v13103_v29  ;;  %2398 = vmatprep.subr.bf16.mxu0 %v13108_v30 }
 0x30c   :  { %2441 = vmatprep.subr.bf16.mxu1 %v13111_v31 }
 0x30e   :  { %2399 = vmatpush2.bf16.msra.mxu0 %v13106_v32 }
 0x30f   :  { %2442 = vmatpush2.bf16.msra.mxu1 %v13109_v33  ;;  %2400 = vmatprep.subr.bf16.mxu0 %v13114_v34 }
 0x310   :  { %2443 = vmatprep.subr.bf16.mxu1 %v13117_v35 }
 0x312   :  { %2401 = vmatpush2.bf16.msra.mxu0 %v13112_v39 }
 0x313   :  { %2444 = vmatpush2.bf16.msra.mxu1 %v13115_v43  ;;  %2402 = vmatprep.subr.bf16.mxu0 %v13120_v44 }
 0x314   :  { %2445 = vmatprep.subr.bf16.mxu1 %v13123_v46 }
 0x316   :  { %2403 = vmatpush2.bf16.msra.mxu0 %v13118_v50 }
 0x317   :  { %2446 = vmatpush2.bf16.msra.mxu1 %v13121_v53  ;;  %11501 = vmatprep.subr.msk.mxu0 %vm2529_vm6, %v2523_v54 }
 0x319   :  { %2405 = vmatmul.mubr.bf16.vlgmr.msra.gmra.mxu0 %v1985_v58 }
 0x31a   :  { %2448 = vmatmul.mubr.bf16.vlgmr.msra.gmra.mxu1 %v1985_v58  ;;  %11502 = vmatpush1.msk.msra.mxu0 %vm2529_vm6, %v2497_v49 }
 0x31b   :  { %2602 = vmatprep.mubr.f32.mxu0 %v15215_v0  ;;  %11504 = vmatprep.subr.msk.mxu0 %vm2529_vm6, %v2524_v59 }
 0x321   :  { %11503 = vmatmul.mubr.msk.f32.vlgmr.msra.gmra.mxu0 %vm2525_vm7, %v2496_v60 }
 0x322   :  { %11505 = vmatpush1.msk.msra.mxu0 %vm2529_vm6, %v2498_v56  ;;  %2673 = vmatprep.mubr.f32.mxu0 %v15215_v0 }
 0x325   :  { %11506 = vmatmul.mubr.msk.f32.vlgmr.msra.gmra.mxu0 %vm2525_vm7, %v2496_v60 }
 0x326   :  { %15125 = shalt.err (!%p15122_p0)  }
 0x327   :  { %269 = dma.hbm_to_vmem [thread:$0]  %s15850_s10, 65536, %s267_s18, [#allocation6] }
 0x328   :  { %s270_s21 = scalar_lea.hbm %s15850_s10, 65536  ;;  %s15136_s23 = scalar_lea.vmem %s281_s1, 65536 }
 0x329   :  { %p15137_p1 = scmp.ne.s32.totalorder %s281_s1, %s15136_s23  ;;  %p15141_p2 = scmp.lt.s32.totalorder %s281_s1, %s267_s18 }
 0x32a   :  { %p15142_p3 = scmp.lt.s32.totalorder %s15118_s30, %s15136_s23 }
 0x32c   :  { %p15143_p4 = por %p15142_p3, %p15141_p2 }
 0x32e   :  { %p15144_p5 = pnand %p15143_p4, %p15137_p1 }
 0x330   :  { %15147 = shalt.err (!%p15144_p5)  }
 0x331   :  { %283 = dma.hbm_to_vmem [thread:$0]  %s270_s21, 65536, %s281_s1, [#allocation6 + $0x1]  ;;  %v2466_v12 = vld [vmem:[#allocation19] sm:$0xf]  ;;  %v2478_v13 = vsub.s32 2, %v15413_v37  ;;  %v2482_v15 = vsub.s32 3, %v15413_v37 }
 0x332   :  { %v2471_v18 = vrot.slane %v2466_v12, %v15416_v40  ;;  %v2475_v25 = vrot.slane %v2466_v12, %v15419_v42  ;;  %v2499_v30 = vld [vmem:[#allocation22] sm:$0xf] }
 0x333   :  { %v2479_v21 = vrot.slane %v2466_v12, %v2478_v13  ;;  %v2483_v29 = vrot.slane %v2466_v12, %v2482_v15  ;;  %v2504_v45 = vrot.slane %v2499_v30, %v15416_v40  ;;  %v2508_v53 = vrot.slane %v2499_v30, %v15419_v42 }
 0x334   :  { %v2512_v59 = vrot.slane %v2499_v30, %v2478_v13 }
 0x359   :  { %v1494_v61 = vpop.f32.mrf.mxu0  ;;  %v1537_v62 = vpop.f32.mrf.mxu1 }
 0x35b   :  { %v1496_v63 = vpop.f32.mrf.mxu0  ;;  %v1539_v1 = vpop.f32.mrf.mxu1 }
 0x35d   :  { %v1498_v2 = vpop.f32.mrf.mxu0  ;;  %v1541_v3 = vpop.f32.mrf.mxu1 }
 0x35f   :  { %v1500_v4 = vpop.f32.mrf.mxu0  ;;  %v1543_v5 = vpop.f32.mrf.mxu1 }
 0x399   :  { %v1900_v6 = vpop.f32.mrf.mxu0  ;;  %v1943_v7 = vpop.f32.mrf.mxu1 }
 0x39a   :  { %v1901_v16 = vadd.f32 %v1900_v6, %v1494_v61  ;;  %v1944_v19 = vadd.f32 %v1943_v7, %v1537_v62 }
 0x39b   :  { %v1902_v8 = vpop.f32.mrf.mxu0  ;;  %v1945_v9 = vpop.f32.mrf.mxu1 }
 0x39c   :  { %v1903_v22 = vadd.f32 %v1902_v8, %v1496_v63  ;;  %v1946_v26 = vadd.f32 %v1945_v9, %v1539_v1  ;;  %v2516_v63 = vrot.slane %v2499_v30, %v2482_v15 }
 0x39d   :  { %v1904_v10 = vpop.f32.mrf.mxu0  ;;  %v1947_v11 = vpop.f32.mrf.mxu1 }
 0x39e   :  { %v1905_v31 = vadd.f32 %v1904_v10, %v1498_v2  ;;  %v1948_v34 = vadd.f32 %v1947_v11, %v1541_v3 }
 0x39f   :  { %v1906_v14 = vpop.f32.mrf.mxu0  ;;  %v1949_v17 = vpop.f32.mrf.mxu1 }
 0x3a0   :  { %v1907_v39 = vadd.f32 %v1906_v14, %v1500_v4  ;;  %v1950_v46 = vadd.f32 %v1949_v17, %v1543_v5 }
 0x3d9   :  { %v2406_v20 = vpop.f32.mrf.mxu0 }
 0x3da   :  { %v2458_v23 = vadd.f32 %v2406_v20, %v1901_v16  ;;  %v2449_v24 = vpop.f32.mrf.mxu1 }
 0x3db   :  { %v2460_v27 = vadd.f32 %v2449_v24, %v1944_v19  ;;  %v2408_v28 = vpop.f32.mrf.mxu0 }
 0x3dc   :  { %v15447_v32 = vadd.f32 %v2471_v18, %v2458_v23  ;;  %v2459_v37 = vadd.f32 %v2408_v28, %v1903_v22  ;;  %v2451_v33 = vpop.f32.mrf.mxu1 }
 0x3dd   :  { %v15449_v35 = vadd.f32 %v2479_v21, %v2460_v27  ;;  %v2461_v36 = vadd.f32 %v2451_v33, %v1946_v26  ;;  %v2410_v38 = vpop.f32.mrf.mxu0 }
 0x3de   :  { %v2489_v41 = vadd.f32 %v2475_v25, %v2459_v37  ;;  %v2462_v43 = vadd.f32 %v2410_v38, %v1905_v31  ;;  %v2453_v44 = vpop.f32.mrf.mxu1 }
 0x3df   :  { %v2491_v47 = vadd.f32 %v2483_v29, %v2461_v36  ;;  %v2464_v48 = vadd.f32 %v2453_v44, %v1948_v34  ;;  %v2412_v49 = vpop.f32.mrf.mxu0 }
 0x3e0   :  { %v15452_v50 = vadd.f32 %v2471_v18, %v2462_v43  ;;  %v2463_v51 = vadd.f32 %v2412_v49, %v1907_v39  ;;  %v2455_v52 = vpop.f32.mrf.mxu1 }
 0x3e1   :  { %v15455_v54 = vadd.f32 %v2479_v21, %v2464_v48  ;;  %v2465_v55 = vadd.f32 %v2455_v52, %v1950_v46  ;;  %v2604_v56 = vpop.f32.mrf.mxu0 }
 0x3e2   :  { %v2493_v57 = vadd.f32 %v2475_v25, %v2463_v51  ;;  %v15457_v58 = vadd.f32 %v2604_v56, %v2504_v45 }
 0x3e3   :  { %v2495_v60 = vadd.f32 %v2483_v29, %v2465_v55  ;;  %v2606_v61 = vpop.f32.mrf.mxu0 }
 0x3e4   :  { %v15459_v62 = vadd.f32 %v2606_v61, %v2508_v53 }
 0x3e5   :  { %v2675_v1 = vpop.f32.mrf.mxu0 }
 0x3e6   :  { %v15461_v2 = vadd.f32 %v2675_v1, %v2512_v59 }
 0x3e7   :  { %v2677_v3 = vpop.f32.mrf.mxu0 }
 0x3e8   :  { %v15463_v4 = vadd.f32 %v2677_v3, %v2516_v63 }
 0x3e9   :  { %15187 = dma.done.wait [#allocation6], 65536 }
 0x3ea   :  { %15188 = vsyncadd [#allocation6], 4294901760  ;;  %v2686_v5 = vpack.c.bf16 %v2489_v41, %v2489_v41  ;;  %v2690_v6 = vpack.c.bf16 %v2493_v57, %v2493_v57  ;;  %v2688_v7 = vpack.c.bf16 %v2491_v47, %v2491_v47  ;;  %v2692_v8 = vpack.c.bf16 %v2495_v60, %v2495_v60  ;;  %v13126_v16 = vld [vmem:[#allocation5 + $0xe4] ss:$16 sps:$4 sm:$0xff]   ;;  %v13130_v21 = vld [vmem:[#allocation5 + $0xe0] ss:$16 sps:$4 sm:$0xff]  }
 0x3eb   :  { %vm2838_vm8 = vcmask 1041409   ;;  %v13128_v19 = vld [vmem:[#allocation5 + $0x2e4] ss:$16 sps:$4 sm:$0xff]   ;;  %3494 = vmatprep.subr.bf16.mxu0 %v13126_v16  ;;  %v13131_v22 = vld [vmem:[#allocation5 + $0x2e0] ss:$16 sps:$4 sm:$0xff]  }
 0x3ec   :  { %v15465_v9 = vunpack.c.l.b16 %v2686_v5  ;;  %v15467_v10 = vunpack.c.l.b16 %v2690_v6  ;;  %v15469_v11 = vunpack.c.l.b16 %v2688_v7  ;;  %v15471_v12 = vunpack.c.l.b16 %v2692_v8  ;;  %3535 = vmatprep.subr.bf16.mxu1 %v13128_v19  ;;  %v13132_v23 = vld [vmem:[#allocation5 + $0xc4] ss:$16 sps:$4 sm:$0xff]   ;;  %3495 = vmatpush1.bf16.msra.mxu0 %v13130_v21  ;;  %v13136_v25 = vld [vmem:[#allocation5 + $0xc0] ss:$16 sps:$4 sm:$0xff]  }
 0x3ed   :  { %3536 = vmatpush1.bf16.msra.mxu1 %v13131_v22  ;;  %v13134_v24 = vld [vmem:[#allocation5 + $0x2c4] ss:$16 sps:$4 sm:$0xff]   ;;  %3496 = vmatprep.subr.bf16.mxu0 %v13132_v23  ;;  %v13137_v26 = vld [vmem:[#allocation5 + $0x2c0] ss:$16 sps:$4 sm:$0xff]  }
 0x3ee   :  { %v2840_v13 = vrot.slane %v15467_v10, 7  ;;  %v2844_v14 = vrot.slane %v15471_v12, 7  ;;  %3537 = vmatprep.subr.bf16.mxu1 %v13134_v24  ;;  %v13138_v27 = vld [vmem:[#allocation5 + $0xa4] ss:$16 sps:$4 sm:$0xff]   ;;  %v13142_v29 = vld [vmem:[#allocation5 + $0xa0] ss:$16 sps:$4 sm:$0xff]  }
 0x3ef   :  { %v13140_v28 = vld [vmem:[#allocation5 + $0x2a4] ss:$16 sps:$4 sm:$0xff]   ;;  %v13143_v30 = vld [vmem:[#allocation5 + $0x2a0] ss:$16 sps:$4 sm:$0xff]  }
 0x3f0   :  { %v2841_v15 = vsel %vm2838_vm8, %v2840_v13, %v15465_v9  ;;  %v2845_v18 = vsel %vm2838_vm8, %v2844_v14, %v15469_v11  ;;  %3497 = vmatpush1.bf16.msra.mxu0 %v13136_v25  ;;  %v13144_v31 = vld [vmem:[#allocation5 + $0x84] ss:$16 sps:$4 sm:$0xff]   ;;  %v13148_v33 = vld [vmem:[#allocation5 + $0x80] ss:$16 sps:$4 sm:$0xff]   ;;  %v2689_v25 = vpack.c.bf16 %v15452_v50, %v15452_v50 }
 0x3f1   :  { %v15477_v17 = vpack.c.b16 %v2841_v15, %v2841_v15  ;;  %v15481_v20 = vpack.c.b16 %v2845_v18, %v2845_v18  ;;  %3538 = vmatpush1.bf16.msra.mxu1 %v13137_v26  ;;  %3498 = vmatprep.subr.bf16.mxu0 %v13138_v27  ;;  %v13146_v37 = vld [vmem:[#allocation5 + $0x284] ss:$16 sps:$4 sm:$0xff]   ;;  %v13149_v34 = vld [vmem:[#allocation5 + $0x280] ss:$16 sps:$4 sm:$0xff]   ;;  %v2691_v26 = vpack.c.bf16 %v15455_v54, %v15455_v54 }
 0x3f2   :  { %3539 = vmatprep.subr.bf16.mxu1 %v13140_v28  ;;  %v13150_v36 = vld [vmem:[#allocation5 + $0x64] ss:$16 sps:$4 sm:$0xff]   ;;  %v13154_v39 = vld [vmem:[#allocation5 + $0x60] ss:$16 sps:$4 sm:$0xff]  }
 0x3f3   :  { %3526 = vmatprep.mubr.bf16.mxu0 %v15477_v17  ;;  %3567 = vmatprep.mubr.bf16.mxu1 %v15481_v20  ;;  %v13152_v38 = vld [vmem:[#allocation5 + $0x264] ss:$16 sps:$4 sm:$0xff]   ;;  %v13155_v41 = vld [vmem:[#allocation5 + $0x260] ss:$16 sps:$4 sm:$0xff]   ;;  %v15495_v50 = vunpack.c.l.b16 %v2691_v26  ;;  %v13269_v26 = vld [vmem:[#allocation5 + $0x20c] ss:$16 sps:$4 sm:$0xff]  }
 0x3f4   :  { %3499 = vmatpush1.bf16.msra.mxu0 %v13142_v29  ;;  %v13156_v43 = vld [vmem:[#allocation5 + $0x44] ss:$16 sps:$4 sm:$0xff]   ;;  %v13160_v45 = vld [vmem:[#allocation5 + $0x40] ss:$16 sps:$4 sm:$0xff]  }
 0x3f5   :  { %3540 = vmatpush1.bf16.msra.mxu1 %v13143_v30  ;;  %3500 = vmatprep.subr.bf16.mxu0 %v13144_v31  ;;  %v13158_v44 = vld [vmem:[#allocation5 + $0x244] ss:$16 sps:$4 sm:$0xff]   ;;  %v13161_v46 = vld [vmem:[#allocation5 + $0x240] ss:$16 sps:$4 sm:$0xff]   ;;  %v2685_v31 = vpack.c.bf16 %v15447_v32, %v15447_v32 }
 0x3f6   :  { %3541 = vmatprep.subr.bf16.mxu1 %v13146_v37  ;;  %v13162_v47 = vld [vmem:[#allocation5 + $0x24] ss:$16 sps:$4 sm:$0xff]   ;;  %v13166_v49 = vld [vmem:[#allocation5 + $0x20] ss:$16 sps:$4 sm:$0xff]   ;;  %v15491_v37 = vunpack.c.l.b16 %v2689_v25  ;;  %v13266_v25 = vld [vmem:[#allocation5 + $0xc] ss:$16 sps:$4 sm:$0xff]  }
 0x3f7   :  { %v13164_v48 = vld [vmem:[#allocation5 + $0x224] ss:$16 sps:$4 sm:$0xff]   ;;  %v13167_v51 = vld [vmem:[#allocation5 + $0x220] ss:$16 sps:$4 sm:$0xff]  }
 0x3f8   :  { %3501 = vmatpush1.bf16.msra.mxu0 %v13148_v33  ;;  %v13168_v52 = vld [vmem:[#allocation5 + $0x4] ss:$16 sps:$4 sm:$0xff]   ;;  %v13172_v55 = vld [vmem:[#allocation5] ss:$16 sps:$4 sm:$0xff]   ;;  %v2687_v33 = vpack.c.bf16 %v15449_v35, %v15449_v35 }
 0x3f9   :  { %3542 = vmatpush1.bf16.msra.mxu1 %v13149_v34  ;;  %3502 = vmatprep.subr.bf16.mxu0 %v13150_v36  ;;  %v13170_v53 = vld [vmem:[#allocation5 + $0x204] ss:$16 sps:$4 sm:$0xff]   ;;  %v13173_v56 = vld [vmem:[#allocation5 + $0x200] ss:$16 sps:$4 sm:$0xff]  }
 0x3fa   :  { %3543 = vmatprep.subr.bf16.mxu1 %v13152_v38  ;;  %v13174_v57 = vld [vmem:[#allocation5 + $0x1e4] ss:$16 sps:$4 sm:$0xff]   ;;  %v13178_v60 = vld [vmem:[#allocation5 + $0x1e0] ss:$16 sps:$4 sm:$0xff]   ;;  %v15500_v32 = vunpack.c.l.b16 %v2687_v33  ;;  %v13273_v33 = vld [vmem:[#allocation5 + $0x3e8] ss:$16 sps:$4 sm:$0xff]  }
 0x3fb   :  { %v13176_v59 = vld [vmem:[#allocation5 + $0x3e4] ss:$16 sps:$4 sm:$0xff]   ;;  %v13179_v61 = vld [vmem:[#allocation5 + $0x3e0] ss:$16 sps:$4 sm:$0xff]  }
 0x3fc   :  { %3503 = vmatpush1.bf16.msra.mxu0 %v13154_v39  ;;  %v13180_v63 = vld [vmem:[#allocation5 + $0x1c4] ss:$16 sps:$4 sm:$0xff]   ;;  %v13184_v3 = vld [vmem:[#allocation5 + $0x1c0] ss:$16 sps:$4 sm:$0xff]   ;;  %v15497_v39 = vunpack.c.l.b16 %v2685_v31  ;;  %v13270_v31 = vld [vmem:[#allocation5 + $0x1e8] ss:$16 sps:$4 sm:$0xff]  }
 0x3fd   :  { %3544 = vmatpush1.bf16.msra.mxu1 %v13155_v41  ;;  %3504 = vmatprep.subr.bf16.mxu0 %v13156_v43  ;;  %v13182_v1 = vld [vmem:[#allocation5 + $0x3c4] ss:$16 sps:$4 sm:$0xff]   ;;  %v13185_v5 = vld [vmem:[#allocation5 + $0x3c0] ss:$16 sps:$4 sm:$0xff]   ;;  %v2837_v41 = vrot.slane %v15491_v37, 7  ;;  %v2842_v43 = vrot.slane %v15495_v50, 7 }
 0x3fe   :  { %3545 = vmatprep.subr.bf16.mxu1 %v13158_v44  ;;  %v13186_v6 = vld [vmem:[#allocation5 + $0x1a4] ss:$16 sps:$4 sm:$0xff]   ;;  %v13190_v8 = vld [vmem:[#allocation5 + $0x1a0] ss:$16 sps:$4 sm:$0xff]  }
 0x3ff   :  { %v13188_v7 = vld [vmem:[#allocation5 + $0x3a4] ss:$16 sps:$4 sm:$0xff]   ;;  %v13191_v13 = vld [vmem:[#allocation5 + $0x3a0] ss:$16 sps:$4 sm:$0xff]  }
 0x400   :  { %3505 = vmatpush1.bf16.msra.mxu0 %v13160_v45  ;;  %v13192_v14 = vld [vmem:[#allocation5 + $0x184] ss:$16 sps:$4 sm:$0xff]   ;;  %v13196_v16 = vld [vmem:[#allocation5 + $0x180] ss:$16 sps:$4 sm:$0xff]  }
 0x401   :  { %3546 = vmatpush1.bf16.msra.mxu1 %v13161_v46  ;;  %3506 = vmatprep.subr.bf16.mxu0 %v13162_v47  ;;  %v13194_v15 = vld [vmem:[#allocation5 + $0x384] ss:$16 sps:$4 sm:$0xff]   ;;  %v13197_v18 = vld [vmem:[#allocation5 + $0x380] ss:$16 sps:$4 sm:$0xff]   ;;  %v2839_v46 = vsel %vm2838_vm8, %v2837_v41, %v15497_v39  ;;  %v2843_v47 = vsel %vm2838_vm8, %v2842_v43, %v15500_v32  ;;  %v13284_v41 = vld [vmem:[#allocation5 + $0x1ac] ss:$16 sps:$4 sm:$0xff]  }
 0x402   :  { %3547 = vmatprep.subr.bf16.mxu1 %v13164_v48  ;;  %v13198_v19 = vld [vmem:[#allocation5 + $0x164] ss:$16 sps:$4 sm:$0xff]   ;;  %v13202_v22 = vld [vmem:[#allocation5 + $0x160] ss:$16 sps:$4 sm:$0xff]   ;;  %v13224_v48 = vld [vmem:[#allocation5 + $0xec] ss:$16 sps:$4 sm:$0xff]  }
 0x403   :  { %v13200_v21 = vld [vmem:[#allocation5 + $0x364] ss:$16 sps:$4 sm:$0xff]   ;;  %v13203_v23 = vld [vmem:[#allocation5 + $0x360] ss:$16 sps:$4 sm:$0xff]   ;;  %v13287_v43 = vld [vmem:[#allocation5 + $0x3ac] ss:$16 sps:$4 sm:$0xff]  }
 0x404   :  { %3507 = vmatpush1.bf16.msra.mxu0 %v13166_v49  ;;  %v13204_v24 = vld [vmem:[#allocation5 + $0x144] ss:$16 sps:$4 sm:$0xff]   ;;  %v13208_v28 = vld [vmem:[#allocation5 + $0x140] ss:$16 sps:$4 sm:$0xff]   ;;  %v13227_v49 = vld [vmem:[#allocation5 + $0x2ec] ss:$16 sps:$4 sm:$0xff]  }
 0x405   :  { %3548 = vmatpush1.bf16.msra.mxu1 %v13167_v51  ;;  %3508 = vmatprep.subr.bf16.mxu0 %v13168_v52  ;;  %v13206_v27 = vld [vmem:[#allocation5 + $0x344] ss:$16 sps:$4 sm:$0xff]   ;;  %v13209_v29 = vld [vmem:[#allocation5 + $0x340] ss:$16 sps:$4 sm:$0xff]   ;;  %v15507_v51 = vpack.c.b16 %v2839_v46, %v2839_v46  ;;  %v15509_v52 = vpack.c.b16 %v2843_v47, %v2843_v47  ;;  %v13293_v46 = vld [vmem:[#allocation5 + $0x38c] ss:$16 sps:$4 sm:$0xff]  }
 0x406   :  { %3549 = vmatprep.subr.bf16.mxu1 %v13170_v53  ;;  %v13210_v30 = vld [vmem:[#allocation5 + $0x124] ss:$16 sps:$4 sm:$0xff]   ;;  %v13214_v34 = vld [vmem:[#allocation5 + $0x120] ss:$16 sps:$4 sm:$0xff]   ;;  %v13222_v53 = vld [vmem:[#allocation5 + $0xe8] ss:$16 sps:$4 sm:$0xff]  }
 0x407   :  { %v13212_v54 = vld [vmem:[#allocation5 + $0x324] ss:$16 sps:$4 sm:$0xff]   ;;  %v13215_v36 = vld [vmem:[#allocation5 + $0x320] ss:$16 sps:$4 sm:$0xff]   ;;  %v13288_v47 = vld [vmem:[#allocation5 + $0x188] ss:$16 sps:$4 sm:$0xff]  }
 0x408   :  { %3509 = vmatpush1.bf16.msra.mxu0 %v13172_v55  ;;  %v13216_v38 = vld [vmem:[#allocation5 + $0x104] ss:$16 sps:$4 sm:$0xff]   ;;  %v13220_v44 = vld [vmem:[#allocation5 + $0x100] ss:$16 sps:$4 sm:$0xff]   ;;  %v13225_v55 = vld [vmem:[#allocation5 + $0x2e8] ss:$16 sps:$4 sm:$0xff]  }
 0x409   :  { %3550 = vmatpush1.bf16.msra.mxu1 %v13173_v56  ;;  %3510 = vmatprep.subr.bf16.mxu0 %v13174_v57  ;;  %v13218_v35 = vld [vmem:[#allocation5 + $0x304] ss:$16 sps:$4 sm:$0xff]   ;;  %v13221_v45 = vld [vmem:[#allocation5 + $0x300] ss:$16 sps:$4 sm:$0xff]   ;;  %v13230_v56 = vld [vmem:[#allocation5 + $0xcc] ss:$16 sps:$4 sm:$0xff]  }
 0x40a   :  { %3551 = vmatprep.subr.bf16.mxu1 %v13176_v59  ;;  %v13233_v57 = vld [vmem:[#allocation5 + $0x2cc] ss:$16 sps:$4 sm:$0xff]   ;;  %v13228_v59 = vld [vmem:[#allocation5 + $0xc8] ss:$16 sps:$4 sm:$0xff]  }
 0x40c   :  { %3511 = vmatpush2.bf16.msra.mxu0 %v13178_v60  ;;  %v13231_v60 = vld [vmem:[#allocation5 + $0x2c8] ss:$16 sps:$4 sm:$0xff]  }
 0x40d   :  { %3552 = vmatpush2.bf16.msra.mxu1 %v13179_v61  ;;  %3512 = vmatprep.subr.bf16.mxu0 %v13180_v63  ;;  %v13236_v61 = vld [vmem:[#allocation5 + $0xac] ss:$16 sps:$4 sm:$0xff]  }
 0x40e   :  { %3553 = vmatprep.subr.bf16.mxu1 %v13182_v1  ;;  %v13239_v63 = vld [vmem:[#allocation5 + $0x2ac] ss:$16 sps:$4 sm:$0xff]   ;;  %v13234_v1 = vld [vmem:[#allocation5 + $0xa8] ss:$16 sps:$4 sm:$0xff]  }
 0x410   :  { %3513 = vmatpush2.bf16.msra.mxu0 %v13184_v3  ;;  %v13237_v3 = vld [vmem:[#allocation5 + $0x2a8] ss:$16 sps:$4 sm:$0xff]  }
 0x411   :  { %3554 = vmatpush2.bf16.msra.mxu1 %v13185_v5  ;;  %3514 = vmatprep.subr.bf16.mxu0 %v13186_v6  ;;  %v13242_v5 = vld [vmem:[#allocation5 + $0x8c] ss:$16 sps:$4 sm:$0xff]  }
 0x412   :  { %3555 = vmatprep.subr.bf16.mxu1 %v13188_v7  ;;  %v13245_v6 = vld [vmem:[#allocation5 + $0x28c] ss:$16 sps:$4 sm:$0xff]   ;;  %v13240_v7 = vld [vmem:[#allocation5 + $0x88] ss:$16 sps:$4 sm:$0xff]  }
 0x414   :  { %3515 = vmatpush2.bf16.msra.mxu0 %v13190_v8  ;;  %v13243_v8 = vld [vmem:[#allocation5 + $0x288] ss:$16 sps:$4 sm:$0xff]  }
 0x415   :  { %3556 = vmatpush2.bf16.msra.mxu1 %v13191_v13  ;;  %3516 = vmatprep.subr.bf16.mxu0 %v13192_v14  ;;  %v13248_v13 = vld [vmem:[#allocation5 + $0x6c] ss:$16 sps:$4 sm:$0xff]  }
 0x416   :  { %3557 = vmatprep.subr.bf16.mxu1 %v13194_v15  ;;  %v13251_v14 = vld [vmem:[#allocation5 + $0x26c] ss:$16 sps:$4 sm:$0xff]   ;;  %v13246_v15 = vld [vmem:[#allocation5 + $0x68] ss:$16 sps:$4 sm:$0xff]  }
 0x418   :  { %3517 = vmatpush2.bf16.msra.mxu0 %v13196_v16  ;;  %v13257_v16 = vld [vmem:[#allocation5 + $0x24c] ss:$16 sps:$4 sm:$0xff]  }
 0x419   :  { %3558 = vmatpush2.bf16.msra.mxu1 %v13197_v18  ;;  %3518 = vmatprep.subr.bf16.mxu0 %v13198_v19  ;;  %v13252_v18 = vld [vmem:[#allocation5 + $0x48] ss:$16 sps:$4 sm:$0xff]  }
 0x41a   :  { %3559 = vmatprep.subr.bf16.mxu1 %v13200_v21  ;;  %v13255_v19 = vld [vmem:[#allocation5 + $0x248] ss:$16 sps:$4 sm:$0xff]   ;;  %v13260_v21 = vld [vmem:[#allocation5 + $0x2c] ss:$16 sps:$4 sm:$0xff]  }
 0x41c   :  { %3519 = vmatpush2.bf16.msra.mxu0 %v13202_v22  ;;  %v13263_v22 = vld [vmem:[#allocation5 + $0x22c] ss:$16 sps:$4 sm:$0xff]  }
 0x41d   :  { %3560 = vmatpush2.bf16.msra.mxu1 %v13203_v23  ;;  %3520 = vmatprep.subr.bf16.mxu0 %v13204_v24  ;;  %v13258_v23 = vld [vmem:[#allocation5 + $0x28] ss:$16 sps:$4 sm:$0xff]  }
 0x41e   :  { %3561 = vmatprep.subr.bf16.mxu1 %v13206_v27  ;;  %v13261_v24 = vld [vmem:[#allocation5 + $0x228] ss:$16 sps:$4 sm:$0xff]  }
 0x41f   :  { %v13264_v27 = vld [vmem:[#allocation5 + $0x8] ss:$16 sps:$4 sm:$0xff]  }
 0x420   :  { %3521 = vmatpush2.bf16.msra.mxu0 %v13208_v28  ;;  %v13267_v28 = vld [vmem:[#allocation5 + $0x208] ss:$16 sps:$4 sm:$0xff]  }
 0x421   :  { %3562 = vmatpush2.bf16.msra.mxu1 %v13209_v29  ;;  %3522 = vmatprep.subr.bf16.mxu0 %v13210_v30  ;;  %v13272_v29 = vld [vmem:[#allocation5 + $0x1ec] ss:$16 sps:$4 sm:$0xff]  }
 0x422   :  { %3563 = vmatprep.subr.bf16.mxu1 %v13212_v54  ;;  %v13275_v30 = vld [vmem:[#allocation5 + $0x3ec] ss:$16 sps:$4 sm:$0xff]  }
 0x423   :  { %v13278_v54 = vld [vmem:[#allocation5 + $0x1cc] ss:$16 sps:$4 sm:$0xff]  }
 0x424   :  { %3523 = vmatpush2.bf16.msra.mxu0 %v13214_v34  ;;  %v13281_v34 = vld [vmem:[#allocation5 + $0x3cc] ss:$16 sps:$4 sm:$0xff]  }
 0x425   :  { %3564 = vmatpush2.bf16.msra.mxu1 %v13215_v36  ;;  %3524 = vmatprep.subr.bf16.mxu0 %v13216_v38  ;;  %v13276_v36 = vld [vmem:[#allocation5 + $0x1c8] ss:$16 sps:$4 sm:$0xff]  }
 0x426   :  { %3565 = vmatprep.subr.bf16.mxu1 %v13218_v35  ;;  %v13279_v38 = vld [vmem:[#allocation5 + $0x3c8] ss:$16 sps:$4 sm:$0xff]  }
 0x427   :  { %v13282_v35 = vld [vmem:[#allocation5 + $0x1a8] ss:$16 sps:$4 sm:$0xff]  }
 0x428   :  { %3525 = vmatpush2.bf16.msra.mxu0 %v13220_v44  ;;  %v13285_v44 = vld [vmem:[#allocation5 + $0x3a8] ss:$16 sps:$4 sm:$0xff]  }
 0x429   :  { %3566 = vmatpush2.bf16.msra.mxu1 %v13221_v45  ;;  %3576 = vmatprep.subr.bf16.mxu0 %v13224_v48  ;;  %v13290_v45 = vld [vmem:[#allocation5 + $0x18c] ss:$16 sps:$4 sm:$0xff]   ;;  %v13291_v48 = vld [vmem:[#allocation5 + $0x388] ss:$16 sps:$4 sm:$0xff]  }
 0x42a   :  { %3617 = vmatprep.subr.bf16.mxu1 %v13227_v49  ;;  %v13296_v49 = vld [vmem:[#allocation5 + $0x16c] ss:$16 sps:$4 sm:$0xff]  }
 0x42b   :  { %3527 = vmatmul.mubr.bf16.vlgmr.msra.gmra.mxu0 %v15507_v51 }
 0x42c   :  { %3568 = vmatmul.mubr.bf16.vlgmr.msra.gmra.mxu1 %v15509_v52  ;;  %3577 = vmatpush1.bf16.msra.mxu0 %v13222_v53  ;;  %v13299_v53 = vld [vmem:[#allocation5 + $0x36c] ss:$16 sps:$4 sm:$0xff]  }
 0x42d   :  { %3618 = vmatpush1.bf16.msra.mxu1 %v13225_v55  ;;  %3578 = vmatprep.subr.bf16.mxu0 %v13230_v56  ;;  %v13294_v55 = vld [vmem:[#allocation5 + $0x168] ss:$16 sps:$4 sm:$0xff]  }
 0x42e   :  { %3619 = vmatprep.subr.bf16.mxu1 %v13233_v57  ;;  %3608 = vmatprep.mubr.bf16.mxu0 %v15477_v17  ;;  %v13249_v17 = vld [vmem:[#allocation5 + $0x268] ss:$16 sps:$4 sm:$0xff]   ;;  %v13302_v57 = vld [vmem:[#allocation5 + $0x14c] ss:$16 sps:$4 sm:$0xff]  }
 0x42f   :  { %3649 = vmatprep.mubr.bf16.mxu1 %v15481_v20  ;;  %v13254_v20 = vld [vmem:[#allocation5 + $0x4c] ss:$16 sps:$4 sm:$0xff]   ;;  %v13297_v56 = vld [vmem:[#allocation5 + $0x368] ss:$16 sps:$4 sm:$0xff]  }
 0x430   :  { %3579 = vmatpush1.bf16.msra.mxu0 %v13228_v59  ;;  %v13305_v59 = vld [vmem:[#allocation5 + $0x34c] ss:$16 sps:$4 sm:$0xff]  }
 0x431   :  { %3620 = vmatpush1.bf16.msra.mxu1 %v13231_v60  ;;  %3580 = vmatprep.subr.bf16.mxu0 %v13236_v61  ;;  %v13300_v60 = vld [vmem:[#allocation5 + $0x148] ss:$16 sps:$4 sm:$0xff]  }
 0x432   :  { %3621 = vmatprep.subr.bf16.mxu1 %v13239_v63  ;;  %v13303_v61 = vld [vmem:[#allocation5 + $0x348] ss:$16 sps:$4 sm:$0xff]   ;;  %v13308_v63 = vld [vmem:[#allocation5 + $0x12c] ss:$16 sps:$4 sm:$0xff]  }
 0x434   :  { %3581 = vmatpush1.bf16.msra.mxu0 %v13234_v1  ;;  %v13311_v1 = vld [vmem:[#allocation5 + $0x32c] ss:$16 sps:$4 sm:$0xff]  }
 0x435   :  { %3622 = vmatpush1.bf16.msra.mxu1 %v13237_v3  ;;  %3582 = vmatprep.subr.bf16.mxu0 %v13242_v5  ;;  %v13306_v3 = vld [vmem:[#allocation5 + $0x128] ss:$16 sps:$4 sm:$0xff]  }
 0x436   :  { %3623 = vmatprep.subr.bf16.mxu1 %v13245_v6  ;;  %v13309_v5 = vld [vmem:[#allocation5 + $0x328] ss:$16 sps:$4 sm:$0xff]   ;;  %v13314_v6 = vld [vmem:[#allocation5 + $0x10c] ss:$16 sps:$4 sm:$0xff]  }
 0x438   :  { %3583 = vmatpush1.bf16.msra.mxu0 %v13240_v7  ;;  %v13317_v7 = vld [vmem:[#allocation5 + $0x30c] ss:$16 sps:$4 sm:$0xff]  }
 0x439   :  { %3624 = vmatpush1.bf16.msra.mxu1 %v13243_v8  ;;  %3584 = vmatprep.subr.bf16.mxu0 %v13248_v13  ;;  %v3793_v8 = vrot.slane %v15465_v9, 1  ;;  %v13312_v13 = vld [vmem:[#allocation5 + $0x108] ss:$16 sps:$4 sm:$0xff]  }
 0x43a   :  { %3625 = vmatprep.subr.bf16.mxu1 %v13251_v14  ;;  %v13315_v14 = vld [vmem:[#allocation5 + $0x308] ss:$16 sps:$4 sm:$0xff]  }
 0x43c   :  { %3585 = vmatpush1.bf16.msra.mxu0 %v13246_v15  ;;  %v3797_v15 = vrot.slane %v15469_v11, 1 }
 0x43d   :  { %3626 = vmatpush1.bf16.msra.mxu1 %v13249_v17  ;;  %3586 = vmatprep.subr.bf16.mxu0 %v13254_v20  ;;  %v13320_v17 = vld [vmem:[#allocation5 + $0x4e4] ss:$16 sps:$4 sm:$0xff]  }
 0x43e   :  { %3627 = vmatprep.subr.bf16.mxu1 %v13257_v16  ;;  %v13323_v20 = vld [vmem:[#allocation5 + $0x6e4] ss:$16 sps:$4 sm:$0xff]   ;;  %v13318_v16 = vld [vmem:[#allocation5 + $0x4e0] ss:$16 sps:$4 sm:$0xff]  }
 0x440   :  { %3587 = vmatpush1.bf16.msra.mxu0 %v13252_v18  ;;  %v13321_v18 = vld [vmem:[#allocation5 + $0x6e0] ss:$16 sps:$4 sm:$0xff]  }
 0x441   :  { %3628 = vmatpush1.bf16.msra.mxu1 %v13255_v19  ;;  %3588 = vmatprep.subr.bf16.mxu0 %v13260_v21  ;;  %v3794_v19 = vsel %vm2838_vm8, %v15467_v10, %v3793_v8  ;;  %v3798_v21 = vsel %vm2838_vm8, %v15471_v12, %v3797_v15  ;;  %v13383_v8 = vld [vmem:[#allocation5 + $0x7a4] ss:$16 sps:$4 sm:$0xff]  }
 0x442   :  { %3629 = vmatprep.subr.bf16.mxu1 %v13263_v22  ;;  %v13326_v22 = vld [vmem:[#allocation5 + $0x4c4] ss:$16 sps:$4 sm:$0xff]  }
 0x443   :  { %v13386_v15 = vld [vmem:[#allocation5 + $0x584] ss:$16 sps:$4 sm:$0xff]  }
 0x444   :  { %3589 = vmatpush1.bf16.msra.mxu0 %v13258_v23  ;;  %v13329_v23 = vld [vmem:[#allocation5 + $0x6c4] ss:$16 sps:$4 sm:$0xff]  }
 0x445   :  { %3630 = vmatpush1.bf16.msra.mxu1 %v13261_v24  ;;  %3590 = vmatprep.subr.bf16.mxu0 %v13266_v25  ;;  %v15521_v24 = vpack.c.b16 %v3794_v19, %v3794_v19  ;;  %v15523_v25 = vpack.c.b16 %v3798_v21, %v3798_v21  ;;  %v13395_v19 = vld [vmem:[#allocation5 + $0x764] ss:$16 sps:$4 sm:$0xff]   ;;  %v13390_v21 = vld [vmem:[#allocation5 + $0x560] ss:$16 sps:$4 sm:$0xff]  }
 0x446   :  { %3631 = vmatprep.subr.bf16.mxu1 %v13269_v26  ;;  %v13324_v26 = vld [vmem:[#allocation5 + $0x4c0] ss:$16 sps:$4 sm:$0xff]  }
 0x448   :  { %3591 = vmatpush1.bf16.msra.mxu0 %v13264_v27  ;;  %v13327_v27 = vld [vmem:[#allocation5 + $0x6c0] ss:$16 sps:$4 sm:$0xff]  }
 0x449   :  { %3632 = vmatpush1.bf16.msra.mxu1 %v13267_v28  ;;  %3592 = vmatprep.subr.bf16.mxu0 %v13272_v29  ;;  %v13332_v28 = vld [vmem:[#allocation5 + $0x4a4] ss:$16 sps:$4 sm:$0xff]  }
 0x44a   :  { %3633 = vmatprep.subr.bf16.mxu1 %v13275_v30  ;;  %v13335_v29 = vld [vmem:[#allocation5 + $0x6a4] ss:$16 sps:$4 sm:$0xff]   ;;  %v13330_v30 = vld [vmem:[#allocation5 + $0x4a0] ss:$16 sps:$4 sm:$0xff]  }
 0x44c   :  { %3593 = vmatpush2.bf16.msra.mxu0 %v13270_v31  ;;  %v13333_v31 = vld [vmem:[#allocation5 + $0x6a0] ss:$16 sps:$4 sm:$0xff]  }
 0x44d   :  { %3634 = vmatpush2.bf16.msra.mxu1 %v13273_v33  ;;  %3594 = vmatprep.subr.bf16.mxu0 %v13278_v54  ;;  %v13338_v33 = vld [vmem:[#allocation5 + $0x484] ss:$16 sps:$4 sm:$0xff]   ;;  %v13339_v54 = vld [vmem:[#allocation5 + $0x680] ss:$16 sps:$4 sm:$0xff]  }
 0x44e   :  { %3635 = vmatprep.subr.bf16.mxu1 %v13281_v34  ;;  %v13344_v34 = vld [vmem:[#allocation5 + $0x464] ss:$16 sps:$4 sm:$0xff]  }
 0x450   :  { %3595 = vmatpush2.bf16.msra.mxu0 %v13276_v36  ;;  %v13347_v36 = vld [vmem:[#allocation5 + $0x664] ss:$16 sps:$4 sm:$0xff]  }
 0x451   :  { %3636 = vmatpush2.bf16.msra.mxu1 %v13279_v38  ;;  %3596 = vmatprep.subr.bf16.mxu0 %v13284_v41  ;;  %v13342_v38 = vld [vmem:[#allocation5 + $0x460] ss:$16 sps:$4 sm:$0xff]  }
 0x452   :  { %3637 = vmatprep.subr.bf16.mxu1 %v13287_v43  ;;  %v13345_v41 = vld [vmem:[#allocation5 + $0x660] ss:$16 sps:$4 sm:$0xff]   ;;  %v13350_v43 = vld [vmem:[#allocation5 + $0x444] ss:$16 sps:$4 sm:$0xff]  }
 0x454   :  { %3597 = vmatpush2.bf16.msra.mxu0 %v13282_v35  ;;  %v13353_v35 = vld [vmem:[#allocation5 + $0x644] ss:$16 sps:$4 sm:$0xff]  }
 0x455   :  { %3638 = vmatpush2.bf16.msra.mxu1 %v13285_v44  ;;  %3598 = vmatprep.subr.bf16.mxu0 %v13290_v45  ;;  %v13348_v44 = vld [vmem:[#allocation5 + $0x440] ss:$16 sps:$4 sm:$0xff]  }
 0x456   :  { %3639 = vmatprep.subr.bf16.mxu1 %v13293_v46  ;;  %v13351_v45 = vld [vmem:[#allocation5 + $0x640] ss:$16 sps:$4 sm:$0xff]   ;;  %v13356_v46 = vld [vmem:[#allocation5 + $0x424] ss:$16 sps:$4 sm:$0xff]  }
 0x458   :  { %3599 = vmatpush2.bf16.msra.mxu0 %v13288_v47  ;;  %v13359_v47 = vld [vmem:[#allocation5 + $0x624] ss:$16 sps:$4 sm:$0xff]  }
 0x459   :  { %3640 = vmatpush2.bf16.msra.mxu1 %v13291_v48  ;;  %3600 = vmatprep.subr.bf16.mxu0 %v13296_v49  ;;  %v13354_v48 = vld [vmem:[#allocation5 + $0x420] ss:$16 sps:$4 sm:$0xff]  }
 0x45a   :  { %3641 = vmatprep.subr.bf16.mxu1 %v13299_v53  ;;  %v13357_v49 = vld [vmem:[#allocation5 + $0x620] ss:$16 sps:$4 sm:$0xff]   ;;  %v13362_v53 = vld [vmem:[#allocation5 + $0x404] ss:$16 sps:$4 sm:$0xff]  }
 0x45c   :  { %3601 = vmatpush2.bf16.msra.mxu0 %v13294_v55  ;;  %v13365_v55 = vld [vmem:[#allocation5 + $0x604] ss:$16 sps:$4 sm:$0xff]  }
 0x45d   :  { %3642 = vmatpush2.bf16.msra.mxu1 %v13297_v56  ;;  %3602 = vmatprep.subr.bf16.mxu0 %v13302_v57  ;;  %v13360_v56 = vld [vmem:[#allocation5 + $0x400] ss:$16 sps:$4 sm:$0xff]  }
 0x45e   :  { %3643 = vmatprep.subr.bf16.mxu1 %v13305_v59  ;;  %v13363_v57 = vld [vmem:[#allocation5 + $0x600] ss:$16 sps:$4 sm:$0xff]   ;;  %v13368_v59 = vld [vmem:[#allocation5 + $0x5e4] ss:$16 sps:$4 sm:$0xff]  }
 0x460   :  { %3603 = vmatpush2.bf16.msra.mxu0 %v13300_v60  ;;  %v13371_v60 = vld [vmem:[#allocation5 + $0x7e4] ss:$16 sps:$4 sm:$0xff]  }
 0x461   :  { %3644 = vmatpush2.bf16.msra.mxu1 %v13303_v61  ;;  %3604 = vmatprep.subr.bf16.mxu0 %v13308_v63  ;;  %v13366_v61 = vld [vmem:[#allocation5 + $0x5e0] ss:$16 sps:$4 sm:$0xff]  }
 0x462   :  { %3645 = vmatprep.subr.bf16.mxu1 %v13311_v1  ;;  %v13369_v63 = vld [vmem:[#allocation5 + $0x7e0] ss:$16 sps:$4 sm:$0xff]   ;;  %v13374_v1 = vld [vmem:[#allocation5 + $0x5c4] ss:$16 sps:$4 sm:$0xff]  }
 0x464   :  { %3605 = vmatpush2.bf16.msra.mxu0 %v13306_v3  ;;  %v13377_v3 = vld [vmem:[#allocation5 + $0x7c4] ss:$16 sps:$4 sm:$0xff]  }
 0x465   :  { %3646 = vmatpush2.bf16.msra.mxu1 %v13309_v5  ;;  %3606 = vmatprep.subr.bf16.mxu0 %v13314_v6  ;;  %v13372_v5 = vld [vmem:[#allocation5 + $0x5c0] ss:$16 sps:$4 sm:$0xff]  }
 0x466   :  { %3647 = vmatprep.subr.bf16.mxu1 %v13317_v7  ;;  %v13375_v6 = vld [vmem:[#allocation5 + $0x7c0] ss:$16 sps:$4 sm:$0xff]   ;;  %v13380_v7 = vld [vmem:[#allocation5 + $0x5a4] ss:$16 sps:$4 sm:$0xff]  }
 0x468   :  { %3607 = vmatpush2.bf16.msra.mxu0 %v13312_v13  ;;  %v13378_v13 = vld [vmem:[#allocation5 + $0x5a0] ss:$16 sps:$4 sm:$0xff]  }
 0x469   :  { %3648 = vmatpush2.bf16.msra.mxu1 %v13315_v14  ;;  %4447 = vmatprep.subr.bf16.mxu0 %v13320_v17  ;;  %v13381_v14 = vld [vmem:[#allocation5 + $0x7a0] ss:$16 sps:$4 sm:$0xff]   ;;  %v13389_v17 = vld [vmem:[#allocation5 + $0x784] ss:$16 sps:$4 sm:$0xff]  }
 0x46a   :  { %4488 = vmatprep.subr.bf16.mxu1 %v13323_v20  ;;  %v13384_v20 = vld [vmem:[#allocation5 + $0x580] ss:$16 sps:$4 sm:$0xff]  }
 0x46b   :  { %3609 = vmatmul.mubr.bf16.vlgmr.msra.gmra.mxu0 %v15507_v51  ;;  %v13341_v51 = vld [vmem:[#allocation5 + $0x684] ss:$16 sps:$4 sm:$0xff]  }
 0x46c   :  { %3650 = vmatmul.mubr.bf16.vlgmr.msra.gmra.mxu1 %v15509_v52  ;;  %4448 = vmatpush1.bf16.msra.mxu0 %v13318_v16  ;;  %v13336_v52 = vld [vmem:[#allocation5 + $0x480] ss:$16 sps:$4 sm:$0xff]  }
 0x46d   :  { %4489 = vmatpush1.bf16.msra.mxu1 %v13321_v18  ;;  %4449 = vmatprep.subr.bf16.mxu0 %v13326_v22  ;;  %v13387_v16 = vld [vmem:[#allocation5 + $0x780] ss:$16 sps:$4 sm:$0xff]   ;;  %v13392_v18 = vld [vmem:[#allocation5 + $0x564] ss:$16 sps:$4 sm:$0xff]  }
 0x46e   :  { %4490 = vmatprep.subr.bf16.mxu1 %v13329_v23  ;;  %4479 = vmatprep.mubr.bf16.mxu0 %v15521_v24  ;;  %v13393_v22 = vld [vmem:[#allocation5 + $0x760] ss:$16 sps:$4 sm:$0xff]   ;;  %v13398_v23 = vld [vmem:[#allocation5 + $0x544] ss:$16 sps:$4 sm:$0xff]  }
 0x46f   :  { %4520 = vmatprep.mubr.bf16.mxu1 %v15523_v25 }
 0x470   :  { %4450 = vmatpush1.bf16.msra.mxu0 %v13324_v26  ;;  %v13401_v26 = vld [vmem:[#allocation5 + $0x744] ss:$16 sps:$4 sm:$0xff]  }
 0x471   :  { %4491 = vmatpush1.bf16.msra.mxu1 %v13327_v27  ;;  %4451 = vmatprep.subr.bf16.mxu0 %v13332_v28  ;;  %v13396_v27 = vld [vmem:[#allocation5 + $0x540] ss:$16 sps:$4 sm:$0xff]  }
 0x472   :  { %4492 = vmatprep.subr.bf16.mxu1 %v13335_v29  ;;  %v13399_v28 = vld [vmem:[#allocation5 + $0x740] ss:$16 sps:$4 sm:$0xff]   ;;  %v13404_v29 = vld [vmem:[#allocation5 + $0x524] ss:$16 sps:$4 sm:$0xff]  }
 0x474   :  { %4452 = vmatpush1.bf16.msra.mxu0 %v13330_v30  ;;  %v13407_v30 = vld [vmem:[#allocation5 + $0x724] ss:$16 sps:$4 sm:$0xff]  }
 0x475   :  { %4493 = vmatpush1.bf16.msra.mxu1 %v13333_v31  ;;  %4453 = vmatprep.subr.bf16.mxu0 %v13338_v33  ;;  %v13402_v31 = vld [vmem:[#allocation5 + $0x520] ss:$16 sps:$4 sm:$0xff]  }
 0x476   :  { %4494 = vmatprep.subr.bf16.mxu1 %v13341_v51  ;;  %v13405_v33 = vld [vmem:[#allocation5 + $0x720] ss:$16 sps:$4 sm:$0xff]   ;;  %v13410_v51 = vld [vmem:[#allocation5 + $0x504] ss:$16 sps:$4 sm:$0xff]  }
 0x478   :  { %4454 = vmatpush1.bf16.msra.mxu0 %v13336_v52  ;;  %v3791_v52 = vrot.slane %v15497_v39, 1 }
 0x479   :  { %4495 = vmatpush1.bf16.msra.mxu1 %v13339_v54  ;;  %4455 = vmatprep.subr.bf16.mxu0 %v13344_v34  ;;  %v3795_v54 = vrot.slane %v15500_v32, 1  ;;  %v13413_v34 = vld [vmem:[#allocation5 + $0x704] ss:$16 sps:$4 sm:$0xff]  }
 0x47a   :  { %4496 = vmatprep.subr.bf16.mxu1 %v13347_v36  ;;  %v13408_v36 = vld [vmem:[#allocation5 + $0x500] ss:$16 sps:$4 sm:$0xff]  }
 0x47c   :  { %4456 = vmatpush1.bf16.msra.mxu0 %v13342_v38  ;;  %v13411_v38 = vld [vmem:[#allocation5 + $0x700] ss:$16 sps:$4 sm:$0xff]  }
 0x47d   :  { %4497 = vmatpush1.bf16.msra.mxu1 %v13345_v41  ;;  %4457 = vmatprep.subr.bf16.mxu0 %v13350_v43  ;;  %v3792_v41 = vsel %vm2838_vm8, %v15491_v37, %v3791_v52  ;;  %v3796_v43 = vsel %vm2838_vm8, %v15495_v50, %v3795_v54  ;;  %v13476_v52 = vld [vmem:[#allocation5 + $0x5ac] ss:$16 sps:$4 sm:$0xff]  }
 0x47e   :  { %4498 = vmatprep.subr.bf16.mxu1 %v13353_v35  ;;  %v13416_v35 = vld [vmem:[#allocation5 + $0x4ec] ss:$16 sps:$4 sm:$0xff]  }
 0x47f   :  { %v13479_v54 = vld [vmem:[#allocation5 + $0x7ac] ss:$16 sps:$4 sm:$0xff]  }
 0x480   :  { %4458 = vmatpush1.bf16.msra.mxu0 %v13348_v44  ;;  %v13419_v44 = vld [vmem:[#allocation5 + $0x6ec] ss:$16 sps:$4 sm:$0xff]  }
 0x481   :  { %4499 = vmatpush1.bf16.msra.mxu1 %v13351_v45  ;;  %4459 = vmatprep.subr.bf16.mxu0 %v13356_v46  ;;  %v15535_v45 = vpack.c.b16 %v3792_v41, %v3792_v41  ;;  %v15537_v46 = vpack.c.b16 %v3796_v43, %v3796_v43  ;;  %v13485_v41 = vld [vmem:[#allocation5 + $0x78c] ss:$16 sps:$4 sm:$0xff]   ;;  %v13480_v43 = vld [vmem:[#allocation5 + $0x588] ss:$16 sps:$4 sm:$0xff]  }
 0x482   :  { %4500 = vmatprep.subr.bf16.mxu1 %v13359_v47  ;;  %v13414_v47 = vld [vmem:[#allocation5 + $0x4e8] ss:$16 sps:$4 sm:$0xff]  }
 0x484   :  { %4460 = vmatpush1.bf16.msra.mxu0 %v13354_v48  ;;  %v13417_v48 = vld [vmem:[#allocation5 + $0x6e8] ss:$16 sps:$4 sm:$0xff]  }
 0x485   :  { %4501 = vmatpush1.bf16.msra.mxu1 %v13357_v49  ;;  %4461 = vmatprep.subr.bf16.mxu0 %v13362_v53  ;;  %v13422_v49 = vld [vmem:[#allocation5 + $0x4cc] ss:$16 sps:$4 sm:$0xff]  }
 0x486   :  { %4502 = vmatprep.subr.bf16.mxu1 %v13365_v55  ;;  %v13425_v53 = vld [vmem:[#allocation5 + $0x6cc] ss:$16 sps:$4 sm:$0xff]   ;;  %v13420_v55 = vld [vmem:[#allocation5 + $0x4c8] ss:$16 sps:$4 sm:$0xff]  }
 0x488   :  { %4462 = vmatpush1.bf16.msra.mxu0 %v13360_v56  ;;  %v13423_v56 = vld [vmem:[#allocation5 + $0x6c8] ss:$16 sps:$4 sm:$0xff]  }
 0x489   :  { %4503 = vmatpush1.bf16.msra.mxu1 %v13363_v57  ;;  %4463 = vmatprep.subr.bf16.mxu0 %v13368_v59  ;;  %v13428_v57 = vld [vmem:[#allocation5 + $0x4ac] ss:$16 sps:$4 sm:$0xff]  }
 0x48a   :  { %4504 = vmatprep.subr.bf16.mxu1 %v13371_v60  ;;  %v13431_v59 = vld [vmem:[#allocation5 + $0x6ac] ss:$16 sps:$4 sm:$0xff]   ;;  %v13426_v60 = vld [vmem:[#allocation5 + $0x4a8] ss:$16 sps:$4 sm:$0xff]  }
 0x48c   :  { %4464 = vmatpush2.bf16.msra.mxu0 %v13366_v61  ;;  %v13429_v61 = vld [vmem:[#allocation5 + $0x6a8] ss:$16 sps:$4 sm:$0xff]  }
 0x48d   :  { %4505 = vmatpush2.bf16.msra.mxu1 %v13369_v63  ;;  %4465 = vmatprep.subr.bf16.mxu0 %v13374_v1  ;;  %v13434_v63 = vld [vmem:[#allocation5 + $0x48c] ss:$16 sps:$4 sm:$0xff]  }
 0x48e   :  { %4506 = vmatprep.subr.bf16.mxu1 %v13377_v3  ;;  %v13437_v1 = vld [vmem:[#allocation5 + $0x68c] ss:$16 sps:$4 sm:$0xff]   ;;  %v13432_v3 = vld [vmem:[#allocation5 + $0x488] ss:$16 sps:$4 sm:$0xff]  }
 0x490   :  { %4466 = vmatpush2.bf16.msra.mxu0 %v13372_v5  ;;  %v13435_v5 = vld [vmem:[#allocation5 + $0x688] ss:$16 sps:$4 sm:$0xff]  }
 0x491   :  { %4507 = vmatpush2.bf16.msra.mxu1 %v13375_v6  ;;  %4467 = vmatprep.subr.bf16.mxu0 %v13380_v7  ;;  %v13440_v6 = vld [vmem:[#allocation5 + $0x46c] ss:$16 sps:$4 sm:$0xff]  }
 0x492   :  { %4508 = vmatprep.subr.bf16.mxu1 %v13383_v8  ;;  %v13443_v7 = vld [vmem:[#allocation5 + $0x66c] ss:$16 sps:$4 sm:$0xff]   ;;  %v13438_v8 = vld [vmem:[#allocation5 + $0x468] ss:$16 sps:$4 sm:$0xff]  }
 0x494   :  { %4468 = vmatpush2.bf16.msra.mxu0 %v13378_v13  ;;  %v13449_v13 = vld [vmem:[#allocation5 + $0x64c] ss:$16 sps:$4 sm:$0xff]  }
 0x495   :  { %4509 = vmatpush2.bf16.msra.mxu1 %v13381_v14  ;;  %4469 = vmatprep.subr.bf16.mxu0 %v13386_v15  ;;  %v13444_v14 = vld [vmem:[#allocation5 + $0x448] ss:$16 sps:$4 sm:$0xff]  }
 0x496   :  { %4510 = vmatprep.subr.bf16.mxu1 %v13389_v17  ;;  %v13447_v15 = vld [vmem:[#allocation5 + $0x648] ss:$16 sps:$4 sm:$0xff]   ;;  %v13452_v17 = vld [vmem:[#allocation5 + $0x42c] ss:$16 sps:$4 sm:$0xff]  }
 0x498   :  { %4470 = vmatpush2.bf16.msra.mxu0 %v13384_v20  ;;  %v13455_v20 = vld [vmem:[#allocation5 + $0x62c] ss:$16 sps:$4 sm:$0xff]  }
 0x499   :  { %4511 = vmatpush2.bf16.msra.mxu1 %v13387_v16  ;;  %4471 = vmatprep.subr.bf16.mxu0 %v13392_v18  ;;  %v13450_v16 = vld [vmem:[#allocation5 + $0x428] ss:$16 sps:$4 sm:$0xff]  }
 0x49a   :  { %4512 = vmatprep.subr.bf16.mxu1 %v13395_v19  ;;  %v13453_v18 = vld [vmem:[#allocation5 + $0x628] ss:$16 sps:$4 sm:$0xff]   ;;  %v13458_v19 = vld [vmem:[#allocation5 + $0x40c] ss:$16 sps:$4 sm:$0xff]  }
 0x49c   :  { %4472 = vmatpush2.bf16.msra.mxu0 %v13390_v21  ;;  %v13461_v21 = vld [vmem:[#allocation5 + $0x60c] ss:$16 sps:$4 sm:$0xff]  }
 0x49d   :  { %4513 = vmatpush2.bf16.msra.mxu1 %v13393_v22  ;;  %4473 = vmatprep.subr.bf16.mxu0 %v13398_v23  ;;  %v13456_v22 = vld [vmem:[#allocation5 + $0x408] ss:$16 sps:$4 sm:$0xff]  }
 0x49e   :  { %4514 = vmatprep.subr.bf16.mxu1 %v13401_v26  ;;  %v13459_v23 = vld [vmem:[#allocation5 + $0x608] ss:$16 sps:$4 sm:$0xff]   ;;  %v13464_v26 = vld [vmem:[#allocation5 + $0x5ec] ss:$16 sps:$4 sm:$0xff]  }
 0x4a0   :  { %4474 = vmatpush2.bf16.msra.mxu0 %v13396_v27  ;;  %v13467_v27 = vld [vmem:[#allocation5 + $0x7ec] ss:$16 sps:$4 sm:$0xff]  }
 0x4a1   :  { %4515 = vmatpush2.bf16.msra.mxu1 %v13399_v28  ;;  %4475 = vmatprep.subr.bf16.mxu0 %v13404_v29  ;;  %v13462_v28 = vld [vmem:[#allocation5 + $0x5e8] ss:$16 sps:$4 sm:$0xff]  }
 0x4a2   :  { %4516 = vmatprep.subr.bf16.mxu1 %v13407_v30  ;;  %v13465_v29 = vld [vmem:[#allocation5 + $0x7e8] ss:$16 sps:$4 sm:$0xff]   ;;  %v13470_v30 = vld [vmem:[#allocation5 + $0x5cc] ss:$16 sps:$4 sm:$0xff]  }
 0x4a4   :  { %4476 = vmatpush2.bf16.msra.mxu0 %v13402_v31  ;;  %v13473_v31 = vld [vmem:[#allocation5 + $0x7cc] ss:$16 sps:$4 sm:$0xff]  }
 0x4a5   :  { %4517 = vmatpush2.bf16.msra.mxu1 %v13405_v33  ;;  %4477 = vmatprep.subr.bf16.mxu0 %v13410_v51  ;;  %v13468_v33 = vld [vmem:[#allocation5 + $0x5c8] ss:$16 sps:$4 sm:$0xff]  }
 0x4a6   :  { %4518 = vmatprep.subr.bf16.mxu1 %v13413_v34  ;;  %v13471_v51 = vld [vmem:[#allocation5 + $0x7c8] ss:$16 sps:$4 sm:$0xff]  }
 0x4a7   :  { %v13474_v34 = vld [vmem:[#allocation5 + $0x5a8] ss:$16 sps:$4 sm:$0xff]  }
 0x4a8   :  { %4478 = vmatpush2.bf16.msra.mxu0 %v13408_v36  ;;  %v13477_v36 = vld [vmem:[#allocation5 + $0x7a8] ss:$16 sps:$4 sm:$0xff]  }
 0x4a9   :  { %4519 = vmatpush2.bf16.msra.mxu1 %v13411_v38  ;;  %4529 = vmatprep.subr.bf16.mxu0 %v13416_v35  ;;  %v13482_v38 = vld [vmem:[#allocation5 + $0x58c] ss:$16 sps:$4 sm:$0xff]   ;;  %v13483_v35 = vld [vmem:[#allocation5 + $0x788] ss:$16 sps:$4 sm:$0xff]  }
 0x4aa   :  { %4570 = vmatprep.subr.bf16.mxu1 %v13419_v44  ;;  %v13488_v44 = vld [vmem:[#allocation5 + $0x56c] ss:$16 sps:$4 sm:$0xff]  }
 0x4ab   :  { %4480 = vmatmul.mubr.bf16.vlgmr.msra.gmra.mxu0 %v15535_v45 }
 0x4ac   :  { %4521 = vmatmul.mubr.bf16.vlgmr.msra.gmra.mxu1 %v15537_v46  ;;  %4530 = vmatpush1.bf16.msra.mxu0 %v13414_v47  ;;  %v13491_v47 = vld [vmem:[#allocation5 + $0x76c] ss:$16 sps:$4 sm:$0xff]  }
 0x4ad   :  { %4571 = vmatpush1.bf16.msra.mxu1 %v13417_v48  ;;  %4531 = vmatprep.subr.bf16.mxu0 %v13422_v49  ;;  %v13486_v48 = vld [vmem:[#allocation5 + $0x568] ss:$16 sps:$4 sm:$0xff]  }
 0x4ae   :  { %4572 = vmatprep.subr.bf16.mxu1 %v13425_v53  ;;  %4561 = vmatprep.mubr.bf16.mxu0 %v15521_v24  ;;  %v13441_v24 = vld [vmem:[#allocation5 + $0x668] ss:$16 sps:$4 sm:$0xff]   ;;  %v13494_v53 = vld [vmem:[#allocation5 + $0x54c] ss:$16 sps:$4 sm:$0xff]  }
 0x4af   :  { %4602 = vmatprep.mubr.bf16.mxu1 %v15523_v25  ;;  %v13446_v25 = vld [vmem:[#allocation5 + $0x44c] ss:$16 sps:$4 sm:$0xff]   ;;  %v13489_v49 = vld [vmem:[#allocation5 + $0x768] ss:$16 sps:$4 sm:$0xff]  }
 0x4b0   :  { %4532 = vmatpush1.bf16.msra.mxu0 %v13420_v55  ;;  %v13497_v55 = vld [vmem:[#allocation5 + $0x74c] ss:$16 sps:$4 sm:$0xff]  }
 0x4b1   :  { %4573 = vmatpush1.bf16.msra.mxu1 %v13423_v56  ;;  %4533 = vmatprep.subr.bf16.mxu0 %v13428_v57  ;;  %v13492_v56 = vld [vmem:[#allocation5 + $0x548] ss:$16 sps:$4 sm:$0xff]  }
 0x4b2   :  { %4574 = vmatprep.subr.bf16.mxu1 %v13431_v59  ;;  %v13495_v57 = vld [vmem:[#allocation5 + $0x748] ss:$16 sps:$4 sm:$0xff]   ;;  %v13500_v59 = vld [vmem:[#allocation5 + $0x52c] ss:$16 sps:$4 sm:$0xff]  }
 0x4b4   :  { %4534 = vmatpush1.bf16.msra.mxu0 %v13426_v60  ;;  %v13503_v60 = vld [vmem:[#allocation5 + $0x72c] ss:$16 sps:$4 sm:$0xff]  }
 0x4b5   :  { %4575 = vmatpush1.bf16.msra.mxu1 %v13429_v61  ;;  %4535 = vmatprep.subr.bf16.mxu0 %v13434_v63  ;;  %v13498_v61 = vld [vmem:[#allocation5 + $0x528] ss:$16 sps:$4 sm:$0xff]  }
 0x4b6   :  { %4576 = vmatprep.subr.bf16.mxu1 %v13437_v1  ;;  %v13501_v63 = vld [vmem:[#allocation5 + $0x728] ss:$16 sps:$4 sm:$0xff]   ;;  %v13506_v1 = vld [vmem:[#allocation5 + $0x50c] ss:$16 sps:$4 sm:$0xff]  }
 0x4b8   :  { %4536 = vmatpush1.bf16.msra.mxu0 %v13432_v3  ;;  %v13509_v3 = vld [vmem:[#allocation5 + $0x70c] ss:$16 sps:$4 sm:$0xff]  }
 0x4b9   :  { %4577 = vmatpush1.bf16.msra.mxu1 %v13435_v5  ;;  %4537 = vmatprep.subr.bf16.mxu0 %v13440_v6  ;;  %v13504_v5 = vld [vmem:[#allocation5 + $0x508] ss:$16 sps:$4 sm:$0xff]  }
 0x4ba   :  { %4578 = vmatprep.subr.bf16.mxu1 %v13443_v7  ;;  %v13507_v6 = vld [vmem:[#allocation5 + $0x708] ss:$16 sps:$4 sm:$0xff]   ;;  %v4747_v7 = vrot.slane %v15465_v9, 2 }
 0x4bc   :  { %4538 = vmatpush1.bf16.msra.mxu0 %v13438_v8  ;;  %v4748_v8 = vrot.slane %v15467_v10, 1 }
 0x4bd   :  { %4579 = vmatpush1.bf16.msra.mxu1 %v13441_v24  ;;  %4539 = vmatprep.subr.bf16.mxu0 %v13446_v25  ;;  %v4753_v24 = vrot.slane %v15469_v11, 2  ;;  %v4754_v25 = vrot.slane %v15471_v12, 1 }
 0x4be   :  { %4580 = vmatprep.subr.bf16.mxu1 %v13449_v13  ;;  %v13512_v13 = vld [vmem:[#allocation5 + $0x8e4] ss:$16 sps:$4 sm:$0xff]  }
 0x4c0   :  { %4540 = vmatpush1.bf16.msra.mxu0 %v13444_v14  ;;  %v13515_v14 = vld [vmem:[#allocation5 + $0xae4] ss:$16 sps:$4 sm:$0xff]  }
 0x4c1   :  { %4581 = vmatpush1.bf16.msra.mxu1 %v13447_v15  ;;  %4541 = vmatprep.subr.bf16.mxu0 %v13452_v17  ;;  %v13510_v15 = vld [vmem:[#allocation5 + $0x8e0] ss:$16 sps:$4 sm:$0xff]  }
 0x4c2   :  { %4582 = vmatprep.subr.bf16.mxu1 %v13455_v20  ;;  %v13513_v17 = vld [vmem:[#allocation5 + $0xae0] ss:$16 sps:$4 sm:$0xff]   ;;  %v4749_v20 = vsel %vm2838_vm8, %v4748_v8, %v4747_v7  ;;  %v13560_v8 = vld [vmem:[#allocation5 + $0x9e4] ss:$16 sps:$4 sm:$0xff]  }
 0x4c3   :  { %v13555_v7 = vld [vmem:[#allocation5 + $0xa00] ss:$16 sps:$4 sm:$0xff]  }
 0x4c4   :  { %4542 = vmatpush1.bf16.msra.mxu0 %v13450_v16  ;;  %v4755_v16 = vsel %vm2838_vm8, %v4754_v25, %v4753_v24  ;;  %v13563_v24 = vld [vmem:[#allocation5 + $0xbe4] ss:$16 sps:$4 sm:$0xff]   ;;  %v13558_v25 = vld [vmem:[#allocation5 + $0x9e0] ss:$16 sps:$4 sm:$0xff]  }
 0x4c5   :  { %4583 = vmatpush1.bf16.msra.mxu1 %v13453_v18  ;;  %4543 = vmatprep.subr.bf16.mxu0 %v13458_v19  ;;  %v13518_v18 = vld [vmem:[#allocation5 + $0x8c4] ss:$16 sps:$4 sm:$0xff]  }
 0x4c6   :  { %4584 = vmatprep.subr.bf16.mxu1 %v13461_v21  ;;  %v13521_v19 = vld [vmem:[#allocation5 + $0xac4] ss:$16 sps:$4 sm:$0xff]   ;;  %v13516_v21 = vld [vmem:[#allocation5 + $0x8c0] ss:$16 sps:$4 sm:$0xff]  }
 0x4c8   :  { %4544 = vmatpush1.bf16.msra.mxu0 %v13456_v22  ;;  %v13519_v22 = vld [vmem:[#allocation5 + $0xac0] ss:$16 sps:$4 sm:$0xff]  }
 0x4c9   :  { %4585 = vmatpush1.bf16.msra.mxu1 %v13459_v23  ;;  %4545 = vmatprep.subr.bf16.mxu0 %v13464_v26  ;;  %v15549_v23 = vpack.c.b16 %v4749_v20, %v4749_v20  ;;  %v15551_v26 = vpack.c.b16 %v4755_v16, %v4755_v16  ;;  %v13567_v20 = vld [vmem:[#allocation5 + $0xbc0] ss:$16 sps:$4 sm:$0xff]   ;;  %v13572_v16 = vld [vmem:[#allocation5 + $0x9a4] ss:$16 sps:$4 sm:$0xff]  }
 0x4ca   :  { %4586 = vmatprep.subr.bf16.mxu1 %v13467_v27 }
 0x4cc   :  { %4546 = vmatpush2.bf16.msra.mxu0 %v13462_v28 }
 0x4cd   :  { %4587 = vmatpush2.bf16.msra.mxu1 %v13465_v29  ;;  %4547 = vmatprep.subr.bf16.mxu0 %v13470_v30 }
 0x4ce   :  { %4588 = vmatprep.subr.bf16.mxu1 %v13473_v31 }
 0x4d0   :  { %4548 = vmatpush2.bf16.msra.mxu0 %v13468_v33  ;;  %v13524_v33 = vld [vmem:[#allocation5 + $0x8a4] ss:$16 sps:$4 sm:$0xff]  }
 0x4d1   :  { %4589 = vmatpush2.bf16.msra.mxu1 %v13471_v51  ;;  %4549 = vmatprep.subr.bf16.mxu0 %v13476_v52  ;;  %v13527_v51 = vld [vmem:[#allocation5 + $0xaa4] ss:$16 sps:$4 sm:$0xff]  }
 0x4d2   :  { %4590 = vmatprep.subr.bf16.mxu1 %v13479_v54  ;;  %v13522_v54 = vld [vmem:[#allocation5 + $0x8a0] ss:$16 sps:$4 sm:$0xff]  }
 0x4d4   :  { %4550 = vmatpush2.bf16.msra.mxu0 %v13474_v34  ;;  %v13525_v34 = vld [vmem:[#allocation5 + $0xaa0] ss:$16 sps:$4 sm:$0xff]  }
 0x4d5   :  { %4591 = vmatpush2.bf16.msra.mxu1 %v13477_v36  ;;  %4551 = vmatprep.subr.bf16.mxu0 %v13482_v38 }
 0x4d6   :  { %4592 = vmatprep.subr.bf16.mxu1 %v13485_v41  ;;  %v13530_v41 = vld [vmem:[#allocation5 + $0x884] ss:$16 sps:$4 sm:$0xff]  }
 0x4d8   :  { %4552 = vmatpush2.bf16.msra.mxu0 %v13480_v43  ;;  %v13533_v43 = vld [vmem:[#allocation5 + $0xa84] ss:$16 sps:$4 sm:$0xff]  }
 0x4d9   :  { %4593 = vmatpush2.bf16.msra.mxu1 %v13483_v35  ;;  %4553 = vmatprep.subr.bf16.mxu0 %v13488_v44  ;;  %v13528_v35 = vld [vmem:[#allocation5 + $0x880] ss:$16 sps:$4 sm:$0xff]  }
 0x4da   :  { %4594 = vmatprep.subr.bf16.mxu1 %v13491_v47  ;;  %v13531_v44 = vld [vmem:[#allocation5 + $0xa80] ss:$16 sps:$4 sm:$0xff]   ;;  %v13536_v47 = vld [vmem:[#allocation5 + $0x864] ss:$16 sps:$4 sm:$0xff]  }
 0x4dc   :  { %4554 = vmatpush2.bf16.msra.mxu0 %v13486_v48  ;;  %v13539_v48 = vld [vmem:[#allocation5 + $0xa64] ss:$16 sps:$4 sm:$0xff]  }
 0x4dd   :  { %4595 = vmatpush2.bf16.msra.mxu1 %v13489_v49  ;;  %4555 = vmatprep.subr.bf16.mxu0 %v13494_v53  ;;  %v13534_v49 = vld [vmem:[#allocation5 + $0x860] ss:$16 sps:$4 sm:$0xff]  }
 0x4de   :  { %4596 = vmatprep.subr.bf16.mxu1 %v13497_v55  ;;  %v13537_v53 = vld [vmem:[#allocation5 + $0xa60] ss:$16 sps:$4 sm:$0xff]   ;;  %v13542_v55 = vld [vmem:[#allocation5 + $0x844] ss:$16 sps:$4 sm:$0xff]  }
 0x4e0   :  { %4556 = vmatpush2.bf16.msra.mxu0 %v13492_v56  ;;  %v13545_v56 = vld [vmem:[#allocation5 + $0xa44] ss:$16 sps:$4 sm:$0xff]  }
 0x4e1   :  { %4597 = vmatpush2.bf16.msra.mxu1 %v13495_v57  ;;  %4557 = vmatprep.subr.bf16.mxu0 %v13500_v59  ;;  %v13540_v57 = vld [vmem:[#allocation5 + $0x840] ss:$16 sps:$4 sm:$0xff]  }
 0x4e2   :  { %4598 = vmatprep.subr.bf16.mxu1 %v13503_v60  ;;  %v13543_v59 = vld [vmem:[#allocation5 + $0xa40] ss:$16 sps:$4 sm:$0xff]   ;;  %v13548_v60 = vld [vmem:[#allocation5 + $0x824] ss:$16 sps:$4 sm:$0xff]  }
 0x4e4   :  { %4558 = vmatpush2.bf16.msra.mxu0 %v13498_v61  ;;  %v13551_v61 = vld [vmem:[#allocation5 + $0xa24] ss:$16 sps:$4 sm:$0xff]  }
 0x4e5   :  { %4599 = vmatpush2.bf16.msra.mxu1 %v13501_v63  ;;  %4559 = vmatprep.subr.bf16.mxu0 %v13506_v1  ;;  %v13546_v63 = vld [vmem:[#allocation5 + $0x820] ss:$16 sps:$4 sm:$0xff]  }
 0x4e6   :  { %4600 = vmatprep.subr.bf16.mxu1 %v13509_v3  ;;  %v13549_v1 = vld [vmem:[#allocation5 + $0xa20] ss:$16 sps:$4 sm:$0xff]   ;;  %v13554_v3 = vld [vmem:[#allocation5 + $0x804] ss:$16 sps:$4 sm:$0xff]  }
 0x4e8   :  { %4560 = vmatpush2.bf16.msra.mxu0 %v13504_v5  ;;  %v13557_v5 = vld [vmem:[#allocation5 + $0xa04] ss:$16 sps:$4 sm:$0xff]  }
 0x4e9   :  { %4601 = vmatpush2.bf16.msra.mxu1 %v13507_v6  ;;  %5404 = vmatprep.subr.bf16.mxu0 %v13512_v13  ;;  %v13552_v6 = vld [vmem:[#allocation5 + $0x800] ss:$16 sps:$4 sm:$0xff]  }
 0x4ea   :  { %5445 = vmatprep.subr.bf16.mxu1 %v13515_v14  ;;  %v13561_v13 = vld [vmem:[#allocation5 + $0xbe0] ss:$16 sps:$4 sm:$0xff]   ;;  %v13566_v14 = vld [vmem:[#allocation5 + $0x9c4] ss:$16 sps:$4 sm:$0xff]  }
 0x4eb   :  { %v3528_v27 = vpop.f32.mrf.mxu0  ;;  %4562 = vmatmul.mubr.bf16.vlgmr.msra.gmra.mxu0 %v15535_v45 }
 0x4ec   :  { %v3569_v28 = vpop.f32.mrf.mxu1  ;;  %4603 = vmatmul.mubr.bf16.vlgmr.msra.gmra.mxu1 %v15537_v46  ;;  %5405 = vmatpush1.bf16.msra.mxu0 %v13510_v15  ;;  %v13569_v15 = vld [vmem:[#allocation5 + $0xbc4] ss:$16 sps:$4 sm:$0xff]  }
 0x4ed   :  { %v15555_v29 = vadd.f32 %v3569_v28, %v3528_v27  ;;  %5446 = vmatpush1.bf16.msra.mxu1 %v13513_v17  ;;  %v3530_v30 = vpop.f32.mrf.mxu0  ;;  %5406 = vmatprep.subr.bf16.mxu0 %v13518_v18  ;;  %v13564_v17 = vld [vmem:[#allocation5 + $0x9c0] ss:$16 sps:$4 sm:$0xff]   ;;  %v13575_v18 = vld [vmem:[#allocation5 + $0xba4] ss:$16 sps:$4 sm:$0xff]  }
 0x4ee   :  { %v3571_v31 = vpop.f32.mrf.mxu1  ;;  %5447 = vmatprep.subr.bf16.mxu1 %v13521_v19  ;;  %5436 = vmatprep.mubr.bf16.mxu0 %v15549_v23  ;;  %v13570_v19 = vld [vmem:[#allocation5 + $0x9a0] ss:$16 sps:$4 sm:$0xff]   ;;  %v13581_v27 = vld [vmem:[#allocation5 + $0xb84] ss:$16 sps:$4 sm:$0xff]  }
 0x4ef   :  { %v15557_v52 = vadd.f32 %v3571_v31, %v3530_v30  ;;  %5477 = vmatprep.mubr.bf16.mxu1 %v15551_v26  ;;  %v3532_v45 = vpop.f32.mrf.mxu0  ;;  %v13576_v28 = vld [vmem:[#allocation5 + $0x980] ss:$16 sps:$4 sm:$0xff]   ;;  %v13584_v31 = vld [vmem:[#allocation5 + $0x964] ss:$16 sps:$4 sm:$0xff]  }
 0x4f0   :  { %v3573_v46 = vpop.f32.mrf.mxu1  ;;  %5407 = vmatpush1.bf16.msra.mxu0 %v13516_v21  ;;  %v13573_v21 = vld [vmem:[#allocation5 + $0xba0] ss:$16 sps:$4 sm:$0xff]   ;;  %v13593_v45 = vld [vmem:[#allocation5 + $0xb44] ss:$16 sps:$4 sm:$0xff]  }
 0x4f1   :  { %5448 = vmatpush1.bf16.msra.mxu1 %v13519_v22  ;;  %v3533_v36 = vpop.f32.mrf.mxu0  ;;  %5408 = vmatprep.subr.bf16.mxu0 %v13524_v33  ;;  %v13578_v22 = vld [vmem:[#allocation5 + $0x984] ss:$16 sps:$4 sm:$0xff]   ;;  %v13579_v30 = vld [vmem:[#allocation5 + $0xb80] ss:$16 sps:$4 sm:$0xff]  }
 0x4f2   :  { %v3574_v38 = vpop.f32.mrf.mxu1  ;;  %5449 = vmatprep.subr.bf16.mxu1 %v13527_v51  ;;  %v13587_v33 = vld [vmem:[#allocation5 + $0xb64] ss:$16 sps:$4 sm:$0xff]   ;;  %v13582_v51 = vld [vmem:[#allocation5 + $0x960] ss:$16 sps:$4 sm:$0xff]  }
 0x4f3   :  { %v13588_v46 = vld [vmem:[#allocation5 + $0x940] ss:$16 sps:$4 sm:$0xff]   ;;  %v13596_v38 = vld [vmem:[#allocation5 + $0x924] ss:$16 sps:$4 sm:$0xff]  }
 0x4f4   :  { %5409 = vmatpush1.bf16.msra.mxu0 %v13522_v54  ;;  %v13585_v54 = vld [vmem:[#allocation5 + $0xb60] ss:$16 sps:$4 sm:$0xff]  }
 0x4f5   :  { %5450 = vmatpush1.bf16.msra.mxu1 %v13525_v34  ;;  %5410 = vmatprep.subr.bf16.mxu0 %v13530_v41  ;;  %v13590_v34 = vld [vmem:[#allocation5 + $0x944] ss:$16 sps:$4 sm:$0xff]   ;;  %v13591_v36 = vld [vmem:[#allocation5 + $0xb40] ss:$16 sps:$4 sm:$0xff]  }
 0x4f6   :  { %5451 = vmatprep.subr.bf16.mxu1 %v13533_v43  ;;  %v13599_v41 = vld [vmem:[#allocation5 + $0xb24] ss:$16 sps:$4 sm:$0xff]   ;;  %v4744_v43 = vrot.slane %v15497_v39, 2 }
 0x4f8   :  { %5411 = vmatpush1.bf16.msra.mxu0 %v13528_v35  ;;  %v4745_v35 = vrot.slane %v15491_v37, 1 }
 0x4f9   :  { %5452 = vmatpush1.bf16.msra.mxu1 %v13531_v44  ;;  %5412 = vmatprep.subr.bf16.mxu0 %v13536_v47  ;;  %v4750_v44 = vrot.slane %v15500_v32, 2  ;;  %v13594_v47 = vld [vmem:[#allocation5 + $0x920] ss:$16 sps:$4 sm:$0xff]  }
 0x4fa   :  { %5453 = vmatprep.subr.bf16.mxu1 %v13539_v48  ;;  %v13597_v48 = vld [vmem:[#allocation5 + $0xb20] ss:$16 sps:$4 sm:$0xff]  }
 0x4fc   :  { %5413 = vmatpush1.bf16.msra.mxu0 %v13534_v49  ;;  %v4751_v49 = vrot.slane %v15495_v50, 1 }
 0x4fd   :  { %5454 = vmatpush1.bf16.msra.mxu1 %v13537_v53  ;;  %5414 = vmatprep.subr.bf16.mxu0 %v13542_v55  ;;  %v13602_v53 = vld [vmem:[#allocation5 + $0x904] ss:$16 sps:$4 sm:$0xff]  }
 0x4fe   :  { %5455 = vmatprep.subr.bf16.mxu1 %v13545_v56  ;;  %v13605_v55 = vld [vmem:[#allocation5 + $0xb04] ss:$16 sps:$4 sm:$0xff]   ;;  %v13600_v56 = vld [vmem:[#allocation5 + $0x900] ss:$16 sps:$4 sm:$0xff]  }
 0x500   :  { %5415 = vmatpush1.bf16.msra.mxu0 %v13540_v57  ;;  %v13603_v57 = vld [vmem:[#allocation5 + $0xb00] ss:$16 sps:$4 sm:$0xff]  }
 0x501   :  { %5456 = vmatpush1.bf16.msra.mxu1 %v13543_v59  ;;  %5416 = vmatprep.subr.bf16.mxu0 %v13548_v60  ;;  %v4746_v59 = vsel %vm2838_vm8, %v4745_v35, %v4744_v43  ;;  %v4752_v60 = vsel %vm2838_vm8, %v4751_v49, %v4750_v44  ;;  %v13639_v43 = vld [vmem:[#allocation5 + $0xa48] ss:$16 sps:$4 sm:$0xff]   ;;  %v13644_v35 = vld [vmem:[#allocation5 + $0x82c] ss:$16 sps:$4 sm:$0xff]  }
 0x502   :  { %5457 = vmatprep.subr.bf16.mxu1 %v13551_v61  ;;  %v13608_v61 = vld [vmem:[#allocation5 + $0x8ec] ss:$16 sps:$4 sm:$0xff]  }
 0x503   :  { %v13647_v44 = vld [vmem:[#allocation5 + $0xa2c] ss:$16 sps:$4 sm:$0xff]  }
 0x504   :  { %5417 = vmatpush1.bf16.msra.mxu0 %v13546_v63  ;;  %v13611_v63 = vld [vmem:[#allocation5 + $0xaec] ss:$16 sps:$4 sm:$0xff]  }
 0x505   :  { %5458 = vmatpush1.bf16.msra.mxu1 %v13549_v1  ;;  %5418 = vmatprep.subr.bf16.mxu0 %v13554_v3  ;;  %v13606_v1 = vld [vmem:[#allocation5 + $0x8e8] ss:$16 sps:$4 sm:$0xff]   ;;  %v15567_v3 = vpack.c.b16 %v4746_v59, %v4746_v59  ;;  %v13650_v49 = vld [vmem:[#allocation5 + $0x80c] ss:$16 sps:$4 sm:$0xff]  }
 0x506   :  { %5459 = vmatprep.subr.bf16.mxu1 %v13557_v5  ;;  %v15569_v5 = vpack.c.b16 %v4752_v60, %v4752_v60  ;;  %v13659_v59 = vld [vmem:[#allocation5 + $0xbec] ss:$16 sps:$4 sm:$0xff]   ;;  %v13654_v60 = vld [vmem:[#allocation5 + $0x9e8] ss:$16 sps:$4 sm:$0xff]  }
 0x508   :  { %5419 = vmatpush1.bf16.msra.mxu0 %v13552_v6  ;;  %v13609_v6 = vld [vmem:[#allocation5 + $0xae8] ss:$16 sps:$4 sm:$0xff]  }
 0x509   :  { %5460 = vmatpush1.bf16.msra.mxu1 %v13555_v7  ;;  %5420 = vmatprep.subr.bf16.mxu0 %v13560_v8  ;;  %v13614_v7 = vld [vmem:[#allocation5 + $0x8cc] ss:$16 sps:$4 sm:$0xff]  }
 0x50a   :  { %5461 = vmatprep.subr.bf16.mxu1 %v13563_v24  ;;  %v13617_v8 = vld [vmem:[#allocation5 + $0xacc] ss:$16 sps:$4 sm:$0xff]  }
 0x50c   :  { %5421 = vmatpush2.bf16.msra.mxu0 %v13558_v25 }
 0x50d   :  { %5462 = vmatpush2.bf16.msra.mxu1 %v13561_v13  ;;  %5422 = vmatprep.subr.bf16.mxu0 %v13566_v14  ;;  %v13612_v14 = vld [vmem:[#allocation5 + $0x8c8] ss:$16 sps:$4 sm:$0xff]  }
 0x50e   :  { %5463 = vmatprep.subr.bf16.mxu1 %v13569_v15  ;;  %v13615_v15 = vld [vmem:[#allocation5 + $0xac8] ss:$16 sps:$4 sm:$0xff]  }
 0x510   :  { %5423 = vmatpush2.bf16.msra.mxu0 %v13564_v17 }
 0x511   :  { %5464 = vmatpush2.bf16.msra.mxu1 %v13567_v20  ;;  %5424 = vmatprep.subr.bf16.mxu0 %v13572_v16  ;;  %v13620_v16 = vld [vmem:[#allocation5 + $0x8ac] ss:$16 sps:$4 sm:$0xff]  }
 0x512   :  { %5465 = vmatprep.subr.bf16.mxu1 %v13575_v18  ;;  %v13623_v18 = vld [vmem:[#allocation5 + $0xaac] ss:$16 sps:$4 sm:$0xff]  }
 0x514   :  { %5425 = vmatpush2.bf16.msra.mxu0 %v13570_v19 }
 0x515   :  { %5466 = vmatpush2.bf16.msra.mxu1 %v13573_v21  ;;  %5426 = vmatprep.subr.bf16.mxu0 %v13578_v22 }
 0x516   :  { %5467 = vmatprep.subr.bf16.mxu1 %v13581_v27  ;;  %v13618_v27 = vld [vmem:[#allocation5 + $0x8a8] ss:$16 sps:$4 sm:$0xff]  }
 0x518   :  { %5427 = vmatpush2.bf16.msra.mxu0 %v13576_v28  ;;  %v13621_v28 = vld [vmem:[#allocation5 + $0xaa8] ss:$16 sps:$4 sm:$0xff]  }
 0x519   :  { %5468 = vmatpush2.bf16.msra.mxu1 %v13579_v30  ;;  %5428 = vmatprep.subr.bf16.mxu0 %v13584_v31 }
 0x51a   :  { %5469 = vmatprep.subr.bf16.mxu1 %v13587_v33  ;;  %v13626_v33 = vld [vmem:[#allocation5 + $0x88c] ss:$16 sps:$4 sm:$0xff]  }
 0x51c   :  { %5429 = vmatpush2.bf16.msra.mxu0 %v13582_v51  ;;  %v13629_v51 = vld [vmem:[#allocation5 + $0xa8c] ss:$16 sps:$4 sm:$0xff]  }
 0x51d   :  { %5470 = vmatpush2.bf16.msra.mxu1 %v13585_v54  ;;  %5430 = vmatprep.subr.bf16.mxu0 %v13590_v34  ;;  %v13624_v54 = vld [vmem:[#allocation5 + $0x888] ss:$16 sps:$4 sm:$0xff]  }
 0x51e   :  { %5471 = vmatprep.subr.bf16.mxu1 %v13593_v45  ;;  %v13627_v34 = vld [vmem:[#allocation5 + $0xa88] ss:$16 sps:$4 sm:$0xff]  }
 0x51f   :  { %v13630_v45 = vld [vmem:[#allocation5 + $0x868] ss:$16 sps:$4 sm:$0xff]  }
 0x520   :  { %5431 = vmatpush2.bf16.msra.mxu0 %v13588_v46  ;;  %v13633_v46 = vld [vmem:[#allocation5 + $0xa68] ss:$16 sps:$4 sm:$0xff]  }
 0x521   :  { %5472 = vmatpush2.bf16.msra.mxu1 %v13591_v36  ;;  %5432 = vmatprep.subr.bf16.mxu0 %v13596_v38  ;;  %v13638_v36 = vld [vmem:[#allocation5 + $0x84c] ss:$16 sps:$4 sm:$0xff]  }
 0x522   :  { %5473 = vmatprep.subr.bf16.mxu1 %v13599_v41  ;;  %v13641_v38 = vld [vmem:[#allocation5 + $0xa4c] ss:$16 sps:$4 sm:$0xff]   ;;  %v13636_v41 = vld [vmem:[#allocation5 + $0x848] ss:$16 sps:$4 sm:$0xff]  }
 0x524   :  { %5433 = vmatpush2.bf16.msra.mxu0 %v13594_v47  ;;  %v13642_v47 = vld [vmem:[#allocation5 + $0x828] ss:$16 sps:$4 sm:$0xff]  }
 0x525   :  { %5474 = vmatpush2.bf16.msra.mxu1 %v13597_v48  ;;  %5434 = vmatprep.subr.bf16.mxu0 %v13602_v53  ;;  %v13645_v48 = vld [vmem:[#allocation5 + $0xa28] ss:$16 sps:$4 sm:$0xff]   ;;  %v13653_v53 = vld [vmem:[#allocation5 + $0xa0c] ss:$16 sps:$4 sm:$0xff]  }
 0x526   :  { %5475 = vmatprep.subr.bf16.mxu1 %v13605_v55  ;;  %v13648_v55 = vld [vmem:[#allocation5 + $0x808] ss:$16 sps:$4 sm:$0xff]  }
 0x528   :  { %5435 = vmatpush2.bf16.msra.mxu0 %v13600_v56  ;;  %v13651_v56 = vld [vmem:[#allocation5 + $0xa08] ss:$16 sps:$4 sm:$0xff]  }
 0x529   :  { %5476 = vmatpush2.bf16.msra.mxu1 %v13603_v57  ;;  %5486 = vmatprep.subr.bf16.mxu0 %v13608_v61  ;;  %v13656_v57 = vld [vmem:[#allocation5 + $0x9ec] ss:$16 sps:$4 sm:$0xff]   ;;  %v13657_v61 = vld [vmem:[#allocation5 + $0xbe8] ss:$16 sps:$4 sm:$0xff]  }
 0x52a   :  { %5527 = vmatprep.subr.bf16.mxu1 %v13611_v63  ;;  %v13662_v63 = vld [vmem:[#allocation5 + $0x9cc] ss:$16 sps:$4 sm:$0xff]  }
 0x52b   :  { %v3610_v24 = vpop.f32.mrf.mxu0  ;;  %5437 = vmatmul.mubr.bf16.vlgmr.msra.gmra.mxu0 %v15567_v3 }
 0x52c   :  { %v3651_v25 = vpop.f32.mrf.mxu1  ;;  %5478 = vmatmul.mubr.bf16.vlgmr.msra.gmra.mxu1 %v15569_v5  ;;  %5487 = vmatpush1.bf16.msra.mxu0 %v13606_v1  ;;  %v13665_v1 = vld [vmem:[#allocation5 + $0xbcc] ss:$16 sps:$4 sm:$0xff]  }
 0x52d   :  { %v15573_v13 = vadd.f32 %v3651_v25, %v3610_v24  ;;  %5528 = vmatpush1.bf16.msra.mxu1 %v13609_v6  ;;  %v3612_v17 = vpop.f32.mrf.mxu0  ;;  %5488 = vmatprep.subr.bf16.mxu0 %v13614_v7  ;;  %v13660_v6 = vld [vmem:[#allocation5 + $0x9c8] ss:$16 sps:$4 sm:$0xff]   ;;  %v13671_v24 = vld [vmem:[#allocation5 + $0xbac] ss:$16 sps:$4 sm:$0xff]  }
 0x52e   :  { %v3653_v20 = vpop.f32.mrf.mxu1  ;;  %5529 = vmatprep.subr.bf16.mxu1 %v13617_v8  ;;  %5518 = vmatprep.mubr.bf16.mxu0 %v15549_v23  ;;  %v13632_v23 = vld [vmem:[#allocation5 + $0x86c] ss:$16 sps:$4 sm:$0xff]   ;;  %v13663_v7 = vld [vmem:[#allocation5 + $0xbc8] ss:$16 sps:$4 sm:$0xff]  }
 0x52f   :  { %v15575_v19 = vadd.f32 %v3653_v20, %v3612_v17  ;;  %5559 = vmatprep.mubr.bf16.mxu1 %v15551_v26  ;;  %v3614_v21 = vpop.f32.mrf.mxu0  ;;  %v13635_v26 = vld [vmem:[#allocation5 + $0xa6c] ss:$16 sps:$4 sm:$0xff]   ;;  %v13666_v25 = vld [vmem:[#allocation5 + $0x9a8] ss:$16 sps:$4 sm:$0xff]  }
 0x530   :  { %v3655_v22 = vpop.f32.mrf.mxu1  ;;  %5489 = vmatpush1.bf16.msra.mxu0 %v13612_v14  ;;  %v13668_v8 = vld [vmem:[#allocation5 + $0x9ac] ss:$16 sps:$4 sm:$0xff]   ;;  %v13669_v14 = vld [vmem:[#allocation5 + $0xba8] ss:$16 sps:$4 sm:$0xff]  }
 0x531   :  { %5530 = vmatpush1.bf16.msra.mxu1 %v13615_v15  ;;  %v3615_v30 = vpop.f32.mrf.mxu0  ;;  %5490 = vmatprep.subr.bf16.mxu0 %v13620_v16  ;;  %v13674_v15 = vld [vmem:[#allocation5 + $0x98c] ss:$16 sps:$4 sm:$0xff]   ;;  %v13672_v20 = vld [vmem:[#allocation5 + $0x988] ss:$16 sps:$4 sm:$0xff]  }
 0x532   :  { %v3656_v31 = vpop.f32.mrf.mxu1  ;;  %5531 = vmatprep.subr.bf16.mxu1 %v13623_v18  ;;  %v13677_v17 = vld [vmem:[#allocation5 + $0xb8c] ss:$16 sps:$4 sm:$0xff]   ;;  %v13675_v16 = vld [vmem:[#allocation5 + $0xb88] ss:$16 sps:$4 sm:$0xff]  }
 0x533   :  { %v13680_v18 = vld [vmem:[#allocation5 + $0x96c] ss:$16 sps:$4 sm:$0xff]   ;;  %v13678_v22 = vld [vmem:[#allocation5 + $0x968] ss:$16 sps:$4 sm:$0xff]  }
 0x534   :  { %5491 = vmatpush1.bf16.msra.mxu0 %v13618_v27  ;;  %v13683_v21 = vld [vmem:[#allocation5 + $0xb6c] ss:$16 sps:$4 sm:$0xff]   ;;  %v13681_v27 = vld [vmem:[#allocation5 + $0xb68] ss:$16 sps:$4 sm:$0xff]  }
 0x535   :  { %5532 = vmatpush1.bf16.msra.mxu1 %v13621_v28  ;;  %5492 = vmatprep.subr.bf16.mxu0 %v13626_v33  ;;  %v13686_v28 = vld [vmem:[#allocation5 + $0x94c] ss:$16 sps:$4 sm:$0xff]   ;;  %v13684_v31 = vld [vmem:[#allocation5 + $0x948] ss:$16 sps:$4 sm:$0xff]  }
 0x536   :  { %5533 = vmatprep.subr.bf16.mxu1 %v13629_v51  ;;  %v13689_v30 = vld [vmem:[#allocation5 + $0xb4c] ss:$16 sps:$4 sm:$0xff]   ;;  %v13687_v33 = vld [vmem:[#allocation5 + $0xb48] ss:$16 sps:$4 sm:$0xff]  }
 0x537   :  { %v13692_v51 = vld [vmem:[#allocation5 + $0x92c] ss:$16 sps:$4 sm:$0xff]  }
 0x538   :  { %5493 = vmatpush1.bf16.msra.mxu0 %v13624_v54  ;;  %v13695_v54 = vld [vmem:[#allocation5 + $0xb2c] ss:$16 sps:$4 sm:$0xff]  }
 0x539   :  { %5534 = vmatpush1.bf16.msra.mxu1 %v13627_v34  ;;  %5494 = vmatprep.subr.bf16.mxu0 %v13632_v23  ;;  %v13690_v34 = vld [vmem:[#allocation5 + $0x928] ss:$16 sps:$4 sm:$0xff]  }
 0x53a   :  { %5535 = vmatprep.subr.bf16.mxu1 %v13635_v26  ;;  %v13693_v23 = vld [vmem:[#allocation5 + $0xb28] ss:$16 sps:$4 sm:$0xff]   ;;  %v13698_v26 = vld [vmem:[#allocation5 + $0x90c] ss:$16 sps:$4 sm:$0xff]  }
 0x53c   :  { %5495 = vmatpush1.bf16.msra.mxu0 %v13630_v45  ;;  %v13701_v45 = vld [vmem:[#allocation5 + $0xb0c] ss:$16 sps:$4 sm:$0xff]  }
 0x53d   :  { %5536 = vmatpush1.bf16.msra.mxu1 %v13633_v46  ;;  %5496 = vmatprep.subr.bf16.mxu0 %v13638_v36  ;;  %v5704_v46 = vrot.slane %v15465_v9, 3  ;;  %v5705_v36 = vrot.slane %v15467_v10, 2 }
 0x53e   :  { %5537 = vmatprep.subr.bf16.mxu1 %v13641_v38  ;;  %v5710_v38 = vrot.slane %v15469_v11, 3 }
 0x540   :  { %5497 = vmatpush1.bf16.msra.mxu0 %v13636_v41  ;;  %v5711_v41 = vrot.slane %v15471_v12, 2 }
 0x541   :  { %5538 = vmatpush1.bf16.msra.mxu1 %v13639_v43  ;;  %5498 = vmatprep.subr.bf16.mxu0 %v13644_v35  ;;  %v13696_v43 = vld [vmem:[#allocation5 + $0x908] ss:$16 sps:$4 sm:$0xff]  }
 0x542   :  { %5539 = vmatprep.subr.bf16.mxu1 %v13647_v44  ;;  %v13699_v35 = vld [vmem:[#allocation5 + $0xb08] ss:$16 sps:$4 sm:$0xff]   ;;  %v13704_v44 = vld [vmem:[#allocation5 + $0xce4] ss:$16 sps:$4 sm:$0xff]  }
 0x544   :  { %5499 = vmatpush1.bf16.msra.mxu0 %v13642_v47  ;;  %v13707_v47 = vld [vmem:[#allocation5 + $0xee4] ss:$16 sps:$4 sm:$0xff]  }
 0x545   :  { %5540 = vmatpush1.bf16.msra.mxu1 %v13645_v48  ;;  %5500 = vmatprep.subr.bf16.mxu0 %v13650_v49  ;;  %v5706_v48 = vsel %vm2838_vm8, %v5705_v36, %v5704_v46  ;;  %v5712_v49 = vsel %vm2838_vm8, %v5711_v41, %v5710_v38  ;;  %v13743_v46 = vld [vmem:[#allocation5 + $0xe24] ss:$16 sps:$4 sm:$0xff]   ;;  %v13738_v36 = vld [vmem:[#allocation5 + $0xc20] ss:$16 sps:$4 sm:$0xff]  }
 0x546   :  { %5541 = vmatprep.subr.bf16.mxu1 %v13653_v53  ;;  %v13702_v53 = vld [vmem:[#allocation5 + $0xce0] ss:$16 sps:$4 sm:$0xff]   ;;  %v13746_v41 = vld [vmem:[#allocation5 + $0xc04] ss:$16 sps:$4 sm:$0xff]  }
 0x547   :  { %v13741_v38 = vld [vmem:[#allocation5 + $0xe20] ss:$16 sps:$4 sm:$0xff]  }
 0x548   :  { %5501 = vmatpush1.bf16.msra.mxu0 %v13648_v55  ;;  %v13705_v55 = vld [vmem:[#allocation5 + $0xee0] ss:$16 sps:$4 sm:$0xff]  }
 0x549   :  { %5542 = vmatpush1.bf16.msra.mxu1 %v13651_v56  ;;  %5502 = vmatprep.subr.bf16.mxu0 %v13656_v57  ;;  %v13710_v56 = vld [vmem:[#allocation5 + $0xcc4] ss:$16 sps:$4 sm:$0xff]  }
 0x54a   :  { %5543 = vmatprep.subr.bf16.mxu1 %v13659_v59  ;;  %v13713_v57 = vld [vmem:[#allocation5 + $0xec4] ss:$16 sps:$4 sm:$0xff]   ;;  %v15585_v59 = vpack.c.b16 %v5706_v48, %v5706_v48 }
 0x54b   :  { %v13755_v48 = vld [vmem:[#allocation5 + $0xfe4] ss:$16 sps:$4 sm:$0xff]  }
 0x54c   :  { %5503 = vmatpush2.bf16.msra.mxu0 %v13654_v60  ;;  %v15587_v60 = vpack.c.b16 %v5712_v49, %v5712_v49  ;;  %v13750_v49 = vld [vmem:[#allocation5 + $0xde0] ss:$16 sps:$4 sm:$0xff]  }
 0x54d   :  { %5544 = vmatpush2.bf16.msra.mxu1 %v13657_v61  ;;  %5504 = vmatprep.subr.bf16.mxu0 %v13662_v63 }
 0x54e   :  { %5545 = vmatprep.subr.bf16.mxu1 %v13665_v1  ;;  %v3658_v1 = vadd.f32 %v15555_v29, %v15457_v58 }
 0x550   :  { %5505 = vmatpush2.bf16.msra.mxu0 %v13660_v6 }
 0x551   :  { %5546 = vmatpush2.bf16.msra.mxu1 %v13663_v7  ;;  %5506 = vmatprep.subr.bf16.mxu0 %v13668_v8  ;;  %v13708_v7 = vld [vmem:[#allocation5 + $0xcc0] ss:$16 sps:$4 sm:$0xff]  }
 0x552   :  { %5547 = vmatprep.subr.bf16.mxu1 %v13671_v24  ;;  %v13711_v8 = vld [vmem:[#allocation5 + $0xec0] ss:$16 sps:$4 sm:$0xff]  }
 0x554   :  { %5507 = vmatpush2.bf16.msra.mxu0 %v13666_v25 }
 0x555   :  { %5548 = vmatpush2.bf16.msra.mxu1 %v13669_v14  ;;  %5508 = vmatprep.subr.bf16.mxu0 %v13674_v15  ;;  %v13716_v14 = vld [vmem:[#allocation5 + $0xca4] ss:$16 sps:$4 sm:$0xff]  }
 0x556   :  { %5549 = vmatprep.subr.bf16.mxu1 %v13677_v17  ;;  %v13719_v15 = vld [vmem:[#allocation5 + $0xea4] ss:$16 sps:$4 sm:$0xff]   ;;  %v3659_v17 = vadd.f32 %v15557_v52, %v15459_v62 }
 0x557   :  { %v13722_v62 = vld [vmem:[#allocation5 + $0xc84] ss:$16 sps:$4 sm:$0xff]  }
 0x558   :  { %5509 = vmatpush2.bf16.msra.mxu0 %v13672_v20  ;;  %v13725_v52 = vld [vmem:[#allocation5 + $0xe84] ss:$16 sps:$4 sm:$0xff]  }
 0x559   :  { %5550 = vmatpush2.bf16.msra.mxu1 %v13675_v16  ;;  %5510 = vmatprep.subr.bf16.mxu0 %v13680_v18  ;;  %v13714_v16 = vld [vmem:[#allocation5 + $0xca0] ss:$16 sps:$4 sm:$0xff]  }
 0x55a   :  { %5551 = vmatprep.subr.bf16.mxu1 %v13683_v21  ;;  %v13717_v18 = vld [vmem:[#allocation5 + $0xea0] ss:$16 sps:$4 sm:$0xff]  }
 0x55c   :  { %5511 = vmatpush2.bf16.msra.mxu0 %v13678_v22 }
 0x55d   :  { %5552 = vmatpush2.bf16.msra.mxu1 %v13681_v27  ;;  %5512 = vmatprep.subr.bf16.mxu0 %v13686_v28  ;;  %v13720_v27 = vld [vmem:[#allocation5 + $0xc80] ss:$16 sps:$4 sm:$0xff]  }
 0x55e   :  { %5553 = vmatprep.subr.bf16.mxu1 %v13689_v30  ;;  %v13723_v28 = vld [vmem:[#allocation5 + $0xe80] ss:$16 sps:$4 sm:$0xff]   ;;  %v13728_v30 = vld [vmem:[#allocation5 + $0xc64] ss:$16 sps:$4 sm:$0xff]  }
 0x560   :  { %5513 = vmatpush2.bf16.msra.mxu0 %v13684_v31  ;;  %v13731_v31 = vld [vmem:[#allocation5 + $0xe64] ss:$16 sps:$4 sm:$0xff]  }
 0x561   :  { %5554 = vmatpush2.bf16.msra.mxu1 %v13687_v33  ;;  %5514 = vmatprep.subr.bf16.mxu0 %v13692_v51  ;;  %v13726_v33 = vld [vmem:[#allocation5 + $0xc60] ss:$16 sps:$4 sm:$0xff]  }
 0x562   :  { %5555 = vmatprep.subr.bf16.mxu1 %v13695_v54  ;;  %v13729_v51 = vld [vmem:[#allocation5 + $0xe60] ss:$16 sps:$4 sm:$0xff]   ;;  %v13734_v54 = vld [vmem:[#allocation5 + $0xc44] ss:$16 sps:$4 sm:$0xff]  }
 0x564   :  { %5515 = vmatpush2.bf16.msra.mxu0 %v13690_v34  ;;  %v13737_v34 = vld [vmem:[#allocation5 + $0xe44] ss:$16 sps:$4 sm:$0xff]  }
 0x565   :  { %5556 = vmatpush2.bf16.msra.mxu1 %v13693_v23  ;;  %5516 = vmatprep.subr.bf16.mxu0 %v13698_v26  ;;  %v13732_v23 = vld [vmem:[#allocation5 + $0xc40] ss:$16 sps:$4 sm:$0xff]  }
 0x566   :  { %5557 = vmatprep.subr.bf16.mxu1 %v13701_v45  ;;  %v13735_v26 = vld [vmem:[#allocation5 + $0xe40] ss:$16 sps:$4 sm:$0xff]   ;;  %v13740_v45 = vld [vmem:[#allocation5 + $0xc24] ss:$16 sps:$4 sm:$0xff]  }
 0x568   :  { %5517 = vmatpush2.bf16.msra.mxu0 %v13696_v43  ;;  %v13749_v43 = vld [vmem:[#allocation5 + $0xe04] ss:$16 sps:$4 sm:$0xff]  }
 0x569   :  { %5558 = vmatpush2.bf16.msra.mxu1 %v13699_v35  ;;  %6361 = vmatprep.subr.bf16.mxu0 %v13704_v44  ;;  %v13744_v35 = vld [vmem:[#allocation5 + $0xc00] ss:$16 sps:$4 sm:$0xff]  }
 0x56a   :  { %6402 = vmatprep.subr.bf16.mxu1 %v13707_v47  ;;  %v13747_v44 = vld [vmem:[#allocation5 + $0xe00] ss:$16 sps:$4 sm:$0xff]   ;;  %v13752_v47 = vld [vmem:[#allocation5 + $0xde4] ss:$16 sps:$4 sm:$0xff]  }
 0x56b   :  { %v4481_v61 = vpop.f32.mrf.mxu0  ;;  %5519 = vmatmul.mubr.bf16.vlgmr.msra.gmra.mxu0 %v15567_v3 }
 0x56c   :  { %v4522_v63 = vpop.f32.mrf.mxu1  ;;  %5560 = vmatmul.mubr.bf16.vlgmr.msra.gmra.mxu1 %v15569_v5  ;;  %6362 = vmatpush1.bf16.msra.mxu0 %v13702_v53  ;;  %v13753_v53 = vld [vmem:[#allocation5 + $0xfe0] ss:$16 sps:$4 sm:$0xff]  }
 0x56d   :  { %v4523_v6 = vadd.f32 %v4522_v63, %v4481_v61  ;;  %6403 = vmatpush1.bf16.msra.mxu1 %v13705_v55  ;;  %v4483_v24 = vpop.f32.mrf.mxu0  ;;  %6363 = vmatprep.subr.bf16.mxu0 %v13710_v56  ;;  %v13758_v55 = vld [vmem:[#allocation5 + $0xdc4] ss:$16 sps:$4 sm:$0xff]   ;;  %v13759_v61 = vld [vmem:[#allocation5 + $0xfc0] ss:$16 sps:$4 sm:$0xff]  }
 0x56e   :  { %v4524_v25 = vpop.f32.mrf.mxu1  ;;  %6404 = vmatprep.subr.bf16.mxu1 %v13713_v57  ;;  %6393 = vmatprep.mubr.bf16.mxu0 %v15585_v59  ;;  %v13761_v56 = vld [vmem:[#allocation5 + $0xfc4] ss:$16 sps:$4 sm:$0xff]   ;;  %v13756_v57 = vld [vmem:[#allocation5 + $0xdc0] ss:$16 sps:$4 sm:$0xff]  }
 0x56f   :  { %v15595_v3 = vadd.f32 %v4523_v6, %v3658_v1  ;;  %v4525_v5 = vadd.f32 %v4524_v25, %v4483_v24  ;;  %6434 = vmatprep.mubr.bf16.mxu1 %v15587_v60  ;;  %v4485_v58 = vpop.f32.mrf.mxu0  ;;  %v13764_v63 = vld [vmem:[#allocation5 + $0xda4] ss:$16 sps:$4 sm:$0xff]   ;;  %v13762_v6 = vld [vmem:[#allocation5 + $0xda0] ss:$16 sps:$4 sm:$0xff]  }
 0x570   :  { %v4526_v29 = vpop.f32.mrf.mxu1  ;;  %6364 = vmatpush1.bf16.msra.mxu0 %v13708_v7  ;;  %v13767_v1 = vld [vmem:[#allocation5 + $0xfa4] ss:$16 sps:$4 sm:$0xff]   ;;  %v13765_v7 = vld [vmem:[#allocation5 + $0xfa0] ss:$16 sps:$4 sm:$0xff]  }
 0x571   :  { %v15599_v20 = vadd.f32 %v4525_v5, %v3659_v17  ;;  %6405 = vmatpush1.bf16.msra.mxu1 %v13711_v8  ;;  %v4486_v21 = vpop.f32.mrf.mxu0  ;;  %6365 = vmatprep.subr.bf16.mxu0 %v13716_v14  ;;  %v13770_v8 = vld [vmem:[#allocation5 + $0xd84] ss:$16 sps:$4 sm:$0xff]   ;;  %v13768_v25 = vld [vmem:[#allocation5 + $0xd80] ss:$16 sps:$4 sm:$0xff]  }
 0x572   :  { %v4527_v22 = vpop.f32.mrf.mxu1  ;;  %6406 = vmatprep.subr.bf16.mxu1 %v13719_v15  ;;  %v13773_v24 = vld [vmem:[#allocation5 + $0xf84] ss:$16 sps:$4 sm:$0xff]   ;;  %v13771_v14 = vld [vmem:[#allocation5 + $0xf80] ss:$16 sps:$4 sm:$0xff]  }
 0x573   :  { %v13776_v15 = vld [vmem:[#allocation5 + $0xd64] ss:$16 sps:$4 sm:$0xff]   ;;  %v13774_v5 = vld [vmem:[#allocation5 + $0xd60] ss:$16 sps:$4 sm:$0xff]  }
 0x574   :  { %6366 = vmatpush1.bf16.msra.mxu0 %v13714_v16  ;;  %v13779_v17 = vld [vmem:[#allocation5 + $0xf64] ss:$16 sps:$4 sm:$0xff]   ;;  %v13777_v58 = vld [vmem:[#allocation5 + $0xf60] ss:$16 sps:$4 sm:$0xff]  }
 0x575   :  { %6407 = vmatpush1.bf16.msra.mxu1 %v13717_v18  ;;  %6367 = vmatprep.subr.bf16.mxu0 %v13722_v62  ;;  %v13782_v29 = vld [vmem:[#allocation5 + $0xd44] ss:$16 sps:$4 sm:$0xff]   ;;  %v13780_v18 = vld [vmem:[#allocation5 + $0xd40] ss:$16 sps:$4 sm:$0xff]  }
 0x576   :  { %6408 = vmatprep.subr.bf16.mxu1 %v13725_v52  ;;  %v13785_v16 = vld [vmem:[#allocation5 + $0xf44] ss:$16 sps:$4 sm:$0xff]   ;;  %v13783_v21 = vld [vmem:[#allocation5 + $0xf40] ss:$16 sps:$4 sm:$0xff]  }
 0x577   :  { %v13788_v22 = vld [vmem:[#allocation5 + $0xd24] ss:$16 sps:$4 sm:$0xff]   ;;  %v13786_v52 = vld [vmem:[#allocation5 + $0xd20] ss:$16 sps:$4 sm:$0xff]  }
 0x578   :  { %6368 = vmatpush1.bf16.msra.mxu0 %v13720_v27  ;;  %v13791_v62 = vld [vmem:[#allocation5 + $0xf24] ss:$16 sps:$4 sm:$0xff]   ;;  %v13789_v27 = vld [vmem:[#allocation5 + $0xf20] ss:$16 sps:$4 sm:$0xff]  }
 0x579   :  { %6409 = vmatpush1.bf16.msra.mxu1 %v13723_v28  ;;  %6369 = vmatprep.subr.bf16.mxu0 %v13728_v30  ;;  %v5701_v28 = vrot.slane %v15497_v39, 3  ;;  %v5702_v30 = vrot.slane %v15491_v37, 2 }
 0x57a   :  { %6410 = vmatprep.subr.bf16.mxu1 %v13731_v31  ;;  %v5707_v31 = vrot.slane %v15500_v32, 3 }
 0x57c   :  { %6370 = vmatpush1.bf16.msra.mxu0 %v13726_v33  ;;  %v5708_v33 = vrot.slane %v15495_v50, 2 }
 0x57d   :  { %6411 = vmatpush1.bf16.msra.mxu1 %v13729_v51  ;;  %6371 = vmatprep.subr.bf16.mxu0 %v13734_v54  ;;  %v13794_v51 = vld [vmem:[#allocation5 + $0xd04] ss:$16 sps:$4 sm:$0xff]  }
 0x57e   :  { %6412 = vmatprep.subr.bf16.mxu1 %v13737_v34  ;;  %v13797_v54 = vld [vmem:[#allocation5 + $0xf04] ss:$16 sps:$4 sm:$0xff]   ;;  %v13792_v34 = vld [vmem:[#allocation5 + $0xd00] ss:$16 sps:$4 sm:$0xff]  }
 0x580   :  { %6372 = vmatpush1.bf16.msra.mxu0 %v13732_v23  ;;  %v13795_v23 = vld [vmem:[#allocation5 + $0xf00] ss:$16 sps:$4 sm:$0xff]  }
 0x581   :  { %6413 = vmatpush1.bf16.msra.mxu1 %v13735_v26  ;;  %6373 = vmatprep.subr.bf16.mxu0 %v13740_v45  ;;  %v5703_v26 = vsel %vm2838_vm8, %v5702_v30, %v5701_v28  ;;  %v5709_v45 = vsel %vm2838_vm8, %v5708_v33, %v5707_v31  ;;  %v13839_v28 = vld [vmem:[#allocation5 + $0xe2c] ss:$16 sps:$4 sm:$0xff]   ;;  %v13834_v30 = vld [vmem:[#allocation5 + $0xc28] ss:$16 sps:$4 sm:$0xff]  }
 0x582   :  { %6414 = vmatprep.subr.bf16.mxu1 %v13743_v46  ;;  %v13800_v46 = vld [vmem:[#allocation5 + $0xcec] ss:$16 sps:$4 sm:$0xff]   ;;  %v13837_v31 = vld [vmem:[#allocation5 + $0xe28] ss:$16 sps:$4 sm:$0xff]  }
 0x583   :  { %v13842_v33 = vld [vmem:[#allocation5 + $0xc0c] ss:$16 sps:$4 sm:$0xff]  }
 0x584   :  { %6374 = vmatpush1.bf16.msra.mxu0 %v13738_v36  ;;  %v13803_v36 = vld [vmem:[#allocation5 + $0xeec] ss:$16 sps:$4 sm:$0xff]  }
 0x585   :  { %6415 = vmatpush1.bf16.msra.mxu1 %v13741_v38  ;;  %6375 = vmatprep.subr.bf16.mxu0 %v13746_v41  ;;  %v15607_v38 = vpack.c.b16 %v5703_v26, %v5703_v26  ;;  %v15609_v41 = vpack.c.b16 %v5709_v45, %v5709_v45  ;;  %v13851_v26 = vld [vmem:[#allocation5 + $0xfec] ss:$16 sps:$4 sm:$0xff]   ;;  %v13846_v45 = vld [vmem:[#allocation5 + $0xde8] ss:$16 sps:$4 sm:$0xff]  }
 0x586   :  { %6416 = vmatprep.subr.bf16.mxu1 %v13749_v43  ;;  %v13798_v43 = vld [vmem:[#allocation5 + $0xce8] ss:$16 sps:$4 sm:$0xff]  }
 0x588   :  { %6376 = vmatpush1.bf16.msra.mxu0 %v13744_v35  ;;  %v13801_v35 = vld [vmem:[#allocation5 + $0xee8] ss:$16 sps:$4 sm:$0xff]  }
 0x589   :  { %6417 = vmatpush1.bf16.msra.mxu1 %v13747_v44  ;;  %6377 = vmatprep.subr.bf16.mxu0 %v13752_v47  ;;  %v13806_v44 = vld [vmem:[#allocation5 + $0xccc] ss:$16 sps:$4 sm:$0xff]  }
 0x58a   :  { %6418 = vmatprep.subr.bf16.mxu1 %v13755_v48  ;;  %v13809_v47 = vld [vmem:[#allocation5 + $0xecc] ss:$16 sps:$4 sm:$0xff]  }
 0x58c   :  { %6378 = vmatpush2.bf16.msra.mxu0 %v13750_v49 }
 0x58d   :  { %6419 = vmatpush2.bf16.msra.mxu1 %v13753_v53  ;;  %6379 = vmatprep.subr.bf16.mxu0 %v13758_v55  ;;  %v3660_v53 = vadd.f32 %v15573_v13, %v15461_v2 }
 0x58e   :  { %6420 = vmatprep.subr.bf16.mxu1 %v13761_v56  ;;  %v13804_v56 = vld [vmem:[#allocation5 + $0xcc8] ss:$16 sps:$4 sm:$0xff]  }
 0x590   :  { %6380 = vmatpush2.bf16.msra.mxu0 %v13756_v57  ;;  %v13807_v57 = vld [vmem:[#allocation5 + $0xec8] ss:$16 sps:$4 sm:$0xff]  }
 0x591   :  { %6421 = vmatpush2.bf16.msra.mxu1 %v13759_v61  ;;  %6381 = vmatprep.subr.bf16.mxu0 %v13764_v63 }
 0x592   :  { %6422 = vmatprep.subr.bf16.mxu1 %v13767_v1  ;;  %v13812_v1 = vld [vmem:[#allocation5 + $0xcac] ss:$16 sps:$4 sm:$0xff]  }
 0x594   :  { %6382 = vmatpush2.bf16.msra.mxu0 %v13762_v6  ;;  %v13815_v6 = vld [vmem:[#allocation5 + $0xeac] ss:$16 sps:$4 sm:$0xff]  }
 0x595   :  { %6423 = vmatpush2.bf16.msra.mxu1 %v13765_v7  ;;  %6383 = vmatprep.subr.bf16.mxu0 %v13770_v8  ;;  %v3661_v7 = vadd.f32 %v15575_v19, %v15463_v4  ;;  %v13818_v4 = vld [vmem:[#allocation5 + $0xc8c] ss:$16 sps:$4 sm:$0xff]  }
 0x596   :  { %6424 = vmatprep.subr.bf16.mxu1 %v13773_v24  ;;  %v13821_v19 = vld [vmem:[#allocation5 + $0xe8c] ss:$16 sps:$4 sm:$0xff]  }
 0x598   :  { %6384 = vmatpush2.bf16.msra.mxu0 %v13768_v25 }
 0x599   :  { %6425 = vmatpush2.bf16.msra.mxu1 %v13771_v14  ;;  %6385 = vmatprep.subr.bf16.mxu0 %v13776_v15  ;;  %v13810_v14 = vld [vmem:[#allocation5 + $0xca8] ss:$16 sps:$4 sm:$0xff]  }
 0x59a   :  { %6426 = vmatprep.subr.bf16.mxu1 %v13779_v17  ;;  %v13813_v15 = vld [vmem:[#allocation5 + $0xea8] ss:$16 sps:$4 sm:$0xff]  }
 0x59c   :  { %6386 = vmatpush2.bf16.msra.mxu0 %v13774_v5 }
 0x59d   :  { %6427 = vmatpush2.bf16.msra.mxu1 %v13777_v58  ;;  %6387 = vmatprep.subr.bf16.mxu0 %v13782_v29  ;;  %v13816_v58 = vld [vmem:[#allocation5 + $0xc88] ss:$16 sps:$4 sm:$0xff]   ;;  %v13827_v29 = vld [vmem:[#allocation5 + $0xe6c] ss:$16 sps:$4 sm:$0xff]  }
 0x59e   :  { %6428 = vmatprep.subr.bf16.mxu1 %v13785_v16  ;;  %v13822_v16 = vld [vmem:[#allocation5 + $0xc68] ss:$16 sps:$4 sm:$0xff]  }
 0x5a0   :  { %6388 = vmatpush2.bf16.msra.mxu0 %v13780_v18  ;;  %v13825_v18 = vld [vmem:[#allocation5 + $0xe68] ss:$16 sps:$4 sm:$0xff]  }
 0x5a1   :  { %6429 = vmatpush2.bf16.msra.mxu1 %v13783_v21  ;;  %6389 = vmatprep.subr.bf16.mxu0 %v13788_v22  ;;  %v13830_v21 = vld [vmem:[#allocation5 + $0xc4c] ss:$16 sps:$4 sm:$0xff]  }
 0x5a2   :  { %6430 = vmatprep.subr.bf16.mxu1 %v13791_v62  ;;  %v13833_v22 = vld [vmem:[#allocation5 + $0xe4c] ss:$16 sps:$4 sm:$0xff]   ;;  %v13828_v62 = vld [vmem:[#allocation5 + $0xc48] ss:$16 sps:$4 sm:$0xff]  }
 0x5a4   :  { %6390 = vmatpush2.bf16.msra.mxu0 %v13786_v52  ;;  %v13831_v52 = vld [vmem:[#allocation5 + $0xe48] ss:$16 sps:$4 sm:$0xff]  }
 0x5a5   :  { %6431 = vmatpush2.bf16.msra.mxu1 %v13789_v27  ;;  %6391 = vmatprep.subr.bf16.mxu0 %v13794_v51  ;;  %v13836_v27 = vld [vmem:[#allocation5 + $0xc2c] ss:$16 sps:$4 sm:$0xff]  }
 0x5a6   :  { %6432 = vmatprep.subr.bf16.mxu1 %v13797_v54  ;;  %v13845_v51 = vld [vmem:[#allocation5 + $0xe0c] ss:$16 sps:$4 sm:$0xff]   ;;  %v13840_v54 = vld [vmem:[#allocation5 + $0xc08] ss:$16 sps:$4 sm:$0xff]  }
 0x5a8   :  { %6392 = vmatpush2.bf16.msra.mxu0 %v13792_v34  ;;  %v13843_v34 = vld [vmem:[#allocation5 + $0xe08] ss:$16 sps:$4 sm:$0xff]  }
 0x5a9   :  { %6433 = vmatpush2.bf16.msra.mxu1 %v13795_v23  ;;  %6443 = vmatprep.subr.bf16.mxu0 %v13800_v46  ;;  %v13848_v23 = vld [vmem:[#allocation5 + $0xdec] ss:$16 sps:$4 sm:$0xff]   ;;  %v13849_v46 = vld [vmem:[#allocation5 + $0xfe8] ss:$16 sps:$4 sm:$0xff]  }
 0x5aa   :  { %6484 = vmatprep.subr.bf16.mxu1 %v13803_v36  ;;  %v13854_v36 = vld [vmem:[#allocation5 + $0xdcc] ss:$16 sps:$4 sm:$0xff]  }
 0x5ab   :  { %v4563_v48 = vpop.f32.mrf.mxu0  ;;  %6394 = vmatmul.mubr.bf16.vlgmr.msra.gmra.mxu0 %v15607_v38 }
 0x5ac   :  { %v4604_v49 = vpop.f32.mrf.mxu1  ;;  %6435 = vmatmul.mubr.bf16.vlgmr.msra.gmra.mxu1 %v15609_v41  ;;  %6444 = vmatpush1.bf16.msra.mxu0 %v13798_v43  ;;  %v13857_v43 = vld [vmem:[#allocation5 + $0xfcc] ss:$16 sps:$4 sm:$0xff]  }
 0x5ad   :  { %v4605_v55 = vadd.f32 %v4604_v49, %v4563_v48  ;;  %6485 = vmatpush1.bf16.msra.mxu1 %v13801_v35  ;;  %v4565_v61 = vpop.f32.mrf.mxu0  ;;  %6445 = vmatprep.subr.bf16.mxu0 %v13806_v44  ;;  %v13852_v35 = vld [vmem:[#allocation5 + $0xdc8] ss:$16 sps:$4 sm:$0xff]   ;;  %v13863_v48 = vld [vmem:[#allocation5 + $0xfac] ss:$16 sps:$4 sm:$0xff]  }
 0x5ae   :  { %v4606_v63 = vpop.f32.mrf.mxu1  ;;  %6486 = vmatprep.subr.bf16.mxu1 %v13809_v47  ;;  %6475 = vmatprep.mubr.bf16.mxu0 %v15585_v59  ;;  %v13819_v59 = vld [vmem:[#allocation5 + $0xe88] ss:$16 sps:$4 sm:$0xff]   ;;  %v13860_v47 = vld [vmem:[#allocation5 + $0xdac] ss:$16 sps:$4 sm:$0xff]  }
 0x5af   :  { %v15617_v8 = vadd.f32 %v4605_v55, %v3660_v53  ;;  %v4607_v24 = vadd.f32 %v4606_v63, %v4565_v61  ;;  %6516 = vmatprep.mubr.bf16.mxu1 %v15587_v60  ;;  %v4567_v2 = vpop.f32.mrf.mxu0  ;;  %v13824_v60 = vld [vmem:[#allocation5 + $0xc6c] ss:$16 sps:$4 sm:$0xff]   ;;  %v13855_v44 = vld [vmem:[#allocation5 + $0xfc8] ss:$16 sps:$4 sm:$0xff]  }
 0x5b0   :  { %v4608_v13 = vpop.f32.mrf.mxu1  ;;  %6446 = vmatpush1.bf16.msra.mxu0 %v13804_v56  ;;  %v13858_v49 = vld [vmem:[#allocation5 + $0xda8] ss:$16 sps:$4 sm:$0xff]   ;;  %v13866_v55 = vld [vmem:[#allocation5 + $0xd8c] ss:$16 sps:$4 sm:$0xff]  }
 0x5b1   :  { %v15621_v25 = vadd.f32 %v4607_v24, %v3661_v7  ;;  %6487 = vmatpush1.bf16.msra.mxu1 %v13807_v57  ;;  %v4568_v17 = vpop.f32.mrf.mxu0  ;;  %6447 = vmatprep.subr.bf16.mxu0 %v13812_v1  ;;  %v13861_v53 = vld [vmem:[#allocation5 + $0xfa8] ss:$16 sps:$4 sm:$0xff]   ;;  %v13869_v56 = vld [vmem:[#allocation5 + $0xf8c] ss:$16 sps:$4 sm:$0xff]  }
 0x5b2   :  { %v4609_v5 = vpop.f32.mrf.mxu1  ;;  %6488 = vmatprep.subr.bf16.mxu1 %v13815_v6  ;;  %v13864_v57 = vld [vmem:[#allocation5 + $0xd88] ss:$16 sps:$4 sm:$0xff]   ;;  %v13872_v63 = vld [vmem:[#allocation5 + $0xd6c] ss:$16 sps:$4 sm:$0xff]  }
 0x5b3   :  { %v13867_v61 = vld [vmem:[#allocation5 + $0xf88] ss:$16 sps:$4 sm:$0xff]   ;;  %v13875_v1 = vld [vmem:[#allocation5 + $0xf6c] ss:$16 sps:$4 sm:$0xff]  }
 0x5b4   :  { %6448 = vmatpush1.bf16.msra.mxu0 %v13810_v14  ;;  %v13870_v6 = vld [vmem:[#allocation5 + $0xd68] ss:$16 sps:$4 sm:$0xff]   ;;  %v13878_v24 = vld [vmem:[#allocation5 + $0xd4c] ss:$16 sps:$4 sm:$0xff]  }
 0x5b5   :  { %6489 = vmatpush1.bf16.msra.mxu1 %v13813_v15  ;;  %6449 = vmatprep.subr.bf16.mxu0 %v13818_v4  ;;  %v13873_v7 = vld [vmem:[#allocation5 + $0xf68] ss:$16 sps:$4 sm:$0xff]   ;;  %v13881_v2 = vld [vmem:[#allocation5 + $0xf4c] ss:$16 sps:$4 sm:$0xff]  }
 0x5b6   :  { %6490 = vmatprep.subr.bf16.mxu1 %v13821_v19  ;;  %v13876_v13 = vld [vmem:[#allocation5 + $0xd48] ss:$16 sps:$4 sm:$0xff]   ;;  %v13884_v15 = vld [vmem:[#allocation5 + $0xd2c] ss:$16 sps:$4 sm:$0xff]  }
 0x5b7   :  { %v13879_v14 = vld [vmem:[#allocation5 + $0xf48] ss:$16 sps:$4 sm:$0xff]   ;;  %v13887_v17 = vld [vmem:[#allocation5 + $0xf2c] ss:$16 sps:$4 sm:$0xff]  }
 0x5b8   :  { %6450 = vmatpush1.bf16.msra.mxu0 %v13816_v58  ;;  %v13882_v5 = vld [vmem:[#allocation5 + $0xd28] ss:$16 sps:$4 sm:$0xff]   ;;  %v13890_v19 = vld [vmem:[#allocation5 + $0xd0c] ss:$16 sps:$4 sm:$0xff]  }
 0x5b9   :  { %6491 = vmatpush1.bf16.msra.mxu1 %v13819_v59  ;;  %6451 = vmatprep.subr.bf16.mxu0 %v13824_v60  ;;  %v13885_v4 = vld [vmem:[#allocation5 + $0xf28] ss:$16 sps:$4 sm:$0xff]   ;;  %v13893_v58 = vld [vmem:[#allocation5 + $0xf0c] ss:$16 sps:$4 sm:$0xff]  }
 0x5ba   :  { %6492 = vmatprep.subr.bf16.mxu1 %v13827_v29  ;;  %v13888_v59 = vld [vmem:[#allocation5 + $0xd08] ss:$16 sps:$4 sm:$0xff]  }
 0x5bb   :  { %v13891_v60 = vld [vmem:[#allocation5 + $0xf08] ss:$16 sps:$4 sm:$0xff]  }
 0x5bc   :  { %6452 = vmatpush1.bf16.msra.mxu0 %v13822_v16 }
 0x5bd   :  { %6493 = vmatpush1.bf16.msra.mxu1 %v13825_v18  ;;  %6453 = vmatprep.subr.bf16.mxu0 %v13830_v21 }
 0x5be   :  { %6494 = vmatprep.subr.bf16.mxu1 %v13833_v22 }
 0x5c0   :  { %6454 = vmatpush1.bf16.msra.mxu0 %v13828_v62 }
 0x5c1   :  { %6495 = vmatpush1.bf16.msra.mxu1 %v13831_v52  ;;  %6455 = vmatprep.subr.bf16.mxu0 %v13836_v27 }
 0x5c2   :  { %6496 = vmatprep.subr.bf16.mxu1 %v13839_v28 }
 0x5c4   :  { %6456 = vmatpush1.bf16.msra.mxu0 %v13834_v30 }
 0x5c5   :  { %6497 = vmatpush1.bf16.msra.mxu1 %v13837_v31  ;;  %6457 = vmatprep.subr.bf16.mxu0 %v13842_v33 }
 0x5c6   :  { %6498 = vmatprep.subr.bf16.mxu1 %v13845_v51 }
 0x5c8   :  { %6458 = vmatpush1.bf16.msra.mxu0 %v13840_v54 }
 0x5c9   :  { %6499 = vmatpush1.bf16.msra.mxu1 %v13843_v34  ;;  %6459 = vmatprep.subr.bf16.mxu0 %v13848_v23 }
 0x5ca   :  { %6500 = vmatprep.subr.bf16.mxu1 %v13851_v26 }
 0x5cc   :  { %6460 = vmatpush2.bf16.msra.mxu0 %v13846_v45 }
 0x5cd   :  { %6501 = vmatpush2.bf16.msra.mxu1 %v13849_v46  ;;  %6461 = vmatprep.subr.bf16.mxu0 %v13854_v36 }
 0x5ce   :  { %6502 = vmatprep.subr.bf16.mxu1 %v13857_v43 }
 0x5d0   :  { %6462 = vmatpush2.bf16.msra.mxu0 %v13852_v35 }
 0x5d1   :  { %6503 = vmatpush2.bf16.msra.mxu1 %v13855_v44  ;;  %6463 = vmatprep.subr.bf16.mxu0 %v13860_v47 }
 0x5d2   :  { %6504 = vmatprep.subr.bf16.mxu1 %v13863_v48 }
 0x5d4   :  { %6464 = vmatpush2.bf16.msra.mxu0 %v13858_v49 }
 0x5d5   :  { %6505 = vmatpush2.bf16.msra.mxu1 %v13861_v53  ;;  %6465 = vmatprep.subr.bf16.mxu0 %v13866_v55 }
 0x5d6   :  { %6506 = vmatprep.subr.bf16.mxu1 %v13869_v56 }
 0x5d8   :  { %6466 = vmatpush2.bf16.msra.mxu0 %v13864_v57 }
 0x5d9   :  { %6507 = vmatpush2.bf16.msra.mxu1 %v13867_v61  ;;  %6467 = vmatprep.subr.bf16.mxu0 %v13872_v63 }
 0x5da   :  { %6508 = vmatprep.subr.bf16.mxu1 %v13875_v1 }
 0x5dc   :  { %6468 = vmatpush2.bf16.msra.mxu0 %v13870_v6 }
 0x5dd   :  { %6509 = vmatpush2.bf16.msra.mxu1 %v13873_v7  ;;  %6469 = vmatprep.subr.bf16.mxu0 %v13878_v24 }
 0x5de   :  { %6510 = vmatprep.subr.bf16.mxu1 %v13881_v2 }
 0x5e0   :  { %6470 = vmatpush2.bf16.msra.mxu0 %v13876_v13 }
 0x5e1   :  { %6511 = vmatpush2.bf16.msra.mxu1 %v13879_v14  ;;  %6471 = vmatprep.subr.bf16.mxu0 %v13884_v15 }
 0x5e2   :  { %6512 = vmatprep.subr.bf16.mxu1 %v13887_v17 }
 0x5e4   :  { %6472 = vmatpush2.bf16.msra.mxu0 %v13882_v5 }
 0x5e5   :  { %6513 = vmatpush2.bf16.msra.mxu1 %v13885_v4  ;;  %6473 = vmatprep.subr.bf16.mxu0 %v13890_v19 }
 0x5e6   :  { %6514 = vmatprep.subr.bf16.mxu1 %v13893_v58 }
 0x5e8   :  { %6474 = vmatpush2.bf16.msra.mxu0 %v13888_v59 }
 0x5e9   :  { %6515 = vmatpush2.bf16.msra.mxu1 %v13891_v60 }
 0x5eb   :  { %v5438_v29 = vpop.f32.mrf.mxu0  ;;  %6476 = vmatmul.mubr.bf16.vlgmr.msra.gmra.mxu0 %v15607_v38 }
 0x5ec   :  { %v5479_v16 = vpop.f32.mrf.mxu1  ;;  %6517 = vmatmul.mubr.bf16.vlgmr.msra.gmra.mxu1 %v15609_v41 }
 0x5ed   :  { %v5480_v18 = vadd.f32 %v5479_v16, %v5438_v29  ;;  %v5440_v21 = vpop.f32.mrf.mxu0 }
 0x5ee   :  { %v5481_v22 = vpop.f32.mrf.mxu1 }
 0x5ef   :  { %v5568_v62 = vadd.f32 %v5480_v18, %v15595_v3  ;;  %v5482_v52 = vadd.f32 %v5481_v22, %v5440_v21  ;;  %v5442_v27 = vpop.f32.mrf.mxu0 }
 0x5f0   :  { %v5483_v28 = vpop.f32.mrf.mxu1 }
 0x5f1   :  { %v5569_v30 = vadd.f32 %v5482_v52, %v15599_v20  ;;  %v5443_v31 = vpop.f32.mrf.mxu0 }
 0x5f2   :  { %v5484_v33 = vpop.f32.mrf.mxu1 }
 0x62b   :  { %v5520_v51 = vpop.f32.mrf.mxu0 }
 0x62c   :  { %v5561_v54 = vpop.f32.mrf.mxu1 }
 0x62d   :  { %v5562_v34 = vadd.f32 %v5561_v54, %v5520_v51  ;;  %v5522_v23 = vpop.f32.mrf.mxu0 }
 0x62e   :  { %v5563_v26 = vpop.f32.mrf.mxu1 }
 0x62f   :  { %v5570_v38 = vadd.f32 %v5562_v34, %v15617_v8  ;;  %v5564_v41 = vadd.f32 %v5563_v26, %v5522_v23  ;;  %v5524_v45 = vpop.f32.mrf.mxu0 }
 0x630   :  { %v5565_v46 = vpop.f32.mrf.mxu1 }
 0x631   :  { %v5571_v36 = vadd.f32 %v5564_v41, %v15621_v25  ;;  %v5525_v3 = vpop.f32.mrf.mxu0 }
 0x632   :  { %v5566_v43 = vpop.f32.mrf.mxu1 }
 0x66b   :  { %v6395_v35 = vpop.f32.mrf.mxu0 }
 0x66c   :  { %v6436_v44 = vpop.f32.mrf.mxu1 }
 0x66d   :  { %v6437_v47 = vadd.f32 %v6436_v44, %v6395_v35  ;;  %v6397_v20 = vpop.f32.mrf.mxu0 }
 0x66e   :  { %v6438_v48 = vpop.f32.mrf.mxu1 }
 0x66f   :  { %v15629_v49 = vadd.f32 %v6437_v47, %v5568_v62  ;;  %v6439_v53 = vadd.f32 %v6438_v48, %v6397_v20  ;;  %v6399_v55 = vpop.f32.mrf.mxu0 }
 0x670   :  { %v6440_v56 = vpop.f32.mrf.mxu1 }
 0x671   :  { %v15631_v57 = vadd.f32 %v6439_v53, %v5569_v30  ;;  %v6400_v8 = vpop.f32.mrf.mxu0 }
 0x672   :  { %v6441_v61 = vpop.f32.mrf.mxu1 }
 0x6ab   :  { %v6477_v63 = vpop.f32.mrf.mxu0 }
 0x6ac   :  { %v6518_v1 = vpop.f32.mrf.mxu1 }
 0x6ad   :  { %v6519_v6 = vadd.f32 %v6518_v1, %v6477_v63  ;;  %v6479_v25 = vpop.f32.mrf.mxu0 }
 0x6ae   :  { %v6520_v7 = vpop.f32.mrf.mxu1 }
 0x6af   :  { %v15633_v24 = vadd.f32 %v6519_v6, %v5570_v38  ;;  %v6521_v2 = vadd.f32 %v6520_v7, %v6479_v25  ;;  %v6481_v13 = vpop.f32.mrf.mxu0 }
 0x6b0   :  { %v6522_v14 = vpop.f32.mrf.mxu1 }
 0x6b1   :  { %v15635_v15 = vadd.f32 %v6521_v2, %v5571_v36  ;;  %v6482_v17 = vpop.f32.mrf.mxu0 }
 0x6b2   :  { %v6523_v5 = vpop.f32.mrf.mxu1 }
 0x6b3   :  { %15189 = dma.done.wait [#allocation6 + $0x1], 65536 }
 0x6b4   :  { %15190 = vsyncadd [#allocation6 + $0x1], 4294901760  ;;  %v6662_v4 = vrot.slane %v15465_v9, 4  ;;  %v6663_v19 = vrot.slane %v15467_v10, 3  ;;  %v6668_v58 = vrot.slane %v15469_v11, 4  ;;  %v6669_v59 = vrot.slane %v15471_v12, 3 }
 0x6b5   :  { %v13894_v21 = vld [vmem:[#allocation5 + $0x10e4] ss:$16 sps:$4 sm:$0xff]   ;;  %v13898_v62 = vld [vmem:[#allocation5 + $0x10e0] ss:$16 sps:$4 sm:$0xff]   ;;  %vm11169_vm9 = vcmask 523264   ;;  %s15220_s2 = smov [#allocation33]  }
 0x6b6   :  { %v6664_v60 = vsel %vm2838_vm8, %v6663_v19, %v6662_v4  ;;  %v6670_v29 = vsel %vm2838_vm8, %v6669_v59, %v6668_v58  ;;  %v13896_v22 = vld [vmem:[#allocation5 + $0x12e4] ss:$16 sps:$4 sm:$0xff]   ;;  %7319 = vmatprep.subr.bf16.mxu0 %v13894_v21  ;;  %v13899_v52 = vld [vmem:[#allocation5 + $0x12e0] ss:$16 sps:$4 sm:$0xff]   ;;  %s11221_s6 = sshll.u32 %s15220_s2, 4  ;;  %vm11213_vm10 = vcmask 25600   ;;  %s11222_s6 = int_to_ptr.vmem [resolvable:$true] %s11221_s6 }
 0x6b7   :  { %v15643_v16 = vpack.c.b16 %v6664_v60, %v6664_v60  ;;  %v15645_v18 = vpack.c.b16 %v6670_v29, %v6670_v29  ;;  %7360 = vmatprep.subr.bf16.mxu1 %v13896_v22  ;;  %v13900_v27 = vld [vmem:[#allocation5 + $0x10c4] ss:$16 sps:$4 sm:$0xff]   ;;  %7320 = vmatpush1.bf16.msra.mxu0 %v13898_v62  ;;  %v13904_v30 = vld [vmem:[#allocation5 + $0x10c0] ss:$16 sps:$4 sm:$0xff]   ;;  %p15154_p7 = scmp.lt.s32.totalorder %s11222_s6, %s11222_s6 }
 0x6b8   :  { %7361 = vmatpush1.bf16.msra.mxu1 %v13899_v52  ;;  %v13902_v28 = vld [vmem:[#allocation5 + $0x12c4] ss:$16 sps:$4 sm:$0xff]   ;;  %7321 = vmatprep.subr.bf16.mxu0 %v13900_v27  ;;  %v13905_v31 = vld [vmem:[#allocation5 + $0x12c0] ss:$16 sps:$4 sm:$0xff]  }
 0x6b9   :  { %7351 = vmatprep.mubr.bf16.mxu0 %v15643_v16  ;;  %7392 = vmatprep.mubr.bf16.mxu1 %v15645_v18  ;;  %v13906_v33 = vld [vmem:[#allocation5 + $0x10a4] ss:$16 sps:$4 sm:$0xff]   ;;  %v13910_v54 = vld [vmem:[#allocation5 + $0x10a0] ss:$16 sps:$4 sm:$0xff]  }
 0x6ba   :  { %7362 = vmatprep.subr.bf16.mxu1 %v13902_v28  ;;  %v13908_v51 = vld [vmem:[#allocation5 + $0x12a4] ss:$16 sps:$4 sm:$0xff]   ;;  %v13911_v34 = vld [vmem:[#allocation5 + $0x12a0] ss:$16 sps:$4 sm:$0xff]  }
 0x6bb   :  { %7322 = vmatpush1.bf16.msra.mxu0 %v13904_v30  ;;  %v13912_v23 = vld [vmem:[#allocation5 + $0x1084] ss:$16 sps:$4 sm:$0xff]   ;;  %v13916_v38 = vld [vmem:[#allocation5 + $0x1080] ss:$16 sps:$4 sm:$0xff]  }
 0x6bc   :  { %7363 = vmatpush1.bf16.msra.mxu1 %v13905_v31  ;;  %7323 = vmatprep.subr.bf16.mxu0 %v13906_v33  ;;  %v13914_v26 = vld [vmem:[#allocation5 + $0x1284] ss:$16 sps:$4 sm:$0xff]   ;;  %v13917_v41 = vld [vmem:[#allocation5 + $0x1280] ss:$16 sps:$4 sm:$0xff]  }
 0x6bd   :  { %7364 = vmatprep.subr.bf16.mxu1 %v13908_v51  ;;  %v13918_v45 = vld [vmem:[#allocation5 + $0x1064] ss:$16 sps:$4 sm:$0xff]   ;;  %v13922_v36 = vld [vmem:[#allocation5 + $0x1060] ss:$16 sps:$4 sm:$0xff]  }
 0x6be   :  { %v13920_v46 = vld [vmem:[#allocation5 + $0x1264] ss:$16 sps:$4 sm:$0xff]   ;;  %v13923_v3 = vld [vmem:[#allocation5 + $0x1260] ss:$16 sps:$4 sm:$0xff]  }
 0x6bf   :  { %7324 = vmatpush1.bf16.msra.mxu0 %v13910_v54  ;;  %v13924_v43 = vld [vmem:[#allocation5 + $0x1044] ss:$16 sps:$4 sm:$0xff]   ;;  %v13928_v44 = vld [vmem:[#allocation5 + $0x1040] ss:$16 sps:$4 sm:$0xff]  }
 0x6c0   :  { %7365 = vmatpush1.bf16.msra.mxu1 %v13911_v34  ;;  %7325 = vmatprep.subr.bf16.mxu0 %v13912_v23  ;;  %v13926_v35 = vld [vmem:[#allocation5 + $0x1244] ss:$16 sps:$4 sm:$0xff]   ;;  %v13929_v47 = vld [vmem:[#allocation5 + $0x1240] ss:$16 sps:$4 sm:$0xff]   ;;  %v6659_v34 = vrot.slane %v15497_v39, 4 }
 0x6c1   :  { %7366 = vmatprep.subr.bf16.mxu1 %v13914_v26  ;;  %v13930_v20 = vld [vmem:[#allocation5 + $0x1024] ss:$16 sps:$4 sm:$0xff]   ;;  %v13934_v53 = vld [vmem:[#allocation5 + $0x1020] ss:$16 sps:$4 sm:$0xff]  }
 0x6c2   :  { %v13932_v48 = vld [vmem:[#allocation5 + $0x1224] ss:$16 sps:$4 sm:$0xff]   ;;  %v13935_v55 = vld [vmem:[#allocation5 + $0x1220] ss:$16 sps:$4 sm:$0xff]  }
 0x6c3   :  { %7326 = vmatpush1.bf16.msra.mxu0 %v13916_v38  ;;  %v13936_v56 = vld [vmem:[#allocation5 + $0x1004] ss:$16 sps:$4 sm:$0xff]   ;;  %v13940_v61 = vld [vmem:[#allocation5 + $0x1000] ss:$16 sps:$4 sm:$0xff]   ;;  %v6660_v38 = vrot.slane %v15491_v37, 3 }
 0x6c4   :  { %7367 = vmatpush1.bf16.msra.mxu1 %v13917_v41  ;;  %7327 = vmatprep.subr.bf16.mxu0 %v13918_v45  ;;  %v13938_v8 = vld [vmem:[#allocation5 + $0x1204] ss:$16 sps:$4 sm:$0xff]   ;;  %v13941_v63 = vld [vmem:[#allocation5 + $0x1200] ss:$16 sps:$4 sm:$0xff]   ;;  %v6665_v45 = vrot.slane %v15500_v32, 4 }
 0x6c5   :  { %7368 = vmatprep.subr.bf16.mxu1 %v13920_v46  ;;  %v13942_v1 = vld [vmem:[#allocation5 + $0x11e4] ss:$16 sps:$4 sm:$0xff]   ;;  %v13946_v25 = vld [vmem:[#allocation5 + $0x11e0] ss:$16 sps:$4 sm:$0xff]   ;;  %v6666_v46 = vrot.slane %v15495_v50, 3 }
 0x6c6   :  { %v13944_v6 = vld [vmem:[#allocation5 + $0x13e4] ss:$16 sps:$4 sm:$0xff]   ;;  %v13947_v7 = vld [vmem:[#allocation5 + $0x13e0] ss:$16 sps:$4 sm:$0xff]  }
 0x6c7   :  { %7328 = vmatpush1.bf16.msra.mxu0 %v13922_v36  ;;  %v13948_v2 = vld [vmem:[#allocation5 + $0x11c4] ss:$16 sps:$4 sm:$0xff]   ;;  %v13952_v14 = vld [vmem:[#allocation5 + $0x11c0] ss:$16 sps:$4 sm:$0xff]  }
 0x6c8   :  { %7369 = vmatpush1.bf16.msra.mxu1 %v13923_v3  ;;  %7329 = vmatprep.subr.bf16.mxu0 %v13924_v43  ;;  %v13950_v13 = vld [vmem:[#allocation5 + $0x13c4] ss:$16 sps:$4 sm:$0xff]   ;;  %v13953_v17 = vld [vmem:[#allocation5 + $0x13c0] ss:$16 sps:$4 sm:$0xff]  }
 0x6c9   :  { %7370 = vmatprep.subr.bf16.mxu1 %v13926_v35  ;;  %v13954_v5 = vld [vmem:[#allocation5 + $0x11a4] ss:$16 sps:$4 sm:$0xff]   ;;  %v13958_v19 = vld [vmem:[#allocation5 + $0x11a0] ss:$16 sps:$4 sm:$0xff]   ;;  %v6661_v35 = vsel %vm2838_vm8, %v6660_v38, %v6659_v34  ;;  %v14041_v34 = vld [vmem:[#allocation5 + $0x13e8] ss:$16 sps:$4 sm:$0xff]  }
 0x6ca   :  { %v13956_v4 = vld [vmem:[#allocation5 + $0x13a4] ss:$16 sps:$4 sm:$0xff]   ;;  %v13959_v58 = vld [vmem:[#allocation5 + $0x13a0] ss:$16 sps:$4 sm:$0xff]   ;;  %v14044_v38 = vld [vmem:[#allocation5 + $0x11c8] ss:$16 sps:$4 sm:$0xff]  }
 0x6cb   :  { %7330 = vmatpush1.bf16.msra.mxu0 %v13928_v44  ;;  %v13960_v59 = vld [vmem:[#allocation5 + $0x1184] ss:$16 sps:$4 sm:$0xff]   ;;  %v13964_v29 = vld [vmem:[#allocation5 + $0x1180] ss:$16 sps:$4 sm:$0xff]   ;;  %v6667_v44 = vsel %vm2838_vm8, %v6666_v46, %v6665_v45  ;;  %v14052_v45 = vld [vmem:[#allocation5 + $0x11ac] ss:$16 sps:$4 sm:$0xff]  }
 0x6cc   :  { %7371 = vmatpush1.bf16.msra.mxu1 %v13929_v47  ;;  %7331 = vmatprep.subr.bf16.mxu0 %v13930_v20  ;;  %v13962_v60 = vld [vmem:[#allocation5 + $0x1384] ss:$16 sps:$4 sm:$0xff]   ;;  %v13965_v21 = vld [vmem:[#allocation5 + $0x1380] ss:$16 sps:$4 sm:$0xff]   ;;  %v13992_v47 = vld [vmem:[#allocation5 + $0x10ec] ss:$16 sps:$4 sm:$0xff]  }
 0x6cd   :  { %7372 = vmatprep.subr.bf16.mxu1 %v13932_v48  ;;  %v13966_v22 = vld [vmem:[#allocation5 + $0x1164] ss:$16 sps:$4 sm:$0xff]   ;;  %v13970_v52 = vld [vmem:[#allocation5 + $0x1160] ss:$16 sps:$4 sm:$0xff]   ;;  %v13995_v20 = vld [vmem:[#allocation5 + $0x12ec] ss:$16 sps:$4 sm:$0xff]   ;;  %v15655_v48 = vpack.c.b16 %v6661_v35, %v6661_v35 }
 0x6ce   :  { %v13968_v62 = vld [vmem:[#allocation5 + $0x1364] ss:$16 sps:$4 sm:$0xff]   ;;  %v13971_v27 = vld [vmem:[#allocation5 + $0x1360] ss:$16 sps:$4 sm:$0xff]   ;;  %v14055_v46 = vld [vmem:[#allocation5 + $0x13ac] ss:$16 sps:$4 sm:$0xff]  }
 0x6cf   :  { %7332 = vmatpush1.bf16.msra.mxu0 %v13934_v53  ;;  %v13972_v28 = vld [vmem:[#allocation5 + $0x1144] ss:$16 sps:$4 sm:$0xff]   ;;  %v13976_v31 = vld [vmem:[#allocation5 + $0x1140] ss:$16 sps:$4 sm:$0xff]   ;;  %v15657_v53 = vpack.c.b16 %v6667_v44, %v6667_v44  ;;  %v14061_v35 = vld [vmem:[#allocation5 + $0x138c] ss:$16 sps:$4 sm:$0xff]  }
 0x6d0   :  { %7373 = vmatpush1.bf16.msra.mxu1 %v13935_v55  ;;  %7333 = vmatprep.subr.bf16.mxu0 %v13936_v56  ;;  %v13974_v30 = vld [vmem:[#allocation5 + $0x1344] ss:$16 sps:$4 sm:$0xff]   ;;  %v13977_v33 = vld [vmem:[#allocation5 + $0x1340] ss:$16 sps:$4 sm:$0xff]   ;;  %v13990_v55 = vld [vmem:[#allocation5 + $0x10e8] ss:$16 sps:$4 sm:$0xff]  }
 0x6d1   :  { %7374 = vmatprep.subr.bf16.mxu1 %v13938_v8  ;;  %v13978_v51 = vld [vmem:[#allocation5 + $0x1124] ss:$16 sps:$4 sm:$0xff]   ;;  %v13982_v23 = vld [vmem:[#allocation5 + $0x1120] ss:$16 sps:$4 sm:$0xff]   ;;  %v13993_v56 = vld [vmem:[#allocation5 + $0x12e8] ss:$16 sps:$4 sm:$0xff]  }
 0x6d2   :  { %v13980_v54 = vld [vmem:[#allocation5 + $0x1324] ss:$16 sps:$4 sm:$0xff]   ;;  %v13983_v26 = vld [vmem:[#allocation5 + $0x1320] ss:$16 sps:$4 sm:$0xff]   ;;  %v13998_v8 = vld [vmem:[#allocation5 + $0x10cc] ss:$16 sps:$4 sm:$0xff]  }
 0x6d3   :  { %7334 = vmatpush1.bf16.msra.mxu0 %v13940_v61  ;;  %v13984_v41 = vld [vmem:[#allocation5 + $0x1104] ss:$16 sps:$4 sm:$0xff]   ;;  %v13988_v3 = vld [vmem:[#allocation5 + $0x1100] ss:$16 sps:$4 sm:$0xff]   ;;  %v14001_v61 = vld [vmem:[#allocation5 + $0x12cc] ss:$16 sps:$4 sm:$0xff]  }
 0x6d4   :  { %7375 = vmatpush1.bf16.msra.mxu1 %v13941_v63  ;;  %7335 = vmatprep.subr.bf16.mxu0 %v13942_v1  ;;  %v13986_v36 = vld [vmem:[#allocation5 + $0x1304] ss:$16 sps:$4 sm:$0xff]   ;;  %v13989_v43 = vld [vmem:[#allocation5 + $0x1300] ss:$16 sps:$4 sm:$0xff]   ;;  %v13996_v63 = vld [vmem:[#allocation5 + $0x10c8] ss:$16 sps:$4 sm:$0xff]  }
 0x6d5   :  { %7376 = vmatprep.subr.bf16.mxu1 %v13944_v6  ;;  %v13999_v1 = vld [vmem:[#allocation5 + $0x12c8] ss:$16 sps:$4 sm:$0xff]   ;;  %v14004_v6 = vld [vmem:[#allocation5 + $0x10ac] ss:$16 sps:$4 sm:$0xff]  }
 0x6d6   :  { %v14056_v44 = vld [vmem:[#allocation5 + $0x1188] ss:$16 sps:$4 sm:$0xff]  }
 0x6d7   :  { %7336 = vmatpush2.bf16.msra.mxu0 %v13946_v25  ;;  %v14007_v25 = vld [vmem:[#allocation5 + $0x12ac] ss:$16 sps:$4 sm:$0xff]  }
 0x6d8   :  { %7377 = vmatpush2.bf16.msra.mxu1 %v13947_v7  ;;  %7337 = vmatprep.subr.bf16.mxu0 %v13948_v2  ;;  %v14002_v7 = vld [vmem:[#allocation5 + $0x10a8] ss:$16 sps:$4 sm:$0xff]  }
 0x6d9   :  { %7378 = vmatprep.subr.bf16.mxu1 %v13950_v13  ;;  %v14005_v2 = vld [vmem:[#allocation5 + $0x12a8] ss:$16 sps:$4 sm:$0xff]   ;;  %v14010_v13 = vld [vmem:[#allocation5 + $0x108c] ss:$16 sps:$4 sm:$0xff]  }
 0x6db   :  { %7338 = vmatpush2.bf16.msra.mxu0 %v13952_v14  ;;  %v14013_v14 = vld [vmem:[#allocation5 + $0x128c] ss:$16 sps:$4 sm:$0xff]  }
 0x6dc   :  { %7379 = vmatpush2.bf16.msra.mxu1 %v13953_v17  ;;  %7339 = vmatprep.subr.bf16.mxu0 %v13954_v5  ;;  %v14008_v17 = vld [vmem:[#allocation5 + $0x1088] ss:$16 sps:$4 sm:$0xff]  }
 0x6dd   :  { %7380 = vmatprep.subr.bf16.mxu1 %v13956_v4  ;;  %v14011_v5 = vld [vmem:[#allocation5 + $0x1288] ss:$16 sps:$4 sm:$0xff]   ;;  %v14016_v4 = vld [vmem:[#allocation5 + $0x106c] ss:$16 sps:$4 sm:$0xff]  }
 0x6df   :  { %7340 = vmatpush2.bf16.msra.mxu0 %v13958_v19  ;;  %v14019_v19 = vld [vmem:[#allocation5 + $0x126c] ss:$16 sps:$4 sm:$0xff]  }
 0x6e0   :  { %7381 = vmatpush2.bf16.msra.mxu1 %v13959_v58  ;;  %7341 = vmatprep.subr.bf16.mxu0 %v13960_v59  ;;  %v14014_v58 = vld [vmem:[#allocation5 + $0x1068] ss:$16 sps:$4 sm:$0xff]   ;;  %v14025_v59 = vld [vmem:[#allocation5 + $0x124c] ss:$16 sps:$4 sm:$0xff]  }
 0x6e1   :  { %7382 = vmatprep.subr.bf16.mxu1 %v13962_v60  ;;  %v14020_v60 = vld [vmem:[#allocation5 + $0x1048] ss:$16 sps:$4 sm:$0xff]  }
 0x6e3   :  { %7342 = vmatpush2.bf16.msra.mxu0 %v13964_v29  ;;  %v14023_v29 = vld [vmem:[#allocation5 + $0x1248] ss:$16 sps:$4 sm:$0xff]  }
 0x6e4   :  { %7383 = vmatpush2.bf16.msra.mxu1 %v13965_v21  ;;  %7343 = vmatprep.subr.bf16.mxu0 %v13966_v22  ;;  %v14028_v21 = vld [vmem:[#allocation5 + $0x102c] ss:$16 sps:$4 sm:$0xff]  }
 0x6e5   :  { %7384 = vmatprep.subr.bf16.mxu1 %v13968_v62  ;;  %v14031_v22 = vld [vmem:[#allocation5 + $0x122c] ss:$16 sps:$4 sm:$0xff]   ;;  %v14026_v62 = vld [vmem:[#allocation5 + $0x1028] ss:$16 sps:$4 sm:$0xff]  }
 0x6e7   :  { %7344 = vmatpush2.bf16.msra.mxu0 %v13970_v52  ;;  %v14029_v52 = vld [vmem:[#allocation5 + $0x1228] ss:$16 sps:$4 sm:$0xff]  }
 0x6e8   :  { %7385 = vmatpush2.bf16.msra.mxu1 %v13971_v27  ;;  %7345 = vmatprep.subr.bf16.mxu0 %v13972_v28  ;;  %v14034_v27 = vld [vmem:[#allocation5 + $0x100c] ss:$16 sps:$4 sm:$0xff]  }
 0x6e9   :  { %7386 = vmatprep.subr.bf16.mxu1 %v13974_v30  ;;  %v14037_v28 = vld [vmem:[#allocation5 + $0x120c] ss:$16 sps:$4 sm:$0xff]   ;;  %v14032_v30 = vld [vmem:[#allocation5 + $0x1008] ss:$16 sps:$4 sm:$0xff]  }
 0x6eb   :  { %7346 = vmatpush2.bf16.msra.mxu0 %v13976_v31  ;;  %v14035_v31 = vld [vmem:[#allocation5 + $0x1208] ss:$16 sps:$4 sm:$0xff]  }
 0x6ec   :  { %7387 = vmatpush2.bf16.msra.mxu1 %v13977_v33  ;;  %7347 = vmatprep.subr.bf16.mxu0 %v13978_v51  ;;  %v14040_v33 = vld [vmem:[#allocation5 + $0x11ec] ss:$16 sps:$4 sm:$0xff]  }
 0x6ed   :  { %7388 = vmatprep.subr.bf16.mxu1 %v13980_v54  ;;  %v14043_v51 = vld [vmem:[#allocation5 + $0x13ec] ss:$16 sps:$4 sm:$0xff]   ;;  %v14038_v54 = vld [vmem:[#allocation5 + $0x11e8] ss:$16 sps:$4 sm:$0xff]  }
 0x6ef   :  { %7348 = vmatpush2.bf16.msra.mxu0 %v13982_v23  ;;  %v14046_v23 = vld [vmem:[#allocation5 + $0x11cc] ss:$16 sps:$4 sm:$0xff]  }
 0x6f0   :  { %7389 = vmatpush2.bf16.msra.mxu1 %v13983_v26  ;;  %7349 = vmatprep.subr.bf16.mxu0 %v13984_v41  ;;  %v14049_v26 = vld [vmem:[#allocation5 + $0x13cc] ss:$16 sps:$4 sm:$0xff]   ;;  %v14047_v41 = vld [vmem:[#allocation5 + $0x13c8] ss:$16 sps:$4 sm:$0xff]  }
 0x6f1   :  { %7390 = vmatprep.subr.bf16.mxu1 %v13986_v36  ;;  %v14050_v36 = vld [vmem:[#allocation5 + $0x11a8] ss:$16 sps:$4 sm:$0xff]  }
 0x6f3   :  { %7350 = vmatpush2.bf16.msra.mxu0 %v13988_v3  ;;  %v14053_v3 = vld [vmem:[#allocation5 + $0x13a8] ss:$16 sps:$4 sm:$0xff]  }
 0x6f4   :  { %7391 = vmatpush2.bf16.msra.mxu1 %v13989_v43  ;;  %7401 = vmatprep.subr.bf16.mxu0 %v13992_v47  ;;  %v14058_v43 = vld [vmem:[#allocation5 + $0x118c] ss:$16 sps:$4 sm:$0xff]   ;;  %v14059_v47 = vld [vmem:[#allocation5 + $0x1388] ss:$16 sps:$4 sm:$0xff]  }
 0x6f5   :  { %7442 = vmatprep.subr.bf16.mxu1 %v13995_v20  ;;  %v14064_v20 = vld [vmem:[#allocation5 + $0x116c] ss:$16 sps:$4 sm:$0xff]  }
 0x6f6   :  { %7352 = vmatmul.mubr.bf16.vlgmr.msra.gmra.mxu0 %v15655_v48 }
 0x6f7   :  { %7393 = vmatmul.mubr.bf16.vlgmr.msra.gmra.mxu1 %v15657_v53  ;;  %7402 = vmatpush1.bf16.msra.mxu0 %v13990_v55  ;;  %v14067_v55 = vld [vmem:[#allocation5 + $0x136c] ss:$16 sps:$4 sm:$0xff]  }
 0x6f8   :  { %7443 = vmatpush1.bf16.msra.mxu1 %v13993_v56  ;;  %7403 = vmatprep.subr.bf16.mxu0 %v13998_v8  ;;  %v14062_v56 = vld [vmem:[#allocation5 + $0x1168] ss:$16 sps:$4 sm:$0xff]  }
 0x6f9   :  { %7444 = vmatprep.subr.bf16.mxu1 %v14001_v61  ;;  %7433 = vmatprep.mubr.bf16.mxu0 %v15643_v16  ;;  %v14017_v16 = vld [vmem:[#allocation5 + $0x1268] ss:$16 sps:$4 sm:$0xff]   ;;  %v14070_v61 = vld [vmem:[#allocation5 + $0x114c] ss:$16 sps:$4 sm:$0xff]  }
 0x6fa   :  { %7474 = vmatprep.mubr.bf16.mxu1 %v15645_v18  ;;  %v14022_v18 = vld [vmem:[#allocation5 + $0x104c] ss:$16 sps:$4 sm:$0xff]   ;;  %v14065_v8 = vld [vmem:[#allocation5 + $0x1368] ss:$16 sps:$4 sm:$0xff]  }
 0x6fb   :  { %7404 = vmatpush1.bf16.msra.mxu0 %v13996_v63  ;;  %v14073_v63 = vld [vmem:[#allocation5 + $0x134c] ss:$16 sps:$4 sm:$0xff]  }
 0x6fc   :  { %7445 = vmatpush1.bf16.msra.mxu1 %v13999_v1  ;;  %7405 = vmatprep.subr.bf16.mxu0 %v14004_v6  ;;  %v14068_v1 = vld [vmem:[#allocation5 + $0x1148] ss:$16 sps:$4 sm:$0xff]  }
 0x6fd   :  { %7446 = vmatprep.subr.bf16.mxu1 %v14007_v25  ;;  %v14071_v6 = vld [vmem:[#allocation5 + $0x1348] ss:$16 sps:$4 sm:$0xff]   ;;  %v14076_v25 = vld [vmem:[#allocation5 + $0x112c] ss:$16 sps:$4 sm:$0xff]  }
 0x6ff   :  { %7406 = vmatpush1.bf16.msra.mxu0 %v14002_v7  ;;  %v14079_v7 = vld [vmem:[#allocation5 + $0x132c] ss:$16 sps:$4 sm:$0xff]  }
 0x700   :  { %7447 = vmatpush1.bf16.msra.mxu1 %v14005_v2  ;;  %7407 = vmatprep.subr.bf16.mxu0 %v14010_v13  ;;  %v14074_v2 = vld [vmem:[#allocation5 + $0x1128] ss:$16 sps:$4 sm:$0xff]  }
 0x701   :  { %7448 = vmatprep.subr.bf16.mxu1 %v14013_v14  ;;  %v14077_v13 = vld [vmem:[#allocation5 + $0x1328] ss:$16 sps:$4 sm:$0xff]   ;;  %v14082_v14 = vld [vmem:[#allocation5 + $0x110c] ss:$16 sps:$4 sm:$0xff]  }
 0x703   :  { %7408 = vmatpush1.bf16.msra.mxu0 %v14008_v17  ;;  %v14085_v17 = vld [vmem:[#allocation5 + $0x130c] ss:$16 sps:$4 sm:$0xff]  }
 0x704   :  { %7449 = vmatpush1.bf16.msra.mxu1 %v14011_v5  ;;  %7409 = vmatprep.subr.bf16.mxu0 %v14016_v4  ;;  %v7619_v5 = vrot.slane %v15465_v9, 5  ;;  %v7620_v4 = vrot.slane %v15467_v10, 4 }
 0x705   :  { %7450 = vmatprep.subr.bf16.mxu1 %v14019_v19  ;;  %v7625_v19 = vrot.slane %v15469_v11, 5 }
 0x707   :  { %7410 = vmatpush1.bf16.msra.mxu0 %v14014_v58  ;;  %v14080_v58 = vld [vmem:[#allocation5 + $0x1108] ss:$16 sps:$4 sm:$0xff]  }
 0x708   :  { %7451 = vmatpush1.bf16.msra.mxu1 %v14017_v16  ;;  %7411 = vmatprep.subr.bf16.mxu0 %v14022_v18  ;;  %v14083_v16 = vld [vmem:[#allocation5 + $0x1308] ss:$16 sps:$4 sm:$0xff]   ;;  %v7626_v18 = vrot.slane %v15471_v12, 4 }
 0x709   :  { %7452 = vmatprep.subr.bf16.mxu1 %v14025_v59  ;;  %v14088_v59 = vld [vmem:[#allocation5 + $0x14e4] ss:$16 sps:$4 sm:$0xff]  }
 0x70b   :  { %7412 = vmatpush1.bf16.msra.mxu0 %v14020_v60  ;;  %v14091_v60 = vld [vmem:[#allocation5 + $0x16e4] ss:$16 sps:$4 sm:$0xff]  }
 0x70c   :  { %7453 = vmatpush1.bf16.msra.mxu1 %v14023_v29  ;;  %7413 = vmatprep.subr.bf16.mxu0 %v14028_v21  ;;  %v14086_v29 = vld [vmem:[#allocation5 + $0x14e0] ss:$16 sps:$4 sm:$0xff]  }
 0x70d   :  { %7454 = vmatprep.subr.bf16.mxu1 %v14031_v22  ;;  %v14089_v21 = vld [vmem:[#allocation5 + $0x16e0] ss:$16 sps:$4 sm:$0xff]   ;;  %v7621_v22 = vsel %vm2838_vm8, %v7620_v4, %v7619_v5  ;;  %v14148_v4 = vld [vmem:[#allocation5 + $0x15a4] ss:$16 sps:$4 sm:$0xff]  }
 0x70e   :  { %v14143_v5 = vld [vmem:[#allocation5 + $0x17c0] ss:$16 sps:$4 sm:$0xff]  }
 0x70f   :  { %7414 = vmatpush1.bf16.msra.mxu0 %v14026_v62  ;;  %v7627_v62 = vsel %vm2838_vm8, %v7626_v18, %v7625_v19  ;;  %v14151_v19 = vld [vmem:[#allocation5 + $0x17a4] ss:$16 sps:$4 sm:$0xff]  }
 0x710   :  { %7455 = vmatpush1.bf16.msra.mxu1 %v14029_v52  ;;  %7415 = vmatprep.subr.bf16.mxu0 %v14034_v27  ;;  %v14094_v52 = vld [vmem:[#allocation5 + $0x14c4] ss:$16 sps:$4 sm:$0xff]  }
 0x711   :  { %7456 = vmatprep.subr.bf16.mxu1 %v14037_v28  ;;  %v14097_v27 = vld [vmem:[#allocation5 + $0x16c4] ss:$16 sps:$4 sm:$0xff]   ;;  %v15669_v28 = vpack.c.b16 %v7621_v22, %v7621_v22 }
 0x712   :  { %v14154_v18 = vld [vmem:[#allocation5 + $0x1584] ss:$16 sps:$4 sm:$0xff]  }
 0x713   :  { %7416 = vmatpush1.bf16.msra.mxu0 %v14032_v30  ;;  %v15671_v30 = vpack.c.b16 %v7627_v62, %v7627_v62  ;;  %v14163_v22 = vld [vmem:[#allocation5 + $0x1764] ss:$16 sps:$4 sm:$0xff]   ;;  %v14158_v62 = vld [vmem:[#allocation5 + $0x1560] ss:$16 sps:$4 sm:$0xff]  }
 0x714   :  { %7457 = vmatpush1.bf16.msra.mxu1 %v14035_v31  ;;  %7417 = vmatprep.subr.bf16.mxu0 %v14040_v33  ;;  %v14092_v31 = vld [vmem:[#allocation5 + $0x14c0] ss:$16 sps:$4 sm:$0xff]  }
 0x715   :  { %7458 = vmatprep.subr.bf16.mxu1 %v14043_v51  ;;  %v14095_v33 = vld [vmem:[#allocation5 + $0x16c0] ss:$16 sps:$4 sm:$0xff]   ;;  %v14100_v51 = vld [vmem:[#allocation5 + $0x14a4] ss:$16 sps:$4 sm:$0xff]  }
 0x717   :  { %7418 = vmatpush2.bf16.msra.mxu0 %v14038_v54  ;;  %v14103_v54 = vld [vmem:[#allocation5 + $0x16a4] ss:$16 sps:$4 sm:$0xff]  }
 0x718   :  { %7459 = vmatpush2.bf16.msra.mxu1 %v14041_v34  ;;  %7419 = vmatprep.subr.bf16.mxu0 %v14046_v23  ;;  %v14098_v34 = vld [vmem:[#allocation5 + $0x14a0] ss:$16 sps:$4 sm:$0xff]  }
 0x719   :  { %7460 = vmatprep.subr.bf16.mxu1 %v14049_v26  ;;  %v14101_v23 = vld [vmem:[#allocation5 + $0x16a0] ss:$16 sps:$4 sm:$0xff]   ;;  %v14106_v26 = vld [vmem:[#allocation5 + $0x1484] ss:$16 sps:$4 sm:$0xff]  }
 0x71b   :  { %7420 = vmatpush2.bf16.msra.mxu0 %v14044_v38  ;;  %v14107_v38 = vld [vmem:[#allocation5 + $0x1680] ss:$16 sps:$4 sm:$0xff]  }
 0x71c   :  { %7461 = vmatpush2.bf16.msra.mxu1 %v14047_v41  ;;  %7421 = vmatprep.subr.bf16.mxu0 %v14052_v45  ;;  %v14112_v41 = vld [vmem:[#allocation5 + $0x1464] ss:$16 sps:$4 sm:$0xff]  }
 0x71d   :  { %7462 = vmatprep.subr.bf16.mxu1 %v14055_v46  ;;  %v14115_v45 = vld [vmem:[#allocation5 + $0x1664] ss:$16 sps:$4 sm:$0xff]   ;;  %v14110_v46 = vld [vmem:[#allocation5 + $0x1460] ss:$16 sps:$4 sm:$0xff]  }
 0x71f   :  { %7422 = vmatpush2.bf16.msra.mxu0 %v14050_v36  ;;  %v14113_v36 = vld [vmem:[#allocation5 + $0x1660] ss:$16 sps:$4 sm:$0xff]  }
 0x720   :  { %7463 = vmatpush2.bf16.msra.mxu1 %v14053_v3  ;;  %7423 = vmatprep.subr.bf16.mxu0 %v14058_v43  ;;  %v14118_v3 = vld [vmem:[#allocation5 + $0x1444] ss:$16 sps:$4 sm:$0xff]  }
 0x721   :  { %7464 = vmatprep.subr.bf16.mxu1 %v14061_v35  ;;  %v14121_v43 = vld [vmem:[#allocation5 + $0x1644] ss:$16 sps:$4 sm:$0xff]   ;;  %v14116_v35 = vld [vmem:[#allocation5 + $0x1440] ss:$16 sps:$4 sm:$0xff]  }
 0x723   :  { %7424 = vmatpush2.bf16.msra.mxu0 %v14056_v44  ;;  %v14119_v44 = vld [vmem:[#allocation5 + $0x1640] ss:$16 sps:$4 sm:$0xff]  }
 0x724   :  { %7465 = vmatpush2.bf16.msra.mxu1 %v14059_v47  ;;  %7425 = vmatprep.subr.bf16.mxu0 %v14064_v20  ;;  %v14124_v47 = vld [vmem:[#allocation5 + $0x1424] ss:$16 sps:$4 sm:$0xff]  }
 0x725   :  { %7466 = vmatprep.subr.bf16.mxu1 %v14067_v55  ;;  %v14127_v20 = vld [vmem:[#allocation5 + $0x1624] ss:$16 sps:$4 sm:$0xff]   ;;  %v14122_v55 = vld [vmem:[#allocation5 + $0x1420] ss:$16 sps:$4 sm:$0xff]  }
 0x727   :  { %7426 = vmatpush2.bf16.msra.mxu0 %v14062_v56  ;;  %v14125_v56 = vld [vmem:[#allocation5 + $0x1620] ss:$16 sps:$4 sm:$0xff]  }
 0x728   :  { %7467 = vmatpush2.bf16.msra.mxu1 %v14065_v8  ;;  %7427 = vmatprep.subr.bf16.mxu0 %v14070_v61  ;;  %v14130_v8 = vld [vmem:[#allocation5 + $0x1404] ss:$16 sps:$4 sm:$0xff]  }
 0x729   :  { %7468 = vmatprep.subr.bf16.mxu1 %v14073_v63  ;;  %v14133_v61 = vld [vmem:[#allocation5 + $0x1604] ss:$16 sps:$4 sm:$0xff]   ;;  %v14128_v63 = vld [vmem:[#allocation5 + $0x1400] ss:$16 sps:$4 sm:$0xff]  }
 0x72b   :  { %7428 = vmatpush2.bf16.msra.mxu0 %v14068_v1  ;;  %v14131_v1 = vld [vmem:[#allocation5 + $0x1600] ss:$16 sps:$4 sm:$0xff]  }
 0x72c   :  { %7469 = vmatpush2.bf16.msra.mxu1 %v14071_v6  ;;  %7429 = vmatprep.subr.bf16.mxu0 %v14076_v25  ;;  %v14136_v6 = vld [vmem:[#allocation5 + $0x15e4] ss:$16 sps:$4 sm:$0xff]  }
 0x72d   :  { %7470 = vmatprep.subr.bf16.mxu1 %v14079_v7  ;;  %v14139_v25 = vld [vmem:[#allocation5 + $0x17e4] ss:$16 sps:$4 sm:$0xff]   ;;  %v14134_v7 = vld [vmem:[#allocation5 + $0x15e0] ss:$16 sps:$4 sm:$0xff]  }
 0x72f   :  { %7430 = vmatpush2.bf16.msra.mxu0 %v14074_v2  ;;  %v14137_v2 = vld [vmem:[#allocation5 + $0x17e0] ss:$16 sps:$4 sm:$0xff]  }
 0x730   :  { %7471 = vmatpush2.bf16.msra.mxu1 %v14077_v13  ;;  %7431 = vmatprep.subr.bf16.mxu0 %v14082_v14  ;;  %v14142_v13 = vld [vmem:[#allocation5 + $0x15c4] ss:$16 sps:$4 sm:$0xff]  }
 0x731   :  { %7472 = vmatprep.subr.bf16.mxu1 %v14085_v17  ;;  %v14145_v14 = vld [vmem:[#allocation5 + $0x17c4] ss:$16 sps:$4 sm:$0xff]   ;;  %v14140_v17 = vld [vmem:[#allocation5 + $0x15c0] ss:$16 sps:$4 sm:$0xff]  }
 0x733   :  { %7432 = vmatpush2.bf16.msra.mxu0 %v14080_v58  ;;  %v14146_v58 = vld [vmem:[#allocation5 + $0x15a0] ss:$16 sps:$4 sm:$0xff]  }
 0x734   :  { %7473 = vmatpush2.bf16.msra.mxu1 %v14083_v16  ;;  %8276 = vmatprep.subr.bf16.mxu0 %v14088_v59  ;;  %v14149_v16 = vld [vmem:[#allocation5 + $0x17a0] ss:$16 sps:$4 sm:$0xff]   ;;  %v14157_v59 = vld [vmem:[#allocation5 + $0x1784] ss:$16 sps:$4 sm:$0xff]  }
 0x735   :  { %8317 = vmatprep.subr.bf16.mxu1 %v14091_v60  ;;  %v14152_v60 = vld [vmem:[#allocation5 + $0x1580] ss:$16 sps:$4 sm:$0xff]  }
 0x736   :  { %7434 = vmatmul.mubr.bf16.vlgmr.msra.gmra.mxu0 %v15655_v48  ;;  %v14109_v48 = vld [vmem:[#allocation5 + $0x1684] ss:$16 sps:$4 sm:$0xff]  }
 0x737   :  { %7475 = vmatmul.mubr.bf16.vlgmr.msra.gmra.mxu1 %v15657_v53  ;;  %8277 = vmatpush1.bf16.msra.mxu0 %v14086_v29  ;;  %v14104_v53 = vld [vmem:[#allocation5 + $0x1480] ss:$16 sps:$4 sm:$0xff]  }
 0x738   :  { %8318 = vmatpush1.bf16.msra.mxu1 %v14089_v21  ;;  %8278 = vmatprep.subr.bf16.mxu0 %v14094_v52  ;;  %v14155_v29 = vld [vmem:[#allocation5 + $0x1780] ss:$16 sps:$4 sm:$0xff]   ;;  %v14160_v21 = vld [vmem:[#allocation5 + $0x1564] ss:$16 sps:$4 sm:$0xff]  }
 0x739   :  { %8319 = vmatprep.subr.bf16.mxu1 %v14097_v27  ;;  %8308 = vmatprep.mubr.bf16.mxu0 %v15669_v28  ;;  %v14161_v52 = vld [vmem:[#allocation5 + $0x1760] ss:$16 sps:$4 sm:$0xff]   ;;  %v14166_v27 = vld [vmem:[#allocation5 + $0x1544] ss:$16 sps:$4 sm:$0xff]  }
 0x73a   :  { %8349 = vmatprep.mubr.bf16.mxu1 %v15671_v30 }
 0x73b   :  { %8279 = vmatpush1.bf16.msra.mxu0 %v14092_v31  ;;  %v14169_v31 = vld [vmem:[#allocation5 + $0x1744] ss:$16 sps:$4 sm:$0xff]  }
 0x73c   :  { %8320 = vmatpush1.bf16.msra.mxu1 %v14095_v33  ;;  %8280 = vmatprep.subr.bf16.mxu0 %v14100_v51  ;;  %v14164_v33 = vld [vmem:[#allocation5 + $0x1540] ss:$16 sps:$4 sm:$0xff]  }
 0x73d   :  { %8321 = vmatprep.subr.bf16.mxu1 %v14103_v54  ;;  %v14167_v51 = vld [vmem:[#allocation5 + $0x1740] ss:$16 sps:$4 sm:$0xff]   ;;  %v14172_v54 = vld [vmem:[#allocation5 + $0x1524] ss:$16 sps:$4 sm:$0xff]  }
 0x73f   :  { %8281 = vmatpush1.bf16.msra.mxu0 %v14098_v34  ;;  %v14175_v34 = vld [vmem:[#allocation5 + $0x1724] ss:$16 sps:$4 sm:$0xff]  }
 0x740   :  { %8322 = vmatpush1.bf16.msra.mxu1 %v14101_v23  ;;  %8282 = vmatprep.subr.bf16.mxu0 %v14106_v26  ;;  %v7616_v23 = vrot.slane %v15497_v39, 5  ;;  %v14170_v26 = vld [vmem:[#allocation5 + $0x1520] ss:$16 sps:$4 sm:$0xff]  }
 0x741   :  { %8323 = vmatprep.subr.bf16.mxu1 %v14109_v48  ;;  %v14173_v48 = vld [vmem:[#allocation5 + $0x1720] ss:$16 sps:$4 sm:$0xff]  }
 0x743   :  { %8283 = vmatpush1.bf16.msra.mxu0 %v14104_v53  ;;  %v7617_v53 = vrot.slane %v15491_v37, 4 }
 0x744   :  { %8324 = vmatpush1.bf16.msra.mxu1 %v14107_v38  ;;  %8284 = vmatprep.subr.bf16.mxu0 %v14112_v41  ;;  %v14178_v38 = vld [vmem:[#allocation5 + $0x1504] ss:$16 sps:$4 sm:$0xff]   ;;  %v7622_v41 = vrot.slane %v15500_v32, 5 }
 0x745   :  { %8325 = vmatprep.subr.bf16.mxu1 %v14115_v45  ;;  %v7623_v45 = vrot.slane %v15495_v50, 4 }
 0x747   :  { %8285 = vmatpush1.bf16.msra.mxu0 %v14110_v46  ;;  %v14181_v46 = vld [vmem:[#allocation5 + $0x1704] ss:$16 sps:$4 sm:$0xff]  }
 0x748   :  { %8326 = vmatpush1.bf16.msra.mxu1 %v14113_v36  ;;  %8286 = vmatprep.subr.bf16.mxu0 %v14118_v3  ;;  %v14176_v36 = vld [vmem:[#allocation5 + $0x1500] ss:$16 sps:$4 sm:$0xff]  }
 0x749   :  { %8327 = vmatprep.subr.bf16.mxu1 %v14121_v43  ;;  %v14179_v3 = vld [vmem:[#allocation5 + $0x1700] ss:$16 sps:$4 sm:$0xff]   ;;  %v7618_v43 = vsel %vm2838_vm8, %v7617_v53, %v7616_v23  ;;  %v14233_v23 = vld [vmem:[#allocation5 + $0x17e8] ss:$16 sps:$4 sm:$0xff]  }
 0x74a   :  { %v14236_v53 = vld [vmem:[#allocation5 + $0x15c8] ss:$16 sps:$4 sm:$0xff]  }
 0x74b   :  { %8287 = vmatpush1.bf16.msra.mxu0 %v14116_v35  ;;  %v7624_v35 = vsel %vm2838_vm8, %v7623_v45, %v7622_v41  ;;  %v14244_v41 = vld [vmem:[#allocation5 + $0x15ac] ss:$16 sps:$4 sm:$0xff]  }
 0x74c   :  { %8328 = vmatpush1.bf16.msra.mxu1 %v14119_v44  ;;  %8288 = vmatprep.subr.bf16.mxu0 %v14124_v47  ;;  %v14184_v44 = vld [vmem:[#allocation5 + $0x14ec] ss:$16 sps:$4 sm:$0xff]  }
 0x74d   :  { %8329 = vmatprep.subr.bf16.mxu1 %v14127_v20  ;;  %v14187_v47 = vld [vmem:[#allocation5 + $0x16ec] ss:$16 sps:$4 sm:$0xff]   ;;  %v15683_v20 = vpack.c.b16 %v7618_v43, %v7618_v43 }
 0x74e   :  { %v14247_v45 = vld [vmem:[#allocation5 + $0x17ac] ss:$16 sps:$4 sm:$0xff]  }
 0x74f   :  { %8289 = vmatpush1.bf16.msra.mxu0 %v14122_v55  ;;  %v15685_v55 = vpack.c.b16 %v7624_v35, %v7624_v35  ;;  %v14253_v43 = vld [vmem:[#allocation5 + $0x178c] ss:$16 sps:$4 sm:$0xff]   ;;  %v14248_v35 = vld [vmem:[#allocation5 + $0x1588] ss:$16 sps:$4 sm:$0xff]  }
 0x750   :  { %8330 = vmatpush1.bf16.msra.mxu1 %v14125_v56  ;;  %8290 = vmatprep.subr.bf16.mxu0 %v14130_v8  ;;  %v14182_v56 = vld [vmem:[#allocation5 + $0x14e8] ss:$16 sps:$4 sm:$0xff]  }
 0x751   :  { %8331 = vmatprep.subr.bf16.mxu1 %v14133_v61  ;;  %v14185_v8 = vld [vmem:[#allocation5 + $0x16e8] ss:$16 sps:$4 sm:$0xff]   ;;  %v14190_v61 = vld [vmem:[#allocation5 + $0x14cc] ss:$16 sps:$4 sm:$0xff]  }
 0x753   :  { %8291 = vmatpush1.bf16.msra.mxu0 %v14128_v63  ;;  %v14193_v63 = vld [vmem:[#allocation5 + $0x16cc] ss:$16 sps:$4 sm:$0xff]  }
 0x754   :  { %8332 = vmatpush1.bf16.msra.mxu1 %v14131_v1  ;;  %8292 = vmatprep.subr.bf16.mxu0 %v14136_v6  ;;  %v14188_v1 = vld [vmem:[#allocation5 + $0x14c8] ss:$16 sps:$4 sm:$0xff]  }
 0x755   :  { %8333 = vmatprep.subr.bf16.mxu1 %v14139_v25  ;;  %v14191_v6 = vld [vmem:[#allocation5 + $0x16c8] ss:$16 sps:$4 sm:$0xff]   ;;  %v14196_v25 = vld [vmem:[#allocation5 + $0x14ac] ss:$16 sps:$4 sm:$0xff]  }
 0x757   :  { %8293 = vmatpush2.bf16.msra.mxu0 %v14134_v7  ;;  %v14199_v7 = vld [vmem:[#allocation5 + $0x16ac] ss:$16 sps:$4 sm:$0xff]  }
 0x758   :  { %8334 = vmatpush2.bf16.msra.mxu1 %v14137_v2  ;;  %8294 = vmatprep.subr.bf16.mxu0 %v14142_v13  ;;  %v14194_v2 = vld [vmem:[#allocation5 + $0x14a8] ss:$16 sps:$4 sm:$0xff]  }
 0x759   :  { %8335 = vmatprep.subr.bf16.mxu1 %v14145_v14  ;;  %v14197_v13 = vld [vmem:[#allocation5 + $0x16a8] ss:$16 sps:$4 sm:$0xff]   ;;  %v14202_v14 = vld [vmem:[#allocation5 + $0x148c] ss:$16 sps:$4 sm:$0xff]  }
 0x75b   :  { %8295 = vmatpush2.bf16.msra.mxu0 %v14140_v17  ;;  %v14205_v17 = vld [vmem:[#allocation5 + $0x168c] ss:$16 sps:$4 sm:$0xff]  }
 0x75c   :  { %8336 = vmatpush2.bf16.msra.mxu1 %v14143_v5  ;;  %8296 = vmatprep.subr.bf16.mxu0 %v14148_v4  ;;  %v14200_v5 = vld [vmem:[#allocation5 + $0x1488] ss:$16 sps:$4 sm:$0xff]  }
 0x75d   :  { %8337 = vmatprep.subr.bf16.mxu1 %v14151_v19  ;;  %v14203_v4 = vld [vmem:[#allocation5 + $0x1688] ss:$16 sps:$4 sm:$0xff]   ;;  %v14208_v19 = vld [vmem:[#allocation5 + $0x146c] ss:$16 sps:$4 sm:$0xff]  }
 0x75f   :  { %8297 = vmatpush2.bf16.msra.mxu0 %v14146_v58  ;;  %v14211_v58 = vld [vmem:[#allocation5 + $0x166c] ss:$16 sps:$4 sm:$0xff]  }
 0x760   :  { %8338 = vmatpush2.bf16.msra.mxu1 %v14149_v16  ;;  %8298 = vmatprep.subr.bf16.mxu0 %v14154_v18  ;;  %v14206_v16 = vld [vmem:[#allocation5 + $0x1468] ss:$16 sps:$4 sm:$0xff]   ;;  %v14217_v18 = vld [vmem:[#allocation5 + $0x164c] ss:$16 sps:$4 sm:$0xff]  }
 0x761   :  { %8339 = vmatprep.subr.bf16.mxu1 %v14157_v59  ;;  %v14212_v59 = vld [vmem:[#allocation5 + $0x1448] ss:$16 sps:$4 sm:$0xff]  }
 0x763   :  { %8299 = vmatpush2.bf16.msra.mxu0 %v14152_v60  ;;  %v14215_v60 = vld [vmem:[#allocation5 + $0x1648] ss:$16 sps:$4 sm:$0xff]  }
 0x764   :  { %8340 = vmatpush2.bf16.msra.mxu1 %v14155_v29  ;;  %8300 = vmatprep.subr.bf16.mxu0 %v14160_v21  ;;  %v14220_v29 = vld [vmem:[#allocation5 + $0x142c] ss:$16 sps:$4 sm:$0xff]  }
 0x765   :  { %8341 = vmatprep.subr.bf16.mxu1 %v14163_v22  ;;  %v14223_v21 = vld [vmem:[#allocation5 + $0x162c] ss:$16 sps:$4 sm:$0xff]   ;;  %v14218_v22 = vld [vmem:[#allocation5 + $0x1428] ss:$16 sps:$4 sm:$0xff]  }
 0x767   :  { %8301 = vmatpush2.bf16.msra.mxu0 %v14158_v62  ;;  %v14221_v62 = vld [vmem:[#allocation5 + $0x1628] ss:$16 sps:$4 sm:$0xff]  }
 0x768   :  { %8342 = vmatpush2.bf16.msra.mxu1 %v14161_v52  ;;  %8302 = vmatprep.subr.bf16.mxu0 %v14166_v27  ;;  %v14226_v52 = vld [vmem:[#allocation5 + $0x140c] ss:$16 sps:$4 sm:$0xff]  }
 0x769   :  { %8343 = vmatprep.subr.bf16.mxu1 %v14169_v31  ;;  %v14229_v27 = vld [vmem:[#allocation5 + $0x160c] ss:$16 sps:$4 sm:$0xff]   ;;  %v14224_v31 = vld [vmem:[#allocation5 + $0x1408] ss:$16 sps:$4 sm:$0xff]  }
 0x76b   :  { %8303 = vmatpush2.bf16.msra.mxu0 %v14164_v33  ;;  %v14227_v33 = vld [vmem:[#allocation5 + $0x1608] ss:$16 sps:$4 sm:$0xff]  }
 0x76c   :  { %8344 = vmatpush2.bf16.msra.mxu1 %v14167_v51  ;;  %8304 = vmatprep.subr.bf16.mxu0 %v14172_v54  ;;  %v14232_v51 = vld [vmem:[#allocation5 + $0x15ec] ss:$16 sps:$4 sm:$0xff]  }
 0x76d   :  { %8345 = vmatprep.subr.bf16.mxu1 %v14175_v34  ;;  %v14235_v54 = vld [vmem:[#allocation5 + $0x17ec] ss:$16 sps:$4 sm:$0xff]   ;;  %v14230_v34 = vld [vmem:[#allocation5 + $0x15e8] ss:$16 sps:$4 sm:$0xff]  }
 0x76f   :  { %8305 = vmatpush2.bf16.msra.mxu0 %v14170_v26  ;;  %v14238_v26 = vld [vmem:[#allocation5 + $0x15cc] ss:$16 sps:$4 sm:$0xff]  }
 0x770   :  { %8346 = vmatpush2.bf16.msra.mxu1 %v14173_v48  ;;  %8306 = vmatprep.subr.bf16.mxu0 %v14178_v38  ;;  %v14241_v48 = vld [vmem:[#allocation5 + $0x17cc] ss:$16 sps:$4 sm:$0xff]   ;;  %v14239_v38 = vld [vmem:[#allocation5 + $0x17c8] ss:$16 sps:$4 sm:$0xff]  }
 0x771   :  { %8347 = vmatprep.subr.bf16.mxu1 %v14181_v46  ;;  %v14242_v46 = vld [vmem:[#allocation5 + $0x15a8] ss:$16 sps:$4 sm:$0xff]  }
 0x773   :  { %8307 = vmatpush2.bf16.msra.mxu0 %v14176_v36  ;;  %v14245_v36 = vld [vmem:[#allocation5 + $0x17a8] ss:$16 sps:$4 sm:$0xff]  }
 0x774   :  { %8348 = vmatpush2.bf16.msra.mxu1 %v14179_v3  ;;  %8358 = vmatprep.subr.bf16.mxu0 %v14184_v44  ;;  %v14250_v3 = vld [vmem:[#allocation5 + $0x158c] ss:$16 sps:$4 sm:$0xff]   ;;  %v14251_v44 = vld [vmem:[#allocation5 + $0x1788] ss:$16 sps:$4 sm:$0xff]  }
 0x775   :  { %8399 = vmatprep.subr.bf16.mxu1 %v14187_v47  ;;  %v14256_v47 = vld [vmem:[#allocation5 + $0x156c] ss:$16 sps:$4 sm:$0xff]  }
 0x776   :  { %8309 = vmatmul.mubr.bf16.vlgmr.msra.gmra.mxu0 %v15683_v20 }
 0x777   :  { %8350 = vmatmul.mubr.bf16.vlgmr.msra.gmra.mxu1 %v15685_v55  ;;  %8359 = vmatpush1.bf16.msra.mxu0 %v14182_v56  ;;  %v14259_v56 = vld [vmem:[#allocation5 + $0x176c] ss:$16 sps:$4 sm:$0xff]  }
 0x778   :  { %8400 = vmatpush1.bf16.msra.mxu1 %v14185_v8  ;;  %8360 = vmatprep.subr.bf16.mxu0 %v14190_v61  ;;  %v14254_v8 = vld [vmem:[#allocation5 + $0x1568] ss:$16 sps:$4 sm:$0xff]  }
 0x779   :  { %8401 = vmatprep.subr.bf16.mxu1 %v14193_v63  ;;  %8390 = vmatprep.mubr.bf16.mxu0 %v15669_v28  ;;  %v14209_v28 = vld [vmem:[#allocation5 + $0x1668] ss:$16 sps:$4 sm:$0xff]   ;;  %v14262_v63 = vld [vmem:[#allocation5 + $0x154c] ss:$16 sps:$4 sm:$0xff]  }
 0x77a   :  { %8431 = vmatprep.mubr.bf16.mxu1 %v15671_v30  ;;  %v14214_v30 = vld [vmem:[#allocation5 + $0x144c] ss:$16 sps:$4 sm:$0xff]   ;;  %v14257_v61 = vld [vmem:[#allocation5 + $0x1768] ss:$16 sps:$4 sm:$0xff]  }
 0x77b   :  { %8361 = vmatpush1.bf16.msra.mxu0 %v14188_v1  ;;  %v14265_v1 = vld [vmem:[#allocation5 + $0x174c] ss:$16 sps:$4 sm:$0xff]  }
 0x77c   :  { %8402 = vmatpush1.bf16.msra.mxu1 %v14191_v6  ;;  %8362 = vmatprep.subr.bf16.mxu0 %v14196_v25  ;;  %v14260_v6 = vld [vmem:[#allocation5 + $0x1548] ss:$16 sps:$4 sm:$0xff]  }
 0x77d   :  { %8403 = vmatprep.subr.bf16.mxu1 %v14199_v7  ;;  %v14263_v25 = vld [vmem:[#allocation5 + $0x1748] ss:$16 sps:$4 sm:$0xff]   ;;  %v14268_v7 = vld [vmem:[#allocation5 + $0x152c] ss:$16 sps:$4 sm:$0xff]  }
 0x77f   :  { %8363 = vmatpush1.bf16.msra.mxu0 %v14194_v2  ;;  %v14271_v2 = vld [vmem:[#allocation5 + $0x172c] ss:$16 sps:$4 sm:$0xff]  }
 0x780   :  { %8404 = vmatpush1.bf16.msra.mxu1 %v14197_v13  ;;  %8364 = vmatprep.subr.bf16.mxu0 %v14202_v14  ;;  %v14266_v13 = vld [vmem:[#allocation5 + $0x1528] ss:$16 sps:$4 sm:$0xff]  }
 0x781   :  { %8405 = vmatprep.subr.bf16.mxu1 %v14205_v17  ;;  %v14269_v14 = vld [vmem:[#allocation5 + $0x1728] ss:$16 sps:$4 sm:$0xff]   ;;  %v14274_v17 = vld [vmem:[#allocation5 + $0x150c] ss:$16 sps:$4 sm:$0xff]  }
 0x783   :  { %8365 = vmatpush1.bf16.msra.mxu0 %v14200_v5  ;;  %v14277_v5 = vld [vmem:[#allocation5 + $0x170c] ss:$16 sps:$4 sm:$0xff]  }
 0x784   :  { %8406 = vmatpush1.bf16.msra.mxu1 %v14203_v4  ;;  %8366 = vmatprep.subr.bf16.mxu0 %v14208_v19  ;;  %v14272_v4 = vld [vmem:[#allocation5 + $0x1508] ss:$16 sps:$4 sm:$0xff]  }
 0x785   :  { %8407 = vmatprep.subr.bf16.mxu1 %v14211_v58  ;;  %v14275_v19 = vld [vmem:[#allocation5 + $0x1708] ss:$16 sps:$4 sm:$0xff]   ;;  %v8576_v58 = vrot.slane %v15465_v9, 6 }
 0x787   :  { %8367 = vmatpush1.bf16.msra.mxu0 %v14206_v16  ;;  %v8577_v16 = vrot.slane %v15467_v10, 5 }
 0x788   :  { %8408 = vmatpush1.bf16.msra.mxu1 %v14209_v28  ;;  %8368 = vmatprep.subr.bf16.mxu0 %v14214_v30  ;;  %v8582_v28 = vrot.slane %v15469_v11, 6  ;;  %v8583_v30 = vrot.slane %v15471_v12, 5 }
 0x789   :  { %8409 = vmatprep.subr.bf16.mxu1 %v14217_v18  ;;  %v14280_v18 = vld [vmem:[#allocation5 + $0x18e4] ss:$16 sps:$4 sm:$0xff]  }
 0x78b   :  { %8369 = vmatpush1.bf16.msra.mxu0 %v14212_v59  ;;  %v14283_v59 = vld [vmem:[#allocation5 + $0x1ae4] ss:$16 sps:$4 sm:$0xff]  }
 0x78c   :  { %8410 = vmatpush1.bf16.msra.mxu1 %v14215_v60  ;;  %8370 = vmatprep.subr.bf16.mxu0 %v14220_v29  ;;  %v14278_v60 = vld [vmem:[#allocation5 + $0x18e0] ss:$16 sps:$4 sm:$0xff]  }
 0x78d   :  { %8411 = vmatprep.subr.bf16.mxu1 %v14223_v21  ;;  %v14281_v29 = vld [vmem:[#allocation5 + $0x1ae0] ss:$16 sps:$4 sm:$0xff]   ;;  %v8578_v21 = vsel %vm2838_vm8, %v8577_v16, %v8576_v58  ;;  %v14328_v16 = vld [vmem:[#allocation5 + $0x19e4] ss:$16 sps:$4 sm:$0xff]  }
 0x78e   :  { %v14323_v58 = vld [vmem:[#allocation5 + $0x1a00] ss:$16 sps:$4 sm:$0xff]  }
 0x78f   :  { %8371 = vmatpush1.bf16.msra.mxu0 %v14218_v22  ;;  %v8584_v22 = vsel %vm2838_vm8, %v8583_v30, %v8582_v28  ;;  %v14331_v28 = vld [vmem:[#allocation5 + $0x1be4] ss:$16 sps:$4 sm:$0xff]   ;;  %v14326_v30 = vld [vmem:[#allocation5 + $0x19e0] ss:$16 sps:$4 sm:$0xff]  }
 0x790   :  { %8412 = vmatpush1.bf16.msra.mxu1 %v14221_v62  ;;  %8372 = vmatprep.subr.bf16.mxu0 %v14226_v52  ;;  %v14286_v62 = vld [vmem:[#allocation5 + $0x18c4] ss:$16 sps:$4 sm:$0xff]  }
 0x791   :  { %8413 = vmatprep.subr.bf16.mxu1 %v14229_v27  ;;  %v14289_v52 = vld [vmem:[#allocation5 + $0x1ac4] ss:$16 sps:$4 sm:$0xff]   ;;  %v14284_v27 = vld [vmem:[#allocation5 + $0x18c0] ss:$16 sps:$4 sm:$0xff]  }
 0x793   :  { %8373 = vmatpush1.bf16.msra.mxu0 %v14224_v31  ;;  %v14287_v31 = vld [vmem:[#allocation5 + $0x1ac0] ss:$16 sps:$4 sm:$0xff]  }
 0x794   :  { %8414 = vmatpush1.bf16.msra.mxu1 %v14227_v33  ;;  %8374 = vmatprep.subr.bf16.mxu0 %v14232_v51  ;;  %v15697_v33 = vpack.c.b16 %v8578_v21, %v8578_v21  ;;  %v15699_v51 = vpack.c.b16 %v8584_v22, %v8584_v22  ;;  %v14335_v21 = vld [vmem:[#allocation5 + $0x1bc0] ss:$16 sps:$4 sm:$0xff]   ;;  %v14340_v22 = vld [vmem:[#allocation5 + $0x19a4] ss:$16 sps:$4 sm:$0xff]  }
 0x795   :  { %8415 = vmatprep.subr.bf16.mxu1 %v14235_v54 }
 0x797   :  { %8375 = vmatpush2.bf16.msra.mxu0 %v14230_v34 }
 0x798   :  { %8416 = vmatpush2.bf16.msra.mxu1 %v14233_v23  ;;  %8376 = vmatprep.subr.bf16.mxu0 %v14238_v26 }
 0x799   :  { %8417 = vmatprep.subr.bf16.mxu1 %v14241_v48 }
 0x79b   :  { %8377 = vmatpush2.bf16.msra.mxu0 %v14236_v53  ;;  %v14292_v53 = vld [vmem:[#allocation5 + $0x18a4] ss:$16 sps:$4 sm:$0xff]  }
 0x79c   :  { %8418 = vmatpush2.bf16.msra.mxu1 %v14239_v38  ;;  %8378 = vmatprep.subr.bf16.mxu0 %v14244_v41  ;;  %v14295_v38 = vld [vmem:[#allocation5 + $0x1aa4] ss:$16 sps:$4 sm:$0xff]  }
 0x79d   :  { %8419 = vmatprep.subr.bf16.mxu1 %v14247_v45  ;;  %v14290_v45 = vld [vmem:[#allocation5 + $0x18a0] ss:$16 sps:$4 sm:$0xff]  }
 0x79f   :  { %8379 = vmatpush2.bf16.msra.mxu0 %v14242_v46  ;;  %v14293_v46 = vld [vmem:[#allocation5 + $0x1aa0] ss:$16 sps:$4 sm:$0xff]  }
 0x7a0   :  { %8420 = vmatpush2.bf16.msra.mxu1 %v14245_v36  ;;  %8380 = vmatprep.subr.bf16.mxu0 %v14250_v3 }
 0x7a1   :  { %8421 = vmatprep.subr.bf16.mxu1 %v14253_v43  ;;  %v14298_v43 = vld [vmem:[#allocation5 + $0x1884] ss:$16 sps:$4 sm:$0xff]  }
 0x7a3   :  { %8381 = vmatpush2.bf16.msra.mxu0 %v14248_v35  ;;  %v14301_v35 = vld [vmem:[#allocation5 + $0x1a84] ss:$16 sps:$4 sm:$0xff]  }
 0x7a4   :  { %8422 = vmatpush2.bf16.msra.mxu1 %v14251_v44  ;;  %8382 = vmatprep.subr.bf16.mxu0 %v14256_v47  ;;  %v14296_v44 = vld [vmem:[#allocation5 + $0x1880] ss:$16 sps:$4 sm:$0xff]  }
 0x7a5   :  { %8423 = vmatprep.subr.bf16.mxu1 %v14259_v56  ;;  %v14299_v47 = vld [vmem:[#allocation5 + $0x1a80] ss:$16 sps:$4 sm:$0xff]   ;;  %v14304_v56 = vld [vmem:[#allocation5 + $0x1864] ss:$16 sps:$4 sm:$0xff]  }
 0x7a7   :  { %8383 = vmatpush2.bf16.msra.mxu0 %v14254_v8  ;;  %v14307_v8 = vld [vmem:[#allocation5 + $0x1a64] ss:$16 sps:$4 sm:$0xff]  }
 0x7a8   :  { %8424 = vmatpush2.bf16.msra.mxu1 %v14257_v61  ;;  %8384 = vmatprep.subr.bf16.mxu0 %v14262_v63  ;;  %v14302_v61 = vld [vmem:[#allocation5 + $0x1860] ss:$16 sps:$4 sm:$0xff]  }
 0x7a9   :  { %8425 = vmatprep.subr.bf16.mxu1 %v14265_v1  ;;  %v14305_v63 = vld [vmem:[#allocation5 + $0x1a60] ss:$16 sps:$4 sm:$0xff]   ;;  %v14310_v1 = vld [vmem:[#allocation5 + $0x1844] ss:$16 sps:$4 sm:$0xff]  }
 0x7ab   :  { %8385 = vmatpush2.bf16.msra.mxu0 %v14260_v6  ;;  %v14313_v6 = vld [vmem:[#allocation5 + $0x1a44] ss:$16 sps:$4 sm:$0xff]  }
 0x7ac   :  { %8426 = vmatpush2.bf16.msra.mxu1 %v14263_v25  ;;  %8386 = vmatprep.subr.bf16.mxu0 %v14268_v7  ;;  %v14308_v25 = vld [vmem:[#allocation5 + $0x1840] ss:$16 sps:$4 sm:$0xff]  }
 0x7ad   :  { %8427 = vmatprep.subr.bf16.mxu1 %v14271_v2  ;;  %v14311_v7 = vld [vmem:[#allocation5 + $0x1a40] ss:$16 sps:$4 sm:$0xff]   ;;  %v14316_v2 = vld [vmem:[#allocation5 + $0x1824] ss:$16 sps:$4 sm:$0xff]  }
 0x7af   :  { %8387 = vmatpush2.bf16.msra.mxu0 %v14266_v13  ;;  %v14319_v13 = vld [vmem:[#allocation5 + $0x1a24] ss:$16 sps:$4 sm:$0xff]  }
 0x7b0   :  { %8428 = vmatpush2.bf16.msra.mxu1 %v14269_v14  ;;  %8388 = vmatprep.subr.bf16.mxu0 %v14274_v17  ;;  %v14314_v14 = vld [vmem:[#allocation5 + $0x1820] ss:$16 sps:$4 sm:$0xff]  }
 0x7b1   :  { %8429 = vmatprep.subr.bf16.mxu1 %v14277_v5  ;;  %v14317_v17 = vld [vmem:[#allocation5 + $0x1a20] ss:$16 sps:$4 sm:$0xff]   ;;  %v14322_v5 = vld [vmem:[#allocation5 + $0x1804] ss:$16 sps:$4 sm:$0xff]  }
 0x7b3   :  { %8389 = vmatpush2.bf16.msra.mxu0 %v14272_v4  ;;  %v14325_v4 = vld [vmem:[#allocation5 + $0x1a04] ss:$16 sps:$4 sm:$0xff]  }
 0x7b4   :  { %8430 = vmatpush2.bf16.msra.mxu1 %v14275_v19  ;;  %9233 = vmatprep.subr.bf16.mxu0 %v14280_v18  ;;  %v14320_v19 = vld [vmem:[#allocation5 + $0x1800] ss:$16 sps:$4 sm:$0xff]  }
 0x7b5   :  { %9274 = vmatprep.subr.bf16.mxu1 %v14283_v59  ;;  %v14329_v18 = vld [vmem:[#allocation5 + $0x1be0] ss:$16 sps:$4 sm:$0xff]   ;;  %v14334_v59 = vld [vmem:[#allocation5 + $0x19c4] ss:$16 sps:$4 sm:$0xff]  }
 0x7b6   :  { %v7353_v54 = vpop.f32.mrf.mxu0  ;;  %8391 = vmatmul.mubr.bf16.vlgmr.msra.gmra.mxu0 %v15683_v20 }
 0x7b7   :  { %v7394_v34 = vpop.f32.mrf.mxu1  ;;  %8432 = vmatmul.mubr.bf16.vlgmr.msra.gmra.mxu1 %v15685_v55  ;;  %9234 = vmatpush1.bf16.msra.mxu0 %v14278_v60  ;;  %v14337_v60 = vld [vmem:[#allocation5 + $0x1bc4] ss:$16 sps:$4 sm:$0xff]  }
 0x7b8   :  { %v15703_v23 = vadd.f32 %v7394_v34, %v7353_v54  ;;  %9275 = vmatpush1.bf16.msra.mxu1 %v14281_v29  ;;  %v7355_v26 = vpop.f32.mrf.mxu0  ;;  %9235 = vmatprep.subr.bf16.mxu0 %v14286_v62  ;;  %v14332_v29 = vld [vmem:[#allocation5 + $0x19c0] ss:$16 sps:$4 sm:$0xff]   ;;  %v14343_v62 = vld [vmem:[#allocation5 + $0x1ba4] ss:$16 sps:$4 sm:$0xff]  }
 0x7b9   :  { %v7396_v48 = vpop.f32.mrf.mxu1  ;;  %9276 = vmatprep.subr.bf16.mxu1 %v14289_v52  ;;  %9265 = vmatprep.mubr.bf16.mxu0 %v15697_v33  ;;  %v14338_v52 = vld [vmem:[#allocation5 + $0x19a0] ss:$16 sps:$4 sm:$0xff]   ;;  %v14349_v54 = vld [vmem:[#allocation5 + $0x1b84] ss:$16 sps:$4 sm:$0xff]  }
 0x7ba   :  { %v15705_v41 = vadd.f32 %v7396_v48, %v7355_v26  ;;  %9306 = vmatprep.mubr.bf16.mxu1 %v15699_v51  ;;  %v7357_v20 = vpop.f32.mrf.mxu0  ;;  %v14344_v34 = vld [vmem:[#allocation5 + $0x1980] ss:$16 sps:$4 sm:$0xff]   ;;  %v14352_v48 = vld [vmem:[#allocation5 + $0x1964] ss:$16 sps:$4 sm:$0xff]  }
 0x7bb   :  { %v7398_v55 = vpop.f32.mrf.mxu1  ;;  %9236 = vmatpush1.bf16.msra.mxu0 %v14284_v27  ;;  %v14341_v27 = vld [vmem:[#allocation5 + $0x1ba0] ss:$16 sps:$4 sm:$0xff]   ;;  %v14361_v20 = vld [vmem:[#allocation5 + $0x1b44] ss:$16 sps:$4 sm:$0xff]  }
 0x7bc   :  { %9277 = vmatpush1.bf16.msra.mxu1 %v14287_v31  ;;  %v7358_v36 = vpop.f32.mrf.mxu0  ;;  %9237 = vmatprep.subr.bf16.mxu0 %v14292_v53  ;;  %v14346_v31 = vld [vmem:[#allocation5 + $0x1984] ss:$16 sps:$4 sm:$0xff]   ;;  %v14347_v26 = vld [vmem:[#allocation5 + $0x1b80] ss:$16 sps:$4 sm:$0xff]  }
 0x7bd   :  { %v7399_v3 = vpop.f32.mrf.mxu1  ;;  %9278 = vmatprep.subr.bf16.mxu1 %v14295_v38  ;;  %v14355_v53 = vld [vmem:[#allocation5 + $0x1b64] ss:$16 sps:$4 sm:$0xff]   ;;  %v14350_v38 = vld [vmem:[#allocation5 + $0x1960] ss:$16 sps:$4 sm:$0xff]  }
 0x7be   :  { %v14356_v55 = vld [vmem:[#allocation5 + $0x1940] ss:$16 sps:$4 sm:$0xff]   ;;  %v14364_v3 = vld [vmem:[#allocation5 + $0x1924] ss:$16 sps:$4 sm:$0xff]  }
 0x7bf   :  { %9238 = vmatpush1.bf16.msra.mxu0 %v14290_v45  ;;  %v14353_v45 = vld [vmem:[#allocation5 + $0x1b60] ss:$16 sps:$4 sm:$0xff]  }
 0x7c0   :  { %9279 = vmatpush1.bf16.msra.mxu1 %v14293_v46  ;;  %9239 = vmatprep.subr.bf16.mxu0 %v14298_v43  ;;  %v14358_v46 = vld [vmem:[#allocation5 + $0x1944] ss:$16 sps:$4 sm:$0xff]   ;;  %v14359_v36 = vld [vmem:[#allocation5 + $0x1b40] ss:$16 sps:$4 sm:$0xff]  }
 0x7c1   :  { %9280 = vmatprep.subr.bf16.mxu1 %v14301_v35  ;;  %v14367_v43 = vld [vmem:[#allocation5 + $0x1b24] ss:$16 sps:$4 sm:$0xff]   ;;  %v8573_v35 = vrot.slane %v15497_v39, 6 }
 0x7c3   :  { %9240 = vmatpush1.bf16.msra.mxu0 %v14296_v44  ;;  %v8574_v44 = vrot.slane %v15491_v37, 5 }
 0x7c4   :  { %9281 = vmatpush1.bf16.msra.mxu1 %v14299_v47  ;;  %9241 = vmatprep.subr.bf16.mxu0 %v14304_v56  ;;  %v8579_v47 = vrot.slane %v15500_v32, 6  ;;  %v14362_v56 = vld [vmem:[#allocation5 + $0x1920] ss:$16 sps:$4 sm:$0xff]  }
 0x7c5   :  { %9282 = vmatprep.subr.bf16.mxu1 %v14307_v8  ;;  %v14365_v8 = vld [vmem:[#allocation5 + $0x1b20] ss:$16 sps:$4 sm:$0xff]  }
 0x7c7   :  { %9242 = vmatpush1.bf16.msra.mxu0 %v14302_v61  ;;  %v8580_v61 = vrot.slane %v15495_v50, 5 }
 0x7c8   :  { %9283 = vmatpush1.bf16.msra.mxu1 %v14305_v63  ;;  %9243 = vmatprep.subr.bf16.mxu0 %v14310_v1  ;;  %v14370_v63 = vld [vmem:[#allocation5 + $0x1904] ss:$16 sps:$4 sm:$0xff]  }
 0x7c9   :  { %9284 = vmatprep.subr.bf16.mxu1 %v14313_v6  ;;  %v14373_v1 = vld [vmem:[#allocation5 + $0x1b04] ss:$16 sps:$4 sm:$0xff]   ;;  %v14368_v6 = vld [vmem:[#allocation5 + $0x1900] ss:$16 sps:$4 sm:$0xff]  }
 0x7cb   :  { %9244 = vmatpush1.bf16.msra.mxu0 %v14308_v25  ;;  %v14371_v25 = vld [vmem:[#allocation5 + $0x1b00] ss:$16 sps:$4 sm:$0xff]  }
 0x7cc   :  { %9285 = vmatpush1.bf16.msra.mxu1 %v14311_v7  ;;  %9245 = vmatprep.subr.bf16.mxu0 %v14316_v2  ;;  %v8575_v7 = vsel %vm2838_vm8, %v8574_v44, %v8573_v35  ;;  %v8581_v2 = vsel %vm2838_vm8, %v8580_v61, %v8579_v47  ;;  %v14407_v35 = vld [vmem:[#allocation5 + $0x1a48] ss:$16 sps:$4 sm:$0xff]   ;;  %v14412_v44 = vld [vmem:[#allocation5 + $0x182c] ss:$16 sps:$4 sm:$0xff]  }
 0x7cd   :  { %9286 = vmatprep.subr.bf16.mxu1 %v14319_v13  ;;  %v14376_v13 = vld [vmem:[#allocation5 + $0x18ec] ss:$16 sps:$4 sm:$0xff]  }
 0x7ce   :  { %v14415_v47 = vld [vmem:[#allocation5 + $0x1a2c] ss:$16 sps:$4 sm:$0xff]  }
 0x7cf   :  { %9246 = vmatpush1.bf16.msra.mxu0 %v14314_v14  ;;  %v14379_v14 = vld [vmem:[#allocation5 + $0x1aec] ss:$16 sps:$4 sm:$0xff]  }
 0x7d0   :  { %9287 = vmatpush1.bf16.msra.mxu1 %v14317_v17  ;;  %9247 = vmatprep.subr.bf16.mxu0 %v14322_v5  ;;  %v14374_v17 = vld [vmem:[#allocation5 + $0x18e8] ss:$16 sps:$4 sm:$0xff]   ;;  %v14418_v61 = vld [vmem:[#allocation5 + $0x180c] ss:$16 sps:$4 sm:$0xff]  }
 0x7d1   :  { %9288 = vmatprep.subr.bf16.mxu1 %v14325_v4  ;;  %v14377_v5 = vld [vmem:[#allocation5 + $0x1ae8] ss:$16 sps:$4 sm:$0xff]   ;;  %v15715_v4 = vpack.c.b16 %v8575_v7, %v8575_v7  ;;  %v14427_v7 = vld [vmem:[#allocation5 + $0x1bec] ss:$16 sps:$4 sm:$0xff]  }
 0x7d3   :  { %9248 = vmatpush1.bf16.msra.mxu0 %v14320_v19  ;;  %v15717_v19 = vpack.c.b16 %v8581_v2, %v8581_v2  ;;  %v14422_v2 = vld [vmem:[#allocation5 + $0x19e8] ss:$16 sps:$4 sm:$0xff]  }
 0x7d4   :  { %9289 = vmatpush1.bf16.msra.mxu1 %v14323_v58  ;;  %9249 = vmatprep.subr.bf16.mxu0 %v14328_v16  ;;  %v14382_v58 = vld [vmem:[#allocation5 + $0x18cc] ss:$16 sps:$4 sm:$0xff]  }
 0x7d5   :  { %9290 = vmatprep.subr.bf16.mxu1 %v14331_v28  ;;  %v14385_v16 = vld [vmem:[#allocation5 + $0x1acc] ss:$16 sps:$4 sm:$0xff]   ;;  %v14380_v28 = vld [vmem:[#allocation5 + $0x18c8] ss:$16 sps:$4 sm:$0xff]  }
 0x7d7   :  { %9250 = vmatpush2.bf16.msra.mxu0 %v14326_v30  ;;  %v14383_v30 = vld [vmem:[#allocation5 + $0x1ac8] ss:$16 sps:$4 sm:$0xff]  }
 0x7d8   :  { %9291 = vmatpush2.bf16.msra.mxu1 %v14329_v18  ;;  %9251 = vmatprep.subr.bf16.mxu0 %v14334_v59 }
 0x7d9   :  { %9292 = vmatprep.subr.bf16.mxu1 %v14337_v60 }
 0x7db   :  { %9252 = vmatpush2.bf16.msra.mxu0 %v14332_v29 }
 0x7dc   :  { %9293 = vmatpush2.bf16.msra.mxu1 %v14335_v21  ;;  %9253 = vmatprep.subr.bf16.mxu0 %v14340_v22  ;;  %v14388_v22 = vld [vmem:[#allocation5 + $0x18ac] ss:$16 sps:$4 sm:$0xff]  }
 0x7dd   :  { %9294 = vmatprep.subr.bf16.mxu1 %v14343_v62  ;;  %v14391_v62 = vld [vmem:[#allocation5 + $0x1aac] ss:$16 sps:$4 sm:$0xff]  }
 0x7df   :  { %9254 = vmatpush2.bf16.msra.mxu0 %v14338_v52 }
 0x7e0   :  { %9295 = vmatpush2.bf16.msra.mxu1 %v14341_v27  ;;  %9255 = vmatprep.subr.bf16.mxu0 %v14346_v31  ;;  %v14386_v27 = vld [vmem:[#allocation5 + $0x18a8] ss:$16 sps:$4 sm:$0xff]  }
 0x7e1   :  { %9296 = vmatprep.subr.bf16.mxu1 %v14349_v54  ;;  %v14389_v31 = vld [vmem:[#allocation5 + $0x1aa8] ss:$16 sps:$4 sm:$0xff]  }
 0x7e3   :  { %9256 = vmatpush2.bf16.msra.mxu0 %v14344_v34 }
 0x7e4   :  { %9297 = vmatpush2.bf16.msra.mxu1 %v14347_v26  ;;  %9257 = vmatprep.subr.bf16.mxu0 %v14352_v48 }
 0x7e5   :  { %9298 = vmatprep.subr.bf16.mxu1 %v14355_v53  ;;  %v14394_v53 = vld [vmem:[#allocation5 + $0x188c] ss:$16 sps:$4 sm:$0xff]  }
 0x7e7   :  { %9258 = vmatpush2.bf16.msra.mxu0 %v14350_v38  ;;  %v14397_v38 = vld [vmem:[#allocation5 + $0x1a8c] ss:$16 sps:$4 sm:$0xff]  }
 0x7e8   :  { %9299 = vmatpush2.bf16.msra.mxu1 %v14353_v45  ;;  %9259 = vmatprep.subr.bf16.mxu0 %v14358_v46  ;;  %v14392_v45 = vld [vmem:[#allocation5 + $0x1888] ss:$16 sps:$4 sm:$0xff]  }
 0x7e9   :  { %9300 = vmatprep.subr.bf16.mxu1 %v14361_v20  ;;  %v14395_v46 = vld [vmem:[#allocation5 + $0x1a88] ss:$16 sps:$4 sm:$0xff]   ;;  %v14400_v20 = vld [vmem:[#allocation5 + $0x186c] ss:$16 sps:$4 sm:$0xff]  }
 0x7eb   :  { %9260 = vmatpush2.bf16.msra.mxu0 %v14356_v55  ;;  %v14401_v55 = vld [vmem:[#allocation5 + $0x1a68] ss:$16 sps:$4 sm:$0xff]  }
 0x7ec   :  { %9301 = vmatpush2.bf16.msra.mxu1 %v14359_v36  ;;  %9261 = vmatprep.subr.bf16.mxu0 %v14364_v3  ;;  %v14406_v36 = vld [vmem:[#allocation5 + $0x184c] ss:$16 sps:$4 sm:$0xff]  }
 0x7ed   :  { %9302 = vmatprep.subr.bf16.mxu1 %v14367_v43  ;;  %v14409_v3 = vld [vmem:[#allocation5 + $0x1a4c] ss:$16 sps:$4 sm:$0xff]   ;;  %v14404_v43 = vld [vmem:[#allocation5 + $0x1848] ss:$16 sps:$4 sm:$0xff]  }
 0x7ef   :  { %9262 = vmatpush2.bf16.msra.mxu0 %v14362_v56  ;;  %v14410_v56 = vld [vmem:[#allocation5 + $0x1828] ss:$16 sps:$4 sm:$0xff]  }
 0x7f0   :  { %9303 = vmatpush2.bf16.msra.mxu1 %v14365_v8  ;;  %9263 = vmatprep.subr.bf16.mxu0 %v14370_v63  ;;  %v14413_v8 = vld [vmem:[#allocation5 + $0x1a28] ss:$16 sps:$4 sm:$0xff]   ;;  %v14421_v63 = vld [vmem:[#allocation5 + $0x1a0c] ss:$16 sps:$4 sm:$0xff]  }
 0x7f1   :  { %9304 = vmatprep.subr.bf16.mxu1 %v14373_v1  ;;  %v14416_v1 = vld [vmem:[#allocation5 + $0x1808] ss:$16 sps:$4 sm:$0xff]  }
 0x7f3   :  { %9264 = vmatpush2.bf16.msra.mxu0 %v14368_v6  ;;  %v14419_v6 = vld [vmem:[#allocation5 + $0x1a08] ss:$16 sps:$4 sm:$0xff]  }
 0x7f4   :  { %9305 = vmatpush2.bf16.msra.mxu1 %v14371_v25  ;;  %9315 = vmatprep.subr.bf16.mxu0 %v14376_v13  ;;  %v14424_v25 = vld [vmem:[#allocation5 + $0x19ec] ss:$16 sps:$4 sm:$0xff]   ;;  %v14425_v13 = vld [vmem:[#allocation5 + $0x1be8] ss:$16 sps:$4 sm:$0xff]  }
 0x7f5   :  { %9356 = vmatprep.subr.bf16.mxu1 %v14379_v14  ;;  %v14430_v14 = vld [vmem:[#allocation5 + $0x19cc] ss:$16 sps:$4 sm:$0xff]  }
 0x7f6   :  { %v7435_v18 = vpop.f32.mrf.mxu0  ;;  %9266 = vmatmul.mubr.bf16.vlgmr.msra.gmra.mxu0 %v15715_v4 }
 0x7f7   :  { %v7476_v59 = vpop.f32.mrf.mxu1  ;;  %9307 = vmatmul.mubr.bf16.vlgmr.msra.gmra.mxu1 %v15717_v19  ;;  %9316 = vmatpush1.bf16.msra.mxu0 %v14374_v17  ;;  %v14433_v17 = vld [vmem:[#allocation5 + $0x1bcc] ss:$16 sps:$4 sm:$0xff]  }
 0x7f8   :  { %v15721_v60 = vadd.f32 %v7476_v59, %v7435_v18  ;;  %9357 = vmatpush1.bf16.msra.mxu1 %v14377_v5  ;;  %v7437_v29 = vpop.f32.mrf.mxu0  ;;  %9317 = vmatprep.subr.bf16.mxu0 %v14382_v58  ;;  %v14428_v5 = vld [vmem:[#allocation5 + $0x19c8] ss:$16 sps:$4 sm:$0xff]   ;;  %v14442_v59 = vld [vmem:[#allocation5 + $0x198c] ss:$16 sps:$4 sm:$0xff]  }
 0x7f9   :  { %v7478_v21 = vpop.f32.mrf.mxu1  ;;  %9358 = vmatprep.subr.bf16.mxu1 %v14385_v16  ;;  %9347 = vmatprep.mubr.bf16.mxu0 %v15697_v33  ;;  %v14403_v33 = vld [vmem:[#allocation5 + $0x1a6c] ss:$16 sps:$4 sm:$0xff]   ;;  %v14431_v58 = vld [vmem:[#allocation5 + $0x1bc8] ss:$16 sps:$4 sm:$0xff]  }
 0x7fa   :  { %v15723_v52 = vadd.f32 %v7478_v21, %v7437_v29  ;;  %9388 = vmatprep.mubr.bf16.mxu1 %v15699_v51  ;;  %v7439_v54 = vpop.f32.mrf.mxu0  ;;  %v14398_v51 = vld [vmem:[#allocation5 + $0x1868] ss:$16 sps:$4 sm:$0xff]   ;;  %v14436_v16 = vld [vmem:[#allocation5 + $0x19ac] ss:$16 sps:$4 sm:$0xff]  }
 0x7fb   :  { %v7480_v34 = vpop.f32.mrf.mxu1  ;;  %9318 = vmatpush1.bf16.msra.mxu0 %v14380_v28  ;;  %v14439_v28 = vld [vmem:[#allocation5 + $0x1bac] ss:$16 sps:$4 sm:$0xff]   ;;  %v14437_v18 = vld [vmem:[#allocation5 + $0x1ba8] ss:$16 sps:$4 sm:$0xff]  }
 0x7fc   :  { %9359 = vmatpush1.bf16.msra.mxu1 %v14383_v30  ;;  %v7440_v26 = vpop.f32.mrf.mxu0  ;;  %9319 = vmatprep.subr.bf16.mxu0 %v14388_v22  ;;  %v14434_v30 = vld [vmem:[#allocation5 + $0x19a8] ss:$16 sps:$4 sm:$0xff]   ;;  %v14445_v29 = vld [vmem:[#allocation5 + $0x1b8c] ss:$16 sps:$4 sm:$0xff]  }
 0x7fd   :  { %v7481_v48 = vpop.f32.mrf.mxu1  ;;  %9360 = vmatprep.subr.bf16.mxu1 %v14391_v62  ;;  %v14440_v21 = vld [vmem:[#allocation5 + $0x1988] ss:$16 sps:$4 sm:$0xff]   ;;  %v14448_v62 = vld [vmem:[#allocation5 + $0x196c] ss:$16 sps:$4 sm:$0xff]  }
 0x7fe   :  { %v14443_v22 = vld [vmem:[#allocation5 + $0x1b88] ss:$16 sps:$4 sm:$0xff]   ;;  %v14454_v34 = vld [vmem:[#allocation5 + $0x194c] ss:$16 sps:$4 sm:$0xff]  }
 0x7ff   :  { %9320 = vmatpush1.bf16.msra.mxu0 %v14386_v27  ;;  %v14451_v27 = vld [vmem:[#allocation5 + $0x1b6c] ss:$16 sps:$4 sm:$0xff]   ;;  %v14449_v54 = vld [vmem:[#allocation5 + $0x1b68] ss:$16 sps:$4 sm:$0xff]  }
 0x800   :  { %9361 = vmatpush1.bf16.msra.mxu1 %v14389_v31  ;;  %9321 = vmatprep.subr.bf16.mxu0 %v14394_v53  ;;  %v14446_v31 = vld [vmem:[#allocation5 + $0x1968] ss:$16 sps:$4 sm:$0xff]   ;;  %v14457_v26 = vld [vmem:[#allocation5 + $0x1b4c] ss:$16 sps:$4 sm:$0xff]  }
 0x801   :  { %9362 = vmatprep.subr.bf16.mxu1 %v14397_v38  ;;  %v14452_v48 = vld [vmem:[#allocation5 + $0x1948] ss:$16 sps:$4 sm:$0xff]   ;;  %v14460_v38 = vld [vmem:[#allocation5 + $0x192c] ss:$16 sps:$4 sm:$0xff]  }
 0x802   :  { %v14455_v53 = vld [vmem:[#allocation5 + $0x1b48] ss:$16 sps:$4 sm:$0xff]  }
 0x803   :  { %9322 = vmatpush1.bf16.msra.mxu0 %v14392_v45  ;;  %v14463_v45 = vld [vmem:[#allocation5 + $0x1b2c] ss:$16 sps:$4 sm:$0xff]  }
 0x804   :  { %9363 = vmatpush1.bf16.msra.mxu1 %v14395_v46  ;;  %9323 = vmatprep.subr.bf16.mxu0 %v14400_v20  ;;  %v14458_v46 = vld [vmem:[#allocation5 + $0x1928] ss:$16 sps:$4 sm:$0xff]  }
 0x805   :  { %9364 = vmatprep.subr.bf16.mxu1 %v14403_v33  ;;  %v14461_v20 = vld [vmem:[#allocation5 + $0x1b28] ss:$16 sps:$4 sm:$0xff]   ;;  %v14466_v33 = vld [vmem:[#allocation5 + $0x190c] ss:$16 sps:$4 sm:$0xff]  }
 0x807   :  { %9324 = vmatpush1.bf16.msra.mxu0 %v14398_v51  ;;  %v14469_v51 = vld [vmem:[#allocation5 + $0x1b0c] ss:$16 sps:$4 sm:$0xff]  }
 0x808   :  { %9365 = vmatpush1.bf16.msra.mxu1 %v14401_v55  ;;  %9325 = vmatprep.subr.bf16.mxu0 %v14406_v36  ;;  %v9533_v55 = vrot.slane %v15465_v9, 7  ;;  %v9534_v36 = vrot.slane %v15467_v10, 6  ;;  %v14470_v9 = vld [vmem:[#allocation5 + $0x1ce0] ss:$16 sps:$4 sm:$0xff]  }
 0x809   :  { %9366 = vmatprep.subr.bf16.mxu1 %v14409_v3  ;;  %v9539_v3 = vrot.slane %v15469_v11, 7  ;;  %v14473_v10 = vld [vmem:[#allocation5 + $0x1ee0] ss:$16 sps:$4 sm:$0xff]   ;;  %v14478_v11 = vld [vmem:[#allocation5 + $0x1cc4] ss:$16 sps:$4 sm:$0xff]  }
 0x80b   :  { %9326 = vmatpush1.bf16.msra.mxu0 %v14404_v43  ;;  %v9540_v43 = vrot.slane %v15471_v12, 6  ;;  %v14481_v12 = vld [vmem:[#allocation5 + $0x1ec4] ss:$16 sps:$4 sm:$0xff]  }
 0x80c   :  { %9367 = vmatpush1.bf16.msra.mxu1 %v14407_v35  ;;  %9327 = vmatprep.subr.bf16.mxu0 %v14412_v44  ;;  %v14464_v35 = vld [vmem:[#allocation5 + $0x1908] ss:$16 sps:$4 sm:$0xff]  }
 0x80d   :  { %9368 = vmatprep.subr.bf16.mxu1 %v14415_v47  ;;  %v14467_v44 = vld [vmem:[#allocation5 + $0x1b08] ss:$16 sps:$4 sm:$0xff]   ;;  %v14472_v47 = vld [vmem:[#allocation5 + $0x1ce4] ss:$16 sps:$4 sm:$0xff]  }
 0x80f   :  { %9328 = vmatpush1.bf16.msra.mxu0 %v14410_v56  ;;  %v14475_v56 = vld [vmem:[#allocation5 + $0x1ee4] ss:$16 sps:$4 sm:$0xff]  }
 0x810   :  { %9369 = vmatpush1.bf16.msra.mxu1 %v14413_v8  ;;  %9329 = vmatprep.subr.bf16.mxu0 %v14418_v61  ;;  %v9535_v8 = vsel %vm2838_vm8, %v9534_v36, %v9533_v55  ;;  %v9541_v61 = vsel %vm2838_vm8, %v9540_v43, %v9539_v3  ;;  %v14517_v55 = vld [vmem:[#allocation5 + $0x1e04] ss:$16 sps:$4 sm:$0xff]   ;;  %v14512_v36 = vld [vmem:[#allocation5 + $0x1c00] ss:$16 sps:$4 sm:$0xff]  }
 0x811   :  { %9370 = vmatprep.subr.bf16.mxu1 %v14421_v63  ;;  %v15733_v63 = vpack.c.b16 %v9535_v8, %v9535_v8  ;;  %v14515_v3 = vld [vmem:[#allocation5 + $0x1e00] ss:$16 sps:$4 sm:$0xff]   ;;  %v14520_v43 = vld [vmem:[#allocation5 + $0x1de4] ss:$16 sps:$4 sm:$0xff]  }
 0x812   :  { %v14529_v8 = vld [vmem:[#allocation5 + $0x1fc4] ss:$16 sps:$4 sm:$0xff]  }
 0x813   :  { %9330 = vmatpush1.bf16.msra.mxu0 %v14416_v1  ;;  %v15735_v1 = vpack.c.b16 %v9541_v61, %v9541_v61  ;;  %v14524_v61 = vld [vmem:[#allocation5 + $0x1dc0] ss:$16 sps:$4 sm:$0xff]  }
 0x814   :  { %9371 = vmatpush1.bf16.msra.mxu1 %v14419_v6  ;;  %9331 = vmatprep.subr.bf16.mxu0 %v14424_v25 }
 0x815   :  { %9372 = vmatprep.subr.bf16.mxu1 %v14427_v7  ;;  %v7483_v7 = vadd.f32 %v15703_v23, %v15629_v49 }
 0x817   :  { %9332 = vmatpush2.bf16.msra.mxu0 %v14422_v2 }
 0x818   :  { %9373 = vmatpush2.bf16.msra.mxu1 %v14425_v13  ;;  %9333 = vmatprep.subr.bf16.mxu0 %v14430_v14  ;;  %v14476_v13 = vld [vmem:[#allocation5 + $0x1cc0] ss:$16 sps:$4 sm:$0xff]  }
 0x819   :  { %9374 = vmatprep.subr.bf16.mxu1 %v14433_v17  ;;  %v14479_v14 = vld [vmem:[#allocation5 + $0x1ec0] ss:$16 sps:$4 sm:$0xff]  }
 0x81b   :  { %9334 = vmatpush2.bf16.msra.mxu0 %v14428_v5 }
 0x81c   :  { %9375 = vmatpush2.bf16.msra.mxu1 %v14431_v58  ;;  %9335 = vmatprep.subr.bf16.mxu0 %v14436_v16  ;;  %v14484_v58 = vld [vmem:[#allocation5 + $0x1ca4] ss:$16 sps:$4 sm:$0xff]  }
 0x81d   :  { %9376 = vmatprep.subr.bf16.mxu1 %v14439_v28  ;;  %v14487_v16 = vld [vmem:[#allocation5 + $0x1ea4] ss:$16 sps:$4 sm:$0xff]   ;;  %v7484_v28 = vadd.f32 %v15705_v41, %v15631_v57 }
 0x81e   :  { %v14490_v57 = vld [vmem:[#allocation5 + $0x1c84] ss:$16 sps:$4 sm:$0xff]  }
 0x81f   :  { %9336 = vmatpush2.bf16.msra.mxu0 %v14434_v30  ;;  %v14493_v41 = vld [vmem:[#allocation5 + $0x1e84] ss:$16 sps:$4 sm:$0xff]  }
 0x820   :  { %9377 = vmatpush2.bf16.msra.mxu1 %v14437_v18  ;;  %9337 = vmatprep.subr.bf16.mxu0 %v14442_v59  ;;  %v14482_v18 = vld [vmem:[#allocation5 + $0x1ca0] ss:$16 sps:$4 sm:$0xff]  }
 0x821   :  { %9378 = vmatprep.subr.bf16.mxu1 %v14445_v29  ;;  %v14485_v59 = vld [vmem:[#allocation5 + $0x1ea0] ss:$16 sps:$4 sm:$0xff]  }
 0x823   :  { %9338 = vmatpush2.bf16.msra.mxu0 %v14440_v21 }
 0x824   :  { %9379 = vmatpush2.bf16.msra.mxu1 %v14443_v22  ;;  %9339 = vmatprep.subr.bf16.mxu0 %v14448_v62  ;;  %v14488_v22 = vld [vmem:[#allocation5 + $0x1c80] ss:$16 sps:$4 sm:$0xff]  }
 0x825   :  { %9380 = vmatprep.subr.bf16.mxu1 %v14451_v27  ;;  %v14491_v62 = vld [vmem:[#allocation5 + $0x1e80] ss:$16 sps:$4 sm:$0xff]   ;;  %v14496_v27 = vld [vmem:[#allocation5 + $0x1c64] ss:$16 sps:$4 sm:$0xff]  }
 0x827   :  { %9340 = vmatpush2.bf16.msra.mxu0 %v14446_v31  ;;  %v14499_v31 = vld [vmem:[#allocation5 + $0x1e64] ss:$16 sps:$4 sm:$0xff]  }
 0x828   :  { %9381 = vmatpush2.bf16.msra.mxu1 %v14449_v54  ;;  %9341 = vmatprep.subr.bf16.mxu0 %v14454_v34  ;;  %v14494_v54 = vld [vmem:[#allocation5 + $0x1c60] ss:$16 sps:$4 sm:$0xff]  }
 0x829   :  { %9382 = vmatprep.subr.bf16.mxu1 %v14457_v26  ;;  %v14497_v34 = vld [vmem:[#allocation5 + $0x1e60] ss:$16 sps:$4 sm:$0xff]   ;;  %v14502_v26 = vld [vmem:[#allocation5 + $0x1c44] ss:$16 sps:$4 sm:$0xff]  }
 0x82b   :  { %9342 = vmatpush2.bf16.msra.mxu0 %v14452_v48  ;;  %v14505_v48 = vld [vmem:[#allocation5 + $0x1e44] ss:$16 sps:$4 sm:$0xff]  }
 0x82c   :  { %9383 = vmatpush2.bf16.msra.mxu1 %v14455_v53  ;;  %9343 = vmatprep.subr.bf16.mxu0 %v14460_v38  ;;  %v14500_v53 = vld [vmem:[#allocation5 + $0x1c40] ss:$16 sps:$4 sm:$0xff]  }
 0x82d   :  { %9384 = vmatprep.subr.bf16.mxu1 %v14463_v45  ;;  %v14503_v38 = vld [vmem:[#allocation5 + $0x1e40] ss:$16 sps:$4 sm:$0xff]   ;;  %v14508_v45 = vld [vmem:[#allocation5 + $0x1c24] ss:$16 sps:$4 sm:$0xff]  }
 0x82f   :  { %9344 = vmatpush2.bf16.msra.mxu0 %v14458_v46  ;;  %v14511_v46 = vld [vmem:[#allocation5 + $0x1e24] ss:$16 sps:$4 sm:$0xff]  }
 0x830   :  { %9385 = vmatpush2.bf16.msra.mxu1 %v14461_v20  ;;  %9345 = vmatprep.subr.bf16.mxu0 %v14466_v33  ;;  %v14506_v20 = vld [vmem:[#allocation5 + $0x1c20] ss:$16 sps:$4 sm:$0xff]  }
 0x831   :  { %9386 = vmatprep.subr.bf16.mxu1 %v14469_v51  ;;  %v14509_v33 = vld [vmem:[#allocation5 + $0x1e20] ss:$16 sps:$4 sm:$0xff]   ;;  %v14514_v51 = vld [vmem:[#allocation5 + $0x1c04] ss:$16 sps:$4 sm:$0xff]  }
 0x833   :  { %9346 = vmatpush2.bf16.msra.mxu0 %v14464_v35  ;;  %v14523_v35 = vld [vmem:[#allocation5 + $0x1fe4] ss:$16 sps:$4 sm:$0xff]  }
 0x834   :  { %9387 = vmatpush2.bf16.msra.mxu1 %v14467_v44  ;;  %10190 = vmatprep.subr.bf16.mxu0 %v14472_v47  ;;  %v14518_v44 = vld [vmem:[#allocation5 + $0x1de0] ss:$16 sps:$4 sm:$0xff]  }
 0x835   :  { %10231 = vmatprep.subr.bf16.mxu1 %v14475_v56  ;;  %v14521_v47 = vld [vmem:[#allocation5 + $0x1fe0] ss:$16 sps:$4 sm:$0xff]   ;;  %v14526_v56 = vld [vmem:[#allocation5 + $0x1dc4] ss:$16 sps:$4 sm:$0xff]  }
 0x836   :  { %v8310_v6 = vpop.f32.mrf.mxu0  ;;  %9348 = vmatmul.mubr.bf16.vlgmr.msra.gmra.mxu0 %v15715_v4 }
 0x837   :  { %v8351_v25 = vpop.f32.mrf.mxu1  ;;  %9389 = vmatmul.mubr.bf16.vlgmr.msra.gmra.mxu1 %v15717_v19  ;;  %10191 = vmatpush1.bf16.msra.mxu0 %v14470_v9  ;;  %v14527_v9 = vld [vmem:[#allocation5 + $0x1fc0] ss:$16 sps:$4 sm:$0xff]  }
 0x838   :  { %v8352_v2 = vadd.f32 %v8351_v25, %v8310_v6  ;;  %10232 = vmatpush1.bf16.msra.mxu1 %v14473_v10  ;;  %v8312_v17 = vpop.f32.mrf.mxu0  ;;  %10192 = vmatprep.subr.bf16.mxu0 %v14478_v11  ;;  %v14532_v10 = vld [vmem:[#allocation5 + $0x1da4] ss:$16 sps:$4 sm:$0xff]   ;;  %v14533_v6 = vld [vmem:[#allocation5 + $0x1fa0] ss:$16 sps:$4 sm:$0xff]  }
 0x839   :  { %v8353_v5 = vpop.f32.mrf.mxu1  ;;  %10233 = vmatprep.subr.bf16.mxu1 %v14481_v12  ;;  %10222 = vmatprep.mubr.bf16.mxu0 %v15733_v63  ;;  %v14535_v11 = vld [vmem:[#allocation5 + $0x1fa4] ss:$16 sps:$4 sm:$0xff]   ;;  %v14530_v12 = vld [vmem:[#allocation5 + $0x1da0] ss:$16 sps:$4 sm:$0xff]  }
 0x83a   :  { %v15743_v4 = vadd.f32 %v8352_v2, %v7483_v7  ;;  %v8354_v19 = vadd.f32 %v8353_v5, %v8312_v17  ;;  %10263 = vmatprep.mubr.bf16.mxu1 %v15735_v1  ;;  %v8314_v49 = vpop.f32.mrf.mxu0  ;;  %v14538_v25 = vld [vmem:[#allocation5 + $0x1d84] ss:$16 sps:$4 sm:$0xff]   ;;  %v14536_v2 = vld [vmem:[#allocation5 + $0x1d80] ss:$16 sps:$4 sm:$0xff]  }
 0x83b   :  { %v8355_v23 = vpop.f32.mrf.mxu1  ;;  %10193 = vmatpush1.bf16.msra.mxu0 %v14476_v13  ;;  %v14541_v7 = vld [vmem:[#allocation5 + $0x1f84] ss:$16 sps:$4 sm:$0xff]   ;;  %v14539_v13 = vld [vmem:[#allocation5 + $0x1f80] ss:$16 sps:$4 sm:$0xff]  }
 0x83c   :  { %v15747_v30 = vadd.f32 %v8354_v19, %v7484_v28  ;;  %10234 = vmatpush1.bf16.msra.mxu1 %v14479_v14  ;;  %v8315_v29 = vpop.f32.mrf.mxu0  ;;  %10194 = vmatprep.subr.bf16.mxu0 %v14484_v58  ;;  %v14544_v14 = vld [vmem:[#allocation5 + $0x1d64] ss:$16 sps:$4 sm:$0xff]   ;;  %v14542_v5 = vld [vmem:[#allocation5 + $0x1d60] ss:$16 sps:$4 sm:$0xff]  }
 0x83d   :  { %v8356_v21 = vpop.f32.mrf.mxu1  ;;  %10235 = vmatprep.subr.bf16.mxu1 %v14487_v16  ;;  %v14547_v17 = vld [vmem:[#allocation5 + $0x1f64] ss:$16 sps:$4 sm:$0xff]   ;;  %v14545_v58 = vld [vmem:[#allocation5 + $0x1f60] ss:$16 sps:$4 sm:$0xff]  }
 0x83e   :  { %v14550_v16 = vld [vmem:[#allocation5 + $0x1d44] ss:$16 sps:$4 sm:$0xff]   ;;  %v14548_v19 = vld [vmem:[#allocation5 + $0x1d40] ss:$16 sps:$4 sm:$0xff]   ;;  %v9530_v21 = vrot.slane %v15497_v39, 7 }
 0x83f   :  { %10195 = vmatpush1.bf16.msra.mxu0 %v14482_v18  ;;  %v14553_v28 = vld [vmem:[#allocation5 + $0x1f44] ss:$16 sps:$4 sm:$0xff]   ;;  %v14551_v49 = vld [vmem:[#allocation5 + $0x1f40] ss:$16 sps:$4 sm:$0xff]   ;;  %v14568_v39 = vld [vmem:[#allocation5 + $0x1cec] ss:$16 sps:$4 sm:$0xff]  }
 0x840   :  { %10236 = vmatpush1.bf16.msra.mxu1 %v14485_v59  ;;  %10196 = vmatprep.subr.bf16.mxu0 %v14490_v57  ;;  %v14556_v23 = vld [vmem:[#allocation5 + $0x1d24] ss:$16 sps:$4 sm:$0xff]   ;;  %v14554_v59 = vld [vmem:[#allocation5 + $0x1d20] ss:$16 sps:$4 sm:$0xff]   ;;  %v9531_v57 = vrot.slane %v15491_v37, 6 }
 0x841   :  { %10237 = vmatprep.subr.bf16.mxu1 %v14493_v41  ;;  %v14559_v18 = vld [vmem:[#allocation5 + $0x1f24] ss:$16 sps:$4 sm:$0xff]   ;;  %v14557_v29 = vld [vmem:[#allocation5 + $0x1f20] ss:$16 sps:$4 sm:$0xff]   ;;  %v9536_v41 = vrot.slane %v15500_v32, 7 }
 0x842   :  { %v14571_v37 = vld [vmem:[#allocation5 + $0x1eec] ss:$16 sps:$4 sm:$0xff]  }
 0x843   :  { %10197 = vmatpush1.bf16.msra.mxu0 %v14488_v22  ;;  %v9537_v22 = vrot.slane %v15495_v50, 6  ;;  %v14566_v50 = vld [vmem:[#allocation5 + $0x1ce8] ss:$16 sps:$4 sm:$0xff]  }
 0x844   :  { %10238 = vmatpush1.bf16.msra.mxu1 %v14491_v62  ;;  %10198 = vmatprep.subr.bf16.mxu0 %v14496_v27  ;;  %v14562_v62 = vld [vmem:[#allocation5 + $0x1d04] ss:$16 sps:$4 sm:$0xff]  }
 0x845   :  { %10239 = vmatprep.subr.bf16.mxu1 %v14499_v31  ;;  %v14565_v27 = vld [vmem:[#allocation5 + $0x1f04] ss:$16 sps:$4 sm:$0xff]   ;;  %v14560_v31 = vld [vmem:[#allocation5 + $0x1d00] ss:$16 sps:$4 sm:$0xff]  }
 0x847   :  { %10199 = vmatpush1.bf16.msra.mxu0 %v14494_v54  ;;  %v14563_v54 = vld [vmem:[#allocation5 + $0x1f00] ss:$16 sps:$4 sm:$0xff]  }
 0x848   :  { %10240 = vmatpush1.bf16.msra.mxu1 %v14497_v34  ;;  %10200 = vmatprep.subr.bf16.mxu0 %v14502_v26  ;;  %v9532_v34 = vsel %vm2838_vm8, %v9531_v57, %v9530_v21  ;;  %v9538_v26 = vsel %vm2838_vm8, %v9537_v22, %v9536_v41  ;;  %v14619_v21 = vld [vmem:[#allocation5 + $0x1fec] ss:$16 sps:$4 sm:$0xff]   ;;  %v14614_v57 = vld [vmem:[#allocation5 + $0x1de8] ss:$16 sps:$4 sm:$0xff]  }
 0x849   :  { %10241 = vmatprep.subr.bf16.mxu1 %v14505_v48  ;;  %v15755_v48 = vpack.c.b16 %v9532_v34, %v9532_v34  ;;  %v15757_v32 = vpack.c.b16 %v9538_v26, %v9538_v26  ;;  %v14617_v41 = vld [vmem:[#allocation5 + $0x1fe8] ss:$16 sps:$4 sm:$0xff]   ;;  %v14622_v22 = vld [vmem:[#allocation5 + $0x1dcc] ss:$16 sps:$4 sm:$0xff]  }
 0x84a   :  { %v14631_v34 = vld [vmem:[#allocation5 + $0x1fac] ss:$16 sps:$4 sm:$0xff]   ;;  %v14626_v26 = vld [vmem:[#allocation5 + $0x1da8] ss:$16 sps:$4 sm:$0xff]  }
 0x84b   :  { %10201 = vmatpush1.bf16.msra.mxu0 %v14500_v53  ;;  %v14569_v53 = vld [vmem:[#allocation5 + $0x1ee8] ss:$16 sps:$4 sm:$0xff]  }
 0x84c   :  { %10242 = vmatpush1.bf16.msra.mxu1 %v14503_v38  ;;  %10202 = vmatprep.subr.bf16.mxu0 %v14508_v45  ;;  %v14574_v38 = vld [vmem:[#allocation5 + $0x1ccc] ss:$16 sps:$4 sm:$0xff]  }
 0x84d   :  { %10243 = vmatprep.subr.bf16.mxu1 %v14511_v46  ;;  %v14577_v45 = vld [vmem:[#allocation5 + $0x1ecc] ss:$16 sps:$4 sm:$0xff]  }
 0x84f   :  { %10203 = vmatpush1.bf16.msra.mxu0 %v14506_v20 }
 0x850   :  { %10244 = vmatpush1.bf16.msra.mxu1 %v14509_v33  ;;  %10204 = vmatprep.subr.bf16.mxu0 %v14514_v51  ;;  %v7485_v33 = vadd.f32 %v15721_v60, %v15633_v24 }
 0x851   :  { %10245 = vmatprep.subr.bf16.mxu1 %v14517_v55  ;;  %v14572_v55 = vld [vmem:[#allocation5 + $0x1cc8] ss:$16 sps:$4 sm:$0xff]  }
 0x853   :  { %10205 = vmatpush1.bf16.msra.mxu0 %v14512_v36  ;;  %v14575_v36 = vld [vmem:[#allocation5 + $0x1ec8] ss:$16 sps:$4 sm:$0xff]  }
 0x854   :  { %10246 = vmatpush1.bf16.msra.mxu1 %v14515_v3  ;;  %10206 = vmatprep.subr.bf16.mxu0 %v14520_v43 }
 0x855   :  { %10247 = vmatprep.subr.bf16.mxu1 %v14523_v35  ;;  %v14580_v35 = vld [vmem:[#allocation5 + $0x1cac] ss:$16 sps:$4 sm:$0xff]  }
 0x857   :  { %10207 = vmatpush2.bf16.msra.mxu0 %v14518_v44  ;;  %v14583_v44 = vld [vmem:[#allocation5 + $0x1eac] ss:$16 sps:$4 sm:$0xff]  }
 0x858   :  { %10248 = vmatpush2.bf16.msra.mxu1 %v14521_v47  ;;  %10208 = vmatprep.subr.bf16.mxu0 %v14526_v56  ;;  %v7486_v47 = vadd.f32 %v15723_v52, %v15635_v15  ;;  %v14586_v15 = vld [vmem:[#allocation5 + $0x1c8c] ss:$16 sps:$4 sm:$0xff]  }
 0x859   :  { %10249 = vmatprep.subr.bf16.mxu1 %v14529_v8  ;;  %v14589_v52 = vld [vmem:[#allocation5 + $0x1e8c] ss:$16 sps:$4 sm:$0xff]  }
 0x85b   :  { %10209 = vmatpush2.bf16.msra.mxu0 %v14524_v61 }
 0x85c   :  { %10250 = vmatpush2.bf16.msra.mxu1 %v14527_v9  ;;  %10210 = vmatprep.subr.bf16.mxu0 %v14532_v10  ;;  %v14578_v9 = vld [vmem:[#allocation5 + $0x1ca8] ss:$16 sps:$4 sm:$0xff]  }
 0x85d   :  { %10251 = vmatprep.subr.bf16.mxu1 %v14535_v11  ;;  %v14581_v10 = vld [vmem:[#allocation5 + $0x1ea8] ss:$16 sps:$4 sm:$0xff]  }
 0x85f   :  { %10211 = vmatpush2.bf16.msra.mxu0 %v14530_v12 }
 0x860   :  { %10252 = vmatpush2.bf16.msra.mxu1 %v14533_v6  ;;  %10212 = vmatprep.subr.bf16.mxu0 %v14538_v25  ;;  %v14584_v6 = vld [vmem:[#allocation5 + $0x1c88] ss:$16 sps:$4 sm:$0xff]   ;;  %v14595_v25 = vld [vmem:[#allocation5 + $0x1e6c] ss:$16 sps:$4 sm:$0xff]  }
 0x861   :  { %10253 = vmatprep.subr.bf16.mxu1 %v14541_v7  ;;  %v14590_v7 = vld [vmem:[#allocation5 + $0x1c68] ss:$16 sps:$4 sm:$0xff]  }
 0x863   :  { %10213 = vmatpush2.bf16.msra.mxu0 %v14536_v2  ;;  %v14593_v2 = vld [vmem:[#allocation5 + $0x1e68] ss:$16 sps:$4 sm:$0xff]  }
 0x864   :  { %10254 = vmatpush2.bf16.msra.mxu1 %v14539_v13  ;;  %10214 = vmatprep.subr.bf16.mxu0 %v14544_v14  ;;  %v14598_v13 = vld [vmem:[#allocation5 + $0x1c4c] ss:$16 sps:$4 sm:$0xff]  }
 0x865   :  { %10255 = vmatprep.subr.bf16.mxu1 %v14547_v17  ;;  %v14601_v14 = vld [vmem:[#allocation5 + $0x1e4c] ss:$16 sps:$4 sm:$0xff]   ;;  %v14596_v17 = vld [vmem:[#allocation5 + $0x1c48] ss:$16 sps:$4 sm:$0xff]  }
 0x867   :  { %10215 = vmatpush2.bf16.msra.mxu0 %v14542_v5  ;;  %v14599_v5 = vld [vmem:[#allocation5 + $0x1e48] ss:$16 sps:$4 sm:$0xff]  }
 0x868   :  { %10256 = vmatpush2.bf16.msra.mxu1 %v14545_v58  ;;  %10216 = vmatprep.subr.bf16.mxu0 %v14550_v16  ;;  %v14604_v58 = vld [vmem:[#allocation5 + $0x1c2c] ss:$16 sps:$4 sm:$0xff]  }
 0x869   :  { %10257 = vmatprep.subr.bf16.mxu1 %v14553_v28  ;;  %v14607_v16 = vld [vmem:[#allocation5 + $0x1e2c] ss:$16 sps:$4 sm:$0xff]   ;;  %v14602_v28 = vld [vmem:[#allocation5 + $0x1c28] ss:$16 sps:$4 sm:$0xff]  }
 0x86b   :  { %10217 = vmatpush2.bf16.msra.mxu0 %v14548_v19  ;;  %v14605_v19 = vld [vmem:[#allocation5 + $0x1e28] ss:$16 sps:$4 sm:$0xff]  }
 0x86c   :  { %10258 = vmatpush2.bf16.msra.mxu1 %v14551_v49  ;;  %10218 = vmatprep.subr.bf16.mxu0 %v14556_v23  ;;  %v14610_v49 = vld [vmem:[#allocation5 + $0x1c0c] ss:$16 sps:$4 sm:$0xff]  }
 0x86d   :  { %10259 = vmatprep.subr.bf16.mxu1 %v14559_v18  ;;  %v14613_v23 = vld [vmem:[#allocation5 + $0x1e0c] ss:$16 sps:$4 sm:$0xff]   ;;  %v14608_v18 = vld [vmem:[#allocation5 + $0x1c08] ss:$16 sps:$4 sm:$0xff]  }
 0x86f   :  { %10219 = vmatpush2.bf16.msra.mxu0 %v14554_v59  ;;  %v14611_v59 = vld [vmem:[#allocation5 + $0x1e08] ss:$16 sps:$4 sm:$0xff]  }
 0x870   :  { %10260 = vmatpush2.bf16.msra.mxu1 %v14557_v29  ;;  %10220 = vmatprep.subr.bf16.mxu0 %v14562_v62  ;;  %v14616_v29 = vld [vmem:[#allocation5 + $0x1dec] ss:$16 sps:$4 sm:$0xff]  }
 0x871   :  { %10261 = vmatprep.subr.bf16.mxu1 %v14565_v27  ;;  %v14625_v62 = vld [vmem:[#allocation5 + $0x1fcc] ss:$16 sps:$4 sm:$0xff]   ;;  %v14620_v27 = vld [vmem:[#allocation5 + $0x1dc8] ss:$16 sps:$4 sm:$0xff]  }
 0x873   :  { %10221 = vmatpush2.bf16.msra.mxu0 %v14560_v31  ;;  %v14623_v31 = vld [vmem:[#allocation5 + $0x1fc8] ss:$16 sps:$4 sm:$0xff]  }
 0x874   :  { %10262 = vmatpush2.bf16.msra.mxu1 %v14563_v54  ;;  %10272 = vmatprep.subr.bf16.mxu0 %v14568_v39  ;;  %v14628_v54 = vld [vmem:[#allocation5 + $0x1dac] ss:$16 sps:$4 sm:$0xff]   ;;  %v14629_v39 = vld [vmem:[#allocation5 + $0x1fa8] ss:$16 sps:$4 sm:$0xff]  }
 0x875   :  { %10313 = vmatprep.subr.bf16.mxu1 %v14571_v37  ;;  %v14634_v37 = vld [vmem:[#allocation5 + $0x1d8c] ss:$16 sps:$4 sm:$0xff]  }
 0x876   :  { %v8392_v46 = vpop.f32.mrf.mxu0  ;;  %10223 = vmatmul.mubr.bf16.vlgmr.msra.gmra.mxu0 %v15755_v48 }
 0x877   :  { %v8433_v20 = vpop.f32.mrf.mxu1  ;;  %10264 = vmatmul.mubr.bf16.vlgmr.msra.gmra.mxu1 %v15757_v32  ;;  %10273 = vmatpush1.bf16.msra.mxu0 %v14566_v50  ;;  %v14637_v50 = vld [vmem:[#allocation5 + $0x1f8c] ss:$16 sps:$4 sm:$0xff]  }
 0x878   :  { %v8434_v51 = vadd.f32 %v8433_v20, %v8392_v46  ;;  %10314 = vmatpush1.bf16.msra.mxu1 %v14569_v53  ;;  %v8394_v3 = vpop.f32.mrf.mxu0  ;;  %10274 = vmatprep.subr.bf16.mxu0 %v14574_v38  ;;  %v14632_v53 = vld [vmem:[#allocation5 + $0x1d88] ss:$16 sps:$4 sm:$0xff]   ;;  %v14643_v46 = vld [vmem:[#allocation5 + $0x1f6c] ss:$16 sps:$4 sm:$0xff]  }
 0x879   :  { %v8435_v43 = vpop.f32.mrf.mxu1  ;;  %10315 = vmatprep.subr.bf16.mxu1 %v14577_v45  ;;  %10304 = vmatprep.mubr.bf16.mxu0 %v15733_v63  ;;  %v14587_v63 = vld [vmem:[#allocation5 + $0x1e88] ss:$16 sps:$4 sm:$0xff]   ;;  %v14640_v45 = vld [vmem:[#allocation5 + $0x1d6c] ss:$16 sps:$4 sm:$0xff]  }
 0x87a   :  { %v15765_v56 = vadd.f32 %v8434_v51, %v7485_v33  ;;  %v8436_v8 = vadd.f32 %v8435_v43, %v8394_v3  ;;  %10345 = vmatprep.mubr.bf16.mxu1 %v15735_v1  ;;  %v8396_v24 = vpop.f32.mrf.mxu0  ;;  %v14592_v1 = vld [vmem:[#allocation5 + $0x1c6c] ss:$16 sps:$4 sm:$0xff]   ;;  %v14635_v38 = vld [vmem:[#allocation5 + $0x1f88] ss:$16 sps:$4 sm:$0xff]  }
 0x87b   :  { %v8437_v60 = vpop.f32.mrf.mxu1  ;;  %10275 = vmatpush1.bf16.msra.mxu0 %v14572_v55  ;;  %v14638_v20 = vld [vmem:[#allocation5 + $0x1d68] ss:$16 sps:$4 sm:$0xff]   ;;  %v14646_v51 = vld [vmem:[#allocation5 + $0x1d4c] ss:$16 sps:$4 sm:$0xff]  }
 0x87c   :  { %v15769_v61 = vadd.f32 %v8436_v8, %v7486_v47  ;;  %10316 = vmatpush1.bf16.msra.mxu1 %v14575_v36  ;;  %v8397_v11 = vpop.f32.mrf.mxu0  ;;  %10276 = vmatprep.subr.bf16.mxu0 %v14580_v35  ;;  %v14641_v33 = vld [vmem:[#allocation5 + $0x1f68] ss:$16 sps:$4 sm:$0xff]   ;;  %v14649_v55 = vld [vmem:[#allocation5 + $0x1f4c] ss:$16 sps:$4 sm:$0xff]  }
 0x87d   :  { %v8438_v12 = vpop.f32.mrf.mxu1  ;;  %10317 = vmatprep.subr.bf16.mxu1 %v14583_v44  ;;  %v14644_v36 = vld [vmem:[#allocation5 + $0x1d48] ss:$16 sps:$4 sm:$0xff]   ;;  %v14652_v43 = vld [vmem:[#allocation5 + $0x1d2c] ss:$16 sps:$4 sm:$0xff]  }
 0x87e   :  { %v14647_v3 = vld [vmem:[#allocation5 + $0x1f48] ss:$16 sps:$4 sm:$0xff]   ;;  %v14655_v35 = vld [vmem:[#allocation5 + $0x1f2c] ss:$16 sps:$4 sm:$0xff]  }
 0x87f   :  { %10277 = vmatpush1.bf16.msra.mxu0 %v14578_v9  ;;  %v14650_v44 = vld [vmem:[#allocation5 + $0x1d28] ss:$16 sps:$4 sm:$0xff]   ;;  %v14658_v8 = vld [vmem:[#allocation5 + $0x1d0c] ss:$16 sps:$4 sm:$0xff]  }
 0x880   :  { %10318 = vmatpush1.bf16.msra.mxu1 %v14581_v10  ;;  %10278 = vmatprep.subr.bf16.mxu0 %v14586_v15  ;;  %v14653_v47 = vld [vmem:[#allocation5 + $0x1f28] ss:$16 sps:$4 sm:$0xff]   ;;  %v14661_v24 = vld [vmem:[#allocation5 + $0x1f0c] ss:$16 sps:$4 sm:$0xff]  }
 0x881   :  { %10319 = vmatprep.subr.bf16.mxu1 %v14589_v52  ;;  %v14656_v60 = vld [vmem:[#allocation5 + $0x1d08] ss:$16 sps:$4 sm:$0xff]  }
 0x882   :  { %v14659_v9 = vld [vmem:[#allocation5 + $0x1f08] ss:$16 sps:$4 sm:$0xff]  }
 0x883   :  { %10279 = vmatpush1.bf16.msra.mxu0 %v14584_v6  ;;  %v14664_v10 = vld [vmem:[#allocation24 + $0x74] ss:$8 sps:$4 sm:$0xff]   ;;  %v14662_v11 = vld [vmem:[#allocation24 + $0x70] ss:$8 sps:$4 sm:$0xff]   ;;  %v14667_v12 = vld [vmem:[#allocation24 + $0x64] ss:$8 sps:$4 sm:$0xff]  }
 0x884   :  { %10320 = vmatpush1.bf16.msra.mxu1 %v14587_v63  ;;  %10280 = vmatprep.subr.bf16.mxu0 %v14592_v1  ;;  %v14665_v63 = vld [vmem:[#allocation24 + $0x60] ss:$8 sps:$4 sm:$0xff]  }
 0x885   :  { %10321 = vmatprep.subr.bf16.mxu1 %v14595_v25 }
 0x887   :  { %10281 = vmatpush1.bf16.msra.mxu0 %v14590_v7  ;;  %v14670_v7 = vld [vmem:[#allocation24 + $0x54] ss:$8 sps:$4 sm:$0xff]  }
 0x888   :  { %10322 = vmatpush1.bf16.msra.mxu1 %v14593_v2  ;;  %10282 = vmatprep.subr.bf16.mxu0 %v14598_v13 }
 0x889   :  { %10323 = vmatprep.subr.bf16.mxu1 %v14601_v14 }
 0x88b   :  { %10283 = vmatpush1.bf16.msra.mxu0 %v14596_v17 }
 0x88c   :  { %10324 = vmatpush1.bf16.msra.mxu1 %v14599_v5  ;;  %10284 = vmatprep.subr.bf16.mxu0 %v14604_v58 }
 0x88d   :  { %10325 = vmatprep.subr.bf16.mxu1 %v14607_v16  ;;  %v14673_v16 = vld [vmem:[#allocation24 + $0x44] ss:$8 sps:$4 sm:$0xff]  }
 0x88f   :  { %10285 = vmatpush1.bf16.msra.mxu0 %v14602_v28  ;;  %v14712_v28 = vld [vmem:[#allocation24 + $0x174] ss:$8 sps:$4 sm:$0xff]  }
 0x890   :  { %10326 = vmatpush1.bf16.msra.mxu1 %v14605_v19  ;;  %10286 = vmatprep.subr.bf16.mxu0 %v14610_v49  ;;  %v14671_v19 = vld [vmem:[#allocation24 + $0x40] ss:$8 sps:$4 sm:$0xff]   ;;  %v14710_v49 = vld [vmem:[#allocation24 + $0x170] ss:$8 sps:$4 sm:$0xff]  }
 0x891   :  { %10327 = vmatprep.subr.bf16.mxu1 %v14613_v23  ;;  %v14676_v23 = vld [vmem:[#allocation24 + $0x34] ss:$8 sps:$4 sm:$0xff]  }
 0x893   :  { %10287 = vmatpush1.bf16.msra.mxu0 %v14608_v18  ;;  %v14713_v18 = vld [vmem:[#allocation24 + $0x160] ss:$8 sps:$4 sm:$0xff]  }
 0x894   :  { %10328 = vmatpush1.bf16.msra.mxu1 %v14611_v59  ;;  %10288 = vmatprep.subr.bf16.mxu0 %v14616_v29  ;;  %v14718_v59 = vld [vmem:[#allocation24 + $0x154] ss:$8 sps:$4 sm:$0xff]   ;;  %v14679_v29 = vld [vmem:[#allocation24 + $0x24] ss:$8 sps:$4 sm:$0xff]  }
 0x895   :  { %10329 = vmatprep.subr.bf16.mxu1 %v14619_v21  ;;  %v14716_v21 = vld [vmem:[#allocation24 + $0x150] ss:$8 sps:$4 sm:$0xff]  }
 0x897   :  { %10289 = vmatpush2.bf16.msra.mxu0 %v14614_v57  ;;  %v14721_v57 = vld [vmem:[#allocation24 + $0x144] ss:$8 sps:$4 sm:$0xff]  }
 0x898   :  { %10330 = vmatpush2.bf16.msra.mxu1 %v14617_v41  ;;  %10290 = vmatprep.subr.bf16.mxu0 %v14622_v22  ;;  %v14677_v41 = vld [vmem:[#allocation24 + $0x20] ss:$8 sps:$4 sm:$0xff]   ;;  %v14682_v22 = vld [vmem:[#allocation24 + $0x14] ss:$8 sps:$4 sm:$0xff]  }
 0x899   :  { %10331 = vmatprep.subr.bf16.mxu1 %v14625_v62  ;;  %v14719_v62 = vld [vmem:[#allocation24 + $0x140] ss:$8 sps:$4 sm:$0xff]  }
 0x89b   :  { %10291 = vmatpush2.bf16.msra.mxu0 %v14620_v27  ;;  %v14724_v27 = vld [vmem:[#allocation24 + $0x134] ss:$8 sps:$4 sm:$0xff]  }
 0x89c   :  { %10332 = vmatpush2.bf16.msra.mxu1 %v14623_v31  ;;  %10292 = vmatprep.subr.bf16.mxu0 %v14628_v54  ;;  %v14680_v31 = vld [vmem:[#allocation24 + $0x10] ss:$8 sps:$4 sm:$0xff]   ;;  %v14685_v54 = vld [vmem:[#allocation24 + $0x4] ss:$8 sps:$4 sm:$0xff]  }
 0x89d   :  { %10333 = vmatprep.subr.bf16.mxu1 %v14631_v34  ;;  %v14722_v34 = vld [vmem:[#allocation24 + $0x130] ss:$8 sps:$4 sm:$0xff]  }
 0x89f   :  { %10293 = vmatpush2.bf16.msra.mxu0 %v14626_v26  ;;  %v14727_v26 = vld [vmem:[#allocation24 + $0x124] ss:$8 sps:$4 sm:$0xff]  }
 0x8a0   :  { %10334 = vmatpush2.bf16.msra.mxu1 %v14629_v39  ;;  %10294 = vmatprep.subr.bf16.mxu0 %v14634_v37  ;;  %v14683_v39 = vld [vmem:[#allocation24] ss:$8 sps:$4 sm:$0xff]   ;;  %v14688_v37 = vld [vmem:[#allocation24 + $0xf4] ss:$8 sps:$4 sm:$0xff]  }
 0x8a1   :  { %10335 = vmatprep.subr.bf16.mxu1 %v14637_v50  ;;  %v14725_v50 = vld [vmem:[#allocation24 + $0x120] ss:$8 sps:$4 sm:$0xff]  }
 0x8a3   :  { %10295 = vmatpush2.bf16.msra.mxu0 %v14632_v53  ;;  %v14730_v53 = vld [vmem:[#allocation24 + $0x114] ss:$8 sps:$4 sm:$0xff]  }
 0x8a4   :  { %10336 = vmatpush2.bf16.msra.mxu1 %v14635_v38  ;;  %10296 = vmatprep.subr.bf16.mxu0 %v14640_v45  ;;  %v14686_v38 = vld [vmem:[#allocation24 + $0xf0] ss:$8 sps:$4 sm:$0xff]   ;;  %v14691_v45 = vld [vmem:[#allocation24 + $0xe4] ss:$8 sps:$4 sm:$0xff]  }
 0x8a5   :  { %10337 = vmatprep.subr.bf16.mxu1 %v14643_v46  ;;  %v14728_v46 = vld [vmem:[#allocation24 + $0x110] ss:$8 sps:$4 sm:$0xff]  }
 0x8a7   :  { %10297 = vmatpush2.bf16.msra.mxu0 %v14638_v20  ;;  %v14733_v20 = vld [vmem:[#allocation24 + $0x104] ss:$8 sps:$4 sm:$0xff]  }
 0x8a8   :  { %10338 = vmatpush2.bf16.msra.mxu1 %v14641_v33  ;;  %10298 = vmatprep.subr.bf16.mxu0 %v14646_v51  ;;  %v14689_v33 = vld [vmem:[#allocation24 + $0xe0] ss:$8 sps:$4 sm:$0xff]   ;;  %v14694_v51 = vld [vmem:[#allocation24 + $0xd4] ss:$8 sps:$4 sm:$0xff]  }
 0x8a9   :  { %10339 = vmatprep.subr.bf16.mxu1 %v14649_v55  ;;  %v14731_v55 = vld [vmem:[#allocation24 + $0x100] ss:$8 sps:$4 sm:$0xff]  }
 0x8ab   :  { %10299 = vmatpush2.bf16.msra.mxu0 %v14644_v36  ;;  %v14736_v36 = vld [vmem:[#allocation24 + $0x1f4] ss:$8 sps:$4 sm:$0xff]  }
 0x8ac   :  { %10340 = vmatpush2.bf16.msra.mxu1 %v14647_v3  ;;  %10300 = vmatprep.subr.bf16.mxu0 %v14652_v43  ;;  %v14692_v3 = vld [vmem:[#allocation24 + $0xd0] ss:$8 sps:$4 sm:$0xff]   ;;  %v14697_v43 = vld [vmem:[#allocation24 + $0xc4] ss:$8 sps:$4 sm:$0xff]  }
 0x8ad   :  { %10341 = vmatprep.subr.bf16.mxu1 %v14655_v35  ;;  %v14734_v35 = vld [vmem:[#allocation24 + $0x1f0] ss:$8 sps:$4 sm:$0xff]  }
 0x8af   :  { %10301 = vmatpush2.bf16.msra.mxu0 %v14650_v44  ;;  %v14739_v44 = vld [vmem:[#allocation24 + $0x1e4] ss:$8 sps:$4 sm:$0xff]  }
 0x8b0   :  { %10342 = vmatpush2.bf16.msra.mxu1 %v14653_v47  ;;  %10302 = vmatprep.subr.bf16.mxu0 %v14658_v8  ;;  %v14695_v47 = vld [vmem:[#allocation24 + $0xc0] ss:$8 sps:$4 sm:$0xff]   ;;  %v14700_v8 = vld [vmem:[#allocation24 + $0xb4] ss:$8 sps:$4 sm:$0xff]  }
 0x8b1   :  { %10343 = vmatprep.subr.bf16.mxu1 %v14661_v24  ;;  %v14737_v24 = vld [vmem:[#allocation24 + $0x1e0] ss:$8 sps:$4 sm:$0xff]  }
 0x8b3   :  { %10303 = vmatpush2.bf16.msra.mxu0 %v14656_v60  ;;  %v14742_v60 = vld [vmem:[#allocation24 + $0x1d4] ss:$8 sps:$4 sm:$0xff]  }
 0x8b4   :  { %10344 = vmatpush2.bf16.msra.mxu1 %v14659_v9  ;;  %10758 = vmatprep.subr.bf16.mxu0 %v14664_v10  ;;  %v14698_v9 = vld [vmem:[#allocation24 + $0xb0] ss:$8 sps:$4 sm:$0xff]   ;;  %v14703_v10 = vld [vmem:[#allocation24 + $0xa4] ss:$8 sps:$4 sm:$0xff]  }
 0x8b5   :  { %10799 = vmatprep.subr.bf16.mxu1 %v14712_v28  ;;  %v14752_v28 = vld [vmem:[#allocation24 + $0x190] ss:$8 sps:$4 sm:$0xff]  }
 0x8b6   :  { %v9267_v15 = vpop.f32.mrf.mxu0  ;;  %10305 = vmatmul.mubr.bf16.vlgmr.msra.gmra.mxu0 %v15755_v48  ;;  %v14668_v48 = vld [vmem:[#allocation24 + $0x50] ss:$8 sps:$4 sm:$0xff]  }
 0x8b7   :  { %v9308_v52 = vpop.f32.mrf.mxu1  ;;  %10346 = vmatmul.mubr.bf16.vlgmr.msra.gmra.mxu1 %v15757_v32  ;;  %10759 = vmatpush1.bf16.msra.mxu0 %v14662_v11  ;;  %v14740_v11 = vld [vmem:[#allocation24 + $0x1d0] ss:$8 sps:$4 sm:$0xff]  }
 0x8b8   :  { %v9309_v6 = vadd.f32 %v9308_v52, %v9267_v15  ;;  %v9269_v1 = vpop.f32.mrf.mxu0  ;;  %10760 = vmatprep.subr.bf16.mxu0 %v14667_v12  ;;  %10800 = vmatpush1.bf16.msra.mxu1 %v14710_v49  ;;  %v14745_v12 = vld [vmem:[#allocation24 + $0x1c4] ss:$8 sps:$4 sm:$0xff]   ;;  %v14701_v15 = vld [vmem:[#allocation24 + $0xa0] ss:$8 sps:$4 sm:$0xff]   ;;  %v14706_v52 = vld [vmem:[#allocation24 + $0x94] ss:$8 sps:$4 sm:$0xff]  }
 0x8b9   :  { %v9310_v25 = vpop.f32.mrf.mxu1 }
 0x8ba   :  { %v15774_v2 = vadd.f32 %v9309_v6, %v15743_v4  ;;  %v9311_v13 = vadd.f32 %v9310_v25, %v9269_v1  ;;  %v9271_v14 = vpop.f32.mrf.mxu0  ;;  %v14715_v4 = vld [vmem:[#allocation24 + $0x164] ss:$8 sps:$4 sm:$0xff]   ;;  %v14743_v6 = vld [vmem:[#allocation24 + $0x1c0] ss:$8 sps:$4 sm:$0xff]   ;;  %v14704_v1 = vld [vmem:[#allocation24 + $0x90] ss:$8 sps:$4 sm:$0xff]  }
 0x8bb   :  { %v9312_v17 = vpop.f32.mrf.mxu1  ;;  %10761 = vmatpush1.bf16.msra.mxu0 %v14665_v63  ;;  %10801 = vmatprep.subr.bf16.mxu1 %v14715_v4  ;;  %v14748_v63 = vld [vmem:[#allocation24 + $0x1b4] ss:$8 sps:$4 sm:$0xff]   ;;  %v14709_v25 = vld [vmem:[#allocation24 + $0x84] ss:$8 sps:$4 sm:$0xff]   ;;  %v14707_v14 = vld [vmem:[#allocation24 + $0x80] ss:$8 sps:$4 sm:$0xff]  }
 0x8bc   :  { %v15777_v5 = vadd.f32 %v9311_v13, %v15747_v30  ;;  %v9272_v58 = vpop.f32.mrf.mxu0  ;;  %10762 = vmatprep.subr.bf16.mxu0 %v14670_v7  ;;  %v14674_v30 = vld [vmem:[#allocation24 + $0x30] ss:$8 sps:$4 sm:$0xff]   ;;  %10802 = vmatpush1.bf16.msra.mxu1 %v14713_v18  ;;  %v14751_v13 = vld [vmem:[#allocation24 + $0x1a4] ss:$8 sps:$4 sm:$0xff]   ;;  %v14749_v17 = vld [vmem:[#allocation24 + $0x1a0] ss:$8 sps:$4 sm:$0xff]  }
 0x8bd   :  { %v9313_v32 = vpop.f32.mrf.mxu1  ;;  %10803 = vmatprep.subr.bf16.mxu1 %v14718_v59  ;;  %v14746_v7 = vld [vmem:[#allocation24 + $0x1b0] ss:$8 sps:$4 sm:$0xff]  }
 0x8be   :  { %v14754_v32 = vld [vmem:[#allocation24 + $0x194] ss:$8 sps:$4 sm:$0xff]  }
 0x8bf   :  { %10763 = vmatpush1.bf16.msra.mxu0 %v14668_v48 }
 0x8c0   :  { %10764 = vmatprep.subr.bf16.mxu0 %v14673_v16  ;;  %10804 = vmatpush1.bf16.msra.mxu1 %v14716_v21  ;;  %v14755_v21 = vld [vmem:[#allocation24 + $0x180] ss:$8 sps:$4 sm:$0xff]  }
 0x8c1   :  { %10805 = vmatprep.subr.bf16.mxu1 %v14721_v57 }
 0x8c3   :  { %10765 = vmatpush1.bf16.msra.mxu0 %v14671_v19 }
 0x8c4   :  { %10766 = vmatprep.subr.bf16.mxu0 %v14676_v23  ;;  %10806 = vmatpush1.bf16.msra.mxu1 %v14719_v62 }
 0x8c5   :  { %10807 = vmatprep.subr.bf16.mxu1 %v14724_v27 }
 0x8c7   :  { %10767 = vmatpush1.bf16.msra.mxu0 %v14674_v30  ;;  %v14757_v30 = vld [vmem:[#allocation24 + $0x184] ss:$8 sps:$4 sm:$0xff]  }
 0x8c8   :  { %10768 = vmatprep.subr.bf16.mxu0 %v14679_v29  ;;  %10808 = vmatpush1.bf16.msra.mxu1 %v14722_v34 }
 0x8c9   :  { %10809 = vmatprep.subr.bf16.mxu1 %v14727_v26 }
 0x8cb   :  { %10769 = vmatpush1.bf16.msra.mxu0 %v14677_v41 }
 0x8cc   :  { %10770 = vmatprep.subr.bf16.mxu0 %v14682_v22  ;;  %10810 = vmatpush1.bf16.msra.mxu1 %v14725_v50 }
 0x8cd   :  { %10811 = vmatprep.subr.bf16.mxu1 %v14730_v53 }
 0x8cf   :  { %10771 = vmatpush1.bf16.msra.mxu0 %v14680_v31 }
 0x8d0   :  { %10772 = vmatprep.subr.bf16.mxu0 %v14685_v54  ;;  %10812 = vmatpush1.bf16.msra.mxu1 %v14728_v46 }
 0x8d1   :  { %10813 = vmatprep.subr.bf16.mxu1 %v14733_v20 }
 0x8d3   :  { %10773 = vmatpush1.bf16.msra.mxu0 %v14683_v39 }
 0x8d4   :  { %10774 = vmatprep.subr.bf16.mxu0 %v14688_v37  ;;  %10814 = vmatpush1.bf16.msra.mxu1 %v14731_v55 }
 0x8d5   :  { %10815 = vmatprep.subr.bf16.mxu1 %v14736_v36 }
 0x8d7   :  { %10775 = vmatpush2.bf16.msra.mxu0 %v14686_v38 }
 0x8d8   :  { %10776 = vmatprep.subr.bf16.mxu0 %v14691_v45  ;;  %10816 = vmatpush2.bf16.msra.mxu1 %v14734_v35 }
 0x8d9   :  { %10817 = vmatprep.subr.bf16.mxu1 %v14739_v44 }
 0x8db   :  { %10777 = vmatpush2.bf16.msra.mxu0 %v14689_v33 }
 0x8dc   :  { %10778 = vmatprep.subr.bf16.mxu0 %v14694_v51  ;;  %10818 = vmatpush2.bf16.msra.mxu1 %v14737_v24  ;;  %v14759_v24 = vld [vmem:[#allocation27 + $0x38] sm:$0xff]  }
 0x8dd   :  { %10819 = vmatprep.subr.bf16.mxu1 %v14742_v60  ;;  %v14760_v60 = vld [vmem:[#allocation27 + $0x70] sm:$0xff]  }
 0x8df   :  { %10779 = vmatpush2.bf16.msra.mxu0 %v14692_v3 }
 0x8e0   :  { %10780 = vmatprep.subr.bf16.mxu0 %v14697_v43  ;;  %10820 = vmatpush2.bf16.msra.mxu1 %v14740_v11  ;;  %v14763_v11 = vld [vmem:[#allocation27 + $0x28] sm:$0xff]  }
 0x8e1   :  { %10821 = vmatprep.subr.bf16.mxu1 %v14745_v12  ;;  %v14764_v12 = vld [vmem:[#allocation27 + $0x60] sm:$0xff]  }
 0x8e3   :  { %10781 = vmatpush2.bf16.msra.mxu0 %v14695_v47 }
 0x8e4   :  { %10782 = vmatprep.subr.bf16.mxu0 %v14700_v8  ;;  %10822 = vmatpush2.bf16.msra.mxu1 %v14743_v6  ;;  %v14758_v8 = vld [vmem:[#allocation27 + $0x78] sm:$0xff]  }
 0x8e5   :  { %10823 = vmatprep.subr.bf16.mxu1 %v14748_v63  ;;  %v14767_v6 = vld [vmem:[#allocation27 + $0x18] sm:$0xff]   ;;  %v14768_v63 = vld [vmem:[#allocation27 + $0x50] sm:$0xff]  }
 0x8e7   :  { %10783 = vmatpush2.bf16.msra.mxu0 %v14698_v9  ;;  %v14761_v9 = vld [vmem:[#allocation27 + $0x30] sm:$0xff]  }
 0x8e8   :  { %10784 = vmatprep.subr.bf16.mxu0 %v14703_v10  ;;  %10824 = vmatpush2.bf16.msra.mxu1 %v14746_v7  ;;  %v14762_v10 = vld [vmem:[#allocation27 + $0x68] sm:$0xff]  }
 0x8e9   :  { %10825 = vmatprep.subr.bf16.mxu1 %v14751_v13  ;;  %v14771_v7 = vld [vmem:[#allocation27 + $0x8] sm:$0xff]   ;;  %v14772_v13 = vld [vmem:[#allocation27 + $0x40] sm:$0xff]  }
 0x8eb   :  { %10785 = vmatpush2.bf16.msra.mxu0 %v14701_v15  ;;  %v14765_v15 = vld [vmem:[#allocation27 + $0x20] sm:$0xff]  }
 0x8ec   :  { %10786 = vmatprep.subr.bf16.mxu0 %v14706_v52  ;;  %10826 = vmatpush2.bf16.msra.mxu1 %v14749_v17  ;;  %v14766_v52 = vld [vmem:[#allocation27 + $0x58] sm:$0xff]  }
 0x8ed   :  { %10827 = vmatprep.subr.bf16.mxu1 %v14754_v32  ;;  %v14774_v17 = vld [vmem:[%s15855_s15 + $0x38] sm:$0xff]   ;;  %v14777_v32 = vld [vmem:[%s15855_s15 + $0x20] sm:$0xff]  }
 0x8ef   :  { %10787 = vmatpush2.bf16.msra.mxu0 %v14704_v1  ;;  %v14769_v1 = vld [vmem:[#allocation27 + $0x10] sm:$0xff]  }
 0x8f0   :  { %10788 = vmatprep.subr.bf16.mxu0 %v14709_v25  ;;  %10828 = vmatpush2.bf16.msra.mxu1 %v14752_v28  ;;  %v14770_v25 = vld [vmem:[#allocation27 + $0x48] sm:$0xff]   ;;  %v14779_v28 = vld [vmem:[%s15855_s15 + $0x10] sm:$0xff]  }
 0x8f1   :  { %10829 = vmatprep.subr.bf16.mxu1 %v14757_v30 }
 0x8f3   :  { %10789 = vmatpush2.bf16.msra.mxu0 %v14707_v14  ;;  %v14773_v14 = vld [vmem:[#allocation27] sm:$0xff]  }
 0x8f4   :  { %10830 = vmatpush2.bf16.msra.mxu1 %v14755_v21  ;;  %12638 = vmatprep.subr.bf16.mxu0 %v14758_v8 }
 0x8f5   :  { %12698 = vmatprep.subr.bf16.mxu1 %v15215_v0 }
 0x8f6   :  { %v9349_v48 = vpop.f32.mrf.mxu0 }
 0x8f7   :  { %v9390_v58 = vpop.f32.mrf.mxu1 }
 0x8f8   :  { %v9391_v16 = vadd.f32 %v9390_v58, %v9349_v48  ;;  %v9351_v19 = vpop.f32.mrf.mxu0  ;;  %v14775_v48 = vld [vmem:[%s15855_s15 + $0x30] sm:$0xff]   ;;  %v14776_v58 = vld [vmem:[%s15855_s15 + $0x28] sm:$0xff]  }
 0x8f9   :  { %v9392_v49 = vpop.f32.mrf.mxu1 }
 0x8fa   :  { %v9399_v23 = vadd.f32 %v9391_v16, %v15765_v56  ;;  %v9393_v4 = vadd.f32 %v9392_v49, %v9351_v19  ;;  %v9353_v18 = vpop.f32.mrf.mxu0  ;;  %v14778_v16 = vld [vmem:[%s15855_s15 + $0x18] sm:$0xff]  }
 0x8fb   :  { %v9394_v59 = vpop.f32.mrf.mxu1  ;;  %v10426_v18 = vld [vmem:[#allocation25] sm:$0x3] }
 0x8fc   :  { %v9400_v29 = vadd.f32 %v9393_v4, %v15769_v61  ;;  %v9354_v57 = vpop.f32.mrf.mxu0  ;;  %v10431_v59 = vrot.slane %v10426_v18, %v15416_v40  ;;  %v10435_v30 = vrot.slane %v10426_v18, %v15419_v42  ;;  %v14780_v40 = vld [vmem:[%s15855_s15 + $0x8] sm:$0xff]   ;;  %v14781_v42 = vld [vmem:[%s15855_s15] sm:$0xff]  }
 0x8fd   :  { %v9395_v41 = vpop.f32.mrf.mxu1 }
 0x936   :  { %v10224_v22 = vpop.f32.mrf.mxu0 }
 0x937   :  { %v10265_v62 = vpop.f32.mrf.mxu1 }
 0x938   :  { %v10266_v27 = vadd.f32 %v10265_v62, %v10224_v22  ;;  %v10226_v31 = vpop.f32.mrf.mxu0 }
 0x939   :  { %v10267_v54 = vpop.f32.mrf.mxu1 }
 0x93a   :  { %v10268_v56 = vadd.f32 %v10267_v54, %v10226_v31  ;;  %v10354_v34 = vadd.f32 %v10266_v27, %v15774_v2  ;;  %v10228_v26 = vpop.f32.mrf.mxu0 }
 0x93b   :  { %v10269_v39 = vpop.f32.mrf.mxu1  ;;  %v14783_v26 = vld [vmem:[%s15857_s17 + $0x10] sm:$0xff]  }
 0x93c   :  { %v10355_v37 = vadd.f32 %v10268_v56, %v15777_v5  ;;  %v10229_v61 = vpop.f32.mrf.mxu0  ;;  %v10358_v38 = vpack.c.bf16 %v10354_v34, %v10354_v34  ;;  %v14782_v34 = vld [vmem:[%s15857_s17 + $0x18] sm:$0xff]   ;;  %v14784_v39 = vld [vmem:[%s15857_s17 + $0x8] sm:$0xff]  }
 0x93d   :  { %v10270_v50 = vpop.f32.mrf.mxu1  ;;  %v12595_v61 = vld [vmem:[#allocation28] ss:$0 sm:$0xff] }
 0x93e   :  { %v10359_v53 = vpack.c.bf16 %v10355_v37, %v10355_v37 }
 0x940   :  { %10790 = vmatprep.mubr.bf16.mxu0 %v10359_v53 }
 0x941   :  { %10791 = vmatmul.mubr.bf16.vlgmr.msra.gmra.mxu0 %v10358_v38 }
 0x942   :  { %12639 = vmatpush3.bf16.msra.mxu0 %v14759_v24 }
 0x943   :  { %12640 = vmatprep.subr.bf16.mxu0 %v14760_v60 }
 0x946   :  { %12641 = vmatpush3.bf16.msra.mxu0 %v14761_v9 }
 0x947   :  { %12642 = vmatprep.subr.bf16.mxu0 %v14762_v10 }
 0x94a   :  { %12643 = vmatpush3.bf16.msra.mxu0 %v14763_v11 }
 0x94b   :  { %12644 = vmatprep.subr.bf16.mxu0 %v14764_v12 }
 0x94e   :  { %12645 = vmatpush3.bf16.msra.mxu0 %v14765_v15 }
 0x94f   :  { %12646 = vmatprep.subr.bf16.mxu0 %v14766_v52 }
 0x952   :  { %12647 = vmatpush3.bf16.msra.mxu0 %v14767_v6 }
 0x953   :  { %12648 = vmatprep.subr.bf16.mxu0 %v14768_v63 }
 0x956   :  { %12649 = vmatpush3.bf16.msra.mxu0 %v14769_v1 }
 0x957   :  { %12650 = vmatprep.subr.bf16.mxu0 %v14770_v25 }
 0x95a   :  { %12651 = vmatpush3.bf16.msra.mxu0 %v14771_v7 }
 0x95b   :  { %12652 = vmatprep.subr.bf16.mxu0 %v14772_v13 }
 0x95e   :  { %12653 = vmatpush3.bf16.msra.mxu0 %v14773_v14 }
 0x95f   :  { %12718 = vmatprep.subr.bf16.mxu0 %v15215_v0 }
 0x976   :  { %v10306_v45 = vpop.f32.mrf.mxu0 }
 0x977   :  { %v10347_v46 = vpop.f32.mrf.mxu1 }
 0x978   :  { %v10348_v20 = vadd.f32 %v10347_v46, %v10306_v45  ;;  %v10308_v33 = vpop.f32.mrf.mxu0 }
 0x979   :  { %v10349_v51 = vpop.f32.mrf.mxu1 }
 0x97a   :  { %v10350_v55 = vadd.f32 %v10349_v51, %v10308_v33  ;;  %v10356_v36 = vadd.f32 %v10348_v20, %v9399_v23  ;;  %v10310_v3 = vpop.f32.mrf.mxu0  ;;  %v14785_v33 = vld [vmem:[%s15857_s17] sm:$0xff]   ;;  %s15149_s17 = scalar_lea.vmem %s11222_s6, 32 }
 0x97b   :  { %v10351_v43 = vpop.f32.mrf.mxu1  ;;  %v12612_v51 = vld [vmem:[#allocation30] ss:$0 sm:$0xff]  ;;  %p15150_p6 = scmp.ne.s32.totalorder %s11222_s6, %s15149_s17  ;;  %p15155_p8 = scmp.lt.s32.totalorder %s15149_s17, %s15149_s17 }
 0x97c   :  { %v10357_v2 = vadd.f32 %v10350_v55, %v9400_v29  ;;  %v10311_v35 = vpop.f32.mrf.mxu0  ;;  %v10360_v5 = vpack.c.bf16 %v10356_v36, %v10356_v36 }
 0x97d   :  { %v10352_v44 = vpop.f32.mrf.mxu1  ;;  %v12621_v35 = vld [vmem:[#allocation31] ss:$0 sm:$0xff]  ;;  %p15156_p9 = por %p15155_p8, %p15154_p7 }
 0x97e   :  { %v10361_v47 = vpack.c.bf16 %v10357_v2, %v10357_v2 }
 0x97f   :  { %p15157_p10 = pnand %p15156_p9, %p15150_p6 }
 0x980   :  { %10831 = vmatprep.mubr.bf16.mxu1 %v10361_v47 }
 0x981   :  { %10832 = vmatmul.mubr.bf16.vlgmr.msra.gmra.mxu1 %v10360_v5 }
 0x982   :  { %12714 = vmatprep.mubr.msk.bf16.mxu1 %vm15216_vm1, %v15215_v0  ;;  %12699 = vmatpush3.bf16.msra.mxu1 %v14774_v17 }
 0x983   :  { %12700 = vmatprep.subr.bf16.mxu1 %v15215_v0 }
 0x986   :  { %12701 = vmatpush3.bf16.msra.mxu1 %v14775_v48 }
 0x987   :  { %12702 = vmatprep.subr.bf16.mxu1 %v15215_v0 }
 0x98a   :  { %12703 = vmatpush3.bf16.msra.mxu1 %v14776_v58 }
 0x98b   :  { %12704 = vmatprep.subr.bf16.mxu1 %v15215_v0 }
 0x98e   :  { %12705 = vmatpush3.bf16.msra.mxu1 %v14777_v32 }
 0x98f   :  { %12706 = vmatprep.subr.bf16.mxu1 %v15215_v0 }
 0x992   :  { %12707 = vmatpush3.bf16.msra.mxu1 %v14778_v16 }
 0x993   :  { %12708 = vmatprep.subr.bf16.mxu1 %v15215_v0 }
 0x996   :  { %12709 = vmatpush3.bf16.msra.mxu1 %v14779_v28 }
 0x997   :  { %12710 = vmatprep.subr.bf16.mxu1 %v15215_v0 }
 0x99a   :  { %12711 = vmatpush3.bf16.msra.mxu1 %v14780_v40 }
 0x99b   :  { %12712 = vmatprep.subr.bf16.mxu1 %v15215_v0 }
 0x99e   :  { %12713 = vmatpush3.bf16.msra.mxu1 %v14781_v42 }
 0xa01   :  { %v10792_v19 = vpop.f32.mrf.mxu0 }
 0xa02   :  { %v10793_v29 = vadd.f32 %v10792_v19, %v10431_v59 }
 0xa03   :  { %v10794_v49 = vpop.f32.mrf.mxu0 }
 0xa04   :  { %v10795_v57 = vadd.f32 %v10794_v49, %v10435_v30 }
 0xa05   :  { %v10796_v23 = vpop.f32.mrf.mxu0 }
 0xa07   :  { %v10797_v4 = vpop.f32.mrf.mxu0 }
 0xa41   :  { %v10833_v21 = vpop.f32.mrf.mxu1 }
 0xa42   :  { %v10834_v41 = vadd.f32 %v10833_v21, %v10793_v29 }
 0xa43   :  { %v10835_v22 = vpop.f32.mrf.mxu1 }
 0xa44   :  { %v10836_v62 = vadd.f32 %v10835_v22, %v10795_v57  ;;  %v10840_v54 = vpack.c.bf16 %v10834_v41, %v10834_v41 }
 0xa45   :  { %v10837_v27 = vpop.f32.mrf.mxu1 }
 0xa46   :  { %v10841_v31 = vpack.c.bf16 %v10836_v62, %v10836_v62 }
 0xa47   :  { %v10838_v56 = vpop.f32.mrf.mxu1 }
 0xa48   :  { %11009 = vmatprep.mubr.bf16.mxu0 %v10841_v31 }
 0xa49   :  { %11010 = vmatmul.mubr.bf16.vlgmr.msra.gmra.mxu0 %v10840_v54 }
 0xa4a   :  { %12726 = vmatprep.mubr.msk.bf16.mxu0 %vm15216_vm1, %v15215_v0  ;;  %12719 = vmatpush3.bf16.msra.mxu0 %v14782_v34 }
 0xa4b   :  { %12720 = vmatprep.subr.bf16.mxu0 %v15215_v0 }
 0xa4e   :  { %12721 = vmatpush3.bf16.msra.mxu0 %v14783_v26 }
 0xa4f   :  { %12722 = vmatprep.subr.bf16.mxu0 %v15215_v0 }
 0xa52   :  { %12723 = vmatpush3.bf16.msra.mxu0 %v14784_v39 }
 0xa53   :  { %12724 = vmatprep.subr.bf16.mxu0 %v15215_v0 }
 0xa56   :  { %12725 = vmatpush3.bf16.msra.mxu0 %v14785_v33 }
 0xb09   :  { %v12654_v37 = vpop.f32.mrf.mxu0 }
 0xb0b   :  { %v12655_v50 = vpop.f32.mrf.mxu0 }
 0xb0c   :  { %v12656_v53 = vadd.f32 %v12655_v50, %v12654_v37 }
 0xb0d   :  { %v12657_v38 = vpop.f32.mrf.mxu0 }
 0xb0e   :  { %v11012_v45 = vadd.f32 %v12656_v53, %v12595_v61 }
 0xb0f   :  { %v12658_v46 = vpop.f32.mrf.mxu0 }
 0xb10   :  { %v11017_v20 = vpack.c.bf16 %v11012_v45, %v11012_v45 }
 0xb12   :  { %12715 = vmatmul.mubr.bf16.vlgmr.msra.gmra.mxu1 %v11017_v20 }
 0xbd2   :  { %v11123_v55 = vpop.f32.mrf.mxu1 }
 0xbd3   :  { %v11124_v36 = vadd.f32 %v12612_v51, %v11123_v55 }
 0xbd4   :  { %v12716_v3 = vpop.f32.mrf.mxu1 }
 0xbd5   :  { %v11129_v0 = vpack.c.bf16 %v11124_v36, %v11124_v36 }
 0xbd6   :  { %v11126_v43 = vpop.f32.mrf.mxu1 }
 0xbd7   :  { %12727 = vmatmul.mubr.msk.bf16.vlgmr.msra.gmra.mxu0 %vm11169_vm9, %v11129_v0 }
 0xbd8   :  { %v12717_v2 = vpop.f32.mrf.mxu1 }
 0xc97   :  { %v11207_v44 = vpop.f32.mrf.mxu0 }
 0xc98   :  { %v11208_v47 = vadd.f32 %v12621_v35, %v11207_v44 }
 0xc99   :  { %v12728_v5 = vpop.f32.mrf.mxu0 }
 0xc9a   :  { %11214 = vst.msk [vmem:[#allocation33] sm:$0x3] %vm11213_vm10, %v11208_v47 }
 0xc9b   :  { %v11210_v8 = vpop.f32.mrf.mxu0 }
 0xc9c   :  { %15160 = shalt.err (!%p15157_p10)
}
 0xc9d   :  { %11224 = dma.vmem_to_hbm [thread:$0]  %s11222_s6, 32, %s15859_s19, [#allocation9]   ;;  %v12729_v24 = vpop.f32.mrf.mxu0 }
 0xc9e   :  { %15191 = dma.done.wait [#allocation9], 32  }
 0xc9f   :  { %15192 = vsyncadd [#allocation9], 4294967264 }
 0xca0   :  { %11228 = vsyncpa [#allocation8], 1 }
 0xca1   :  { %11229 = vsyncpa [#allocation11], 1 }
 0xca2   :  { %11230 = vsyncpa [#allocation14], 1 }
 0xca3   :  { %11231 = vsyncpa [#allocation17], 1 }
 0xca4   :  { %11232 = vsyncpa [#allocation20], 1 }
 0xca5   :  { %11233 = vsyncpa [#allocation23], 1 }
 0xca6   :  { %11234 = vsyncpa [#allocation26], 1 }
 0xca7   :  { %11235 = vsyncpa [#allocation29], 1 }
 0xca8   :  { %11236 = vsyncpa [#allocation32], 1 }
 0xca9   :  { %11237 = vsyncpa [#allocation9], 1 }
 0xcaa   :  { %11238 = vsyncmov [#allocation6] }
 0xcad   :  { %s11239_s23 = vpop.sfrf %11238 }
 0xcae   :  { %p12627_p11 = scmp.ne.s32.totalorder %s11239_s23, 0 }
 0xcb0   :  { %11243 = shalt.err (%p12627_p11)  }
 0xcb1   :  { %11245 = vsyncmov [#allocation6 + $0x1] }
 0xcb4   :  { %s11246_s10 = vpop.sfrf %11245 }
 0xcb5   :  { %p12628_p12 = scmp.ne.s32.totalorder %s11246_s10, 0 }
 0xcb7   :  { %11250 = shalt.err (%p12628_p12)  }

</bundles_post_ra>
